<compile_context>
chip_gen: v7x
topology: tpu7x:2x2x1
jax: 0.10.0
libtpu: 0.0.40
codegen_flags: <defaults>
</compile_context>

<pallas_src>
import jax
import jax.numpy as jnp
from jax import lax
from jax.experimental import pallas as pl
from jax.experimental.pallas import tpu as pltpu


# f32 keeps exact parity with the f32 PyTorch/JAX reference (1e-4 check).
# Set to jnp.bfloat16 on v6e/v7x for ~2-4x MXU throughput on the pointwise
# matmuls (accumulation stays f32); tolerance then needs to be ~1e-2.
MATMUL_DTYPE = jnp.float32

_VMEM_LIMIT = 64 * 1024 * 1024   # <= physical on v5e/v6e (128 MiB) and v7x (64 MiB)


# ---------------------------------------------------------------------------
# Kernel 1: ConvTranspose2d(Cin, 32, k=2, s=2) as a single lane-dense matmul.
#   y[n, i*Wi+j, (a*2+b)*32 + co] = sum_ci x[n,i,j,ci] * Wt[ci,co,a,b] + b[co]
# The 2x2 spatial scatter (pixel shuffle) is wrapper-side layout plumbing over
# the small 32-channel tensor only.
# ---------------------------------------------------------------------------
def _upconv_kernel(x_ref, w_ref, b_ref, o_ref):
    y = jnp.dot(x_ref[0].astype(MATMUL_DTYPE), w_ref[...],
                preferred_element_type=jnp.float32)
    o_ref[0] = (y + b_ref[...]).astype(o_ref.dtype)


def conv_transpose_2x2(x_nhwc, wt, bt):
    """x: (N, Hi, Wi, Cin); wt: (Cin, 32, 2, 2) torch layout; bt: (32,).
    Returns x1: (N, 2*Hi, 2*Wi, 32)."""
    N, Hi, Wi, Cin = x_nhwc.shape
    Cu = wt.shape[1]
    x2d = x_nhwc.reshape(N, Hi * Wi, Cin)
    # (Cin, 32, 2, 2) -> (Cin, 2, 2, 32) -> (Cin, 128); column = (a*2+b)*32+co
    w_mat = (jnp.transpose(wt, (0, 2, 3, 1)).reshape(Cin, 4 * Cu)
             .astype(MATMUL_DTYPE))
    b_row = jnp.tile(bt, 4)[None, :]                          # (1, 4*Cu)

    y = pl.pallas_call(
        _upconv_kernel,
        out_shape=jax.ShapeDtypeStruct((N, Hi * Wi, 4 * Cu), x_nhwc.dtype),
        grid=(N,),
        in_specs=[pl.BlockSpec((1, Hi * Wi, Cin), lambda n: (n, 0, 0)),
                  pl.BlockSpec((Cin, 4 * Cu), lambda n: (0, 0)),
                  pl.BlockSpec((1, 4 * Cu), lambda n: (0, 0))],
        out_specs=pl.BlockSpec((1, Hi * Wi, 4 * Cu), lambda n: (n, 0, 0)),
        compiler_params=pltpu.CompilerParams(
            dimension_semantics=("parallel",),
            vmem_limit_bytes=_VMEM_LIMIT),
    )(x2d, w_mat, b_row)

    # Pixel shuffle (layout plumbing over the 32-channel tensor only).
    x1 = (y.reshape(N, Hi, Wi, 2, 2, Cu)
            .transpose(0, 1, 3, 2, 4, 5)
            .reshape(N, 2 * Hi, 2 * Wi, Cu))
    return x1


# ---------------------------------------------------------------------------
# Kernel 2: fused  concat + [depthwise3x3 + pointwise1x1 + BN + ReLU] x 2
# One grid step = one image; padding, depthwise outputs and the 160-channel
# hidden state live only in VMEM.
# ---------------------------------------------------------------------------
def _make_double_conv_kernel(Ho, Wo, Cc, Cu, C, woff):
    Hp = Ho + 2
    Wp = woff + Wo + woff        # 8-wide zero slab on both sides -> aligned

    def kernel(conc_ref, x1_ref, dw1a_ref, dw1b_ref, pw1_ref, t1_ref,
               dw2_ref, pw2_ref, t2_ref, o_ref, concp, x1p, h1p):

        # ---- zero only the halo cells the 3x3 taps read (rows 0 / Ho+1,
        #      columns woff-1 / woff+Wo), using aligned 8-wide slabs and full
        #      rows.  Done every step: scratch is per-core, so gating on
        #      program_id==0 would leave the 2nd megacore's border undefined.
        def zero_border(ref, ch):
            zrow = jnp.zeros((1, Wp, ch), jnp.float32)
            zpad = jnp.zeros((Hp, woff, ch), jnp.float32)
            ref[0:1, :, :] = zrow
            ref[Ho + 1:Ho + 2, :, :] = zrow
            ref[:, 0:woff, :] = zpad
            ref[:, woff + Wo:woff + Wo + woff, :] = zpad

        zero_border(concp, Cc)
        zero_border(x1p, Cu)
        zero_border(h1p, C)

        # ---- build the zero-padded inputs in VMEM (aligned interior stores
        #      at column offset `woff`).  The 160-ch concat is never
        #      materialized: pointwise(cat(a,b)) = a @ pw[:Cc] + b @ pw[Cc:].
        concp[1:Ho + 1, woff:woff + Wo, :] = conc_ref[0]
        x1p[1:Ho + 1, woff:woff + Wo, :] = x1_ref[0]

        dw1a = dw1a_ref[...]                                 # (9, 1, Cc)
        dw1b = dw1b_ref[...]                                 # (9, 1, Cu)
        dw2 = dw2_ref[...]                                   # (9, 1, C)

        # ------------------ stage 1: SeparableConv + BN + ReLU -------------
        dca = concp[0:Ho, woff - 1:woff - 1 + Wo, :] * dw1a[0]
        dcb = x1p[0:Ho, woff - 1:woff - 1 + Wo, :] * dw1b[0]
        for k in range(1, 9):
            dy, dx = divmod(k, 3)
            c0 = woff - 1 + dx
            dca = dca + concp[dy:dy + Ho, c0:c0 + Wo, :] * dw1a[k]
            dcb = dcb + x1p[dy:dy + Ho, c0:c0 + Wo, :] * dw1b[k]

        # BN scale is pre-folded into pw1/pw2 columns; only shift + ReLU here.
        h1 = jnp.dot(dca.reshape(Ho * Wo, Cc).astype(MATMUL_DTYPE),
                     pw1_ref[:Cc, :], preferred_element_type=jnp.float32)
        h1 = h1 + jnp.dot(dcb.reshape(Ho * Wo, Cu).astype(MATMUL_DTYPE),
                          pw1_ref[Cc:, :], preferred_element_type=jnp.float32)
        h1 = jnp.maximum(h1 + t1_ref[...], 0.0)
        # keep the padded stage-1 hidden state in VMEM (aligned interior store)
        h1p[1:Ho + 1, woff:woff + Wo, :] = h1.reshape(Ho, Wo, C)

        # ------------------ stage 2: SeparableConv + BN + ReLU -------------
        dc2 = h1p[0:Ho, woff - 1:woff - 1 + Wo, :] * dw2[0]
        for k in range(1, 9):
            dy, dx = divmod(k, 3)
            c0 = woff - 1 + dx
            dc2 = dc2 + h1p[dy:dy + Ho, c0:c0 + Wo, :] * dw2[k]
        h2 = jnp.dot(dc2.reshape(Ho * Wo, C).astype(MATMUL_DTYPE),
                     pw2_ref[...], preferred_element_type=jnp.float32)
        h2 = jnp.maximum(h2 + t2_ref[...], 0.0)
        o_ref[0] = h2.reshape(Ho, Wo, C).astype(o_ref.dtype)

    return kernel


def _fold_bn(gamma, beta, mean, var, eps=1e-5):
    s = gamma / jnp.sqrt(var + eps)
    t = beta - mean * s
    return s[None, :], t[None, :]


def double_conv_fused(conc_nhwc, x1_nhwc, p):
    N, Ho, Wo, Cc = conc_nhwc.shape
    Cu = x1_nhwc.shape[-1]
    C = Cc + Cu
    woff = 8                                   # aligned interior column offset
    Hp, Wp = Ho + 2, woff + Wo + woff

    # Host-side prep: fold the BN scale into the pointwise weights and
    # pre-split the stage-1 depthwise weights per branch.
    s1, t1 = _fold_bn(p['g1'], p['b1'], p['m1'], p['v1'])
    s2, t2 = _fold_bn(p['g2'], p['b2'], p['m2'], p['v2'])
    pw1f = (p['pw1'] * s1).astype(MATMUL_DTYPE)              # (C, C)
    pw2f = (p['pw2'] * s2).astype(MATMUL_DTYPE)
    dw1 = p['dw1'].reshape(9, 1, C)
    dw1a, dw1b = dw1[:, :, :Cc], dw1[:, :, Cc:]
    dw2 = p['dw2'].reshape(9, 1, C)

    kernel = _make_double_conv_kernel(Ho, Wo, Cc, Cu, C, woff)
    c2 = lambda n: (0, 0)
    c3 = lambda n: (0, 0, 0)
    return pl.pallas_call(
        kernel,
        out_shape=jax.ShapeDtypeStruct((N, Ho, Wo, C), conc_nhwc.dtype),
        grid=(N,),
        in_specs=[pl.BlockSpec((1, Ho, Wo, Cc), lambda n: (n, 0, 0, 0)),
                  pl.BlockSpec((1, Ho, Wo, Cu), lambda n: (n, 0, 0, 0)),
                  pl.BlockSpec((9, 1, Cc), c3),
                  pl.BlockSpec((9, 1, Cu), c3),
                  pl.BlockSpec((C, C), c2),
                  pl.BlockSpec((1, C), c2),
                  pl.BlockSpec((9, 1, C), c3),
                  pl.BlockSpec((C, C), c2),
                  pl.BlockSpec((1, C), c2)],
        out_specs=pl.BlockSpec((1, Ho, Wo, C), lambda n: (n, 0, 0, 0)),
        scratch_shapes=[pltpu.VMEM((Hp, Wp, Cc), jnp.float32),
                        pltpu.VMEM((Hp, Wp, Cu), jnp.float32),
                        pltpu.VMEM((Hp, Wp, C), jnp.float32)],
        compiler_params=pltpu.CompilerParams(
            dimension_semantics=("parallel",),
            vmem_limit_bytes=_VMEM_LIMIT),
    )(conc_nhwc, x1_nhwc, dw1a, dw1b, pw1f, t1, dw2, pw2f, t2)


# --------------------------- Up_Block_3p wrapper ----------------------------
def up_block_3p(x_nchw, conc_nchw, p):
    """x: (N, Cin, Hi, Wi), conc: (N, 128, 2Hi, 2Wi) -> (N, 160, 2Hi, 2Wi)."""
    x = jnp.transpose(x_nchw, (0, 2, 3, 1))        # NCHW -> NHWC
    conc = jnp.transpose(conc_nchw, (0, 2, 3, 1))
    x1 = conv_transpose_2x2(x, p['wt'], p['bt'])
    out = double_conv_fused(conc, x1, p)
    return jnp.transpose(out, (0, 3, 1, 2))        # NHWC -> NCHW


# ------------------------------ JAX reference --------------------------------
def _ref_up_block_3p(x_nchw, conc_nchw, p, eps=1e-5):
    x = jnp.transpose(x_nchw, (0, 2, 3, 1))
    conc = jnp.transpose(conc_nchw, (0, 2, 3, 1))
    # ConvTranspose2d(k=2, s=2) == lhs-dilated conv with the flipped kernel.
    w_flip = jnp.transpose(p['wt'], (2, 3, 0, 1))[::-1, ::-1]   # (2,2,Cin,32)
    x1 = lax.conv_general_dilated(
        x, w_flip, window_strides=(1, 1), padding=((1, 1), (1, 1)),
        lhs_dilation=(2, 2),
        dimension_numbers=('NHWC', 'HWIO', 'NHWC')) + p['bt']
    h = jnp.concatenate([conc, x1], axis=-1)
    C = h.shape[-1]

    def sep_bn_relu(h, dw, pw, g, b, m, v):
        h = lax.conv_general_dilated(
            h, dw.reshape(3, 3, 1, C), (1, 1), 'SAME',
            dimension_numbers=('NHWC', 'HWIO', 'NHWC'), feature_group_count=C)
        h = lax.conv_general_dilated(
            h, pw.reshape(1, 1, C, C), (1, 1), 'SAME',
            dimension_numbers=('NHWC', 'HWIO', 'NHWC'))
        h = (h - m) / jnp.sqrt(v + eps) * g + b
        return jnp.maximum(h, 0.0)

    h = sep_bn_relu(h, p['dw1'], p['pw1'], p['g1'], p['b1'], p['m1'], p['v1'])
    h = sep_bn_relu(h, p['dw2'], p['pw2'], p['g2'], p['b2'], p['m2'], p['v2'])
    return jnp.transpose(h, (0, 3, 1, 2))


# ----------------------------------- main ------------------------------------
if __name__ == "__main__":
    key = jax.random.PRNGKey(0)
    N, Cin, Hi, Wi = 2, 64, 8, 8
    Ho, Wo = 2 * Hi, 2 * Wi
    Cc, Cu = 128, 32          # conc channels, ConvTranspose output channels
    C = Cc + Cu               # 160, hard-coded by the module

    ks = jax.random.split(key, 16)
    x = jax.random.normal(ks[0], (N, Cin, Hi, Wi), jnp.float32)
    conc = jax.random.normal(ks[1], (N, Cc, Ho, Wo), jnp.float32)
    p = {
        # ConvTranspose2d weight in torch layout (in, out, kh, kw) + bias
        'wt': 0.1 * jax.random.normal(ks[2], (Cin, Cu, 2, 2), jnp.float32),
        'bt': 0.1 * jax.random.normal(ks[3], (Cu,), jnp.float32),
        # depthwise (kh, kw, C), pointwise (Cin, Cout); no conv biases
        'dw1': 0.1 * jax.random.normal(ks[4], (3, 3, C), jnp.float32),
        'pw1': 0.1 * jax.random.normal(ks[5], (C, C), jnp.float32),
        'g1': 1.0 + 0.1 * jax.random.normal(ks[6], (C,), jnp.float32),
        'b1': 0.1 * jax.random.normal(ks[7], (C,), jnp.float32),
        'm1': 0.1 * jax.random.normal(ks[8], (C,), jnp.float32),
        'v1': jax.random.uniform(ks[9], (C,), jnp.float32, 0.5, 1.5),
        'dw2': 0.1 * jax.random.normal(ks[10], (3, 3, C), jnp.float32),
        'pw2': 0.1 * jax.random.normal(ks[11], (C, C), jnp.float32),
        'g2': 1.0 + 0.1 * jax.random.normal(ks[12], (C,), jnp.float32),
        'b2': 0.1 * jax.random.normal(ks[13], (C,), jnp.float32),
        'm2': 0.1 * jax.random.normal(ks[14], (C,), jnp.float32),
        'v2': jax.random.uniform(ks[15], (C,), jnp.float32, 0.5, 1.5),
    }

    fwd = jax.jit(up_block_3p)
    out = jax.block_until_ready(fwd(x, conc, p))
    assert out.shape == (N, C, Ho, Wo), out.shape

    ref = jax.block_until_ready(_ref_up_block_3p(x, conc, p))
    tol = 1e-4 if MATMUL_DTYPE == jnp.float32 else 2e-2
    err = float(jnp.max(jnp.abs(out - ref)))
    assert jnp.allclose(out, ref, atol=tol, rtol=tol), err
    print("KERNEL_OK")
</pallas_src>

<mosaic_0001>
module attributes {stable_mosaic.version = 11 : i64} {
  func.func @_upconv_kernel(%arg0: i32, %arg1: memref<1x64x64xf32, #tpu.memory_space<vmem>>, %arg2: memref<64x128xf32, #tpu.memory_space<vmem>>, %arg3: memref<1x128xf32, #tpu.memory_space<vmem>>, %arg4: memref<1x64x128xf32, #tpu.memory_space<vmem>>) attributes {dimension_semantics = [#tpu.dimension_semantics<parallel>], iteration_bounds = array<i64: 2>, scalar_prefetch = 0 : i64, scratch_operands = 0 : i64, tpu.core_type = #tpu.core_type<tc>, window_params = [{transform_indices = @transform_0, window_bounds = array<i64: 1, 64, 64>}, {pipeline_mode = #tpu.pipeline_mode<synchronous>, transform_indices = @transform_1, window_bounds = array<i64: 64, 128>}, {pipeline_mode = #tpu.pipeline_mode<synchronous>, transform_indices = @transform_2, window_bounds = array<i64: 1, 128>}, {transform_indices = @transform_3, window_bounds = array<i64: 1, 64, 128>}]} {
    %c0 = arith.constant 0 : index
    %c0_0 = arith.constant 0 : index
    %c0_1 = arith.constant 0 : index
    %0 = vector.load %arg1[%c0, %c0_0, %c0_1] : memref<1x64x64xf32, #tpu.memory_space<vmem>>, vector<1x64x64xf32>
    %1 = vector.shape_cast %0 : vector<1x64x64xf32> to vector<64x64xf32>
    %c0_2 = arith.constant 0 : index
    %c0_3 = arith.constant 0 : index
    %2 = vector.load %arg2[%c0_2, %c0_3] : memref<64x128xf32, #tpu.memory_space<vmem>>, vector<64x128xf32>
    %cst = arith.constant dense<0.000000e+00> : vector<64x128xf32>
    %3 = tpu.matmul %1, %2, %cst {dimension_numbers = #tpu.dot_dimension_numbers<[1], [0], [0], [1], [0, 0, 1, 1], [], []>} : vector<64x64xf32>, vector<64x128xf32>, vector<64x128xf32> -> vector<64x128xf32>
    %c0_4 = arith.constant 0 : index
    %c0_5 = arith.constant 0 : index
    %4 = vector.load %arg3[%c0_4, %c0_5] : memref<1x128xf32, #tpu.memory_space<vmem>>, vector<1x128xf32>
    %5 = vector.broadcast %4 : vector<1x128xf32> to vector<64x128xf32>
    %6 = arith.addf %3, %5 : vector<64x128xf32>
    %c0_6 = arith.constant 0 : index
    %c0_7 = arith.constant 0 : index
    %c0_8 = arith.constant 0 : index
    %7 = vector.load %arg4[%c0_6, %c0_7, %c0_8] : memref<1x64x128xf32, #tpu.memory_space<vmem>>, vector<1x64x128xf32>
    %8 = vector.shape_cast %7 : vector<1x64x128xf32> to vector<64x128xf32>
    %9 = vector.shape_cast %6 : vector<64x128xf32> to vector<1x64x128xf32>
    tpu.vector_store %arg4[%c0_6, %c0_7, %c0_8], %9 {strides = array<i32>} : memref<1x64x128xf32, #tpu.memory_space<vmem>>, vector<1x64x128xf32>,
    return
  }
  func.func @transform_0(%arg0: i32) -> (i32, i32, i32) {
    %c0_i32 = arith.constant 0 : i32
    %c0_i32_0 = arith.constant 0 : i32
    %c0_i32_1 = arith.constant 0 : i32
    return %arg0, %c0_i32, %c0_i32_0 : i32, i32, i32
  }
  func.func @transform_1(%arg0: i32) -> (i32, i32) {
    %c0_i32 = arith.constant 0 : i32
    %c0_i32_0 = arith.constant 0 : i32
    %c0_i32_1 = arith.constant 0 : i32
    return %c0_i32, %c0_i32_0 : i32, i32
  }
  func.func @transform_2(%arg0: i32) -> (i32, i32) {
    %c0_i32 = arith.constant 0 : i32
    %c0_i32_0 = arith.constant 0 : i32
    %c0_i32_1 = arith.constant 0 : i32
    return %c0_i32, %c0_i32_0 : i32, i32
  }
  func.func @transform_3(%arg0: i32) -> (i32, i32, i32) {
    %c0_i32 = arith.constant 0 : i32
    %c0_i32_0 = arith.constant 0 : i32
    %c0_i32_1 = arith.constant 0 : i32
    return %arg0, %c0_i32, %c0_i32_0 : i32, i32, i32
  }
}

module attributes {stable_mosaic.version = 11 : i64} {
  func.func @kernel(%arg0: i32, %arg1: memref<1x16x16x128xf32, #tpu.memory_space<vmem>>, %arg2: memref<1x16x16x32xf32, #tpu.memory_space<vmem>>, %arg3: memref<9x1x128xf32, #tpu.memory_space<vmem>>, %arg4: memref<9x1x32xf32, #tpu.memory_space<vmem>>, %arg5: memref<160x160xf32, #tpu.memory_space<vmem>>, %arg6: memref<1x160xf32, #tpu.memory_space<vmem>>, %arg7: memref<9x1x160xf32, #tpu.memory_space<vmem>>, %arg8: memref<160x160xf32, #tpu.memory_space<vmem>>, %arg9: memref<1x160xf32, #tpu.memory_space<vmem>>, %arg10: memref<1x16x16x160xf32, #tpu.memory_space<vmem>>, %arg11: memref<18x32x128xf32, #tpu.memory_space<vmem>>, %arg12: memref<18x32x32xf32, #tpu.memory_space<vmem>>, %arg13: memref<18x32x160xf32, #tpu.memory_space<vmem>>) attributes {dimension_semantics = [#tpu.dimension_semantics<parallel>], iteration_bounds = array<i64: 2>, scalar_prefetch = 0 : i64, scratch_operands = 3 : i64, tpu.core_type = #tpu.core_type<tc>, window_params = [{transform_indices = @transform_0, window_bounds = array<i64: 1, 16, 16, 128>}, {transform_indices = @transform_1, window_bounds = array<i64: 1, 16, 16, 32>}, {pipeline_mode = #tpu.pipeline_mode<synchronous>, transform_indices = @transform_2, window_bounds = array<i64: 9, 1, 128>}, {pipeline_mode = #tpu.pipeline_mode<synchronous>, transform_indices = @transform_3, window_bounds = array<i64: 9, 1, 32>}, {pipeline_mode = #tpu.pipeline_mode<synchronous>, transform_indices = @transform_4, window_bounds = array<i64: 160, 160>}, {pipeline_mode = #tpu.pipeline_mode<synchronous>, transform_indices = @transform_5, window_bounds = array<i64: 1, 160>}, {pipeline_mode = #tpu.pipeline_mode<synchronous>, transform_indices = @transform_6, window_bounds = array<i64: 9, 1, 160>}, {pipeline_mode = #tpu.pipeline_mode<synchronous>, transform_indices = @transform_7, window_bounds = array<i64: 160, 160>}, {pipeline_mode = #tpu.pipeline_mode<synchronous>, transform_indices = @transform_8, window_bounds = array<i64: 1, 160>}, {transform_indices = @transform_9, window_bounds = array<i64: 1, 16, 16, 160>}]} {
    %cst = arith.constant 0.000000e+00 : f32
    %0 = vector.broadcast %cst : f32 to vector<1x32x128xf32>
    %cst_0 = arith.constant 0.000000e+00 : f32
    %1 = vector.broadcast %cst_0 : f32 to vector<18x8x128xf32>
    %c0 = arith.constant 0 : index
    %c0_1 = arith.constant 0 : index
    %c0_2 = arith.constant 0 : index
    %2 = vector.load %arg11[%c0, %c0_1, %c0_2] : memref<18x32x128xf32, #tpu.memory_space<vmem>>, vector<1x32x128xf32>
    tpu.vector_store %arg11[%c0, %c0_1, %c0_2], %0 {strides = array<i32>} : memref<18x32x128xf32, #tpu.memory_space<vmem>>, vector<1x32x128xf32>,
    %c17 = arith.constant 17 : index
    %c0_3 = arith.constant 0 : index
    %c0_4 = arith.constant 0 : index
    %3 = vector.load %arg11[%c17, %c0_3, %c0_4] : memref<18x32x128xf32, #tpu.memory_space<vmem>>, vector<1x32x128xf32>
    tpu.vector_store %arg11[%c17, %c0_3, %c0_4], %0 {strides = array<i32>} : memref<18x32x128xf32, #tpu.memory_space<vmem>>, vector<1x32x128xf32>,
    %c0_5 = arith.constant 0 : index
    %c0_6 = arith.constant 0 : index
    %c0_7 = arith.constant 0 : index
    %4 = vector.load %arg11[%c0_5, %c0_6, %c0_7] : memref<18x32x128xf32, #tpu.memory_space<vmem>>, vector<18x8x128xf32>
    tpu.vector_store %arg11[%c0_5, %c0_6, %c0_7], %1 {strides = array<i32>} : memref<18x32x128xf32, #tpu.memory_space<vmem>>, vector<18x8x128xf32>,
    %c0_8 = arith.constant 0 : index
    %c24 = arith.constant 24 : index
    %c0_9 = arith.constant 0 : index
    %5 = vector.load %arg11[%c0_8, %c24, %c0_9] : memref<18x32x128xf32, #tpu.memory_space<vmem>>, vector<18x8x128xf32>
    tpu.vector_store %arg11[%c0_8, %c24, %c0_9], %1 {strides = array<i32>} : memref<18x32x128xf32, #tpu.memory_space<vmem>>, vector<18x8x128xf32>,
    %cst_10 = arith.constant 0.000000e+00 : f32
    %6 = vector.broadcast %cst_10 : f32 to vector<1x32x32xf32>
    %cst_11 = arith.constant 0.000000e+00 : f32
    %7 = vector.broadcast %cst_11 : f32 to vector<18x8x32xf32>
    %c0_12 = arith.constant 0 : index
    %c0_13 = arith.constant 0 : index
    %c0_14 = arith.constant 0 : index
    %8 = vector.load %arg12[%c0_12, %c0_13, %c0_14] : memref<18x32x32xf32, #tpu.memory_space<vmem>>, vector<1x32x32xf32>
    tpu.vector_store %arg12[%c0_12, %c0_13, %c0_14], %6 {strides = array<i32>} : memref<18x32x32xf32, #tpu.memory_space<vmem>>, vector<1x32x32xf32>,
    %c17_15 = arith.constant 17 : index
    %c0_16 = arith.constant 0 : index
    %c0_17 = arith.constant 0 : index
    %9 = vector.load %arg12[%c17_15, %c0_16, %c0_17] : memref<18x32x32xf32, #tpu.memory_space<vmem>>, vector<1x32x32xf32>
    tpu.vector_store %arg12[%c17_15, %c0_16, %c0_17], %6 {strides = array<i32>} : memref<18x32x32xf32, #tpu.memory_space<vmem>>, vector<1x32x32xf32>,
    %c0_18 = arith.constant 0 : index
    %c0_19 = arith.constant 0 : index
    %c0_20 = arith.constant 0 : index
    %10 = vector.load %arg12[%c0_18, %c0_19, %c0_20] : memref<18x32x32xf32, #tpu.memory_space<vmem>>, vector<18x8x32xf32>
    tpu.vector_store %arg12[%c0_18, %c0_19, %c0_20], %7 {strides = array<i32>} : memref<18x32x32xf32, #tpu.memory_space<vmem>>, vector<18x8x32xf32>,
    %c0_21 = arith.constant 0 : index
    %c24_22 = arith.constant 24 : index
    %c0_23 = arith.constant 0 : index
    %11 = vector.load %arg12[%c0_21, %c24_22, %c0_23] : memref<18x32x32xf32, #tpu.memory_space<vmem>>, vector<18x8x32xf32>
    tpu.vector_store %arg12[%c0_21, %c24_22, %c0_23], %7 {strides = array<i32>} : memref<18x32x32xf32, #tpu.memory_space<vmem>>, vector<18x8x32xf32>,
    %cst_24 = arith.constant 0.000000e+00 : f32
    %12 = vector.broadcast %cst_24 : f32 to vector<1x32x160xf32>
    %cst_25 = arith.constant 0.000000e+00 : f32
    %13 = vector.broadcast %cst_25 : f32 to vector<18x8x160xf32>
    %c0_26 = arith.constant 0 : index
    %c0_27 = arith.constant 0 : index
    %c0_28 = arith.constant 0 : index
    %14 = vector.load %arg13[%c0_26, %c0_27, %c0_28] : memref<18x32x160xf32, #tpu.memory_space<vmem>>, vector<1x32x160xf32>
    tpu.vector_store %arg13[%c0_26, %c0_27, %c0_28], %12 {strides = array<i32>} : memref<18x32x160xf32, #tpu.memory_space<vmem>>, vector<1x32x160xf32>,
    %c17_29 = arith.constant 17 : index
    %c0_30 = arith.constant 0 : index
    %c0_31 = arith.constant 0 : index
    %15 = vector.load %arg13[%c17_29, %c0_30, %c0_31] : memref<18x32x160xf32, #tpu.memory_space<vmem>>, vector<1x32x160xf32>
    tpu.vector_store %arg13[%c17_29, %c0_30, %c0_31], %12 {strides = array<i32>} : memref<18x32x160xf32, #tpu.memory_space<vmem>>, vector<1x32x160xf32>,
    %c0_32 = arith.constant 0 : index
    %c0_33 = arith.constant 0 : index
    %c0_34 = arith.constant 0 : index
    %16 = vector.load %arg13[%c0_32, %c0_33, %c0_34] : memref<18x32x160xf32, #tpu.memory_space<vmem>>, vector<18x8x160xf32>
    tpu.vector_store %arg13[%c0_32, %c0_33, %c0_34], %13 {strides = array<i32>} : memref<18x32x160xf32, #tpu.memory_space<vmem>>, vector<18x8x160xf32>,
    %c0_35 = arith.constant 0 : index
    %c24_36 = arith.constant 24 : index
    %c0_37 = arith.constant 0 : index
    %17 = vector.load %arg13[%c0_35, %c24_36, %c0_37] : memref<18x32x160xf32, #tpu.memory_space<vmem>>, vector<18x8x160xf32>
    tpu.vector_store %arg13[%c0_35, %c24_36, %c0_37], %13 {strides = array<i32>} : memref<18x32x160xf32, #tpu.memory_space<vmem>>, vector<18x8x160xf32>,
    %c0_38 = arith.constant 0 : index
    %c0_39 = arith.constant 0 : index
    %c0_40 = arith.constant 0 : index
    %c0_41 = arith.constant 0 : index
    %18 = vector.load %arg1[%c0_38, %c0_39, %c0_40, %c0_41] : memref<1x16x16x128xf32, #tpu.memory_space<vmem>>, vector<1x16x16x128xf32>
    %19 = vector.shape_cast %18 : vector<1x16x16x128xf32> to vector<16x16x128xf32>
    %c1 = arith.constant 1 : index
    %c8 = arith.constant 8 : index
    %c0_42 = arith.constant 0 : index
    %20 = vector.load %arg11[%c1, %c8, %c0_42] : memref<18x32x128xf32, #tpu.memory_space<vmem>>, vector<16x16x128xf32>
    tpu.vector_store %arg11[%c1, %c8, %c0_42], %19 {strides = array<i32>} : memref<18x32x128xf32, #tpu.memory_space<vmem>>, vector<16x16x128xf32>,
    %c0_43 = arith.constant 0 : index
    %c0_44 = arith.constant 0 : index
    %c0_45 = arith.constant 0 : index
    %c0_46 = arith.constant 0 : index
    %21 = vector.load %arg2[%c0_43, %c0_44, %c0_45, %c0_46] : memref<1x16x16x32xf32, #tpu.memory_space<vmem>>, vector<1x16x16x32xf32>
    %22 = vector.shape_cast %21 : vector<1x16x16x32xf32> to vector<16x16x32xf32>
    %c1_47 = arith.constant 1 : index
    %c8_48 = arith.constant 8 : index
    %c0_49 = arith.constant 0 : index
    %23 = vector.load %arg12[%c1_47, %c8_48, %c0_49] : memref<18x32x32xf32, #tpu.memory_space<vmem>>, vector<16x16x32xf32>
    tpu.vector_store %arg12[%c1_47, %c8_48, %c0_49], %22 {strides = array<i32>} : memref<18x32x32xf32, #tpu.memory_space<vmem>>, vector<16x16x32xf32>,
    %c0_50 = arith.constant 0 : index
    %c0_51 = arith.constant 0 : index
    %c0_52 = arith.constant 0 : index
    %24 = vector.load %arg3[%c0_50, %c0_51, %c0_52] : memref<9x1x128xf32, #tpu.memory_space<vmem>>, vector<9x1x128xf32>
    %c0_53 = arith.constant 0 : index
    %c0_54 = arith.constant 0 : index
    %c0_55 = arith.constant 0 : index
    %25 = vector.load %arg4[%c0_53, %c0_54, %c0_55] : memref<9x1x32xf32, #tpu.memory_space<vmem>>, vector<9x1x32xf32>
    %c0_56 = arith.constant 0 : index
    %c0_57 = arith.constant 0 : index
    %c0_58 = arith.constant 0 : index
    %26 = vector.load %arg7[%c0_56, %c0_57, %c0_58] : memref<9x1x160xf32, #tpu.memory_space<vmem>>, vector<9x1x160xf32>
    %c0_59 = arith.constant 0 : index
    %c7 = arith.constant 7 : index
    %c0_60 = arith.constant 0 : index
    %27 = vector.load %arg11[%c0_59, %c7, %c0_60] : memref<18x32x128xf32, #tpu.memory_space<vmem>>, vector<16x16x128xf32>
    %28 = vector.extract_strided_slice %24 {offsets = [0, 0, 0], sizes = [1, 1, 128], strides = [1, 1, 1]} : vector<9x1x128xf32> to vector<1x1x128xf32>
    %29 = vector.shape_cast %28 : vector<1x1x128xf32> to vector<1x128xf32>
    %30 = vector.shape_cast %29 : vector<1x128xf32> to vector<1x1x128xf32>
    %31 = vector.broadcast %30 : vector<1x1x128xf32> to vector<16x16x128xf32>
    %32 = arith.mulf %27, %31 : vector<16x16x128xf32>
    %c0_61 = arith.constant 0 : index
    %c7_62 = arith.constant 7 : index
    %c0_63 = arith.constant 0 : index
    %33 = vector.load %arg12[%c0_61, %c7_62, %c0_63] : memref<18x32x32xf32, #tpu.memory_space<vmem>>, vector<16x16x32xf32>
    %34 = vector.extract_strided_slice %25 {offsets = [0, 0, 0], sizes = [1, 1, 32], strides = [1, 1, 1]} : vector<9x1x32xf32> to vector<1x1x32xf32>
    %35 = vector.shape_cast %34 : vector<1x1x32xf32> to vector<1x32xf32>
    %36 = vector.shape_cast %35 : vector<1x32xf32> to vector<1x1x32xf32>
    %37 = vector.broadcast %36 : vector<1x1x32xf32> to vector<16x16x32xf32>
    %38 = arith.mulf %33, %37 : vector<16x16x32xf32>
    %c0_64 = arith.constant 0 : index
    %c8_65 = arith.constant 8 : index
    %c0_66 = arith.constant 0 : index
    %39 = vector.load %arg11[%c0_64, %c8_65, %c0_66] : memref<18x32x128xf32, #tpu.memory_space<vmem>>, vector<16x16x128xf32>
    %40 = vector.extract_strided_slice %24 {offsets = [1, 0, 0], sizes = [1, 1, 128], strides = [1, 1, 1]} : vector<9x1x128xf32> to vector<1x1x128xf32>
    %41 = vector.shape_cast %40 : vector<1x1x128xf32> to vector<1x128xf32>
    %42 = vector.shape_cast %41 : vector<1x128xf32> to vector<1x1x128xf32>
    %43 = vector.broadcast %42 : vector<1x1x128xf32> to vector<16x16x128xf32>
    %44 = arith.mulf %39, %43 : vector<16x16x128xf32>
    %45 = arith.addf %32, %44 : vector<16x16x128xf32>
    %c0_67 = arith.constant 0 : index
    %c8_68 = arith.constant 8 : index
    %c0_69 = arith.constant 0 : index
    %46 = vector.load %arg12[%c0_67, %c8_68, %c0_69] : memref<18x32x32xf32, #tpu.memory_space<vmem>>, vector<16x16x32xf32>
    %47 = vector.extract_strided_slice %25 {offsets = [1, 0, 0], sizes = [1, 1, 32], strides = [1, 1, 1]} : vector<9x1x32xf32> to vector<1x1x32xf32>
    %48 = vector.shape_cast %47 : vector<1x1x32xf32> to vector<1x32xf32>
    %49 = vector.shape_cast %48 : vector<1x32xf32> to vector<1x1x32xf32>
    %50 = vector.broadcast %49 : vector<1x1x32xf32> to vector<16x16x32xf32>
    %51 = arith.mulf %46, %50 : vector<16x16x32xf32>
    %52 = arith.addf %38, %51 : vector<16x16x32xf32>
    %c0_70 = arith.constant 0 : index
    %c9 = arith.constant 9 : index
    %c0_71 = arith.constant 0 : index
    %53 = vector.load %arg11[%c0_70, %c9, %c0_71] : memref<18x32x128xf32, #tpu.memory_space<vmem>>, vector<16x16x128xf32>
    %54 = vector.extract_strided_slice %24 {offsets = [2, 0, 0], sizes = [1, 1, 128], strides = [1, 1, 1]} : vector<9x1x128xf32> to vector<1x1x128xf32>
    %55 = vector.shape_cast %54 : vector<1x1x128xf32> to vector<1x128xf32>
    %56 = vector.shape_cast %55 : vector<1x128xf32> to vector<1x1x128xf32>
    %57 = vector.broadcast %56 : vector<1x1x128xf32> to vector<16x16x128xf32>
    %58 = arith.mulf %53, %57 : vector<16x16x128xf32>
    %59 = arith.addf %45, %58 : vector<16x16x128xf32>
    %c0_72 = arith.constant 0 : index
    %c9_73 = arith.constant 9 : index
    %c0_74 = arith.constant 0 : index
    %60 = vector.load %arg12[%c0_72, %c9_73, %c0_74] : memref<18x32x32xf32, #tpu.memory_space<vmem>>, vector<16x16x32xf32>
    %61 = vector.extract_strided_slice %25 {offsets = [2, 0, 0], sizes = [1, 1, 32], strides = [1, 1, 1]} : vector<9x1x32xf32> to vector<1x1x32xf32>
    %62 = vector.shape_cast %61 : vector<1x1x32xf32> to vector<1x32xf32>
    %63 = vector.shape_cast %62 : vector<1x32xf32> to vector<1x1x32xf32>
    %64 = vector.broadcast %63 : vector<1x1x32xf32> to vector<16x16x32xf32>
    %65 = arith.mulf %60, %64 : vector<16x16x32xf32>
    %66 = arith.addf %52, %65 : vector<16x16x32xf32>
    %c1_75 = arith.constant 1 : index
    %c7_76 = arith.constant 7 : index
    %c0_77 = arith.constant 0 : index
    %67 = vector.load %arg11[%c1_75, %c7_76, %c0_77] : memref<18x32x128xf32, #tpu.memory_space<vmem>>, vector<16x16x128xf32>
    %68 = vector.extract_strided_slice %24 {offsets = [3, 0, 0], sizes = [1, 1, 128], strides = [1, 1, 1]} : vector<9x1x128xf32> to vector<1x1x128xf32>
    %69 = vector.shape_cast %68 : vector<1x1x128xf32> to vector<1x128xf32>
    %70 = vector.shape_cast %69 : vector<1x128xf32> to vector<1x1x128xf32>
    %71 = vector.broadcast %70 : vector<1x1x128xf32> to vector<16x16x128xf32>
    %72 = arith.mulf %67, %71 : vector<16x16x128xf32>
    %73 = arith.addf %59, %72 : vector<16x16x128xf32>
    %c1_78 = arith.constant 1 : index
    %c7_79 = arith.constant 7 : index
    %c0_80 = arith.constant 0 : index
    %74 = vector.load %arg12[%c1_78, %c7_79, %c0_80] : memref<18x32x32xf32, #tpu.memory_space<vmem>>, vector<16x16x32xf32>
    %75 = vector.extract_strided_slice %25 {offsets = [3, 0, 0], sizes = [1, 1, 32], strides = [1, 1, 1]} : vector<9x1x32xf32> to vector<1x1x32xf32>
    %76 = vector.shape_cast %75 : vector<1x1x32xf32> to vector<1x32xf32>
    %77 = vector.shape_cast %76 : vector<1x32xf32> to vector<1x1x32xf32>
    %78 = vector.broadcast %77 : vector<1x1x32xf32> to vector<16x16x32xf32>
    %79 = arith.mulf %74, %78 : vector<16x16x32xf32>
    %80 = arith.addf %66, %79 : vector<16x16x32xf32>
    %c1_81 = arith.constant 1 : index
    %c8_82 = arith.constant 8 : index
    %c0_83 = arith.constant 0 : index
    %81 = vector.load %arg11[%c1_81, %c8_82, %c0_83] : memref<18x32x128xf32, #tpu.memory_space<vmem>>, vector<16x16x128xf32>
    %82 = vector.extract_strided_slice %24 {offsets = [4, 0, 0], sizes = [1, 1, 128], strides = [1, 1, 1]} : vector<9x1x128xf32> to vector<1x1x128xf32>
    %83 = vector.shape_cast %82 : vector<1x1x128xf32> to vector<1x128xf32>
    %84 = vector.shape_cast %83 : vector<1x128xf32> to vector<1x1x128xf32>
    %85 = vector.broadcast %84 : vector<1x1x128xf32> to vector<16x16x128xf32>
    %86 = arith.mulf %81, %85 : vector<16x16x128xf32>
    %87 = arith.addf %73, %86 : vector<16x16x128xf32>
    %c1_84 = arith.constant 1 : index
    %c8_85 = arith.constant 8 : index
    %c0_86 = arith.constant 0 : index
    %88 = vector.load %arg12[%c1_84, %c8_85, %c0_86] : memref<18x32x32xf32, #tpu.memory_space<vmem>>, vector<16x16x32xf32>
    %89 = vector.extract_strided_slice %25 {offsets = [4, 0, 0], sizes = [1, 1, 32], strides = [1, 1, 1]} : vector<9x1x32xf32> to vector<1x1x32xf32>
    %90 = vector.shape_cast %89 : vector<1x1x32xf32> to vector<1x32xf32>
    %91 = vector.shape_cast %90 : vector<1x32xf32> to vector<1x1x32xf32>
    %92 = vector.broadcast %91 : vector<1x1x32xf32> to vector<16x16x32xf32>
    %93 = arith.mulf %88, %92 : vector<16x16x32xf32>
    %94 = arith.addf %80, %93 : vector<16x16x32xf32>
    %c1_87 = arith.constant 1 : index
    %c9_88 = arith.constant 9 : index
    %c0_89 = arith.constant 0 : index
    %95 = vector.load %arg11[%c1_87, %c9_88, %c0_89] : memref<18x32x128xf32, #tpu.memory_space<vmem>>, vector<16x16x128xf32>
    %96 = vector.extract_strided_slice %24 {offsets = [5, 0, 0], sizes = [1, 1, 128], strides = [1, 1, 1]} : vector<9x1x128xf32> to vector<1x1x128xf32>
    %97 = vector.shape_cast %96 : vector<1x1x128xf32> to vector<1x128xf32>
    %98 = vector.shape_cast %97 : vector<1x128xf32> to vector<1x1x128xf32>
    %99 = vector.broadcast %98 : vector<1x1x128xf32> to vector<16x16x128xf32>
    %100 = arith.mulf %95, %99 : vector<16x16x128xf32>
    %101 = arith.addf %87, %100 : vector<16x16x128xf32>
    %c1_90 = arith.constant 1 : index
    %c9_91 = arith.constant 9 : index
    %c0_92 = arith.constant 0 : index
    %102 = vector.load %arg12[%c1_90, %c9_91, %c0_92] : memref<18x32x32xf32, #tpu.memory_space<vmem>>, vector<16x16x32xf32>
    %103 = vector.extract_strided_slice %25 {offsets = [5, 0, 0], sizes = [1, 1, 32], strides = [1, 1, 1]} : vector<9x1x32xf32> to vector<1x1x32xf32>
    %104 = vector.shape_cast %103 : vector<1x1x32xf32> to vector<1x32xf32>
    %105 = vector.shape_cast %104 : vector<1x32xf32> to vector<1x1x32xf32>
    %106 = vector.broadcast %105 : vector<1x1x32xf32> to vector<16x16x32xf32>
    %107 = arith.mulf %102, %106 : vector<16x16x32xf32>
    %108 = arith.addf %94, %107 : vector<16x16x32xf32>
    %c2 = arith.constant 2 : index
    %c7_93 = arith.constant 7 : index
    %c0_94 = arith.constant 0 : index
    %109 = vector.load %arg11[%c2, %c7_93, %c0_94] : memref<18x32x128xf32, #tpu.memory_space<vmem>>, vector<16x16x128xf32>
    %110 = vector.extract_strided_slice %24 {offsets = [6, 0, 0], sizes = [1, 1, 128], strides = [1, 1, 1]} : vector<9x1x128xf32> to vector<1x1x128xf32>
    %111 = vector.shape_cast %110 : vector<1x1x128xf32> to vector<1x128xf32>
    %112 = vector.shape_cast %111 : vector<1x128xf32> to vector<1x1x128xf32>
    %113 = vector.broadcast %112 : vector<1x1x128xf32> to vector<16x16x128xf32>
    %114 = arith.mulf %109, %113 : vector<16x16x128xf32>
    %115 = arith.addf %101, %114 : vector<16x16x128xf32>
    %c2_95 = arith.constant 2 : index
    %c7_96 = arith.constant 7 : index
    %c0_97 = arith.constant 0 : index
    %116 = vector.load %arg12[%c2_95, %c7_96, %c0_97] : memref<18x32x32xf32, #tpu.memory_space<vmem>>, vector<16x16x32xf32>
    %117 = vector.extract_strided_slice %25 {offsets = [6, 0, 0], sizes = [1, 1, 32], strides = [1, 1, 1]} : vector<9x1x32xf32> to vector<1x1x32xf32>
    %118 = vector.shape_cast %117 : vector<1x1x32xf32> to vector<1x32xf32>
    %119 = vector.shape_cast %118 : vector<1x32xf32> to vector<1x1x32xf32>
    %120 = vector.broadcast %119 : vector<1x1x32xf32> to vector<16x16x32xf32>
    %121 = arith.mulf %116, %120 : vector<16x16x32xf32>
    %122 = arith.addf %108, %121 : vector<16x16x32xf32>
    %c2_98 = arith.constant 2 : index
    %c8_99 = arith.constant 8 : index
    %c0_100 = arith.constant 0 : index
    %123 = vector.load %arg11[%c2_98, %c8_99, %c0_100] : memref<18x32x128xf32, #tpu.memory_space<vmem>>, vector<16x16x128xf32>
    %124 = vector.extract_strided_slice %24 {offsets = [7, 0, 0], sizes = [1, 1, 128], strides = [1, 1, 1]} : vector<9x1x128xf32> to vector<1x1x128xf32>
    %125 = vector.shape_cast %124 : vector<1x1x128xf32> to vector<1x128xf32>
    %126 = vector.shape_cast %125 : vector<1x128xf32> to vector<1x1x128xf32>
    %127 = vector.broadcast %126 : vector<1x1x128xf32> to vector<16x16x128xf32>
    %128 = arith.mulf %123, %127 : vector<16x16x128xf32>
    %129 = arith.addf %115, %128 : vector<16x16x128xf32>
    %c2_101 = arith.constant 2 : index
    %c8_102 = arith.constant 8 : index
    %c0_103 = arith.constant 0 : index
    %130 = vector.load %arg12[%c2_101, %c8_102, %c0_103] : memref<18x32x32xf32, #tpu.memory_space<vmem>>, vector<16x16x32xf32>
    %131 = vector.extract_strided_slice %25 {offsets = [7, 0, 0], sizes = [1, 1, 32], strides = [1, 1, 1]} : vector<9x1x32xf32> to vector<1x1x32xf32>
    %132 = vector.shape_cast %131 : vector<1x1x32xf32> to vector<1x32xf32>
    %133 = vector.shape_cast %132 : vector<1x32xf32> to vector<1x1x32xf32>
    %134 = vector.broadcast %133 : vector<1x1x32xf32> to vector<16x16x32xf32>
    %135 = arith.mulf %130, %134 : vector<16x16x32xf32>
    %136 = arith.addf %122, %135 : vector<16x16x32xf32>
    %c2_104 = arith.constant 2 : index
    %c9_105 = arith.constant 9 : index
    %c0_106 = arith.constant 0 : index
    %137 = vector.load %arg11[%c2_104, %c9_105, %c0_106] : memref<18x32x128xf32, #tpu.memory_space<vmem>>, vector<16x16x128xf32>
    %138 = vector.extract_strided_slice %24 {offsets = [8, 0, 0], sizes = [1, 1, 128], strides = [1, 1, 1]} : vector<9x1x128xf32> to vector<1x1x128xf32>
    %139 = vector.shape_cast %138 : vector<1x1x128xf32> to vector<1x128xf32>
    %140 = vector.shape_cast %139 : vector<1x128xf32> to vector<1x1x128xf32>
    %141 = vector.broadcast %140 : vector<1x1x128xf32> to vector<16x16x128xf32>
    %142 = arith.mulf %137, %141 : vector<16x16x128xf32>
    %143 = arith.addf %129, %142 : vector<16x16x128xf32>
    %c2_107 = arith.constant 2 : index
    %c9_108 = arith.constant 9 : index
    %c0_109 = arith.constant 0 : index
    %144 = vector.load %arg12[%c2_107, %c9_108, %c0_109] : memref<18x32x32xf32, #tpu.memory_space<vmem>>, vector<16x16x32xf32>
    %145 = vector.extract_strided_slice %25 {offsets = [8, 0, 0], sizes = [1, 1, 32], strides = [1, 1, 1]} : vector<9x1x32xf32> to vector<1x1x32xf32>
    %146 = vector.shape_cast %145 : vector<1x1x32xf32> to vector<1x32xf32>
    %147 = vector.shape_cast %146 : vector<1x32xf32> to vector<1x1x32xf32>
    %148 = vector.broadcast %147 : vector<1x1x32xf32> to vector<16x16x32xf32>
    %149 = arith.mulf %144, %148 : vector<16x16x32xf32>
    %150 = arith.addf %136, %149 : vector<16x16x32xf32>
    %151 = vector.shape_cast %143 : vector<16x16x128xf32> to vector<256x128xf32>
    %c0_110 = arith.constant 0 : index
    %c0_111 = arith.constant 0 : index
    %152 = vector.load %arg5[%c0_110, %c0_111] : memref<160x160xf32, #tpu.memory_space<vmem>>, vector<128x160xf32>
    %cst_112 = arith.constant dense<0.000000e+00> : vector<256x160xf32>
    %153 = tpu.matmul %151, %152, %cst_112 {dimension_numbers = #tpu.dot_dimension_numbers<[1], [0], [0], [1], [0, 0, 1, 1], [], []>} : vector<256x128xf32>, vector<128x160xf32>, vector<256x160xf32> -> vector<256x160xf32>
    %154 = vector.shape_cast %150 : vector<16x16x32xf32> to vector<256x32xf32>
    %c128 = arith.constant 128 : index
    %c0_113 = arith.constant 0 : index
    %155 = vector.load %arg5[%c128, %c0_113] : memref<160x160xf32, #tpu.memory_space<vmem>>, vector<32x160xf32>
    %cst_114 = arith.constant dense<0.000000e+00> : vector<256x160xf32>
    %156 = tpu.matmul %154, %155, %cst_114 {dimension_numbers = #tpu.dot_dimension_numbers<[1], [0], [0], [1], [0, 0, 1, 1], [], []>} : vector<256x32xf32>, vector<32x160xf32>, vector<256x160xf32> -> vector<256x160xf32>
    %157 = arith.addf %153, %156 : vector<256x160xf32>
    %c0_115 = arith.constant 0 : index
    %c0_116 = arith.constant 0 : index
    %158 = vector.load %arg6[%c0_115, %c0_116] : memref<1x160xf32, #tpu.memory_space<vmem>>, vector<1x160xf32>
    %159 = vector.broadcast %158 : vector<1x160xf32> to vector<256x160xf32>
    %160 = arith.addf %157, %159 : vector<256x160xf32>
    %cst_117 = arith.constant 0.000000e+00 : f32
    %161 = vector.broadcast %cst_117 : f32 to vector<256x160xf32>
    %162 = arith.maximumf %160, %161 : vector<256x160xf32>
    %163 = vector.shape_cast %162 : vector<256x160xf32> to vector<16x16x160xf32>
    %c1_118 = arith.constant 1 : index
    %c8_119 = arith.constant 8 : index
    %c0_120 = arith.constant 0 : index
    %164 = vector.load %arg13[%c1_118, %c8_119, %c0_120] : memref<18x32x160xf32, #tpu.memory_space<vmem>>, vector<16x16x160xf32>
    tpu.vector_store %arg13[%c1_118, %c8_119, %c0_120], %163 {strides = array<i32>} : memref<18x32x160xf32, #tpu.memory_space<vmem>>, vector<16x16x160xf32>,
    %c0_121 = arith.constant 0 : index
    %c7_122 = arith.constant 7 : index
    %c0_123 = arith.constant 0 : index
    %165 = vector.load %arg13[%c0_121, %c7_122, %c0_123] : memref<18x32x160xf32, #tpu.memory_space<vmem>>, vector<16x16x160xf32>
    %166 = vector.extract_strided_slice %26 {offsets = [0, 0, 0], sizes = [1, 1, 160], strides = [1, 1, 1]} : vector<9x1x160xf32> to vector<1x1x160xf32>
    %167 = vector.shape_cast %166 : vector<1x1x160xf32> to vector<1x160xf32>
    %168 = vector.shape_cast %167 : vector<1x160xf32> to vector<1x1x160xf32>
    %169 = vector.broadcast %168 : vector<1x1x160xf32> to vector<16x16x160xf32>
    %170 = arith.mulf %165, %169 : vector<16x16x160xf32>
    %c0_124 = arith.constant 0 : index
    %c8_125 = arith.constant 8 : index
    %c0_126 = arith.constant 0 : index
    %171 = vector.load %arg13[%c0_124, %c8_125, %c0_126] : memref<18x32x160xf32, #tpu.memory_space<vmem>>, vector<16x16x160xf32>
    %172 = vector.extract_strided_slice %26 {offsets = [1, 0, 0], sizes = [1, 1, 160], strides = [1, 1, 1]} : vector<9x1x160xf32> to vector<1x1x160xf32>
    %173 = vector.shape_cast %172 : vector<1x1x160xf32> to vector<1x160xf32>
    %174 = vector.shape_cast %173 : vector<1x160xf32> to vector<1x1x160xf32>
    %175 = vector.broadcast %174 : vector<1x1x160xf32> to vector<16x16x160xf32>
    %176 = arith.mulf %171, %175 : vector<16x16x160xf32>
    %177 = arith.addf %170, %176 : vector<16x16x160xf32>
    %c0_127 = arith.constant 0 : index
    %c9_128 = arith.constant 9 : index
    %c0_129 = arith.constant 0 : index
    %178 = vector.load %arg13[%c0_127, %c9_128, %c0_129] : memref<18x32x160xf32, #tpu.memory_space<vmem>>, vector<16x16x160xf32>
    %179 = vector.extract_strided_slice %26 {offsets = [2, 0, 0], sizes = [1, 1, 160], strides = [1, 1, 1]} : vector<9x1x160xf32> to vector<1x1x160xf32>
    %180 = vector.shape_cast %179 : vector<1x1x160xf32> to vector<1x160xf32>
    %181 = vector.shape_cast %180 : vector<1x160xf32> to vector<1x1x160xf32>
    %182 = vector.broadcast %181 : vector<1x1x160xf32> to vector<16x16x160xf32>
    %183 = arith.mulf %178, %182 : vector<16x16x160xf32>
    %184 = arith.addf %177, %183 : vector<16x16x160xf32>
    %c1_130 = arith.constant 1 : index
    %c7_131 = arith.constant 7 : index
    %c0_132 = arith.constant 0 : index
    %185 = vector.load %arg13[%c1_130, %c7_131, %c0_132] : memref<18x32x160xf32, #tpu.memory_space<vmem>>, vector<16x16x160xf32>
    %186 = vector.extract_strided_slice %26 {offsets = [3, 0, 0], sizes = [1, 1, 160], strides = [1, 1, 1]} : vector<9x1x160xf32> to vector<1x1x160xf32>
    %187 = vector.shape_cast %186 : vector<1x1x160xf32> to vector<1x160xf32>
    %188 = vector.shape_cast %187 : vector<1x160xf32> to vector<1x1x160xf32>
    %189 = vector.broadcast %188 : vector<1x1x160xf32> to vector<16x16x160xf32>
    %190 = arith.mulf %185, %189 : vector<16x16x160xf32>
    %191 = arith.addf %184, %190 : vector<16x16x160xf32>
    %c1_133 = arith.constant 1 : index
    %c8_134 = arith.constant 8 : index
    %c0_135 = arith.constant 0 : index
    %192 = vector.load %arg13[%c1_133, %c8_134, %c0_135] : memref<18x32x160xf32, #tpu.memory_space<vmem>>, vector<16x16x160xf32>
    %193 = vector.extract_strided_slice %26 {offsets = [4, 0, 0], sizes = [1, 1, 160], strides = [1, 1, 1]} : vector<9x1x160xf32> to vector<1x1x160xf32>
    %194 = vector.shape_cast %193 : vector<1x1x160xf32> to vector<1x160xf32>
    %195 = vector.shape_cast %194 : vector<1x160xf32> to vector<1x1x160xf32>
    %196 = vector.broadcast %195 : vector<1x1x160xf32> to vector<16x16x160xf32>
    %197 = arith.mulf %192, %196 : vector<16x16x160xf32>
    %198 = arith.addf %191, %197 : vector<16x16x160xf32>
    %c1_136 = arith.constant 1 : index
    %c9_137 = arith.constant 9 : index
    %c0_138 = arith.constant 0 : index
    %199 = vector.load %arg13[%c1_136, %c9_137, %c0_138] : memref<18x32x160xf32, #tpu.memory_space<vmem>>, vector<16x16x160xf32>
    %200 = vector.extract_strided_slice %26 {offsets = [5, 0, 0], sizes = [1, 1, 160], strides = [1, 1, 1]} : vector<9x1x160xf32> to vector<1x1x160xf32>
    %201 = vector.shape_cast %200 : vector<1x1x160xf32> to vector<1x160xf32>
    %202 = vector.shape_cast %201 : vector<1x160xf32> to vector<1x1x160xf32>
    %203 = vector.broadcast %202 : vector<1x1x160xf32> to vector<16x16x160xf32>
    %204 = arith.mulf %199, %203 : vector<16x16x160xf32>
    %205 = arith.addf %198, %204 : vector<16x16x160xf32>
    %c2_139 = arith.constant 2 : index
    %c7_140 = arith.constant 7 : index
    %c0_141 = arith.constant 0 : index
    %206 = vector.load %arg13[%c2_139, %c7_140, %c0_141] : memref<18x32x160xf32, #tpu.memory_space<vmem>>, vector<16x16x160xf32>
    %207 = vector.extract_strided_slice %26 {offsets = [6, 0, 0], sizes = [1, 1, 160], strides = [1, 1, 1]} : vector<9x1x160xf32> to vector<1x1x160xf32>
    %208 = vector.shape_cast %207 : vector<1x1x160xf32> to vector<1x160xf32>
    %209 = vector.shape_cast %208 : vector<1x160xf32> to vector<1x1x160xf32>
    %210 = vector.broadcast %209 : vector<1x1x160xf32> to vector<16x16x160xf32>
    %211 = arith.mulf %206, %210 : vector<16x16x160xf32>
    %212 = arith.addf %205, %211 : vector<16x16x160xf32>
    %c2_142 = arith.constant 2 : index
    %c8_143 = arith.constant 8 : index
    %c0_144 = arith.constant 0 : index
    %213 = vector.load %arg13[%c2_142, %c8_143, %c0_144] : memref<18x32x160xf32, #tpu.memory_space<vmem>>, vector<16x16x160xf32>
    %214 = vector.extract_strided_slice %26 {offsets = [7, 0, 0], sizes = [1, 1, 160], strides = [1, 1, 1]} : vector<9x1x160xf32> to vector<1x1x160xf32>
    %215 = vector.shape_cast %214 : vector<1x1x160xf32> to vector<1x160xf32>
    %216 = vector.shape_cast %215 : vector<1x160xf32> to vector<1x1x160xf32>
    %217 = vector.broadcast %216 : vector<1x1x160xf32> to vector<16x16x160xf32>
    %218 = arith.mulf %213, %217 : vector<16x16x160xf32>
    %219 = arith.addf %212, %218 : vector<16x16x160xf32>
    %c2_145 = arith.constant 2 : index
    %c9_146 = arith.constant 9 : index
    %c0_147 = arith.constant 0 : index
    %220 = vector.load %arg13[%c2_145, %c9_146, %c0_147] : memref<18x32x160xf32, #tpu.memory_space<vmem>>, vector<16x16x160xf32>
    %221 = vector.extract_strided_slice %26 {offsets = [8, 0, 0], sizes = [1, 1, 160], strides = [1, 1, 1]} : vector<9x1x160xf32> to vector<1x1x160xf32>
    %222 = vector.shape_cast %221 : vector<1x1x160xf32> to vector<1x160xf32>
    %223 = vector.shape_cast %222 : vector<1x160xf32> to vector<1x1x160xf32>
    %224 = vector.broadcast %223 : vector<1x1x160xf32> to vector<16x16x160xf32>
    %225 = arith.mulf %220, %224 : vector<16x16x160xf32>
    %226 = arith.addf %219, %225 : vector<16x16x160xf32>
    %227 = vector.shape_cast %226 : vector<16x16x160xf32> to vector<256x160xf32>
    %c0_148 = arith.constant 0 : index
    %c0_149 = arith.constant 0 : index
    %228 = vector.load %arg8[%c0_148, %c0_149] : memref<160x160xf32, #tpu.memory_space<vmem>>, vector<160x160xf32>
    %cst_150 = arith.constant dense<0.000000e+00> : vector<256x160xf32>
    %229 = tpu.matmul %227, %228, %cst_150 {dimension_numbers = #tpu.dot_dimension_numbers<[1], [0], [0], [1], [0, 0, 1, 1], [], []>} : vector<256x160xf32>, vector<160x160xf32>, vector<256x160xf32> -> vector<256x160xf32>
    %c0_151 = arith.constant 0 : index
    %c0_152 = arith.constant 0 : index
    %230 = vector.load %arg9[%c0_151, %c0_152] : memref<1x160xf32, #tpu.memory_space<vmem>>, vector<1x160xf32>
    %231 = vector.broadcast %230 : vector<1x160xf32> to vector<256x160xf32>
    %232 = arith.addf %229, %231 : vector<256x160xf32>
    %cst_153 = arith.constant 0.000000e+00 : f32
    %233 = vector.broadcast %cst_153 : f32 to vector<256x160xf32>
    %234 = arith.maximumf %232, %233 : vector<256x160xf32>
    %235 = vector.shape_cast %234 : vector<256x160xf32> to vector<16x16x160xf32>
    %c0_154 = arith.constant 0 : index
    %c0_155 = arith.constant 0 : index
    %c0_156 = arith.constant 0 : index
    %c0_157 = arith.constant 0 : index
    %236 = vector.load %arg10[%c0_154, %c0_155, %c0_156, %c0_157] : memref<1x16x16x160xf32, #tpu.memory_space<vmem>>, vector<1x16x16x160xf32>
    %237 = vector.shape_cast %236 : vector<1x16x16x160xf32> to vector<16x16x160xf32>
    %238 = vector.shape_cast %235 : vector<16x16x160xf32> to vector<1x16x16x160xf32>
    tpu.vector_store %arg10[%c0_154, %c0_155, %c0_156, %c0_157], %238 {strides = array<i32>} : memref<1x16x16x160xf32, #tpu.memory_space<vmem>>, vector<1x16x16x160xf32>,
    return
  }
  func.func @transform_0(%arg0: i32) -> (i32, i32, i32, i32) {
    %c0_i32 = arith.constant 0 : i32
    %c0_i32_0 = arith.constant 0 : i32
    %c0_i32_1 = arith.constant 0 : i32
    %c0_i32_2 = arith.constant 0 : i32
    return %arg0, %c0_i32, %c0_i32_0, %c0_i32_1 : i32, i32, i32, i32
  }
  func.func @transform_1(%arg0: i32) -> (i32, i32, i32, i32) {
    %c0_i32 = arith.constant 0 : i32
    %c0_i32_0 = arith.constant 0 : i32
    %c0_i32_1 = arith.constant 0 : i32
    %c0_i32_2 = arith.constant 0 : i32
    return %arg0, %c0_i32, %c0_i32_0, %c0_i32_1 : i32, i32, i32, i32
  }
  func.func @transform_2(%arg0: i32) -> (i32, i32, i32) {
    %c0_i32 = arith.constant 0 : i32
    %c0_i32_0 = arith.constant 0 : i32
    %c0_i32_1 = arith.constant 0 : i32
    %c0_i32_2 = arith.constant 0 : i32
    return %c0_i32, %c0_i32_0, %c0_i32_1 : i32, i32, i32
  }
  func.func @transform_3(%arg0: i32) -> (i32, i32, i32) {
    %c0_i32 = arith.constant 0 : i32
    %c0_i32_0 = arith.constant 0 : i32
    %c0_i32_1 = arith.constant 0 : i32
    %c0_i32_2 = arith.constant 0 : i32
    return %c0_i32, %c0_i32_0, %c0_i32_1 : i32, i32, i32
  }
  func.func @transform_4(%arg0: i32) -> (i32, i32) {
    %c0_i32 = arith.constant 0 : i32
    %c0_i32_0 = arith.constant 0 : i32
    %c0_i32_1 = arith.constant 0 : i32
    return %c0_i32, %c0_i32_0 : i32, i32
  }
  func.func @transform_5(%arg0: i32) -> (i32, i32) {
    %c0_i32 = arith.constant 0 : i32
    %c0_i32_0 = arith.constant 0 : i32
    %c0_i32_1 = arith.constant 0 : i32
    return %c0_i32, %c0_i32_0 : i32, i32
  }
  func.func @transform_6(%arg0: i32) -> (i32, i32, i32) {
    %c0_i32 = arith.constant 0 : i32
    %c0_i32_0 = arith.constant 0 : i32
    %c0_i32_1 = arith.constant 0 : i32
    %c0_i32_2 = arith.constant 0 : i32
    return %c0_i32, %c0_i32_0, %c0_i32_1 : i32, i32, i32
  }
  func.func @transform_7(%arg0: i32) -> (i32, i32) {
    %c0_i32 = arith.constant 0 : i32
    %c0_i32_0 = arith.constant 0 : i32
    %c0_i32_1 = arith.constant 0 : i32
    return %c0_i32, %c0_i32_0 : i32, i32
  }
  func.func @transform_8(%arg0: i32) -> (i32, i32) {
    %c0_i32 = arith.constant 0 : i32
    %c0_i32_0 = arith.constant 0 : i32
    %c0_i32_1 = arith.constant 0 : i32
    return %c0_i32, %c0_i32_0 : i32, i32
  }
  func.func @transform_9(%arg0: i32) -> (i32, i32, i32, i32) {
    %c0_i32 = arith.constant 0 : i32
    %c0_i32_0 = arith.constant 0 : i32
    %c0_i32_1 = arith.constant 0 : i32
    %c0_i32_2 = arith.constant 0 : i32
    return %arg0, %c0_i32, %c0_i32_0, %c0_i32_1 : i32, i32, i32, i32
  }
}

</mosaic_0001>

<bundles_post_ra>
// kernel: tile.9
= control target key start
LH: loop header
LB: loop body
LE: loop exit
PB: predicated region body
PF: predicated region fallthrough
CT: control target
= control target key end

     0   :  { %s101_s0 = inlined_call_operand.vmem [shape: f32[4,32], index: 0, kind: input, shape index: {}]   ;;  %s102_s1 = inlined_call_operand.hbm [shape: f32[1,128], index: 1, kind: output, shape index: {}]  }
   0x1   :  { %v5_v0 = vld [vmem:[%s101_s0] sm:$0xf] }
   0x2   :  { %6 = vst [vmem:[#allocation3] sm:$0xf] %v5_v0 }
   0x3   :  { %2 = vsyncpa [#allocation1], 0  ;;  %vm8_vm0 = vcmask 261120   ;;  %s72_s0 = smov 96   ;;  %s73_s8 = smov 32   ;;  %vm14_vm1 = vcmask 1048320  }
   0x4   :  { %s74_s9 = smov 64   ;;  %vm20_vm2 = vcmask 785920   ;;  %vm26_vm3 = vcmask 523520   ;;  %s75_s10 = smov [#allocation0]  }
   0x5   :  { %s38_s11 = sshll.u32 %s75_s10, 4  ;;  %s39_s11 = int_to_ptr.vmem [resolvable:$true] %s38_s11 }
   0x6   :  { %s48_s12 = scalar_lea.vmem %s39_s11, 16  ;;  %s52_s13 = scalar_lea.vmem %s39_s11, 32 }
   0x7   :  { %p49_p0 = scmp.ne.s32.totalorder %s39_s11, %s48_s12  ;;  %p53_p1 = scmp.lt.s32.totalorder %s39_s11, %s39_s11 }
   0x8   :  { %p54_p2 = scmp.lt.s32.totalorder %s52_s13, %s48_s12 }
   0x9   :  { %v11_v1 = vld [vmem:[#allocation3 + $0x3] sm:$0x1]   ;;  %v23_v2 = vld [vmem:[#allocation3 + $0x1] sm:$0x1]   ;;  %v7_v3 = vld [vmem:[#allocation3] sm:$0x1]  }
   0xa   :  { %12 = vrot.lane.b32.xlu0 %v11_v1, %s72_s0  ;;  %24 = vrot.lane.b32.xlu1 %v23_v2, %s73_s8  ;;  %v17_v4 = vld [vmem:[#allocation3 + $0x2] sm:$0x1]   ;;  %9 = vst.msk [vmem:[#allocation2] sm:$0x1] %vm8_vm0, %v7_v3   ;;  %p55_p3 = por %p54_p2, %p53_p1 }
   0xc   :  { %p56_p4 = pnand %p55_p3, %p49_p0 }
   0xe   :  { %18 = vrot.lane.b32.xlu0 %v17_v4, %s74_s9 }
  0x7c   :  { %v13_v5 = vpop.permute.xlu0 %12   ;;  %v25_v6 = vpop.permute.xlu1 %24  }
  0x7d   :  { %15 = vst.msk [vmem:[#allocation2] sm:$0x1] %vm14_vm1, %v13_v5  }
  0x80   :  { %v19_v7 = vpop.permute.xlu0 %18  }
  0x81   :  { %21 = vst.msk [vmem:[#allocation2] sm:$0x1] %vm20_vm2, %v19_v7  }
  0x82   :  { %27 = vst.msk [vmem:[#allocation2] sm:$0x1] %vm26_vm3, %v25_v6  }
  0x89   :  { %v31_v8 = vld [vmem:[#allocation2] sm:$0x1] }
  0x8a   :  { %33 = vst [vmem:[#allocation0] sm:$0x1] %v31_v8 }
  0x8b   :  { %59 = shalt.err (!%p56_p4)
}
  0x8c   :  { %s60_s16 = scalar_lea.hbm %s102_s1, 16 }
  0x8d   :  { %p61_p5 = scmp.ne.s32.totalorder %s102_s1, %s60_s16  ;;  %p64_p6 = scmp.lt.u32.totalorder %s60_s16, %s102_s1 }
  0x8f   :  { %p66_p7 = pnand %p64_p6, %p61_p5 }
  0x91   :  { %69 = shalt.err (!%p66_p7)
}
  0x92   :  { %41 = dma.vmem_to_hbm [thread:$0]  %s39_s11, 16, %s102_s1, [#allocation1]  }
  0x93   :  { %70 = dma.done.wait [#allocation1], 16  }
  0x94   :  { %71 = vsyncadd [#allocation1], 4294967280 }
  0x95   :  { %43 = vsyncpa [#allocation1], 1 }

// kernel: tile.8
= control target key start
LH: loop header
LB: loop body
LE: loop exit
PB: predicated region body
PF: predicated region fallthrough
CT: control target
= control target key end

     0   :  { %2 = vsyncpa [#allocation1], 0  ;;  %s44_s6 = smov [#allocation0]   ;;  %s70_s0 = inlined_call_operand.hbm [shape: f32[32], index: 0, kind: input, shape index: {}]   ;;  %s71_s1 = inlined_call_operand.vmem [shape: f32[4,32], index: 1, kind: output, shape index: {}]  }
   0x1   :  { %s9_s7 = sshll.u32 %s44_s6, 4  ;;  %s20_s10 = scalar_lea.hbm %s70_s0, 16  ;;  %s10_s7 = int_to_ptr.vmem [resolvable:$true] %s9_s7 }
   0x2   :  { %p21_p0 = scmp.ne.s32.totalorder %s70_s0, %s20_s10  ;;  %p24_p1 = scmp.lt.u32.totalorder %s20_s10, %s70_s0 }
   0x4   :  { %p26_p2 = pnand %p24_p1, %p21_p0 }
   0x6   :  { %29 = shalt.err (!%p26_p2)
}
   0x7   :  { %s30_s15 = scalar_lea.vmem %s10_s7, 16  ;;  %s34_s16 = scalar_lea.vmem %s10_s7, 32 }
   0x8   :  { %p31_p3 = scmp.ne.s32.totalorder %s10_s7, %s30_s15  ;;  %p35_p4 = scmp.lt.s32.totalorder %s10_s7, %s10_s7 }
   0x9   :  { %p36_p5 = scmp.lt.s32.totalorder %s34_s16, %s30_s15 }
   0xb   :  { %p37_p6 = por %p36_p5, %p35_p4 }
   0xd   :  { %p38_p7 = pnand %p37_p6, %p31_p3 }
   0xf   :  { %41 = shalt.err (!%p38_p7)
}
  0x10   :  { %12 = dma.hbm_to_vmem [thread:$0]  %s70_s0, 16, %s10_s7, [#allocation1]  }
  0x11   :  { %42 = dma.done.wait [#allocation1], 16  }
  0x12   :  { %43 = vsyncadd [#allocation1], 4294967280  ;;  %v16_v0 = vld [vmem:[#allocation0] ss:$0 sm:$0xff] }
  0x13   :  { %17 = vst [vmem:[%s71_s1] sm:$0xf] %v16_v0 }
  0x14   :  { %18 = vsyncpa [#allocation1], 1 }

// kernel: up_block_3p.2
= control target key start
LH: loop header
LB: loop body
LE: loop exit
PB: predicated region body
PF: predicated region fallthrough
CT: control target
= control target key end

     0   :  { %8 = vsyncpa [#allocation3], 0  ;;  %s1100_s0 = inlined_call_operand.hbm [shape: f32[2,64,64], index: 0, kind: input, shape index: {}]   ;;  %s1101_s1 = inlined_call_operand.hbm [shape: f32[64,128], index: 1, kind: input, shape index: {}]   ;;  %s1102_s2 = inlined_call_operand.hbm [shape: f32[1,128], index: 2, kind: input, shape index: {}]   ;;  %s1103_s3 = inlined_call_operand.hbm [shape: f32[2,64,128], index: 3, kind: output, shape index: {}]  }
   0x1   :  { %10 = vsyncpa [#allocation3 + $0x1], 0 }
   0x2   :  { %11 = vsyncpa [#allocation6], 0 }
   0x3   :  { %12 = vsyncpa [#allocation4], 0 }
   0x4   :  { %14 = vsyncpa [#allocation4 + $0x1], 0  ;;  %s837_s12 = smov 0   ;;  %s839_s13 = smov 0  }
   0x5   :  { %s841_s14 = smov 0   ;;  %s843_s15 = smov 0  }
   0x6 LB: > { %s858_s16 = sadd.s32 4294967295, %s807_s15   ;;  %s483_s17 = sadd.s32 4294967294, %s807_s15   ;;  %s807_s15 = sphi %s843_s15, %s1123_s15   ;;  %s803_s14 = sphi %s841_s14, %s1122_s14   ;;  %s799_s13 = sphi %s839_s13, %s1121_s13   ;;  %s795_s12 = sphi %s837_s12, %s1120_s12  }
   0x7   : > { %p40_p0 = scmp.ne.s32.totalorder %s799_s13, %s795_s12  ;;  %p1104_p1 = scmp.eq.s32.totalorder %s858_s16, 0 }
   0x8   : > { %p112_p3 = scmp.eq.s32.totalorder %s483_s17, 1  ;;  %p484_p5 = scmp.ge.s32.totalorder %s807_s15, 1 }
   0x9   : > { %p867_p4 = por %p1104_p1, %p40_p0  ;;  %p119_p7 = scmp.lt.s32.totalorder %s807_s15, 3 }
   0xa   : > { %p872_p6 = por %p112_p3, %p40_p0  ;;  %s809_s21 = smov [#allocation5]  }
   0xb   : > { %s1107_s18 = scalar_select %p867_p4, 1, 0 }
   0xc   : > { %s1108_s19 = scalar_select %p872_p6, 1, 0 }
   0xd   : > { %p877_p8 = pnand %p484_p5, %p119_p7  ;;  %s131_s22 = sshll.u32 %s809_s21, 4  ;;  %s881_s22 = int_to_ptr.vmem [resolvable:$true] %s131_s22 }
   0xe   : > { %s810_s24 = smov [#allocation7]   ;;  %s651_s28 = scalar_lea.hbm %s1101_s1, 1024 }
   0xf   : > { %p592_p9 = pneg %p877_p8  ;;  %s145_s25 = sshll.u32 %s810_s24, 4  ;;  %s892_s25 = int_to_ptr.vmem [resolvable:$true] %s145_s25 }
  0x10   : > { %p652_p12 = scmp.ne.s32.totalorder %s1101_s1, %s651_s28  ;;  %p658_p5 = scmp.lt.u32.totalorder %s651_s28, %s1101_s1 }
  0x11   : > { %p888_p11 = pnand %p592_p9, %p1104_p1 }
  0x13   : > { %p653_p13 = pneg %p888_p11 }
  0x15   : > { %p654_p0 = pnand %p653_p13, %p652_p12 }
  0x17   : > { %p655_p3 = pneg %p654_p0 }
  0x19   : > { %p660_p7 = pnand %p658_p5, %p655_p3 }
  0x1b   : > { %663 = shalt.err (!%p660_p7)
}
  0x1c   : > { %s664_s6 = scalar_lea.vmem %s881_s22, 1024  ;;  %p672_p2 = scmp.lt.s32.totalorder %s881_s22, %s881_s22 }
  0x1d   : > { %p665_p9 = scmp.ne.s32.totalorder %s881_s22, %s664_s6  ;;  %p673_p12 = scmp.lt.s32.totalorder %s664_s6, %s664_s6 }
  0x1f   : > { %p667_p10 = pnand %p665_p9, %p653_p13  ;;  %p674_p0 = por %p673_p12, %p672_p2 }
  0x21   : > { %p668_p1 = pneg %p667_p10 }
  0x23   : > { %p675_p6 = pnand %p674_p0, %p668_p1 }
  0x25   : > { %678 = shalt.err (!%p675_p6)
}
  0x26   : > { %s811_s7 = smov 128   ;;  %s812_s8 = smov 8  }
  0x27   : > { %595 = dma.hbm_to_vmem [thread:$0]  (!%p888_p11), %s1101_s1, 1024, %s881_s22, [#allocation6], %s811_s7, %s811_s7, %s812_s8  }
  0x28   : > { %s679_s21 = scalar_lea.hbm %s1102_s2, 16 }
  0x29   : > { %p680_p1 = scmp.ne.s32.totalorder %s1102_s2, %s679_s21  ;;  %p686_p10 = scmp.lt.u32.totalorder %s679_s21, %s1102_s2 }
  0x2b   : > { %p682_p2 = pnand %p680_p1, %p653_p13 }
  0x2d   : > { %p683_p6 = pneg %p682_p2 }
  0x2f   : > { %p688_p3 = pnand %p686_p10, %p683_p6 }
  0x31   : > { %691 = shalt.err (!%p688_p3)
}
  0x32   : > { %s692_s22 = scalar_lea.vmem %s892_s25, 16  ;;  %s699_s29 = scalar_lea.vmem %s892_s25, 32 }
  0x33   : > { %p693_p5 = scmp.ne.s32.totalorder %s892_s25, %s692_s22  ;;  %p700_p12 = scmp.lt.s32.totalorder %s892_s25, %s892_s25 }
  0x34   : > { %p701_p0 = scmp.lt.s32.totalorder %s699_s29, %s692_s22 }
  0x35   : > { %p695_p7 = pnand %p693_p5, %p653_p13 }
  0x36   : > { %p702_p1 = por %p701_p0, %p700_p12 }
  0x37   : > { %p696_p9 = pneg %p695_p7 }
  0x39   : > { %p703_p2 = pnand %p702_p1, %p696_p9 }
  0x3b   : > { %706 = shalt.err (!%p703_p2)
}
  0x3c   : > { %598 = dma.hbm_to_vmem [thread:$0]  (!%p888_p11), %s1102_s2, 16, %s892_s25, [#allocation6]  }
  0x3d   : > { %s951_s5 = sadd.s32 1, %s807_s15   ;;  %s27_s23 = sadd.s32 1, %s803_s14 }
  0x3e   : > { %s24_s6 = ssub.s32 %s807_s15, %s951_s5  ;;  %p34_p13 = scmp.ne.s32.totalorder %s803_s14, %s799_s13 }
  0x3f   : > { %p25_p6 = scmp.eq.s32.totalorder %s24_s6, 0  ;;  %p35_p10 = scmp.eq.s32.totalorder %s807_s15, 0 }
  0x40   : > { %p1111_p3 = scmp.eq.s32.totalorder %s858_s16, 1  ;;  %p609_p7 = scmp.lt.s32.totalorder %s807_s15, 2 }
  0x41   : > { %s967_s10 = scalar_select %p25_p6, %s803_s14, %s27_s23  }
  0x42   : > { %p961_p5 = por %p1111_p3, %p34_p13  ;;  %p36_p9 = por %p35_p10, %p34_p13 }
  0x43   : > { %s156_s11 = sand.u32 1, %s803_s14   ;;  %s510_s25 = sshll.u32 %s807_s15, 10 }
  0x44   : > { %s1112_s9 = scalar_select %p961_p5, 1, 0 }
  0x45   : > { %s488_s17 = sshll.u32 %s156_s11, 6  ;;  %s974_s26 = scalar_lea.hbm %s1100_s0, %s510_s25 }
  0x46   : > { %s160_s27 = scalar_lea.vmem [#allocation2], %s488_s17  ;;  %p978_p11 = pnand %p609_p7, %p36_p9 }
  0x47   : > { %s167_s28 = sshll.u32 %s160_s27, 4  ;;  %s982_s29 = scalar_lea.sflag [#allocation3], %s156_s11  ;;  %s976_s28 = int_to_ptr.vmem [resolvable:$true] %s167_s28 }
  0x48   : > { %s707_s30 = scalar_lea.hbm %s974_s26, 1024  ;;  %p709_p0 = pneg %p978_p11 }
  0x49   : > { %p708_p12 = scmp.ne.s32.totalorder %s974_s26, %s707_s30  ;;  %s712_s6 = scalar_lea.hbm %s1100_s0, 2048 }
  0x4a   : > { %p713_p13 = scmp.lt.u32.totalorder %s974_s26, %s1100_s0  ;;  %p714_p6 = scmp.lt.u32.totalorder %s712_s6, %s707_s30 }
  0x4b   : > { %p710_p1 = pnand %p709_p0, %p708_p12  ;;  %p716_p3 = scmp.lt.u32.totalorder %s707_s30, %s974_s26 }
  0x4c   : > { %p715_p10 = por %p714_p6, %p713_p13 }
  0x4d   : > { %p711_p2 = pneg %p710_p1 }
  0x4e   : > { %p717_p7 = por %p716_p3, %p715_p10 }
  0x50   : > { %p718_p9 = pnand %p717_p7, %p711_p2 }
  0x52   : > { %721 = shalt.err (!%p718_p9)
}
  0x53   : > { %s722_s11 = scalar_lea.vmem %s976_s28, 1024  ;;  %s813_s21 = smov [#allocation2]  }
  0x54   : > { %p723_p12 = scmp.ne.s32.totalorder %s976_s28, %s722_s11  ;;  %s727_s24 = sshll.u32 %s813_s21, 4  ;;  %s728_s24 = int_to_ptr.vmem [resolvable:$false] %s727_s24 }
  0x55   : > { %s729_s27 = scalar_lea.vmem %s728_s24, 2048  ;;  %p730_p4 = scmp.lt.s32.totalorder %s976_s28, %s728_s24 }
  0x56   : > { %p725_p1 = pnand %p723_p12, %p709_p0  ;;  %p731_p13 = scmp.lt.s32.totalorder %s729_s27, %s722_s11 }
  0x58   : > { %p726_p5 = pneg %p725_p1  ;;  %p732_p6 = por %p731_p13, %p730_p4 }
  0x5a   : > { %p733_p10 = pnand %p732_p6, %p726_p5 }
  0x5c   : > { %736 = shalt.err (!%p733_p10)
}
  0x5d   : > { %602 = dma.hbm_to_vmem [thread:$0]  (!%p978_p11), %s974_s26, 1024, %s976_s28, %s982_s29, %s811_s7, %s811_s7, %s812_s8  }
  0x5e   : > { %179 = sbr.rel (%p877_p8) target bundleno = 358 (0x166), region = 32  ;;  %s1016_s30 = sand.u32 (!%p877_p8), 1, %s799_s13  }
  0x5f   : > { %s492_s4 = sshll.u32 (!%p877_p8), %s1016_s30, 6  ;;  %s182_s23 = scalar_lea.sflag (!%p877_p8), [#allocation3], %s1016_s30 }
  0x60   : > { %s1022_s22 = scalar_lea.vmem (!%p877_p8), [#allocation2], %s492_s4  ;;  %p1114_p4 = scmp.ne.s32.totalorder (!%p877_p8), %s1107_s18, 0 }
  0x65   : > { %782 = dma.done.wait (%p1114_p4), %s182_s23, 1024  }
  0x66   : > { %784 = vsyncadd (%p1114_p4), %s182_s23, 4294966272  ;;  %p1115_p5 = scmp.eq.s32.totalorder %s858_s16, 0 }
  0x68   : > { %786 = dma.done.wait (%p1115_p5), [#allocation6], 1040   ;;  %p1116_p8 = pmov %p1115_p5 }
  0x69   : > { %v224_v0 = vld [vmem:[#allocation5] sm:$0xff]  ;;  %v225_v1 = vld [vmem:[#allocation5 + $0x8] sm:$0xff]  ;;  %v226_v2 = vld [vmem:[#allocation5 + $0x10] sm:$0xff]  ;;  %vm239_vm0 = vcmask 523264   ;;  %s215_s18 = scalar_lea.vmem [#allocation8], %s492_s4  ;;  %s511_s7 = sshll.u32 %s858_s16, 10 }
  0x6a   : > { %788 = vsyncadd (%p1116_p8), [#allocation6], 4294966256  ;;  %v556_v3 = vpack.c.bf16 %v225_v1, %v224_v0  ;;  %v227_v4 = vld [vmem:[#allocation5 + $0x18] sm:$0xff]  ;;  %v228_v6 = vld [vmem:[#allocation5 + $0x20] sm:$0xff]  ;;  %s391_s20 = sshll.u32 %s215_s18, 4  ;;  %s1056_s16 = scalar_lea.hbm %s1103_s3, %s511_s7  ;;  %s1051_s20 = int_to_ptr.vmem [resolvable:$true] %s391_s20 }
  0x6b   : > { %v560_v5 = vpack.c.bf16 %v227_v4, %v226_v2  ;;  %v229_v7 = vld [vmem:[#allocation5 + $0x28] sm:$0xff]  ;;  %v216_v8 = vld [vmem:[%s1022_s22] sm:$0xff]  ;;  %v230_v11 = vld [vmem:[#allocation5 + $0x30] sm:$0xff]  ;;  %s378_s28 = scalar_lea.sflag [#allocation4], %s1016_s30  ;;  %s737_s29 = scalar_lea.vmem %s1051_s20, 1024 }
  0x6c   : > { %557 = vmatprep.subr.bf16.mxu0 %v556_v3  ;;  %572 = vmatprep.subr.bf16.mxu1 %v556_v3  ;;  %v220_v9 = vld [vmem:[%s1022_s22 + $0x20] sm:$0xff]  ;;  %v564_v10 = vpack.c.bf16 %v229_v7, %v228_v6  ;;  %v231_v12 = vld [vmem:[#allocation5 + $0x38] sm:$0xff]  ;;  %v217_v14 = vld [vmem:[%s1022_s22 + $0x8] sm:$0xff]  ;;  %p738_p11 = scmp.ne.s32.totalorder %s1051_s20, %s737_s29  ;;  %p1117_p0 = scmp.ne.s32.totalorder %s1112_s9, 0 }
  0x6d   : > { %559 = vmatpush3.bf16.msra.mxu0 %v556_v3  ;;  %576 = vmatpush3.bf16.msra.mxu1 %v556_v3  ;;  %v568_v13 = vpack.c.bf16 %v231_v12, %v230_v11  ;;  %v221_v15 = vld [vmem:[%s1022_s22 + $0x28] sm:$0xff]  ;;  %v218_v16 = vld [vmem:[%s1022_s22 + $0x10] sm:$0xff]  ;;  %v219_v18 = vld [vmem:[%s1022_s22 + $0x18] sm:$0xff]  ;;  %s814_s6 = smov [#allocation8]  }
  0x6e   : > { %561 = vmatprep.subr.bf16.mxu0 %v560_v5  ;;  %573 = vmatprep.subr.bf16.mxu1 %v560_v5  ;;  %v222_v17 = vld [vmem:[%s1022_s22 + $0x30] sm:$0xff]  ;;  %v223_v19 = vld [vmem:[%s1022_s22 + $0x38] sm:$0xff]  ;;  %v496_v20 = vld [vmem:[#allocation7] ss:$0 sm:$0xff]  ;;  %p739_p2 = pnand %p738_p11, %p1117_p0  ;;  %s741_s17 = sshll.u32 %s814_s6, 4  ;;  %s742_s17 = int_to_ptr.vmem [resolvable:$false] %s741_s17 }
  0x6f   : > { %544 = vmatprep.mubr.msk.f32.mxu0 %vm239_vm0, %v216_v8  ;;  %550 = vmatprep.mubr.msk.f32.mxu1 %vm239_vm0, %v220_v9  ;;  %s743_s25 = scalar_lea.vmem %s742_s17, 2048  ;;  %p744_p7 = scmp.lt.s32.totalorder %s1051_s20, %s742_s17 }
  0x70   : > { %p740_p3 = pneg %p739_p2  ;;  %p745_p9 = scmp.lt.s32.totalorder %s743_s25, %s737_s29 }
  0x71   : > { %563 = vmatpush3.bf16.msra.mxu0 %v560_v5  ;;  %577 = vmatpush3.bf16.msra.mxu1 %v560_v5 }
  0x72   : > { %565 = vmatprep.subr.bf16.mxu0 %v564_v10  ;;  %574 = vmatprep.subr.bf16.mxu1 %v564_v10  ;;  %p746_p12 = por %p745_p9, %p744_p7 }
  0x74   : > { %p747_p1 = pnand %p746_p12, %p740_p3 }
  0x75   : > { %567 = vmatpush3.bf16.msra.mxu0 %v564_v10  ;;  %578 = vmatpush3.bf16.msra.mxu1 %v564_v10 }
  0x76   : > { %569 = vmatprep.subr.bf16.mxu0 %v568_v13  ;;  %575 = vmatprep.subr.bf16.mxu1 %v568_v13 }
  0x79   : > { %571 = vmatpush3.bf16.msra.mxu0 %v568_v13  ;;  %579 = vmatpush3.bf16.msra.mxu1 %v568_v13 }
  0x7c   : > { %545 = vmatmul.mubr.msk.f32.vlgmr.msra.gmra.mrb[0].mxu0 %vm239_vm0, %v217_v14  ;;  %551 = vmatmul.mubr.msk.f32.vlgmr.msra.gmra.mrb[0].mxu1 %vm239_vm0, %v221_v15 }
  0x7d   : > { %547 = vmatprep.mubr.msk.f32.mxu0 %vm239_vm0, %v218_v16  ;;  %553 = vmatprep.mubr.msk.f32.mxu1 %vm239_vm0, %v222_v17 }
  0x80   : > { %548 = vmatmul.mubr.msk.f32.gmra.mrb[2].mxu0 %vm239_vm0, %v219_v18  ;;  %554 = vmatmul.mubr.msk.f32.gmra.mrb[2].mxu1 %vm239_vm0, %v223_v19 }
 0x14f   : > { %v546_v21 = vpop.f32.mrb[0].mxu0  ;;  %v552_v22 = vpop.f32.mrb[0].mxu1 }
 0x150   : > { %v336_v23 = vadd.f32 %v546_v21, %v496_v20  ;;  %v356_v24 = vadd.f32 %v552_v22, %v496_v20  ;;  %v330_v25 = vpop.f32.mrb[1].mxu0  ;;  %v350_v26 = vpop.f32.mrb[1].mxu1 }
 0x151   : > { %v331_v27 = vadd.f32 %v496_v20, %v330_v25  ;;  %v351_v28 = vadd.f32 %v496_v20, %v350_v26 }
 0x152   : > { %370 = vst [vmem:[%s215_s18 + $0x8] sm:$0xff] %v336_v23  ;;  %374 = vst [vmem:[%s215_s18 + $0x28] sm:$0xff] %v356_v24 }
 0x153   : > { %369 = vst [vmem:[%s215_s18] sm:$0xff] %v331_v27  ;;  %373 = vst [vmem:[%s215_s18 + $0x20] sm:$0xff] %v351_v28  ;;  %v549_v29 = vpop.f32.mrb[2].mxu0  ;;  %v555_v30 = vpop.f32.mrb[2].mxu1 }
 0x154   : > { %v346_v31 = vadd.f32 %v549_v29, %v496_v20  ;;  %v366_v32 = vadd.f32 %v555_v30, %v496_v20  ;;  %v340_v33 = vpop.f32.mrb[3].mxu0  ;;  %v360_v34 = vpop.f32.mrb[3].mxu1 }
 0x155   : > { %v341_v35 = vadd.f32 %v496_v20, %v340_v33  ;;  %v361_v36 = vadd.f32 %v496_v20, %v360_v34 }
 0x156   : > { %372 = vst [vmem:[%s215_s18 + $0x18] sm:$0xff] %v346_v31  ;;  %376 = vst [vmem:[%s215_s18 + $0x38] sm:$0xff] %v366_v32 }
 0x157   : > { %371 = vst [vmem:[%s215_s18 + $0x10] sm:$0xff] %v341_v35  ;;  %375 = vst [vmem:[%s215_s18 + $0x30] sm:$0xff] %v361_v36 }
 0x158   : > { %750 = shalt.err (!%p747_p1)
}
 0x159   : > { %s751_s11 = scalar_lea.hbm %s1056_s16, 1024  ;;  %s755_s27 = scalar_lea.hbm %s1103_s3, 2048 }
 0x15a   : > { %p752_p13 = scmp.ne.s32.totalorder %s1056_s16, %s751_s11  ;;  %p756_p4 = scmp.lt.u32.totalorder %s1056_s16, %s1103_s3 }
 0x15b   : > { %p757_p5 = scmp.lt.u32.totalorder %s755_s27, %s751_s11  ;;  %p759_p11 = scmp.lt.u32.totalorder %s751_s11, %s1056_s16 }
 0x15c   : > { %p753_p6 = pnand %p752_p13, %p1117_p0 }
 0x15d   : > { %p758_p8 = por %p757_p5, %p756_p4 }
 0x15e   : > { %p754_p10 = pneg %p753_p6 }
 0x15f   : > { %p760_p2 = por %p759_p11, %p758_p8 }
 0x161   : > { %p761_p3 = pnand %p760_p2, %p754_p10 }
 0x163   : > { %764 = shalt.err (!%p761_p3)
}
 0x164   : > { %s815_s22 = smov 128   ;;  %s816_s18 = smov 8  }
 0x165   : > { %590 = dma.vmem_to_hbm [thread:$0]  (%p1117_p0), %s1051_s20, 1024, %s1056_s16, %s378_s28, %s815_s22, %s815_s22, %s816_s18  }
 0x166 PF: > { %s406_s7 = sand.u32 1, %s795_s12   ;;  %p1118_p7 = scmp.ne.s32.totalorder %s1108_s19, 0 }
 0x167   : > { %p1119_p9 = scmp.ge.s32.totalorder %s807_s15, 2  ;;  %s407_s8 = scalar_lea.sflag [#allocation4], %s406_s7 }
 0x169   : > { %p604_p12 = pnand %p1119_p9, %p1118_p7 }
 0x16b   : > { %790 = dma.done.wait (!%p604_p12), %s407_s8, 1024  }
 0x16c   : > { %792 = vsyncadd (!%p604_p12), %s407_s8, 4294966272  ;;  %p17_p1 = scmp.ge.s32.totalorder %s951_s5, 4   ;;  %s1120_s12 = smov %s799_s13 }
 0x16d   : > { %s1121_s13 = smov %s803_s14  ;;  %s1122_s14 = smov %s967_s10 }
 0x16e   : > { %s1123_s15 = smov %s951_s5  ;;  %19 = sbr.rel (!%p17_p1) target bundleno = 6 (0x6), region = 85 }
 0x175   :  { %412 = vsyncpa [#allocation3], 1 }
 0x176   :  { %414 = vsyncpa [#allocation3 + $0x1], 1 }
 0x177   :  { %415 = vsyncpa [#allocation6], 1 }
 0x178   :  { %416 = vsyncpa [#allocation4], 1 }
 0x179   :  { %418 = vsyncpa [#allocation4 + $0x1], 1 }

// kernel: up_block_3p.3
= control target key start
LH: loop header
LB: loop body
LE: loop exit
PB: predicated region body
PF: predicated region fallthrough
CT: control target
= control target key end

     0   :  { %s16017_s0 = inlined_call_operand.hbm [shape: f32[2,16,16,128], index: 0, kind: input, shape index: {}]   ;;  %s16018_s1 = inlined_call_operand.hbm [shape: f32[2,16,16,32], index: 1, kind: input, shape index: {}]   ;;  %s16019_s2 = inlined_call_operand.hbm [shape: f32[9,1,128], index: 2, kind: input, shape index: {}]   ;;  %s16020_s3 = inlined_call_operand.hbm [shape: f32[9,1,32], index: 3, kind: input, shape index: {}]   ;;  %s16021_s4 = inlined_call_operand.hbm [shape: f32[160,160], index: 4, kind: input, shape index: {}]   ;;  %s16022_s5 = inlined_call_operand.hbm [shape: f32[1,160], index: 5, kind: input, shape index: {}]   ;;  %s16023_s6 = inlined_call_operand.hbm [shape: f32[9,1,160], index: 6, kind: input, shape index: {}]   ;;  %s16024_s7 = inlined_call_operand.hbm [shape: f32[160,160], index: 7, kind: input, shape index: {}]   ;;  %s16025_s8 = inlined_call_operand.hbm [shape: f32[1,160], index: 8, kind: input, shape index: {}]   ;;  %s16026_s9 = inlined_call_operand.hbm [shape: f32[2,16,16,160], index: 9, kind: output, shape index: {}]  }
   0x1   :  { %16403 = sst [smem:[#allocation70_spill]] %s16017_s0 }
   0x2   :  { %16404 = sst [smem:[#allocation71_spill]] %s16019_s2 }
   0x3   :  { %16405 = sst [smem:[#allocation72_spill]] %s16020_s3 }
   0x4   :  { %16406 = sst [smem:[#allocation73_spill]] %s16021_s4 }
   0x5   :  { %16407 = sst [smem:[#allocation74_spill]] %s16022_s5 }
   0x6   :  { %16408 = sst [smem:[#allocation75_spill]] %s16026_s9 }
   0x7   :  { %14 = vsyncpa [#allocation6], 0 }
   0x8   :  { %16 = vsyncpa [#allocation6 + $0x1], 0 }
   0x9   :  { %17 = vsyncpa [#allocation9], 0 }
   0xa   :  { %19 = vsyncpa [#allocation9 + $0x1], 0 }
   0xb   :  { %20 = vsyncpa [#allocation12], 0 }
   0xc   :  { %21 = vsyncpa [#allocation15], 0 }
   0xd   :  { %22 = vsyncpa [#allocation18], 0 }
   0xe   :  { %23 = vsyncpa [#allocation7], 0 }
   0xf   :  { %25 = vsyncpa [#allocation7 + $0x1], 0  ;;  %s9329_s30 = smov 0   ;;  %s9331_s10 = smov 0  }
  0x10   :  { %s9333_s11 = smov 0   ;;  %s9335_s12 = smov 0  }
  0x11 LB: > { %s9259_s13 = smov [#allocation10]   ;;  %s9350_s15 = sadd.s32 4294967295, %s9257_s12   ;;  %s9257_s12 = sphi %s9335_s12, %s17091_s12   ;;  %s9253_s11 = sphi %s9333_s11, %s17090_s11   ;;  %s9249_s10 = sphi %s9331_s10, %s17089_s10   ;;  %s9245_s30 = sphi %s9329_s30, %s17088_s30  }
  0x12   : > { %s273_s14 = sshll.u32 %s9259_s13, 4  ;;  %p8459_p0 = scmp.ge.s32.totalorder %s9257_s12, 1  ;;  %s9355_s14 = int_to_ptr.vmem [resolvable:$true] %s273_s14 }
  0x13   : > { %p16028_p1 = scmp.eq.s32.totalorder %s9350_s15, 0  ;;  %p261_p2 = scmp.lt.s32.totalorder %s9257_s12, 3 }
  0x14   : > { %s9260_s17 = smov [#allocation11]   ;;  %s9261_s20 = smov [#allocation14]  }
  0x15   : > { %p9357_p3 = pnand %p8459_p0, %p261_p2  ;;  %s286_s18 = sshll.u32 %s9260_s17, 4  ;;  %s9370_s18 = int_to_ptr.vmem [resolvable:$true] %s286_s18 }
  0x16   : > { %s313_s21 = sshll.u32 %s9261_s20, 4  ;;  %s16411_s2 = sld [smem:[#allocation71_spill]]  ;;  %s9372_s21 = int_to_ptr.vmem [resolvable:$true] %s313_s21 }
  0x17   : > { %s16409_s16 = scalar_select %p9357_p3, 1, 0 }
  0x18   : > { %p8757_p5 = pneg %p9357_p3 }
  0x1a   : > { %p9366_p6 = pnand %p8757_p5, %p16028_p1 }
  0x1c   : > { %s8915_s24 = scalar_lea.hbm %s16411_s2, 144  ;;  %p9382_p8 = pneg %p9366_p6 }
  0x1d   : > { %p8916_p7 = scmp.ne.s32.totalorder %s16411_s2, %s8915_s24  ;;  %p8922_p11 = scmp.lt.u32.totalorder %s8915_s24, %s16411_s2 }
  0x1f   : > { %p8918_p9 = pnand %p9382_p8, %p8916_p7 }
  0x21   : > { %p8919_p10 = pneg %p8918_p9 }
  0x23   : > { %p8924_p12 = pnand %p8922_p11, %p8919_p10 }
  0x25   : > { %8927 = shalt.err (!%p8924_p12)
}
  0x26   : > { %s8928_s13 = scalar_lea.vmem %s9355_s14, 144  ;;  %s8935_s17 = scalar_lea.vmem %s9355_s14, 160 }
  0x27   : > { %p8929_p13 = scmp.ne.s32.totalorder %s9355_s14, %s8928_s13  ;;  %p8936_p5 = scmp.lt.s32.totalorder %s9355_s14, %s9355_s14 }
  0x28   : > { %p8937_p7 = scmp.lt.s32.totalorder %s8935_s17, %s8928_s13 }
  0x29   : > { %p8931_p0 = pnand %p8929_p13, %p9382_p8 }
  0x2a   : > { %p8938_p9 = por %p8937_p7, %p8936_p5 }
  0x2b   : > { %p8932_p2 = pneg %p8931_p0 }
  0x2d   : > { %p8939_p4 = pnand %p8938_p9, %p8932_p2 }
  0x2f   : > { %8942 = shalt.err (!%p8939_p4)
}
  0x30   : > { %s9262_s20 = smov 16   ;;  %s9263_s22 = smov 1  }
  0x31   : > { %8760 = dma.hbm_to_vmem [thread:$0]  (!%p9366_p6), %s16411_s2, 144, %s9355_s14, [#allocation9], %s9262_s20, %s9262_s20, %s9263_s22  }
  0x32   : > { %s16413_s3 = sld [smem:[#allocation72_spill]] }
  0x38   : > { %s8943_s28 = scalar_lea.hbm %s16413_s3, 144 }
  0x39   : > { %p8944_p4 = scmp.ne.s32.totalorder %s16413_s3, %s8943_s28  ;;  %p8950_p12 = scmp.lt.u32.totalorder %s8943_s28, %s16413_s3 }
  0x3b   : > { %p8946_p10 = pnand %p8944_p4, %p9382_p8 }
  0x3d   : > { %p8947_p11 = pneg %p8946_p10 }
  0x3f   : > { %p8952_p13 = pnand %p8950_p12, %p8947_p11 }
  0x41   : > { %8955 = shalt.err (!%p8952_p13)
}
  0x42   : > { %s8956_s14 = scalar_lea.vmem %s9370_s18, 144  ;;  %s8963_s23 = scalar_lea.vmem %s9370_s18, 160 }
  0x43   : > { %p8957_p0 = scmp.ne.s32.totalorder %s9370_s18, %s8956_s14  ;;  %p8964_p7 = scmp.lt.s32.totalorder %s9370_s18, %s9370_s18 }
  0x44   : > { %p8965_p9 = scmp.lt.s32.totalorder %s8963_s23, %s8956_s14 }
  0x45   : > { %p8959_p2 = pnand %p8957_p0, %p9382_p8 }
  0x46   : > { %p8966_p4 = por %p8965_p9, %p8964_p7 }
  0x47   : > { %p8960_p5 = pneg %p8959_p2 }
  0x49   : > { %p8967_p10 = pnand %p8966_p4, %p8960_p5 }
  0x4b   : > { %8970 = shalt.err (!%p8967_p10)
}
  0x4c   : > { %8763 = dma.hbm_to_vmem [thread:$0]  (!%p9366_p6), %s16413_s3, 144, %s9370_s18, [#allocation12], %s9262_s20, %s9262_s20, %s9263_s22  }
  0x4d   : > { %s16414_s5 = sld [smem:[#allocation74_spill]] }
  0x53   : > { %s8971_s28 = scalar_lea.hbm %s16414_s5, 32 }
  0x54   : > { %p8972_p11 = scmp.ne.s32.totalorder %s16414_s5, %s8971_s28  ;;  %p8978_p0 = scmp.lt.u32.totalorder %s8971_s28, %s16414_s5 }
  0x56   : > { %p8974_p12 = pnand %p8972_p11, %p9382_p8 }
  0x58   : > { %p8975_p13 = pneg %p8974_p12 }
  0x5a   : > { %p8980_p2 = pnand %p8978_p0, %p8975_p13 }
  0x5c   : > { %8983 = shalt.err (!%p8980_p2)
}
  0x5d   : > { %s8984_s18 = scalar_lea.vmem %s9372_s21, 32  ;;  %p8992_p4 = scmp.lt.s32.totalorder %s9372_s21, %s9372_s21 }
  0x5e   : > { %p8985_p5 = scmp.ne.s32.totalorder %s9372_s21, %s8984_s18  ;;  %p8993_p10 = scmp.lt.s32.totalorder %s8984_s18, %s8984_s18 }
  0x60   : > { %p8987_p7 = pnand %p8985_p5, %p9382_p8  ;;  %p8994_p11 = por %p8993_p10, %p8992_p4 }
  0x62   : > { %p8988_p9 = pneg %p8987_p7 }
  0x64   : > { %p8995_p12 = pnand %p8994_p11, %p8988_p9 }
  0x66   : > { %8998 = shalt.err (!%p8995_p12)
}
  0x67   : > { %8769 = dma.hbm_to_vmem [thread:$0]  (!%p9366_p6), %s16414_s5, 32, %s9372_s21, [#allocation15]  }
  0x68   : > { %s9264_s9 = smov [#allocation17]   ;;  %s9265_s25 = smov [#allocation13]  }
  0x69   : > { %s336_s24 = sshll.u32 %s9264_s9, 4  ;;  %s299_s26 = sshll.u32 %s9265_s25, 4  ;;  %s337_s24 = int_to_ptr.vmem [resolvable:$true] %s336_s24  ;;  %s9455_s26 = int_to_ptr.vmem [resolvable:$true] %s299_s26 }
  0x6a   : > { %s8999_s13 = scalar_lea.hbm %s16024_s7, 5120 }
  0x6b   : > { %p9000_p13 = scmp.ne.s32.totalorder %s16024_s7, %s8999_s13  ;;  %p9006_p5 = scmp.lt.u32.totalorder %s8999_s13, %s16024_s7 }
  0x6d   : > { %p9002_p0 = pnand %p9000_p13, %p9382_p8 }
  0x6f   : > { %p9003_p2 = pneg %p9002_p0 }
  0x71   : > { %p9008_p7 = pnand %p9006_p5, %p9003_p2 }
  0x73   : > { %9011 = shalt.err (!%p9008_p7)
}
  0x74   : > { %s9012_s22 = scalar_lea.vmem %s337_s24, 5120  ;;  %p9020_p11 = scmp.lt.s32.totalorder %s337_s24, %s337_s24 }
  0x75   : > { %p9013_p9 = scmp.ne.s32.totalorder %s337_s24, %s9012_s22  ;;  %p9021_p12 = scmp.lt.s32.totalorder %s9012_s22, %s9012_s22 }
  0x77   : > { %p9015_p4 = pnand %p9013_p9, %p9382_p8  ;;  %p9022_p1 = por %p9021_p12, %p9020_p11 }
  0x79   : > { %p9016_p10 = pneg %p9015_p4 }
  0x7b   : > { %p9023_p3 = pnand %p9022_p1, %p9016_p10 }
  0x7d   : > { %9026 = shalt.err (!%p9023_p3)
}
  0x7e   : > { %s9266_s23 = smov 256   ;;  %s16415_s4 = sld [smem:[#allocation73_spill]] }
  0x7f   : > { %8775 = dma.hbm_to_vmem [thread:$0]  (!%p9366_p6), %s16024_s7, 5120, %s337_s24, [#allocation18], %s9266_s23, %s9266_s23, %s9262_s20  }
  0x84   : > { %s9027_s13 = scalar_lea.hbm %s16415_s4, 5120 }
  0x85   : > { %p9028_p13 = scmp.ne.s32.totalorder %s16415_s4, %s9027_s13  ;;  %p9034_p0 = scmp.lt.u32.totalorder %s9027_s13, %s16415_s4 }
  0x87   : > { %p9030_p1 = pnand %p9028_p13, %p9382_p8 }
  0x89   : > { %p9031_p3 = pneg %p9030_p1 }
  0x8b   : > { %p9036_p2 = pnand %p9034_p0, %p9031_p3 }
  0x8d   : > { %9039 = shalt.err (!%p9036_p2)
}
  0x8e   : > { %s9040_s24 = scalar_lea.vmem %s9455_s26, 5120  ;;  %p9048_p4 = scmp.lt.s32.totalorder %s9455_s26, %s9455_s26 }
  0x8f   : > { %p9041_p5 = scmp.ne.s32.totalorder %s9455_s26, %s9040_s24  ;;  %p9049_p10 = scmp.lt.s32.totalorder %s9040_s24, %s9040_s24 }
  0x91   : > { %p9043_p7 = pnand %p9041_p5, %p9382_p8  ;;  %p9050_p11 = por %p9049_p10, %p9048_p4 }
  0x93   : > { %p9044_p9 = pneg %p9043_p7 }
  0x95   : > { %p9051_p12 = pnand %p9050_p11, %p9044_p9 }
  0x97   : > { %9054 = shalt.err (!%p9051_p12)
}
  0x98   : > { %8766 = dma.hbm_to_vmem [thread:$0]  (!%p9366_p6), %s16415_s4, 5120, %s9455_s26, [#allocation12], %s9266_s23, %s9266_s23, %s9262_s20  }
  0x99   : > { %s9267_s25 = smov [#allocation16]   ;;  %s9055_s17 = scalar_lea.hbm %s16023_s6, 288 }
  0x9a   : > { %s323_s28 = sshll.u32 %s9267_s25, 4  ;;  %p9056_p13 = scmp.ne.s32.totalorder %s16023_s6, %s9055_s17  ;;  %s324_s28 = int_to_ptr.vmem [resolvable:$true] %s323_s28 }
  0x9b   : > { %p9062_p0 = scmp.lt.u32.totalorder %s9055_s17, %s16023_s6 }
  0x9c   : > { %p9058_p1 = pnand %p9056_p13, %p9382_p8 }
  0x9e   : > { %p9059_p3 = pneg %p9058_p1 }
  0xa0   : > { %p9064_p2 = pnand %p9062_p0, %p9059_p3 }
  0xa2   : > { %9067 = shalt.err (!%p9064_p2)
}
  0xa3   : > { %s9068_s20 = scalar_lea.vmem %s324_s28, 288  ;;  %p9076_p4 = scmp.lt.s32.totalorder %s324_s28, %s324_s28 }
  0xa4   : > { %p9069_p5 = scmp.ne.s32.totalorder %s324_s28, %s9068_s20  ;;  %p9077_p10 = scmp.lt.s32.totalorder %s9068_s20, %s9068_s20 }
  0xa6   : > { %p9071_p7 = pnand %p9069_p5, %p9382_p8  ;;  %p9078_p11 = por %p9077_p10, %p9076_p4 }
  0xa8   : > { %p9072_p9 = pneg %p9071_p7 }
  0xaa   : > { %p9079_p12 = pnand %p9078_p11, %p9072_p9 }
  0xac   : > { %9082 = shalt.err (!%p9079_p12)
}
  0xad   : > { %s9268_s26 = smov 32   ;;  %s9269_s23 = smov 2  }
  0xae   : > { %8772 = dma.hbm_to_vmem [thread:$0]  (!%p9366_p6), %s16023_s6, 288, %s324_s28, [#allocation15], %s9268_s26, %s9268_s26, %s9269_s23  }
  0xaf   : > { %s9270_s25 = smov [#allocation19]   ;;  %s9083_s14 = scalar_lea.hbm %s16025_s8, 32 }
  0xb0   : > { %s350_s29 = sshll.u32 %s9270_s25, 4  ;;  %p9084_p13 = scmp.ne.s32.totalorder %s16025_s8, %s9083_s14  ;;  %s351_s29 = int_to_ptr.vmem [resolvable:$true] %s350_s29 }
  0xb1   : > { %p9090_p0 = scmp.lt.u32.totalorder %s9083_s14, %s16025_s8 }
  0xb2   : > { %p9086_p1 = pnand %p9084_p13, %p9382_p8 }
  0xb4   : > { %p9087_p3 = pneg %p9086_p1 }
  0xb6   : > { %p9092_p2 = pnand %p9090_p0, %p9087_p3 }
  0xb8   : > { %9095 = shalt.err (!%p9092_p2)
}
  0xb9   : > { %s9096_s28 = scalar_lea.vmem %s351_s29, 32  ;;  %p9104_p4 = scmp.lt.s32.totalorder %s351_s29, %s351_s29 }
  0xba   : > { %p9097_p5 = scmp.ne.s32.totalorder %s351_s29, %s9096_s28  ;;  %p9105_p10 = scmp.lt.s32.totalorder %s9096_s28, %s9096_s28 }
  0xbc   : > { %p9099_p7 = pnand %p9097_p5, %p9382_p8  ;;  %p9106_p11 = por %p9105_p10, %p9104_p4 }
  0xbe   : > { %p9100_p9 = pneg %p9099_p7 }
  0xc0   : > { %p9107_p12 = pnand %p9106_p11, %p9100_p9 }
  0xc2   : > { %9110 = shalt.err (!%p9107_p12)
}
  0xc3   : > { %8778 = dma.hbm_to_vmem [thread:$0]  (!%p9366_p6), %s16025_s8, 32, %s351_s29, [#allocation18]  }
  0xc4   : > { %s8458_s27 = sadd.s32 4294967294, %s9257_s12   ;;  %s9538_s19 = sadd.s32 1, %s9257_s12  }
  0xc5   : > { %s35_s22 = ssub.s32 %s9257_s12, %s9538_s19  ;;  %s38_s9 = sadd.s32 1, %s9253_s11 }
  0xc6   : > { %p36_p8 = scmp.eq.s32.totalorder %s35_s22, 0  ;;  %p45_p13 = scmp.ne.s32.totalorder %s9253_s11, %s9249_s10 }
  0xc7   : > { %p46_p1 = scmp.eq.s32.totalorder %s9257_s12, 0  ;;  %p51_p3 = scmp.ne.s32.totalorder %s9249_s10, %s9245_s30 }
  0xc8   : > { %s9549_s25 = scalar_select %p36_p8, %s9253_s11, %s38_s9  }
  0xc9   : > { %p9551_p0 = por %p46_p1, %p45_p13  ;;  %p16417_p2 = scmp.eq.s32.totalorder %s9350_s15, 0 }
  0xca   : > { %p248_p5 = scmp.eq.s32.totalorder %s9350_s15, 1  ;;  %p254_p7 = scmp.eq.s32.totalorder %s8458_s27, 1 }
  0xcb   : > { %p9557_p6 = por %p16417_p2, %p51_p3  ;;  %p8797_p9 = scmp.lt.s32.totalorder %s9257_s12, 2 }
  0xcc   : > { %s361_s17 = sand.u32 1, %s9253_s11   ;;  %p9564_p4 = por %p248_p5, %p45_p13 }
  0xcd   : > { %p9568_p10 = por %p254_p7, %p51_p3  ;;  %s9572_s21 = sshll.u32 %s361_s17, 8 }
  0xce   : > { %s16419_s14 = scalar_select %p9564_p4, 1, 0 }
  0xcf   : > { %s16420_s18 = scalar_select %p9568_p10, 1, 0 }
  0xd0   : > { %s16030_s24 = sshll.u32 %s9257_s12, 12  ;;  %s16421_s0 = sld [smem:[#allocation70_spill]] }
  0xd1   : > { %s365_s23 = scalar_lea.vmem [#allocation5], %s9572_s21  ;;  %p9587_p11 = pnand %p8797_p9, %p9551_p0 }
  0xd2   : > { %s372_s27 = sshll.u32 %s365_s23, 4  ;;  %s9591_s9 = scalar_lea.sflag [#allocation6], %s361_s17  ;;  %s9583_s27 = int_to_ptr.vmem [resolvable:$true] %s372_s27 }
  0xd3   : > { %p9113_p8 = pneg %p9587_p11 }
  0xd6   : > { %s9580_s26 = scalar_lea.hbm %s16421_s0, %s16030_s24  ;;  %s9116_s13 = scalar_lea.hbm %s16421_s0, 8192 }
  0xd7   : > { %s9111_s20 = scalar_lea.hbm %s9580_s26, 4096  ;;  %p9117_p3 = scmp.lt.u32.totalorder %s9580_s26, %s16421_s0 }
  0xd8   : > { %p9112_p12 = scmp.ne.s32.totalorder %s9580_s26, %s9111_s20  ;;  %p9118_p0 = scmp.lt.u32.totalorder %s9116_s13, %s9111_s20 }
  0xd9   : > { %p9120_p5 = scmp.lt.u32.totalorder %s9111_s20, %s9580_s26 }
  0xda   : > { %p9114_p13 = pnand %p9113_p8, %p9112_p12  ;;  %p9119_p2 = por %p9118_p0, %p9117_p3 }
  0xdc   : > { %p9115_p1 = pneg %p9114_p13  ;;  %p9121_p7 = por %p9120_p5, %p9119_p2 }
  0xde   : > { %p9122_p9 = pnand %p9121_p7, %p9115_p1 }
  0xe0   : > { %9125 = shalt.err (!%p9122_p9)
}
  0xe1   : > { %s9126_s17 = scalar_lea.vmem %s9583_s27, 4096  ;;  %s9271_s28 = smov [#allocation5]  }
  0xe2   : > { %p9127_p12 = scmp.ne.s32.totalorder %s9583_s27, %s9126_s17  ;;  %s9131_s23 = sshll.u32 %s9271_s28, 4  ;;  %s9132_s23 = int_to_ptr.vmem [resolvable:$false] %s9131_s23 }
  0xe3   : > { %s9133_s2 = scalar_lea.vmem %s9132_s23, 8192  ;;  %p9134_p4 = scmp.lt.s32.totalorder %s9583_s27, %s9132_s23 }
  0xe4   : > { %p9129_p13 = pnand %p9127_p12, %p9113_p8  ;;  %p9135_p3 = scmp.lt.s32.totalorder %s9133_s2, %s9126_s17 }
  0xe6   : > { %p9130_p10 = pneg %p9129_p13  ;;  %p9136_p0 = por %p9135_p3, %p9134_p4 }
  0xe8   : > { %p9137_p2 = pnand %p9136_p0, %p9130_p10 }
  0xea   : > { %9140 = shalt.err (!%p9137_p2)
}
  0xeb   : > { %s9272_s24 = smov 128   ;;  %s9273_s20 = smov 8  }
  0xec   : > { %8782 = dma.hbm_to_vmem [thread:$0]  (!%p9587_p11), %s9580_s26, 4096, %s9583_s27, %s9591_s9, %s9272_s24, %s9272_s24, %s9273_s20  }
  0xed   : > { %s16423_s13 = sshll.u32 %s9257_s12, 12  ;;  %s386_s2 = scalar_lea.vmem [#allocation8], %s9572_s21 }
  0xee   : > { %s9627_s23 = scalar_lea.hbm %s16018_s1, %s16423_s13  ;;  %s393_s0 = sshll.u32 %s386_s2, 4  ;;  %s9630_s0 = int_to_ptr.vmem [resolvable:$true] %s393_s0 }
  0xef   : > { %s382_s3 = sand.u32 1, %s9257_s12   ;;  %s9141_s5 = scalar_lea.hbm %s9627_s23, 4096 }
  0xf0   : > { %s9633_s4 = scalar_lea.sflag [#allocation9], %s382_s3  ;;  %p9142_p4 = scmp.ne.s32.totalorder %s9627_s23, %s9141_s5 }
  0xf1   : > { %s9146_s9 = scalar_lea.hbm %s16018_s1, 8192  ;;  %p9147_p5 = scmp.lt.u32.totalorder %s9627_s23, %s16018_s1 }
  0xf2   : > { %p9144_p10 = pnand %p9142_p4, %p9113_p8  ;;  %p9148_p7 = scmp.lt.u32.totalorder %s9146_s9, %s9141_s5 }
  0xf3   : > { %p9150_p12 = scmp.lt.u32.totalorder %s9141_s5, %s9627_s23 }
  0xf4   : > { %p9145_p1 = pneg %p9144_p10  ;;  %p9149_p9 = por %p9148_p7, %p9147_p5 }
  0xf6   : > { %p9151_p13 = por %p9150_p12, %p9149_p9 }
  0xf8   : > { %p9152_p3 = pnand %p9151_p13, %p9145_p1 }
  0xfa   : > { %9155 = shalt.err (!%p9152_p3)
}
  0xfb   : > { %s9156_s3 = scalar_lea.vmem %s9630_s0, 4096  ;;  %s9274_s21 = smov [#allocation8]  }
  0xfc   : > { %p9157_p0 = scmp.ne.s32.totalorder %s9630_s0, %s9156_s3  ;;  %s9161_s28 = sshll.u32 %s9274_s21, 4  ;;  %s9162_s28 = int_to_ptr.vmem [resolvable:$false] %s9161_s28 }
  0xfd   : > { %s9163_s2 = scalar_lea.vmem %s9162_s28, 8192  ;;  %p9164_p10 = scmp.lt.s32.totalorder %s9630_s0, %s9162_s28 }
  0xfe   : > { %p9159_p2 = pnand %p9157_p0, %p9113_p8  ;;  %p9165_p5 = scmp.lt.s32.totalorder %s9163_s2, %s9156_s3 }
 0x100   : > { %p9160_p4 = pneg %p9159_p2  ;;  %p9166_p7 = por %p9165_p5, %p9164_p10 }
 0x102   : > { %p9167_p9 = pnand %p9166_p7, %p9160_p4 }
 0x104   : > { %9170 = shalt.err (!%p9167_p9)
}
 0x105   : > { %8785 = dma.hbm_to_vmem [thread:$0]  (!%p9587_p11), %s9627_s23, 4096, %s9630_s0, %s9633_s4, %s9272_s24, %s9272_s24, %s9273_s20  }
 0x106   : > { %p16424_p8 = scmp.ne.s32.totalorder %s16409_s16, 0 }
 0x108   : > { %405 = sbr.rel (%p16424_p8) target bundleno = 1627 (0x65b), region = 56 }
 0x10f   : > { %s9665_s5 = sand.u32 1, %s9249_s10  }
 0x110   : > { %s8475_s26 = sshll.u32 %s9665_s5, 8  ;;  %s408_s27 = scalar_lea.sflag [#allocation6], %s9665_s5 }
 0x111   : > { %s9669_s9 = scalar_lea.vmem [#allocation5], %s8475_s26 }
 0x112   : > { %9216 = dma.done.wait (%p9557_p6), %s408_s27, 4096  }
 0x113   : > { %9218 = vsyncadd (%p9557_p6), %s408_s27, 4294963200  ;;  %s416_s0 = sand.u32 1, %s9350_s15   ;;  %s9676_s16 = scalar_lea.vmem [#allocation8], %s8475_s26 }
 0x114   : > { %s417_s4 = scalar_lea.sflag [#allocation9], %s416_s0 }
 0x115   : > { %9220 = dma.done.wait (%p9557_p6), %s417_s4, 4096  }
 0x116   : > { %9222 = vsyncadd (%p9557_p6), %s417_s4, 4294963200  ;;  %p16425_p11 = scmp.eq.s32.totalorder %s9350_s15, 0 }
 0x118   : > { %9224 = dma.done.wait (%p16425_p11), [#allocation9], 144   ;;  %p16426_p1 = pmov %p16425_p11 }
 0x11a   : > { %9226 = vsyncadd (%p16426_p1), [#allocation9], 4294967152  ;;  %p16427_p12 = pmov %p16426_p1 }
 0x11b   : > { %p16428_p13 = pmov %p16426_p1 }
 0x11c   : > { %9228 = dma.done.wait (%p16427_p12), [#allocation12], 5264  }
 0x11d   : > { %9230 = vsyncadd (%p16428_p13), [#allocation12], 4294962032  ;;  %p16429_p3 = pmov %p16426_p1 }
 0x11e   : > { %p16430_p0 = pmov %p16426_p1 }
 0x11f   : > { %9232 = dma.done.wait (%p16429_p3), [#allocation15], 320  }
 0x120   : > { %9234 = vsyncadd (%p16430_p0), [#allocation15], 4294966976  ;;  %p16431_p6 = pmov %p16430_p0 }
 0x121   : > { %p16432_p2 = pmov %p16430_p0 }
 0x122   : > { %9236 = dma.done.wait (%p16431_p6), [#allocation18], 5152  }
 0x123   : > { %9238 = vsyncadd (%p16432_p2), [#allocation18], 4294962144  ;;  %vm533_vm0 = vcmask 261120   ;;  %v9275_v0 = vmov 0.0   ;;  %v2632_v1 = vld [vmem:[#allocation13 + $0x108] sm:$0xff]  ;;  %v2634_v2 = vld [vmem:[#allocation13 + $0x118] sm:$0xff] }
 0x124   : > { %2799 = vmatprep.mubr.f32.mxu0 %v9275_v0  ;;  %489 = vst [vmem:[#allocation2 + $0x8] sm:$0xff] %v9275_v0  ;;  %490 = vst [vmem:[#allocation2 + $0x10] sm:$0xff] %v9275_v0  ;;  %2895 = vmatprep.mubr.f32.mxu1 %v9275_v0  ;;  %v2631_v3 = vld [vmem:[#allocation13 + $0x100] sm:$0xff]  ;;  %v8575_v4 = vpack.c.bf16 %v2634_v2, %v2632_v1  ;;  %v2633_v5 = vld [vmem:[#allocation13 + $0x110] sm:$0xff]  ;;  %vm3828_vm1 = vcmask 1046528   ;;  %vm4384_vm2 = vcmask 1045504  }
 0x125   : > { %494 = vst [vmem:[#allocation2 + $0x228] sm:$0xff] %v9275_v0  ;;  %495 = vst [vmem:[#allocation2 + $0x230] sm:$0xff] %v9275_v0  ;;  %v2636_v6 = vld [vmem:[#allocation13 + $0x128] sm:$0xff]  ;;  %v2638_v7 = vld [vmem:[#allocation13 + $0x138] sm:$0xff]  ;;  %v8577_v8 = vpack.c.bf16 %v2633_v5, %v2631_v3  ;;  %vm7588_vm3 = vcmask 1040384   ;;  %s8484_s29 = sshll.u32 %s9665_s5, 9 }
 0x126   : > { %498 = vst [vmem:[#allocation2 + $0x20] sm:$0xff] %v9275_v0  ;;  %499 = vst [vmem:[#allocation2 + $0x40] sm:$0xff] %v9275_v0  ;;  %v8579_v9 = vpack.c.bf16 %v2638_v7, %v2636_v6  ;;  %v2635_v10 = vld [vmem:[#allocation13 + $0x120] sm:$0xff]  ;;  %v2637_v11 = vld [vmem:[#allocation13 + $0x130] sm:$0xff]  ;;  %8576 = vmatprep.subr.bf16.mxu0 %v8575_v4  ;;  %8655 = vmatprep.subr.bf16.mxu1 %v8575_v4  ;;  %s15768_s22 = scalar_lea.vmem [#allocation20], %s8484_s29  ;;  %s8574_s24 = sshll.u32 %s9350_s15, 13 }
 0x127   : > { %500 = vst [vmem:[#allocation2 + $0x60] sm:$0xff] %v9275_v0  ;;  %501 = vst [vmem:[#allocation2 + $0x80] sm:$0xff] %v9275_v0  ;;  %v2600_v12 = vld [vmem:[#allocation13 + $0x8] sm:$0xff]  ;;  %v2602_v13 = vld [vmem:[#allocation13 + $0x18] sm:$0xff]  ;;  %8578 = vmatpush1.bf16.msra.mxu0 %v8577_v8  ;;  %v8581_v16 = vpack.c.bf16 %v2637_v11, %v2635_v10  ;;  %8657 = vmatpush1.bf16.msra.mxu1 %v8577_v8  ;;  %s8296_s20 = sshll.u32 %s15768_s22, 4  ;;  %s17084_s17 = sld [smem:[#allocation75_spill]]  ;;  %s15970_s20 = int_to_ptr.vmem [resolvable:$true] %s8296_s20 }
 0x128   : > { %502 = vst [vmem:[#allocation2 + $0xa0] sm:$0xff] %v9275_v0  ;;  %503 = vst [vmem:[#allocation2 + $0xc0] sm:$0xff] %v9275_v0  ;;  %v733_v14 = vld [vmem:[%s9676_s16] sm:$0xff]  ;;  %v734_v15 = vld [vmem:[%s9676_s16 + $0x8] sm:$0xff]  ;;  %8580 = vmatprep.subr.bf16.mxu0 %v8579_v9  ;;  %v8583_v19 = vpack.c.bf16 %v2602_v13, %v2600_v12  ;;  %8656 = vmatprep.subr.bf16.mxu1 %v8579_v9  ;;  %s8283_s15 = scalar_lea.sflag [#allocation7], %s9665_s5  ;;  %s9171_s21 = scalar_lea.vmem %s15970_s20, 8192 }
 0x129   : > { %504 = vst [vmem:[#allocation2 + $0xe0] sm:$0xff] %v9275_v0  ;;  %505 = vst [vmem:[#allocation2 + $0x100] sm:$0xff] %v9275_v0  ;;  %v735_v17 = vld [vmem:[%s9676_s16 + $0x10] sm:$0xff]  ;;  %v736_v18 = vld [vmem:[%s9676_s16 + $0x18] sm:$0xff]  ;;  %p9172_p4 = scmp.ne.s32.totalorder %s15970_s20, %s9171_s21  ;;  %p17085_p10 = scmp.ne.s32.totalorder %s16419_s14, 0 }
 0x12a   : > { %506 = vst [vmem:[#allocation2 + $0x120] sm:$0xff] %v9275_v0  ;;  %507 = vst [vmem:[#allocation2 + $0x140] sm:$0xff] %v9275_v0  ;;  %v9964_v20 = vld [vmem:[#allocation11] ss:$0 sm:$0xff]  ;;  %v9966_v21 = vld [vmem:[#allocation11 + $0x1] ss:$0 sm:$0xff] }
 0x12b   : > { %508 = vst [vmem:[#allocation2 + $0x160] sm:$0xff] %v9275_v0  ;;  %509 = vst [vmem:[#allocation2 + $0x180] sm:$0xff] %v9275_v0  ;;  %v9968_v22 = vld [vmem:[#allocation11 + $0x2] ss:$0 sm:$0xff]  ;;  %v9970_v23 = vld [vmem:[#allocation11 + $0x3] ss:$0 sm:$0xff]  ;;  %8582 = vmatpush1.bf16.msra.mxu0 %v8581_v16  ;;  %8658 = vmatpush1.bf16.msra.mxu1 %v8581_v16  ;;  %p9173_p5 = pnand %p9172_p4, %p17085_p10 }
 0x12c   : > { %510 = vst [vmem:[#allocation2 + $0x1a0] sm:$0xff] %v9275_v0  ;;  %511 = vst [vmem:[#allocation2 + $0x1c0] sm:$0xff] %v9275_v0  ;;  %v9972_v24 = vld [vmem:[#allocation11 + $0x4] ss:$0 sm:$0xff]  ;;  %v9974_v26 = vld [vmem:[#allocation11 + $0x5] ss:$0 sm:$0xff]  ;;  %8584 = vmatprep.subr.bf16.mxu0 %v8583_v19 }
 0x12d   : > { %512 = vst [vmem:[#allocation2 + $0x1e0] sm:$0xff] %v9275_v0  ;;  %513 = vst [vmem:[#allocation2 + $0x200] sm:$0xff] %v9275_v0  ;;  %v9976_v27 = vld [vmem:[#allocation11 + $0x6] ss:$0 sm:$0xff]  ;;  %v9978_v28 = vld [vmem:[#allocation11 + $0x7] ss:$0 sm:$0xff]  ;;  %s15968_s3 = scalar_lea.hbm %s17084_s17, %s8574_s24  ;;  %p9174_p7 = pneg %p9173_p5 }
 0x12e   : > { %516 = vst [vmem:[#allocation2 + $0x38] sm:$0xff] %v9275_v0  ;;  %517 = vst [vmem:[#allocation2 + $0x58] sm:$0xff] %v9275_v0  ;;  %v9981_v32 = vld [vmem:[#allocation13] sm:$0xff]  ;;  %v9983_v33 = vld [vmem:[#allocation11 + $0x8] ss:$0 sm:$0xff]  ;;  %s9276_s28 = smov [#allocation20]  }
 0x12f   : > { %518 = vst [vmem:[#allocation2 + $0x78] sm:$0xff] %v9275_v0  ;;  %519 = vst [vmem:[#allocation2 + $0x98] sm:$0xff] %v9275_v0  ;;  %v9987_v36 = vld [vmem:[#allocation13 + $0x10] sm:$0xff]  ;;  %v9991_v42 = vld [vmem:[#allocation13 + $0x28] sm:$0xff]  ;;  %s9175_s2 = sshll.u32 %s9276_s28, 4  ;;  %s9176_s2 = int_to_ptr.vmem [resolvable:$false] %s9175_s2 }
 0x130   : > { %520 = vst [vmem:[#allocation2 + $0xb8] sm:$0xff] %v9275_v0  ;;  %521 = vst [vmem:[#allocation2 + $0xd8] sm:$0xff] %v9275_v0  ;;  %v9993_v43 = vld [vmem:[#allocation13 + $0x38] sm:$0xff]  ;;  %v8585_v48 = vpack.c.bf16 %v9987_v36, %v9981_v32  ;;  %v737_v12 = vld [vmem:[%s9676_s16 + $0x20] sm:$0xff]  ;;  %s9177_s26 = scalar_lea.vmem %s9176_s2, 16384  ;;  %p9178_p9 = scmp.lt.s32.totalorder %s15970_s20, %s9176_s2 }
 0x131   : > { %522 = vst [vmem:[#allocation2 + $0xf8] sm:$0xff] %v9275_v0  ;;  %523 = vst [vmem:[#allocation2 + $0x118] sm:$0xff] %v9275_v0  ;;  %v8587_v56 = vpack.c.bf16 %v9993_v43, %v9991_v42  ;;  %v738_v13 = vld [vmem:[%s9676_s16 + $0x28] sm:$0xff]  ;;  %p9179_p8 = scmp.lt.s32.totalorder %s9177_s26, %s9171_s21 }
 0x132   : > { %524 = vst [vmem:[#allocation2 + $0x138] sm:$0xff] %v9275_v0  ;;  %525 = vst [vmem:[#allocation2 + $0x158] sm:$0xff] %v9275_v0  ;;  %v10041_v19 = vld [vmem:[#allocation13 + $0x30] sm:$0xff] }
 0x133   : > { %526 = vst [vmem:[#allocation2 + $0x178] sm:$0xff] %v9275_v0  ;;  %527 = vst [vmem:[#allocation2 + $0x198] sm:$0xff] %v9275_v0  ;;  %p9180_p11 = por %p9179_p8, %p9178_p9 }
 0x134   : > { %528 = vst [vmem:[#allocation2 + $0x1b8] sm:$0xff] %v9275_v0  ;;  %529 = vst [vmem:[#allocation2 + $0x1d8] sm:$0xff] %v9275_v0 }
 0x135   : > { %530 = vst [vmem:[#allocation2 + $0x1f8] sm:$0xff] %v9275_v0  ;;  %531 = vst [vmem:[#allocation2 + $0x218] sm:$0xff] %v9275_v0  ;;  %p9181_p1 = pnand %p9180_p11, %p9174_p7 }
 0x136   : > { %581 = vst [vmem:[#allocation4 + $0x10] sm:$0xff] %v9275_v0  ;;  %583 = vst [vmem:[#allocation4 + $0x20] sm:$0xff] %v9275_v0 }
 0x137   : > { %590 = vst [vmem:[#allocation4 + $0x450] sm:$0xff] %v9275_v0  ;;  %592 = vst [vmem:[#allocation4 + $0x460] sm:$0xff] %v9275_v0 }
 0x138   : > { %598 = vst [vmem:[#allocation4 + $0x40] sm:$0xff] %v9275_v0  ;;  %600 = vst [vmem:[#allocation4 + $0x80] sm:$0xff] %v9275_v0 }
 0x139   : > { %602 = vst [vmem:[#allocation4 + $0xc0] sm:$0xff] %v9275_v0  ;;  %604 = vst [vmem:[#allocation4 + $0x100] sm:$0xff] %v9275_v0 }
 0x13a   : > { %606 = vst [vmem:[#allocation4 + $0x140] sm:$0xff] %v9275_v0  ;;  %608 = vst [vmem:[#allocation4 + $0x180] sm:$0xff] %v9275_v0 }
 0x13b   : > { %610 = vst [vmem:[#allocation4 + $0x1c0] sm:$0xff] %v9275_v0  ;;  %612 = vst [vmem:[#allocation4 + $0x200] sm:$0xff] %v9275_v0 }
 0x13c   : > { %614 = vst [vmem:[#allocation4 + $0x240] sm:$0xff] %v9275_v0  ;;  %616 = vst [vmem:[#allocation4 + $0x280] sm:$0xff] %v9275_v0 }
 0x13d   : > { %618 = vst [vmem:[#allocation4 + $0x2c0] sm:$0xff] %v9275_v0  ;;  %620 = vst [vmem:[#allocation4 + $0x300] sm:$0xff] %v9275_v0 }
 0x13e   : > { %622 = vst [vmem:[#allocation4 + $0x340] sm:$0xff] %v9275_v0  ;;  %624 = vst [vmem:[#allocation4 + $0x380] sm:$0xff] %v9275_v0 }
 0x13f   : > { %626 = vst [vmem:[#allocation4 + $0x3c0] sm:$0xff] %v9275_v0  ;;  %628 = vst [vmem:[#allocation4 + $0x400] sm:$0xff] %v9275_v0 }
 0x140   : > { %634 = vst [vmem:[#allocation4 + $0x70] sm:$0xff] %v9275_v0  ;;  %636 = vst [vmem:[#allocation4 + $0xb0] sm:$0xff] %v9275_v0 }
 0x141   : > { %638 = vst [vmem:[#allocation4 + $0xf0] sm:$0xff] %v9275_v0  ;;  %640 = vst [vmem:[#allocation4 + $0x130] sm:$0xff] %v9275_v0 }
 0x142   : > { %642 = vst [vmem:[#allocation4 + $0x170] sm:$0xff] %v9275_v0  ;;  %644 = vst [vmem:[#allocation4 + $0x1b0] sm:$0xff] %v9275_v0 }
 0x143   : > { %646 = vst [vmem:[#allocation4 + $0x1f0] sm:$0xff] %v9275_v0  ;;  %648 = vst [vmem:[#allocation4 + $0x230] sm:$0xff] %v9275_v0 }
 0x144   : > { %650 = vst [vmem:[#allocation4 + $0x270] sm:$0xff] %v9275_v0  ;;  %652 = vst [vmem:[#allocation4 + $0x2b0] sm:$0xff] %v9275_v0 }
 0x145   : > { %654 = vst [vmem:[#allocation4 + $0x2f0] sm:$0xff] %v9275_v0  ;;  %656 = vst [vmem:[#allocation4 + $0x330] sm:$0xff] %v9275_v0 }
 0x146   : > { %658 = vst [vmem:[#allocation4 + $0x370] sm:$0xff] %v9275_v0  ;;  %660 = vst [vmem:[#allocation4 + $0x3b0] sm:$0xff] %v9275_v0 }
 0x147   : > { %662 = vst [vmem:[#allocation4 + $0x3f0] sm:$0xff] %v9275_v0  ;;  %664 = vst [vmem:[#allocation4 + $0x430] sm:$0xff] %v9275_v0 }
 0x148   : > { %497 = vst [vmem:[#allocation2] sm:$0xff] %v9275_v0  ;;  %514 = vst [vmem:[#allocation2 + $0x220] sm:$0xff] %v9275_v0 }
 0x149   : > { %515 = vst [vmem:[#allocation2 + $0x18] sm:$0xff] %v9275_v0  ;;  %532 = vst [vmem:[#allocation2 + $0x238] sm:$0xff] %v9275_v0 }
 0x14a   : > { %596 = vst [vmem:[#allocation4] sm:$0xff] %v9275_v0  ;;  %630 = vst [vmem:[#allocation4 + $0x440] sm:$0xff] %v9275_v0 }
 0x14b   : > { %632 = vst [vmem:[#allocation4 + $0x30] sm:$0xff] %v9275_v0  ;;  %666 = vst [vmem:[#allocation4 + $0x470] sm:$0xff] %v9275_v0 }
 0x14c   : > { %534 = vst.msk [vmem:[#allocation3] sm:$0xff] %vm533_vm0, %v9275_v0  ;;  %535 = vst.msk [vmem:[#allocation3 + $0x8] sm:$0xff] %vm533_vm0, %v9275_v0 }
 0x14d   : > { %536 = vst.msk [vmem:[#allocation3 + $0x10] sm:$0xff] %vm533_vm0, %v9275_v0  ;;  %544 = vst.msk [vmem:[#allocation3 + $0x20] sm:$0xff] %vm533_vm0, %v9275_v0 }
 0x14e   : > { %545 = vst.msk [vmem:[#allocation3 + $0x40] sm:$0xff] %vm533_vm0, %v9275_v0  ;;  %537 = vst.msk [vmem:[#allocation3 + $0x18] sm:$0xff] %vm533_vm0, %v9275_v0 }
 0x14f   : > { %539 = vst.msk [vmem:[#allocation3 + $0x220] sm:$0xff] %vm533_vm0, %v9275_v0  ;;  %540 = vst.msk [vmem:[#allocation3 + $0x228] sm:$0xff] %vm533_vm0, %v9275_v0 }
 0x150   : > { %541 = vst.msk [vmem:[#allocation3 + $0x230] sm:$0xff] %vm533_vm0, %v9275_v0  ;;  %542 = vst.msk [vmem:[#allocation3 + $0x238] sm:$0xff] %vm533_vm0, %v9275_v0 }
 0x151   : > { %546 = vst.msk [vmem:[#allocation3 + $0x60] sm:$0xff] %vm533_vm0, %v9275_v0  ;;  %547 = vst.msk [vmem:[#allocation3 + $0x80] sm:$0xff] %vm533_vm0, %v9275_v0 }
 0x152   : > { %548 = vst.msk [vmem:[#allocation3 + $0xa0] sm:$0xff] %vm533_vm0, %v9275_v0  ;;  %549 = vst.msk [vmem:[#allocation3 + $0xc0] sm:$0xff] %vm533_vm0, %v9275_v0 }
 0x153   : > { %550 = vst.msk [vmem:[#allocation3 + $0xe0] sm:$0xff] %vm533_vm0, %v9275_v0  ;;  %551 = vst.msk [vmem:[#allocation3 + $0x100] sm:$0xff] %vm533_vm0, %v9275_v0  ;;  %v1067_v30 = vld [vmem:[#allocation3 + $0x8] sm:$0xff] }
 0x154   : > { %552 = vst.msk [vmem:[#allocation3 + $0x120] sm:$0xff] %vm533_vm0, %v9275_v0  ;;  %553 = vst.msk [vmem:[#allocation3 + $0x140] sm:$0xff] %vm533_vm0, %v9275_v0  ;;  %v1271_v31 = vld [vmem:[#allocation3 + $0x9] sm:$0xff]  ;;  %v1105_v34 = vmul.f32 %v9966_v21, %v1067_v30 }
 0x155   : > { %554 = vst.msk [vmem:[#allocation3 + $0x160] sm:$0xff] %vm533_vm0, %v9275_v0  ;;  %555 = vst.msk [vmem:[#allocation3 + $0x180] sm:$0xff] %vm533_vm0, %v9275_v0  ;;  %v1309_v35 = vmul.f32 %v9968_v22, %v1271_v31  ;;  %v896_v37 = vld [vmem:[#allocation3 + $0xf] sm:$0xff] }
 0x156   : > { %556 = vst.msk [vmem:[#allocation3 + $0x1a0] sm:$0xff] %vm533_vm0, %v9275_v0  ;;  %557 = vst.msk [vmem:[#allocation3 + $0x1c0] sm:$0xff] %vm533_vm0, %v9275_v0  ;;  %v1068_v38 = vld [vmem:[#allocation3 + $0x10] sm:$0xff]  ;;  %v934_v39 = vmul.f32 %v9964_v20, %v896_v37 }
 0x157   : > { %558 = vst.msk [vmem:[#allocation3 + $0x1e0] sm:$0xff] %vm533_vm0, %v9275_v0  ;;  %559 = vst.msk [vmem:[#allocation3 + $0x200] sm:$0xff] %vm533_vm0, %v9275_v0  ;;  %v1106_v40 = vmul.f32 %v9966_v21, %v1068_v38 }
 0x158   : > { %562 = vst.msk [vmem:[#allocation3 + $0x38] sm:$0xff] %vm533_vm0, %v9275_v0  ;;  %563 = vst.msk [vmem:[#allocation3 + $0x58] sm:$0xff] %vm533_vm0, %v9275_v0 }
 0x159   : > { %564 = vst.msk [vmem:[#allocation3 + $0x78] sm:$0xff] %vm533_vm0, %v9275_v0  ;;  %565 = vst.msk [vmem:[#allocation3 + $0x98] sm:$0xff] %vm533_vm0, %v9275_v0  ;;  %v1138_v55 = vadd.f32 %v1106_v40, %v934_v39 }
 0x15a   : > { %566 = vst.msk [vmem:[#allocation3 + $0xb8] sm:$0xff] %vm533_vm0, %v9275_v0  ;;  %567 = vst.msk [vmem:[#allocation3 + $0xd8] sm:$0xff] %vm533_vm0, %v9275_v0 }
 0x15b   : > { %568 = vst.msk [vmem:[#allocation3 + $0xf8] sm:$0xff] %vm533_vm0, %v9275_v0  ;;  %569 = vst.msk [vmem:[#allocation3 + $0x118] sm:$0xff] %vm533_vm0, %v9275_v0 }
 0x15c   : > { %570 = vst.msk [vmem:[#allocation3 + $0x138] sm:$0xff] %vm533_vm0, %v9275_v0  ;;  %571 = vst.msk [vmem:[#allocation3 + $0x158] sm:$0xff] %vm533_vm0, %v9275_v0 }
 0x15d   : > { %572 = vst.msk [vmem:[#allocation3 + $0x178] sm:$0xff] %vm533_vm0, %v9275_v0  ;;  %573 = vst.msk [vmem:[#allocation3 + $0x198] sm:$0xff] %vm533_vm0, %v9275_v0 }
 0x15e   : > { %574 = vst.msk [vmem:[#allocation3 + $0x1b8] sm:$0xff] %vm533_vm0, %v9275_v0  ;;  %575 = vst.msk [vmem:[#allocation3 + $0x1d8] sm:$0xff] %vm533_vm0, %v9275_v0 }
 0x15f   : > { %576 = vst.msk [vmem:[#allocation3 + $0x1f8] sm:$0xff] %vm533_vm0, %v9275_v0  ;;  %577 = vst.msk [vmem:[#allocation3 + $0x218] sm:$0xff] %vm533_vm0, %v9275_v0 }
 0x160   : > { %580 = vst.msk [vmem:[#allocation4 + $0x8] sm:$0xff] %vm533_vm0, %v9275_v0  ;;  %582 = vst.msk [vmem:[#allocation4 + $0x18] sm:$0xff] %vm533_vm0, %v9275_v0 }
 0x161   : > { %584 = vst.msk [vmem:[#allocation4 + $0x28] sm:$0xff] %vm533_vm0, %v9275_v0  ;;  %586 = vst.msk [vmem:[#allocation4 + $0x38] sm:$0xff] %vm533_vm0, %v9275_v0 }
 0x162   : > { %589 = vst.msk [vmem:[#allocation4 + $0x448] sm:$0xff] %vm533_vm0, %v9275_v0  ;;  %591 = vst.msk [vmem:[#allocation4 + $0x458] sm:$0xff] %vm533_vm0, %v9275_v0 }
 0x163   : > { %593 = vst.msk [vmem:[#allocation4 + $0x468] sm:$0xff] %vm533_vm0, %v9275_v0  ;;  %595 = vst.msk [vmem:[#allocation4 + $0x478] sm:$0xff] %vm533_vm0, %v9275_v0 }
 0x164   : > { %599 = vst.msk [vmem:[#allocation4 + $0x48] sm:$0xff] %vm533_vm0, %v9275_v0  ;;  %601 = vst.msk [vmem:[#allocation4 + $0x88] sm:$0xff] %vm533_vm0, %v9275_v0 }
 0x165   : > { %603 = vst.msk [vmem:[#allocation4 + $0xc8] sm:$0xff] %vm533_vm0, %v9275_v0  ;;  %605 = vst.msk [vmem:[#allocation4 + $0x108] sm:$0xff] %vm533_vm0, %v9275_v0 }
 0x166   : > { %607 = vst.msk [vmem:[#allocation4 + $0x148] sm:$0xff] %vm533_vm0, %v9275_v0  ;;  %609 = vst.msk [vmem:[#allocation4 + $0x188] sm:$0xff] %vm533_vm0, %v9275_v0 }
 0x167   : > { %611 = vst.msk [vmem:[#allocation4 + $0x1c8] sm:$0xff] %vm533_vm0, %v9275_v0  ;;  %613 = vst.msk [vmem:[#allocation4 + $0x208] sm:$0xff] %vm533_vm0, %v9275_v0 }
 0x168   : > { %615 = vst.msk [vmem:[#allocation4 + $0x248] sm:$0xff] %vm533_vm0, %v9275_v0  ;;  %617 = vst.msk [vmem:[#allocation4 + $0x288] sm:$0xff] %vm533_vm0, %v9275_v0 }
 0x169   : > { %619 = vst.msk [vmem:[#allocation4 + $0x2c8] sm:$0xff] %vm533_vm0, %v9275_v0  ;;  %621 = vst.msk [vmem:[#allocation4 + $0x308] sm:$0xff] %vm533_vm0, %v9275_v0 }
 0x16a   : > { %623 = vst.msk [vmem:[#allocation4 + $0x348] sm:$0xff] %vm533_vm0, %v9275_v0  ;;  %625 = vst.msk [vmem:[#allocation4 + $0x388] sm:$0xff] %vm533_vm0, %v9275_v0 }
 0x16b   : > { %627 = vst.msk [vmem:[#allocation4 + $0x3c8] sm:$0xff] %vm533_vm0, %v9275_v0  ;;  %629 = vst.msk [vmem:[#allocation4 + $0x408] sm:$0xff] %vm533_vm0, %v9275_v0 }
 0x16c   : > { %635 = vst.msk [vmem:[#allocation4 + $0x78] sm:$0xff] %vm533_vm0, %v9275_v0  ;;  %637 = vst.msk [vmem:[#allocation4 + $0xb8] sm:$0xff] %vm533_vm0, %v9275_v0 }
 0x16d   : > { %639 = vst.msk [vmem:[#allocation4 + $0xf8] sm:$0xff] %vm533_vm0, %v9275_v0  ;;  %641 = vst.msk [vmem:[#allocation4 + $0x138] sm:$0xff] %vm533_vm0, %v9275_v0 }
 0x16e   : > { %643 = vst.msk [vmem:[#allocation4 + $0x178] sm:$0xff] %vm533_vm0, %v9275_v0  ;;  %645 = vst.msk [vmem:[#allocation4 + $0x1b8] sm:$0xff] %vm533_vm0, %v9275_v0 }
 0x16f   : > { %647 = vst.msk [vmem:[#allocation4 + $0x1f8] sm:$0xff] %vm533_vm0, %v9275_v0  ;;  %649 = vst.msk [vmem:[#allocation4 + $0x238] sm:$0xff] %vm533_vm0, %v9275_v0 }
 0x170   : > { %651 = vst.msk [vmem:[#allocation4 + $0x278] sm:$0xff] %vm533_vm0, %v9275_v0  ;;  %653 = vst.msk [vmem:[#allocation4 + $0x2b8] sm:$0xff] %vm533_vm0, %v9275_v0 }
 0x171   : > { %655 = vst.msk [vmem:[#allocation4 + $0x2f8] sm:$0xff] %vm533_vm0, %v9275_v0  ;;  %657 = vst.msk [vmem:[#allocation4 + $0x338] sm:$0xff] %vm533_vm0, %v9275_v0 }
 0x172   : > { %659 = vst.msk [vmem:[#allocation4 + $0x378] sm:$0xff] %vm533_vm0, %v9275_v0  ;;  %661 = vst.msk [vmem:[#allocation4 + $0x3b8] sm:$0xff] %vm533_vm0, %v9275_v0 }
 0x173   : > { %663 = vst.msk [vmem:[#allocation4 + $0x3f8] sm:$0xff] %vm533_vm0, %v9275_v0  ;;  %665 = vst.msk [vmem:[#allocation4 + $0x438] sm:$0xff] %vm533_vm0, %v9275_v0 }
 0x174   : > { %543 = vst.msk [vmem:[#allocation3] sm:$0xff] %vm533_vm0, %v9275_v0  ;;  %560 = vst.msk [vmem:[#allocation3 + $0x220] sm:$0xff] %vm533_vm0, %v9275_v0 }
 0x175   : > { %561 = vst.msk [vmem:[#allocation3 + $0x18] sm:$0xff] %vm533_vm0, %v9275_v0  ;;  %578 = vst.msk [vmem:[#allocation3 + $0x238] sm:$0xff] %vm533_vm0, %v9275_v0 }
 0x176   : > { %597 = vst.msk [vmem:[#allocation4 + $0x8] sm:$0xff] %vm533_vm0, %v9275_v0  ;;  %631 = vst.msk [vmem:[#allocation4 + $0x448] sm:$0xff] %vm533_vm0, %v9275_v0 }
 0x177   : > { %633 = vst.msk [vmem:[#allocation4 + $0x38] sm:$0xff] %vm533_vm0, %v9275_v0  ;;  %667 = vst.msk [vmem:[#allocation4 + $0x478] sm:$0xff] %vm533_vm0, %v9275_v0 }
 0x178   : > { %766 = vst.msk [vmem:[#allocation3 + $0x28] sm:$0xff] %vm533_vm0, %v733_v14  ;;  %767 = vst.msk [vmem:[#allocation3 + $0x30] sm:$0xff] %vm533_vm0, %v734_v15 }
 0x179   : > { %768 = vst.msk [vmem:[#allocation3 + $0x48] sm:$0xff] %vm533_vm0, %v735_v17  ;;  %769 = vst.msk [vmem:[#allocation3 + $0x50] sm:$0xff] %vm533_vm0, %v736_v18  ;;  %v10039_v18 = vld [vmem:[#allocation13 + $0x20] sm:$0xff] }
 0x17a   : > { %770 = vst.msk [vmem:[#allocation3 + $0x68] sm:$0xff] %vm533_vm0, %v737_v12  ;;  %771 = vst.msk [vmem:[#allocation3 + $0x70] sm:$0xff] %vm533_vm0, %v738_v13  ;;  %v744_v12 = vld [vmem:[%s9676_s16 + $0x58] sm:$0xff] }
 0x17b   : > { %v895_v25 = vld [vmem:[#allocation3 + $0x7] sm:$0xff]  ;;  %777 = vst.msk [vmem:[#allocation3 + $0xd0] sm:$0xff] %vm533_vm0, %v744_v12 }
 0x17c   : > { %v933_v29 = vmul.f32 %v9964_v20, %v895_v25  ;;  %v1272_v41 = vld [vmem:[#allocation3 + $0x11] sm:$0xff] }
 0x17d   : > { %v1310_v49 = vmul.f32 %v9968_v22, %v1272_v41  ;;  %v10054_v41 = vld [vmem:[#allocation13 + $0x48] sm:$0xff] }
 0x17e   : > { %v1137_v44 = vadd.f32 %v1105_v34, %v933_v29  ;;  %v739_v34 = vld [vmem:[%s9676_s16 + $0x30] sm:$0xff] }
 0x17f   : > { %v1475_v45 = vld [vmem:[#allocation3 + $0x27] sm:$0xff]  ;;  %v1476_v61 = vld [vmem:[#allocation3 + $0x2f] sm:$0xff]  ;;  %v1342_v2 = vadd.f32 %v1310_v49, %v1138_v55  ;;  %772 = vst.msk [vmem:[#allocation3 + $0x88] sm:$0xff] %vm533_vm0, %v739_v34 }
 0x180   : > { %v1679_v46 = vld [vmem:[#allocation3 + $0x28] sm:$0xff]  ;;  %v1513_v50 = vmul.f32 %v9970_v23, %v1475_v45  ;;  %v1341_v57 = vadd.f32 %v1309_v35, %v1137_v44  ;;  %v1680_v62 = vld [vmem:[#allocation3 + $0x30] sm:$0xff]  ;;  %v1514_v3 = vmul.f32 %v9970_v23, %v1476_v61  ;;  %v935_v15 = vmul.f32 %v9964_v20, %v1475_v45  ;;  %v740_v35 = vld [vmem:[%s9676_s16 + $0x38] sm:$0xff] }
 0x181   : > { %v1883_v47 = vld [vmem:[#allocation3 + $0x29] sm:$0xff]  ;;  %v1717_v51 = vmul.f32 %v9972_v24, %v1679_v46  ;;  %v1884_v63 = vld [vmem:[#allocation3 + $0x31] sm:$0xff]  ;;  %v1718_v4 = vmul.f32 %v9972_v24, %v1680_v62  ;;  %v1107_v16 = vmul.f32 %v9966_v21, %v1679_v46  ;;  %v936_v40 = vmul.f32 %v9964_v20, %v1476_v61  ;;  %773 = vst.msk [vmem:[#allocation3 + $0x90] sm:$0xff] %vm533_vm0, %v740_v35 }
 0x182   : > { %v10000_v52 = vld [vmem:[#allocation3 + $0x47] sm:$0xff]  ;;  %v1921_v58 = vmul.f32 %v9974_v26, %v1883_v47  ;;  %v10021_v5 = vld [vmem:[#allocation3 + $0x4f] sm:$0xff]  ;;  %v1545_v8 = vadd.f32 %v1513_v50, %v1341_v57  ;;  %v1922_v9 = vmul.f32 %v9974_v26, %v1884_v63  ;;  %v1546_v14 = vadd.f32 %v1514_v3, %v1342_v2 }
 0x183   : > { %v10002_v53 = vld [vmem:[#allocation3 + $0x48] sm:$0xff]  ;;  %v2127_v59 = vmul.f32 %v9976_v27, %v10000_v52  ;;  %v10023_v6 = vld [vmem:[#allocation3 + $0x50] sm:$0xff]  ;;  %v2128_v10 = vmul.f32 %v9976_v27, %v10021_v5  ;;  %v1311_v17 = vmul.f32 %v9968_v22, %v1883_v47  ;;  %v1515_v30 = vmul.f32 %v9970_v23, %v10000_v52  ;;  %v741_v50 = vld [vmem:[%s9676_s16 + $0x40] sm:$0xff] }
 0x184   : > { %v10004_v54 = vld [vmem:[#allocation3 + $0x49] sm:$0xff]  ;;  %v10013_v60 = vmul.f32 %v9978_v28, %v10002_v53  ;;  %v10025_v7 = vld [vmem:[#allocation3 + $0x51] sm:$0xff]  ;;  %v2332_v11 = vmul.f32 %v9978_v28, %v10023_v6  ;;  %v1749_v25 = vadd.f32 %v1717_v51, %v1545_v8  ;;  %v1719_v31 = vmul.f32 %v9972_v24, %v10002_v53  ;;  %774 = vst.msk [vmem:[#allocation3 + $0xa8] sm:$0xff] %vm533_vm0, %v741_v50 }
 0x185   : > { %v10017_v1 = vmul.f32 %v9983_v33, %v10004_v54  ;;  %v2536_v29 = vmul.f32 %v9983_v33, %v10025_v7  ;;  %v1750_v37 = vadd.f32 %v1718_v4, %v1546_v14  ;;  %v1139_v38 = vadd.f32 %v1107_v16, %v935_v15  ;;  %v10056_v44 = vld [vmem:[#allocation13 + $0x58] sm:$0xff]  ;;  %v10072_v3 = vld [vmem:[#allocation13 + $0x50] sm:$0xff] }
 0x186   : > { %v1923_v39 = vmul.f32 %v9974_v26, %v10004_v54  ;;  %v1953_v45 = vadd.f32 %v1921_v58, %v1749_v25  ;;  %v8589_v46 = vpack.c.bf16 %v10041_v19, %v10039_v18  ;;  %v1108_v47 = vmul.f32 %v9966_v21, %v1680_v62  ;;  %v742_v51 = vld [vmem:[%s9676_s16 + $0x48] sm:$0xff]  ;;  %v10070_v58 = vld [vmem:[#allocation13 + $0x40] sm:$0xff] }
 0x187   : > { %v1312_v49 = vmul.f32 %v9968_v22, %v1884_v63  ;;  %v1954_v55 = vadd.f32 %v1922_v9, %v1750_v37  ;;  %v1343_v57 = vadd.f32 %v1311_v17, %v1139_v38  ;;  %v1516_v61 = vmul.f32 %v9970_v23, %v10021_v5  ;;  %775 = vst.msk [vmem:[#allocation3 + $0xb0] sm:$0xff] %vm533_vm0, %v742_v51  ;;  %v743_v9 = vld [vmem:[%s9676_s16 + $0x50] sm:$0xff]  ;;  %v10089_v17 = vld [vmem:[#allocation3 + $0x67] sm:$0xff] }
 0x188   : > { %v1720_v2 = vmul.f32 %v9972_v24, %v10023_v6  ;;  %v2159_v62 = vadd.f32 %v2127_v59, %v1953_v45  ;;  %v1140_v63 = vadd.f32 %v1108_v47, %v936_v40  ;;  %v1924_v4 = vmul.f32 %v9974_v26, %v10025_v7  ;;  %776 = vst.msk [vmem:[#allocation3 + $0xc8] sm:$0xff] %vm533_vm0, %v743_v9  ;;  %v10091_v25 = vld [vmem:[#allocation3 + $0x68] sm:$0xff]  ;;  %v10105_v40 = vld [vmem:[#allocation3 + $0x71] sm:$0xff] }
 0x189   : > { %v8591_v8 = vpack.c.bf16 %v10056_v44, %v10054_v41  ;;  %v2160_v13 = vadd.f32 %v2128_v10, %v1954_v55  ;;  %v1547_v14 = vadd.f32 %v1515_v30, %v1343_v57  ;;  %v937_v15 = vmul.f32 %v9964_v20, %v10000_v52  ;;  %v10093_v34 = vld [vmem:[#allocation3 + $0x69] sm:$0xff] }
 0x18a   : > { %v1109_v16 = vmul.f32 %v9966_v21, %v10002_v53  ;;  %v2363_v59 = vadd.f32 %v10013_v60, %v2159_v62  ;;  %v1344_v10 = vadd.f32 %v1312_v49, %v1140_v63  ;;  %v1313_v30 = vmul.f32 %v9968_v22, %v10004_v54  ;;  %v10101_v38 = vld [vmem:[#allocation3 + $0x6f] sm:$0xff]  ;;  %v10118_v57 = vld [vmem:[#allocation3 + $0x87] sm:$0xff] }
 0x18b   : > { %v8593_v52 = vpack.c.bf16 %v10072_v3, %v10070_v58  ;;  %v2364_v53 = vadd.f32 %v2332_v11, %v2160_v13  ;;  %v1751_v35 = vadd.f32 %v1719_v31, %v1547_v14  ;;  %v2129_v37 = vmul.f32 %v9976_v27, %v10089_v17  ;;  %v10103_v60 = vld [vmem:[#allocation3 + $0x70] sm:$0xff]  ;;  %v10192_v44 = vld [vmem:[#allocation3 + $0xa7] sm:$0xff] }
 0x18c   : > { %v938_v45 = vmul.f32 %v9964_v20, %v10021_v5  ;;  %v2567_v47 = vadd.f32 %v10017_v1, %v2363_v59  ;;  %v2333_v54 = vmul.f32 %v9978_v28, %v10091_v25  ;;  %v2537_v11 = vmul.f32 %v9983_v33, %v10093_v34  ;;  %v10120_v5 = vld [vmem:[#allocation3 + $0x88] sm:$0xff] }
 0x18d   : > { %v1548_v31 = vadd.f32 %v1516_v61, %v1344_v10  ;;  %v2568_v49 = vadd.f32 %v2536_v29, %v2364_v53  ;;  %v1955_v50 = vadd.f32 %v1923_v39, %v1751_v35  ;;  %v2130_v51 = vmul.f32 %v9976_v27, %v10101_v38  ;;  %v10127_v39 = vld [vmem:[#allocation3 + $0x89] sm:$0xff] }
 0x18e   : > { %v2334_v55 = vmul.f32 %v9978_v28, %v10103_v60  ;;  %8503 = vmatmul.mubr.msk.f32.vlgmr.msra.gmra.mrb[0].mxu0 %vm533_vm0, %v2567_v47  ;;  %v2538_v62 = vmul.f32 %v9983_v33, %v10105_v40  ;;  %v1141_v63 = vadd.f32 %v1109_v16, %v937_v15  ;;  %v1517_v29 = vmul.f32 %v9970_v23, %v10089_v17  ;;  %v2612_v15 = vld [vmem:[#allocation13 + $0x68] sm:$0xff]  ;;  %v2614_v53 = vld [vmem:[#allocation13 + $0x78] sm:$0xff] }
 0x18f   : > { %v1752_v1 = vadd.f32 %v1720_v2, %v1548_v31  ;;  %8586 = vmatpush1.bf16.msra.mxu0 %v8585_v48  ;;  %2805 = vmatprep.mubr.f32.mxu0 %v9275_v0  ;;  %v2161_v61 = vadd.f32 %v2129_v37, %v1955_v50  ;;  %v1721_v9 = vmul.f32 %v9972_v24, %v10091_v25 }
 0x190   : > { %v1925_v2 = vmul.f32 %v9974_v26, %v10093_v34  ;;  %8588 = vmatprep.subr.bf16.mxu0 %v8587_v56  ;;  %v1345_v13 = vadd.f32 %v1313_v30, %v1141_v63  ;;  %v2131_v32 = vmul.f32 %v9976_v27, %v10118_v57  ;;  %v10144_v36 = vmul.f32 %v9978_v28, %v10120_v5  ;;  %v10154_v56 = vld [vmem:[#allocation3 + $0x8f] sm:$0xff] }
 0x191   : > { %v1956_v12 = vadd.f32 %v1924_v4, %v1752_v1  ;;  %v2365_v48 = vadd.f32 %v2333_v54, %v2161_v61  ;;  %v10148_v14 = vmul.f32 %v9983_v33, %v10127_v39  ;;  %v1110_v42 = vmul.f32 %v9966_v21, %v10023_v6  ;;  %v10156_v4 = vld [vmem:[#allocation3 + $0x90] sm:$0xff]  ;;  %v745_v6 = vld [vmem:[%s9676_s16 + $0x60] sm:$0xff] }
 0x192   : > { %v1314_v43 = vmul.f32 %v9968_v22, %v10025_v7  ;;  %8504 = vmatmul.mubr.msk.f32.gmra.mrb[2].mxu0 %vm533_vm0, %v2568_v49  ;;  %v1549_v59 = vadd.f32 %v1517_v29, %v1345_v13  ;;  %v1518_v10 = vmul.f32 %v9970_v23, %v10101_v38  ;;  %v1722_v30 = vmul.f32 %v9972_v24, %v10103_v60  ;;  %v746_v7 = vld [vmem:[%s9676_s16 + $0x68] sm:$0xff]  ;;  %v10171_v54 = vld [vmem:[#allocation3 + $0x91] sm:$0xff]  ;;  %v749_v61 = vld [vmem:[%s9676_s16 + $0x80] sm:$0xff] }
 0x193   : > { %v2162_v16 = vadd.f32 %v2130_v51, %v1956_v12  ;;  %2811 = vmatprep.mubr.f32.mxu0 %v9275_v0  ;;  %v2569_v35 = vadd.f32 %v2537_v11, %v2365_v48  ;;  %8590 = vmatpush1.bf16.msra.mxu0 %v8589_v46  ;;  %v1142_v37 = vadd.f32 %v1110_v42, %v938_v45  ;;  %v747_v46 = vld [vmem:[%s9676_s16 + $0x70] sm:$0xff]  ;;  %v748_v45 = vld [vmem:[%s9676_s16 + $0x78] sm:$0xff]  ;;  %v10203_v29 = vld [vmem:[#allocation3 + $0xa8] sm:$0xff] }
 0x194   : > { %v1926_v47 = vmul.f32 %v9974_v26, %v10105_v40  ;;  %778 = vst.msk [vmem:[#allocation3 + $0xe8] sm:$0xff] %vm533_vm0, %v745_v6  ;;  %779 = vst.msk [vmem:[#allocation3 + $0xf0] sm:$0xff] %vm533_vm0, %v746_v7  ;;  %8592 = vmatprep.subr.bf16.mxu0 %v8591_v8  ;;  %v1753_v11 = vadd.f32 %v1721_v9, %v1549_v59  ;;  %v10180_v18 = vmul.f32 %v9976_v27, %v10154_v56  ;;  %v2611_v8 = vld [vmem:[#allocation13 + $0x60] sm:$0xff]  ;;  %v750_v9 = vld [vmem:[%s9676_s16 + $0x88] sm:$0xff] }
 0x195   : > { %v2366_v31 = vadd.f32 %v2334_v55, %v2162_v16  ;;  %v10184_v19 = vmul.f32 %v9978_v28, %v10156_v4  ;;  %v1346_v49 = vadd.f32 %v1314_v43, %v1142_v37  ;;  %v8595_v50 = vpack.c.bf16 %v2614_v53, %v2612_v15  ;;  %v2613_v55 = vld [vmem:[#allocation13 + $0x70] sm:$0xff]  ;;  %780 = vst.msk [vmem:[#allocation3 + $0x108] sm:$0xff] %vm533_vm0, %v747_v46  ;;  %v10230_v43 = vld [vmem:[%s9669_s9 + $0x10] sm:$0xff]  ;;  %v10233_v15 = vld [vmem:[%s9669_s9 + $0x18] sm:$0xff] }
 0x196   : > { %v939_v51 = vmul.f32 %v9964_v20, %v10089_v17  ;;  %v1111_v41 = vmul.f32 %v9966_v21, %v10091_v25  ;;  %781 = vst.msk [vmem:[#allocation3 + $0x110] sm:$0xff] %vm533_vm0, %v748_v45  ;;  %8505 = vmatmul.mubr.msk.f32.gmra.mrb[4].mxu0 %vm533_vm0, %v2569_v35  ;;  %v1957_v63 = vadd.f32 %v1925_v2, %v1753_v11  ;;  %782 = vst.msk [vmem:[#allocation3 + $0x128] sm:$0xff] %vm533_vm0, %v749_v61  ;;  %v10219_v13 = vld [vmem:[%s9669_s9 + $0x8] sm:$0xff]  ;;  %v2616_v46 = vld [vmem:[#allocation13 + $0x88] sm:$0xff] }
 0x197   : > { %v2570_v1 = vadd.f32 %v2538_v62, %v2366_v31  ;;  %v10199_v17 = vmul.f32 %v9983_v33, %v10171_v54  ;;  %v1315_v25 = vmul.f32 %v9968_v22, %v10093_v34  ;;  %2817 = vmatprep.mubr.f32.mxu0 %v9275_v0  ;;  %8594 = vmatpush1.bf16.msra.mxu0 %v8593_v52  ;;  %v10216_v34 = vld [vmem:[%s9669_s9] sm:$0xff]  ;;  %v10227_v42 = vld [vmem:[#allocation3 + $0xa9] sm:$0xff] }
 0x198   : > { %v1550_v62 = vadd.f32 %v1518_v10, %v1346_v49  ;;  %v1143_v2 = vadd.f32 %v1111_v41, %v939_v51  ;;  %v1519_v12 = vmul.f32 %v9970_v23, %v10118_v57  ;;  %783 = vst.msk [vmem:[#allocation3 + $0x130] sm:$0xff] %vm533_vm0, %v750_v9  ;;  %v2163_v48 = vadd.f32 %v2131_v32, %v1957_v63  ;;  %v10249_v35 = vld [vmem:[#allocation3 + $0xaf] sm:$0xff] }
 0x199   : > { %8596 = vmatprep.subr.bf16.mxu0 %v8595_v50  ;;  %v1723_v58 = vmul.f32 %v9972_v24, %v10120_v5  ;;  %v1927_v3 = vmul.f32 %v9974_v26, %v10127_v39  ;;  %v2133_v52 = vmul.f32 %v9976_v27, %v10192_v44  ;;  %701 = vst [vmem:[#allocation2 + $0x28] sm:$0xff] %v10216_v34  ;;  %702 = vst [vmem:[#allocation2 + $0x30] sm:$0xff] %v10219_v13  ;;  %v2615_v63 = vld [vmem:[#allocation13 + $0x80] sm:$0xff] }
 0x19a   : > { %v1754_v32 = vadd.f32 %v1722_v30, %v1550_v62  ;;  %v1347_v16 = vadd.f32 %v1315_v25, %v1143_v2  ;;  %v2337_v59 = vmul.f32 %v9978_v28, %v10203_v29  ;;  %v8597_v10 = vpack.c.bf16 %v2613_v55, %v2611_v8  ;;  %703 = vst [vmem:[#allocation2 + $0x48] sm:$0xff] %v10230_v43  ;;  %v10266_v8 = vld [vmem:[#allocation3 + $0xb1] sm:$0xff]  ;;  %v10281_v2 = vld [vmem:[#allocation3 + $0xc7] sm:$0xff] }
 0x19b   : > { %704 = vst [vmem:[#allocation2 + $0x50] sm:$0xff] %v10233_v15  ;;  %8506 = vmatmul.mubr.msk.f32.gmra.mrb[6].mxu0 %vm533_vm0, %v2570_v1  ;;  %v2367_v53 = vadd.f32 %v10144_v36, %v2163_v48  ;;  %v940_v6 = vmul.f32 %v9964_v20, %v10101_v38  ;;  %v1112_v7 = vmul.f32 %v9966_v21, %v10103_v60  ;;  %v10254_v36 = vld [vmem:[#allocation3 + $0xb0] sm:$0xff]  ;;  %v2617_v48 = vld [vmem:[#allocation13 + $0x90] sm:$0xff] }
 0x19c   : > { %v1316_v30 = vmul.f32 %v9968_v22, %v10105_v40  ;;  %2823 = vmatprep.mubr.f32.mxu0 %v9275_v0  ;;  %v1958_v37 = vadd.f32 %v1926_v47, %v1754_v32  ;;  %v1551_v31 = vadd.f32 %v1519_v12, %v1347_v16  ;;  %v2541_v11 = vmul.f32 %v9983_v33, %v10227_v42  ;;  %v2618_v38 = vld [vmem:[#allocation13 + $0x98] sm:$0xff] }
 0x19d   : > { %8598 = vmatpush1.bf16.msra.mxu0 %v8597_v10  ;;  %v2571_v45 = vadd.f32 %v10148_v14, %v2367_v53  ;;  %v1144_v60 = vadd.f32 %v1112_v7, %v940_v6  ;;  %v1520_v40 = vmul.f32 %v9970_v23, %v10154_v56  ;;  %v1724_v49 = vmul.f32 %v9972_v24, %v10156_v4  ;;  %v10283_v12 = vld [vmem:[#allocation3 + $0xc8] sm:$0xff] }
 0x19e   : > { %v2164_v47 = vadd.f32 %v10180_v18, %v1958_v37  ;;  %v1755_v50 = vadd.f32 %v1723_v58, %v1551_v31  ;;  %v1928_v51 = vmul.f32 %v9974_v26, %v10171_v54  ;;  %v2134_v41 = vmul.f32 %v9976_v27, %v10249_v35  ;;  %v10296_v10 = vld [vmem:[#allocation3 + $0xc9] sm:$0xff] }
 0x19f   : > { %8507 = vmatmul.mubr.msk.f32.gmra.mrb[8].mxu0 %vm533_vm0, %v2571_v45  ;;  %v1348_v14 = vadd.f32 %v1316_v30, %v1144_v60  ;;  %v10271_v55 = vmul.f32 %v9978_v28, %v10254_v36  ;;  %v8599_v1 = vpack.c.bf16 %v2618_v38, %v2616_v46  ;;  %v941_v18 = vmul.f32 %v9964_v20, %v10118_v57  ;;  %v10311_v46 = vld [vmem:[#allocation3 + $0xcf] sm:$0xff] }
 0x1a0   : > { %2829 = vmatprep.mubr.f32.mxu0 %v9275_v0  ;;  %v2368_v25 = vadd.f32 %v10184_v19, %v2164_v47  ;;  %v1959_v61 = vadd.f32 %v1927_v3, %v1755_v50  ;;  %v1113_v9 = vmul.f32 %v9966_v21, %v10120_v5  ;;  %v1317_v62 = vmul.f32 %v9968_v22, %v10127_v39  ;;  %v10320_v60 = vld [vmem:[#allocation3 + $0xd0] sm:$0xff] }
 0x1a1   : > { %v1552_v58 = vadd.f32 %v1520_v40, %v1348_v14  ;;  %v10287_v57 = vmul.f32 %v9983_v33, %v10266_v8  ;;  %8600 = vmatprep.subr.bf16.mxu0 %v8599_v1  ;;  %v1521_v19 = vmul.f32 %v9970_v23, %v10192_v44  ;;  %v1725_v5 = vmul.f32 %v9972_v24, %v10203_v29  ;;  %v2622_v40 = vld [vmem:[#allocation13 + $0xb8] sm:$0xff] }
 0x1a2   : > { %v2572_v3 = vadd.f32 %v10199_v17, %v2368_v25  ;;  %v2165_v39 = vadd.f32 %v2133_v52, %v1959_v61  ;;  %v1145_v32 = vadd.f32 %v1113_v9, %v941_v18  ;;  %v1929_v16 = vmul.f32 %v9974_v26, %v10227_v42  ;;  %v10324_v50 = vld [vmem:[#allocation3 + $0xd1] sm:$0xff]  ;;  %v10339_v18 = vld [vmem:[#allocation3 + $0xe7] sm:$0xff] }
 0x1a3   : > { %v1756_v53 = vadd.f32 %v1724_v49, %v1552_v58  ;;  %v10300_v6 = vmul.f32 %v9976_v27, %v10281_v2  ;;  %v10304_v7 = vmul.f32 %v9978_v28, %v10283_v12  ;;  %v8601_v30 = vpack.c.bf16 %v2617_v48, %v2615_v63  ;;  %v10341_v63 = vld [vmem:[#allocation3 + $0xe8] sm:$0xff]  ;;  %v10351_v61 = vld [vmem:[%s9669_s9 + $0x38] sm:$0xff] }
 0x1a4   : > { %8508 = vmatmul.mubr.msk.f32.gmra.mrb[10].mxu0 %vm533_vm0, %v2572_v3  ;;  %v2369_v17 = vadd.f32 %v2337_v59, %v2165_v39  ;;  %v1349_v52 = vadd.f32 %v1317_v62, %v1145_v32  ;;  %v942_v37 = vmul.f32 %v9964_v20, %v10154_v56  ;;  %v1114_v31 = vmul.f32 %v9966_v21, %v10156_v4  ;;  %v2620_v56 = vld [vmem:[#allocation13 + $0xa8] sm:$0xff]  ;;  %v10344_v25 = vld [vmem:[%s9669_s9 + $0x28] sm:$0xff]  ;;  %v10372_v32 = vld [vmem:[%s9669_s9 + $0x50] sm:$0xff] }
 0x1a5   : > { %2835 = vmatprep.mubr.f32.mxu0 %v9275_v0  ;;  %v1960_v38 = vadd.f32 %v1928_v51, %v1756_v53  ;;  %v10316_v45 = vmul.f32 %v9983_v33, %v10296_v10  ;;  %8602 = vmatpush1.bf16.msra.mxu0 %v8601_v30  ;;  %v1318_v59 = vmul.f32 %v9968_v22, %v10171_v54  ;;  %v10327_v51 = vld [vmem:[%s9669_s9 + $0x20] sm:$0xff]  ;;  %v10369_v39 = vld [vmem:[%s9669_s9 + $0x48] sm:$0xff] }
 0x1a6   : > { %v2573_v4 = vadd.f32 %v2541_v11, %v2369_v17  ;;  %v1553_v49 = vadd.f32 %v1521_v19, %v1349_v52  ;;  %v1146_v47 = vadd.f32 %v1114_v31, %v942_v37  ;;  %v1522_v0 = vmul.f32 %v9970_v23, %v10249_v35  ;;  %705 = vst [vmem:[#allocation2 + $0x68] sm:$0xff] %v10327_v51  ;;  %v10358_v19 = vld [vmem:[#allocation13 + $0xa0] sm:$0xff]  ;;  %v10360_v3 = vld [vmem:[#allocation13 + $0xb0] sm:$0xff] }
 0x1a7   : > { %v2166_v14 = vadd.f32 %v2134_v41, %v1960_v38  ;;  %v1726_v54 = vmul.f32 %v9972_v24, %v10254_v36  ;;  %v10333_v1 = vmul.f32 %v9974_v26, %v10266_v8  ;;  %v10337_v11 = vmul.f32 %v9976_v27, %v10311_v46  ;;  %v10348_v41 = vld [vmem:[%s9669_s9 + $0x30] sm:$0xff]  ;;  %706 = vst [vmem:[#allocation2 + $0x70] sm:$0xff] %v10344_v25  ;;  %v10374_v53 = vld [vmem:[#allocation2 + $0x8] sm:$0xff]  ;;  %v10389_v38 = vld [vmem:[%s9669_s9 + $0x58] sm:$0xff] }
 0x1a8   : > { %8509 = vmatmul.mubr.msk.f32.gmra.mrb[12].mxu0 %vm533_vm0, %v2573_v4  ;;  %v1757_v9 = vadd.f32 %v1725_v5, %v1553_v49  ;;  %v1350_v62 = vadd.f32 %v1318_v59, %v1146_v47  ;;  %v10356_v48 = vmul.f32 %v9978_v28, %v10320_v60  ;;  %v8603_v58 = vpack.c.bf16 %v2622_v40, %v2620_v56  ;;  %v10366_v5 = vld [vmem:[%s9669_s9 + $0x40] sm:$0xff]  ;;  %v10384_v31 = vld [vmem:[#allocation3 + $0xe9] sm:$0xff] }
 0x1a9   : > { %707 = vst [vmem:[#allocation2 + $0x88] sm:$0xff] %v10348_v41  ;;  %708 = vst [vmem:[#allocation2 + $0x90] sm:$0xff] %v10351_v61  ;;  %2841 = vmatprep.mubr.f32.mxu0 %v10374_v53  ;;  %v2370_v30 = vadd.f32 %v10271_v55, %v2166_v14  ;;  %v943_v17 = vmul.f32 %v9964_v20, %v10192_v44  ;;  %v1115_v52 = vmul.f32 %v9966_v21, %v10203_v29  ;;  %v10393_v44 = vld [vmem:[%s9669_s9 + $0x60] sm:$0xff]  ;;  %v10396_v55 = vld [vmem:[%s9669_s9 + $0x68] sm:$0xff] }
 0x1aa   : > { %v1319_v37 = vmul.f32 %v9968_v22, %v10227_v42  ;;  %709 = vst [vmem:[#allocation2 + $0xa8] sm:$0xff] %v10366_v5  ;;  %710 = vst [vmem:[#allocation2 + $0xb0] sm:$0xff] %v10369_v39  ;;  %v1961_v29 = vadd.f32 %v1929_v16, %v1757_v9  ;;  %v1554_v59 = vadd.f32 %v1522_v0, %v1350_v62  ;;  %8604 = vmatprep.subr.bf16.mxu0 %v8603_v58  ;;  %v10408_v40 = vld [vmem:[%s9669_s9 + $0x70] sm:$0xff]  ;;  %v10411_v16 = vld [vmem:[%s9669_s9 + $0x78] sm:$0xff] }
 0x1ab   : > { %711 = vst [vmem:[#allocation2 + $0xc8] sm:$0xff] %v10372_v32  ;;  %16433 = vst [vmem:[#allocation28_spill] sm:$0xff] %v10393_v44  ;;  %v10400_v42 = vmul.f32 %v9983_v33, %v10324_v50  ;;  %v1523_v56 = vmul.f32 %v9970_v23, %v10281_v2  ;;  %v684_v4 = vld [vmem:[%s9669_s9 + $0x80] sm:$0xff]  ;;  %v2574_v49 = vadd.f32 %v10287_v57, %v2370_v30  ;;  %v685_v9 = vld [vmem:[%s9669_s9 + $0x88] sm:$0xff] }
 0x1ac   : > { %16434 = vst [vmem:[#allocation29_spill] sm:$0xff] %v10396_v55  ;;  %712 = vst [vmem:[#allocation2 + $0xd0] sm:$0xff] %v10389_v38  ;;  %v1147_v47 = vadd.f32 %v1115_v52, %v943_v17  ;;  %v1727_v0 = vmul.f32 %v9972_v24, %v10283_v12  ;;  %v1931_v14 = vmul.f32 %v9974_v26, %v10296_v10  ;;  %v751_v62 = vld [vmem:[%s9676_s16 + $0x90] sm:$0xff]  ;;  %v752_v58 = vld [vmem:[%s9676_s16 + $0x98] sm:$0xff] }
 0x1ad   : > { %713 = vst [vmem:[#allocation2 + $0xe8] sm:$0xff] %v10393_v44  ;;  %714 = vst [vmem:[#allocation2 + $0xf0] sm:$0xff] %v10396_v55  ;;  %v2167_v55 = vadd.f32 %v10300_v6, %v1961_v29  ;;  %v1758_v44 = vadd.f32 %v1726_v54, %v1554_v59  ;;  %v2137_v57 = vmul.f32 %v9976_v27, %v10339_v18  ;;  %8510 = vmatmul.mubr.msk.f32.gmra.mrb[14].mxu0 %vm533_vm0, %v2574_v49  ;;  %v10440_v29 = vld [vmem:[#allocation3 + $0xef] sm:$0xff]  ;;  %v2624_v59 = vld [vmem:[#allocation13 + $0xc8] sm:$0xff] }
 0x1ae   : > { %715 = vst [vmem:[#allocation2 + $0x108] sm:$0xff] %v10408_v40  ;;  %716 = vst [vmem:[#allocation2 + $0x110] sm:$0xff] %v10411_v16  ;;  %v10429_v30 = vmul.f32 %v9978_v28, %v10341_v63  ;;  %v1351_v17 = vadd.f32 %v1319_v37, %v1147_v47  ;;  %v8605_v6 = vpack.c.bf16 %v10360_v3, %v10358_v19  ;;  %2847 = vmatprep.mubr.f32.mxu0 %v10374_v53  ;;  %v10451_v19 = vld [vmem:[#allocation3 + $0xf0] sm:$0xff]  ;;  %v687_v3 = vld [vmem:[%s9669_s9 + $0x98] sm:$0xff] }
 0x1af   : > { %717 = vst [vmem:[#allocation2 + $0x128] sm:$0xff] %v684_v4  ;;  %718 = vst [vmem:[#allocation2 + $0x130] sm:$0xff] %v685_v9  ;;  %v944_v54 = vmul.f32 %v9964_v20, %v10249_v35  ;;  %v1116_v52 = vmul.f32 %v9966_v21, %v10254_v36  ;;  %v2626_v4 = vld [vmem:[#allocation13 + $0xd8] sm:$0xff]  ;;  %v2371_v9 = vadd.f32 %v10304_v7, %v2167_v55 }
 0x1b0   : > { %784 = vst.msk [vmem:[#allocation3 + $0x148] sm:$0xff] %vm533_vm0, %v751_v62  ;;  %785 = vst.msk [vmem:[#allocation3 + $0x150] sm:$0xff] %vm533_vm0, %v752_v58  ;;  %v1962_v49 = vadd.f32 %v10333_v1, %v1758_v44  ;;  %v10447_v37 = vmul.f32 %v9983_v33, %v10384_v31  ;;  %v1320_v35 = vmul.f32 %v9968_v22, %v10266_v8  ;;  %v686_v36 = vld [vmem:[%s9669_s9 + $0x90] sm:$0xff]  ;;  %8606 = vmatpush1.bf16.msra.mxu0 %v8605_v6 }
 0x1b1   : > { %v1555_v47 = vadd.f32 %v1523_v56, %v1351_v17  ;;  %v1148_v62 = vadd.f32 %v1116_v52, %v944_v54  ;;  %v1524_v58 = vmul.f32 %v9970_v23, %v10311_v46  ;;  %v1728_v7 = vmul.f32 %v9972_v24, %v10320_v60  ;;  %719 = vst [vmem:[#allocation2 + $0x148] sm:$0xff] %v686_v36  ;;  %v10465_v56 = vld [vmem:[#allocation3 + $0xf1] sm:$0xff]  ;;  %v10477_v36 = vld [vmem:[#allocation3 + $0x107] sm:$0xff] }
 0x1b2   : > { %720 = vst [vmem:[#allocation2 + $0x150] sm:$0xff] %v687_v3  ;;  %v2575_v1 = vadd.f32 %v10316_v45, %v2371_v9  ;;  %v2168_v44 = vadd.f32 %v10337_v11, %v1962_v49  ;;  %v1932_v8 = vmul.f32 %v9974_v26, %v10324_v50  ;;  %v2138_v55 = vmul.f32 %v9976_v27, %v10440_v29  ;;  %v2625_v3 = vld [vmem:[#allocation13 + $0xd0] sm:$0xff] }
 0x1b3   : > { %v1759_v17 = vadd.f32 %v1727_v0, %v1555_v47  ;;  %v1352_v6 = vadd.f32 %v1320_v35, %v1148_v62  ;;  %v2342_v54 = vmul.f32 %v9978_v28, %v10451_v19  ;;  %v8607_v52 = vpack.c.bf16 %v2626_v4, %v2624_v59  ;;  %v2623_v4 = vld [vmem:[#allocation13 + $0xc0] sm:$0xff] }
 0x1b4   : > { %8511 = vmatmul.mubr.msk.f32.gmra.mrb[16].mxu0 %vm533_vm0, %v2575_v1  ;;  %v2372_v45 = vadd.f32 %v10356_v48, %v2168_v44  ;;  %v945_v11 = vmul.f32 %v9964_v20, %v10281_v2  ;;  %v1117_v9 = vmul.f32 %v9966_v21, %v10283_v12  ;;  %v1321_v49 = vmul.f32 %v9968_v22, %v10296_v10  ;;  %v2305_v48 = vld [vmem:[#allocation3 + $0x108] sm:$0xff] }
 0x1b5   : > { %2853 = vmatprep.mubr.f32.mxu0 %v10374_v53  ;;  %v1963_v0 = vadd.f32 %v1931_v14, %v1759_v17  ;;  %v1556_v35 = vadd.f32 %v1524_v58, %v1352_v6  ;;  %v2546_v59 = vmul.f32 %v9983_v33, %v10465_v56  ;;  %8608 = vmatprep.subr.bf16.mxu0 %v8607_v52  ;;  %v2509_v44 = vld [vmem:[#allocation3 + $0x109] sm:$0xff] }
 0x1b6   : > { %v2576_v2 = vadd.f32 %v10400_v42, %v2372_v45  ;;  %v1149_v47 = vadd.f32 %v1117_v9, %v945_v11  ;;  %v1525_v12 = vmul.f32 %v9970_v23, %v10339_v18  ;;  %v1729_v10 = vmul.f32 %v9972_v24, %v10341_v63  ;;  %v2628_v45 = vld [vmem:[#allocation13 + $0xe8] sm:$0xff] }
 0x1b7   : > { %v2169_v62 = vadd.f32 %v2137_v57, %v1963_v0  ;;  %v1760_v1 = vadd.f32 %v1728_v7, %v1556_v35  ;;  %v1933_v14 = vmul.f32 %v9974_v26, %v10384_v31  ;;  %v2139_v58 = vmul.f32 %v9976_v27, %v10477_v36  ;;  %v10505_v0 = vld [vmem:[#allocation3 + $0x110] sm:$0xff] }
 0x1b8   : > { %8512 = vmatmul.mubr.msk.f32.gmra.mrb[18].mxu0 %vm533_vm0, %v2576_v2  ;;  %v1353_v17 = vadd.f32 %v1321_v49, %v1149_v47  ;;  %v10493_v42 = vmul.f32 %v9978_v28, %v2305_v48  ;;  %v8609_v6 = vpack.c.bf16 %v2625_v3, %v2623_v4  ;;  %v946_v52 = vmul.f32 %v9964_v20, %v10311_v46  ;;  %v10503_v49 = vld [vmem:[#allocation3 + $0x10f] sm:$0xff] }
 0x1b9   : > { %2859 = vmatprep.mubr.f32.mxu0 %v10374_v53  ;;  %v2373_v57 = vadd.f32 %v10429_v30, %v2169_v62  ;;  %v1964_v7 = vadd.f32 %v1932_v8, %v1760_v1  ;;  %v1118_v11 = vmul.f32 %v9966_v21, %v10320_v60  ;;  %v1322_v9 = vmul.f32 %v9968_v22, %v10324_v50  ;;  %v2630_v35 = vld [vmem:[#allocation13 + $0xf8] sm:$0xff] }
 0x1ba   : > { %v1557_v4 = vadd.f32 %v1525_v12, %v1353_v17  ;;  %v10508_v46 = vmul.f32 %v9983_v33, %v2509_v44  ;;  %8610 = vmatpush1.bf16.msra.mxu0 %v8609_v6  ;;  %v1526_v30 = vmul.f32 %v9970_v23, %v10440_v29  ;;  %v1730_v8 = vmul.f32 %v9972_v24, %v10451_v19  ;;  %v10519_v47 = vld [vmem:[#allocation3 + $0x111] sm:$0xff] }
 0x1bb   : > { %v2577_v60 = vadd.f32 %v10447_v37, %v2373_v57  ;;  %v2170_v3 = vadd.f32 %v2138_v55, %v1964_v7  ;;  %v1150_v50 = vadd.f32 %v1118_v11, %v946_v52  ;;  %v10517_v2 = vmul.f32 %v9974_v26, %v10465_v56  ;;  %v2103_v52 = vld [vmem:[#allocation3 + $0x127] sm:$0xff]  ;;  %v2627_v11 = vld [vmem:[#allocation13 + $0xe0] sm:$0xff] }
 0x1bc   : > { %v1761_v12 = vadd.f32 %v1729_v10, %v1557_v4  ;;  %v10523_v62 = vmul.f32 %v9976_v27, %v10503_v49  ;;  %v10527_v1 = vmul.f32 %v9978_v28, %v10505_v0  ;;  %v8611_v17 = vpack.c.bf16 %v2630_v35, %v2628_v45  ;;  %v2307_v45 = vld [vmem:[#allocation3 + $0x128] sm:$0xff] }
 0x1bd   : > { %8513 = vmatmul.mubr.msk.f32.gmra.mrb[20].mxu0 %vm533_vm0, %v2577_v60  ;;  %v2374_v37 = vadd.f32 %v2342_v54, %v2170_v3  ;;  %v1354_v55 = vadd.f32 %v1322_v9, %v1150_v50  ;;  %v947_v6 = vmul.f32 %v9964_v20, %v10339_v18  ;;  %v1119_v10 = vmul.f32 %v9966_v21, %v10341_v63  ;;  %v2629_v18 = vld [vmem:[#allocation13 + $0xf0] sm:$0xff] }
 0x1be   : > { %2865 = vmatprep.mubr.f32.mxu0 %v10374_v53  ;;  %v1965_v57 = vadd.f32 %v1933_v14, %v1761_v12  ;;  %v10537_v7 = vmul.f32 %v9983_v33, %v10519_v47  ;;  %8612 = vmatprep.subr.bf16.mxu0 %v8611_v17  ;;  %v1323_v54 = vmul.f32 %v9968_v22, %v10384_v31  ;;  %v2511_v4 = vld [vmem:[#allocation3 + $0x129] sm:$0xff]  ;;  %v753_v60 = vld [vmem:[%s9676_s16 + $0xa0] sm:$0xff] }
 0x1bf   : > { %v2578_v9 = vadd.f32 %v2546_v59, %v2374_v37  ;;  %v1558_v63 = vadd.f32 %v1526_v30, %v1354_v55  ;;  %v1151_v35 = vadd.f32 %v1119_v10, %v947_v6  ;;  %v1527_v14 = vmul.f32 %v9970_v23, %v10477_v36  ;;  %v754_v3 = vld [vmem:[%s9676_s16 + $0xa8] sm:$0xff]  ;;  %v2308_v37 = vld [vmem:[#allocation3 + $0x130] sm:$0xff]  ;;  %786 = vst.msk [vmem:[#allocation3 + $0x168] sm:$0xff] %vm533_vm0, %v753_v60  ;;  %v688_v36 = vld [vmem:[%s9669_s9 + $0xa0] sm:$0xff] }
 0x1c0   : > { %v2171_v50 = vadd.f32 %v2139_v58, %v1965_v57  ;;  %v1731_v12 = vmul.f32 %v9972_v24, %v2305_v48  ;;  %v10547_v31 = vmul.f32 %v9974_v26, %v2509_v44  ;;  %v10550_v17 = vmul.f32 %v9976_v27, %v2103_v52  ;;  %v2104_v59 = vld [vmem:[#allocation3 + $0x12f] sm:$0xff]  ;;  %787 = vst.msk [vmem:[#allocation3 + $0x170] sm:$0xff] %vm533_vm0, %v754_v3  ;;  %v10561_v10 = vld [vmem:[#allocation10] ss:$0 sm:$0xff]  ;;  %v10563_v52 = vld [vmem:[#allocation10 + $0x1] ss:$0 sm:$0xff] }
 0x1c1   : > { %v689_v30 = vld [vmem:[%s9669_s9 + $0xa8] sm:$0xff]  ;;  %v755_v58 = vld [vmem:[%s9676_s16 + $0xb0] sm:$0xff]  ;;  %8514 = vmatmul.mubr.msk.f32.gmra.mrb[22].mxu0 %vm533_vm0, %v2578_v9  ;;  %v1762_v48 = vadd.f32 %v1730_v8, %v1558_v63  ;;  %v1355_v44 = vadd.f32 %v1323_v54, %v1151_v35  ;;  %v10559_v55 = vmul.f32 %v9978_v28, %v2307_v45  ;;  %v8613_v6 = vpack.c.bf16 %v2629_v18, %v2627_v11  ;;  %v10565_v57 = vld [vmem:[#allocation10 + $0x2] ss:$0 sm:$0xff] }
 0x1c2   : > { %721 = vst [vmem:[#allocation2 + $0x168] sm:$0xff] %v688_v36  ;;  %722 = vst [vmem:[#allocation2 + $0x170] sm:$0xff] %v689_v30  ;;  %v756_v60 = vld [vmem:[%s9676_s16 + $0xb8] sm:$0xff]  ;;  %v690_v8 = vld [vmem:[%s9669_s9 + $0xb0] sm:$0xff]  ;;  %2871 = vmatprep.mubr.f32.mxu0 %v10374_v53  ;;  %v2375_v45 = vadd.f32 %v10493_v42, %v2171_v50  ;;  %v948_v11 = vmul.f32 %v9964_v20, %v10440_v29  ;;  %v1120_v18 = vmul.f32 %v9966_v21, %v10451_v19 }
 0x1c3   : > { %788 = vst.msk [vmem:[#allocation3 + $0x188] sm:$0xff] %vm533_vm0, %v755_v58  ;;  %v691_v54 = vld [vmem:[%s9669_s9 + $0xb8] sm:$0xff]  ;;  %v1324_v9 = vmul.f32 %v9968_v22, %v10465_v56  ;;  %789 = vst.msk [vmem:[#allocation3 + $0x190] sm:$0xff] %vm533_vm0, %v756_v60  ;;  %v757_v63 = vld [vmem:[%s9676_s16 + $0xc0] sm:$0xff]  ;;  %v1966_v36 = vadd.f32 %v10517_v2, %v1762_v48  ;;  %v1559_v42 = vadd.f32 %v1527_v14, %v1355_v44  ;;  %8614 = vmatpush1.bf16.msra.mxu0 %v8613_v6 }
 0x1c4   : > { %723 = vst [vmem:[#allocation2 + $0x188] sm:$0xff] %v690_v8  ;;  %724 = vst [vmem:[#allocation2 + $0x190] sm:$0xff] %v691_v54  ;;  %v758_v35 = vld [vmem:[%s9676_s16 + $0xc8] sm:$0xff]  ;;  %v692_v3 = vld [vmem:[%s9669_s9 + $0xc0] sm:$0xff]  ;;  %v10585_v50 = vmul.f32 %v9983_v33, %v2511_v4  ;;  %v1528_v20 = vmul.f32 %v9970_v23, %v10503_v49  ;;  %v2579_v19 = vadd.f32 %v10508_v46, %v2375_v45 }
 0x1c5   : > { %v825_v21 = vld [vmem:[#allocation2 + $0x7] sm:$0xff]  ;;  %790 = vst.msk [vmem:[#allocation3 + $0x1a8] sm:$0xff] %vm533_vm0, %v757_v63  ;;  %791 = vst.msk [vmem:[#allocation3 + $0x1b0] sm:$0xff] %vm533_vm0, %v758_v35  ;;  %v1152_v56 = vadd.f32 %v1120_v18, %v948_v11  ;;  %v1732_v2 = vmul.f32 %v9972_v24, %v10505_v0  ;;  %v1936_v33 = vmul.f32 %v9974_v26, %v10519_v47  ;;  %v2512_v14 = vld [vmem:[#allocation3 + $0x131] sm:$0xff] }
 0x1c6   : > { %v1169_v22 = vld [vmem:[#allocation2 + $0x9] sm:$0xff]  ;;  %725 = vst [vmem:[#allocation2 + $0x1a8] sm:$0xff] %v692_v3  ;;  %v10597_v4 = vld [vmem:[#allocation10 + $0x3] ss:$0 sm:$0xff]  ;;  %v2172_v49 = vadd.f32 %v10523_v62, %v1966_v36  ;;  %v1763_v30 = vadd.f32 %v1731_v12, %v1559_v42  ;;  %v2142_v58 = vmul.f32 %v9976_v27, %v2104_v59  ;;  %v10602_v48 = vmul.f32 %v9978_v28, %v2308_v37  ;;  %v10604_v46 = vld [vmem:[#allocation10 + $0x4] ss:$0 sm:$0xff] }
 0x1c7   : > { %v693_v29 = vld [vmem:[%s9669_s9 + $0xc8] sm:$0xff]  ;;  %v10606_v44 = vld [vmem:[#allocation10 + $0x5] ss:$0 sm:$0xff]  ;;  %8515 = vmatmul.mubr.msk.f32.gmra.mrb[24].mxu0 %vm533_vm0, %v2579_v19  ;;  %v1356_v26 = vadd.f32 %v1324_v9, %v1152_v56  ;;  %v10609_v0 = vld [vmem:[#allocation10 + $0x6] ss:$0 sm:$0xff]  ;;  %v863_v62 = vmul.f32 %v10561_v10, %v825_v21  ;;  %v1003_v27 = vmul.f32 %v10374_v53, %v10563_v52  ;;  %v1207_v28 = vmul.f32 %v10565_v57, %v1169_v22 }
 0x1c8   : > { %v1373_v23 = vld [vmem:[#allocation2 + $0x27] sm:$0xff]  ;;  %726 = vst [vmem:[#allocation2 + $0x1b0] sm:$0xff] %v693_v29  ;;  %2877 = vmatprep.mubr.f32.mxu0 %v10374_v53  ;;  %v2376_v59 = vadd.f32 %v10527_v1, %v2172_v49  ;;  %v1967_v37 = vadd.f32 %v10547_v31, %v1763_v30  ;;  %v10622_v6 = vld [vmem:[#allocation11 + $0x8] ss:$0 sm:$0xff]  ;;  %v1615_v63 = vmul.f32 %v10604_v46, %v10216_v34 }
 0x1c9   : > { %v1781_v24 = vld [vmem:[#allocation2 + $0x29] sm:$0xff]  ;;  %v10611_v47 = vld [vmem:[#allocation10 + $0x7] ss:$0 sm:$0xff]  ;;  %v2550_v60 = vmul.f32 %v10622_v6, %v2512_v14  ;;  %v1411_v8 = vmul.f32 %v10597_v4, %v1373_v23  ;;  %v1170_v45 = vld [vmem:[#allocation2 + $0x11] sm:$0xff]  ;;  %v1560_v11 = vadd.f32 %v1528_v20, %v1356_v26  ;;  %v1035_v9 = vadd.f32 %v1003_v27, %v863_v62 }
 0x1ca   : > { %v10617_v12 = vld [vmem:[#allocation2 + $0x47] sm:$0xff]  ;;  %v826_v54 = vld [vmem:[#allocation2 + $0xf] sm:$0xff]  ;;  %v1819_v35 = vmul.f32 %v10606_v44, %v1781_v24  ;;  %v2580_v3 = vadd.f32 %v10537_v7, %v2376_v59  ;;  %v2173_v36 = vadd.f32 %v10550_v17, %v1967_v37  ;;  %v2229_v20 = vmul.f32 %v10611_v47, %v10230_v43 }
 0x1cb   : > { %v10626_v18 = vld [vmem:[#allocation10 + $0x8] ss:$0 sm:$0xff]  ;;  %v10631_v1 = vld [vmem:[#allocation2 + $0x49] sm:$0xff]  ;;  %v2024_v42 = vmul.f32 %v10609_v0, %v10617_v12  ;;  %v1782_v21 = vld [vmem:[#allocation2 + $0x31] sm:$0xff]  ;;  %v1764_v22 = vadd.f32 %v1732_v2, %v1560_v11  ;;  %v1239_v29 = vadd.f32 %v1207_v28, %v1035_v9  ;;  %v864_v19 = vmul.f32 %v10561_v10, %v826_v54 }
 0x1cc   : > { %v1374_v31 = vld [vmem:[#allocation2 + $0x2f] sm:$0xff]  ;;  %v1208_v56 = vmul.f32 %v10565_v57, %v1170_v45  ;;  %8516 = vmatmul.mubr.msk.f32.gmra.mrb[26].mxu0 %vm533_vm0, %v2580_v3  ;;  %v2377_v7 = vadd.f32 %v10559_v55, %v2173_v36  ;;  %v2433_v17 = vmul.f32 %v10626_v18, %v10631_v1  ;;  %v1616_v30 = vmul.f32 %v10604_v46, %v10219_v13 }
 0x1cd   : > { %v10641_v14 = vld [vmem:[#allocation2 + $0x4f] sm:$0xff]  ;;  %v1412_v49 = vmul.f32 %v10597_v4, %v1374_v31  ;;  %2883 = vmatprep.mubr.f32.mxu0 %v10374_v53  ;;  %v1968_v2 = vadd.f32 %v1936_v33, %v1764_v22  ;;  %v1443_v26 = vadd.f32 %v1411_v8, %v1239_v29  ;;  %v1036_v62 = vadd.f32 %v1003_v27, %v864_v19  ;;  %v10662_v8 = vld [vmem:[#allocation2 + $0x67] sm:$0xff] }
 0x1ce   : > { %v1820_v28 = vmul.f32 %v10606_v44, %v1782_v21  ;;  %v10652_v59 = vld [vmem:[#allocation2 + $0x51] sm:$0xff]  ;;  %v2581_v55 = vadd.f32 %v10585_v50, %v2377_v7  ;;  %v2025_v37 = vmul.f32 %v10609_v0, %v10641_v14  ;;  %v2230_v54 = vmul.f32 %v10611_v47, %v10233_v15  ;;  %v10675_v19 = vld [vmem:[#allocation2 + $0x69] sm:$0xff] }
 0x1cf   : > { %v865_v45 = vmul.f32 %v10561_v10, %v1373_v23  ;;  %v2174_v11 = vadd.f32 %v2142_v58, %v1968_v2  ;;  %v1647_v9 = vadd.f32 %v1615_v63, %v1443_v26  ;;  %v1240_v33 = vadd.f32 %v1208_v56, %v1036_v62  ;;  %v759_v58 = vld [vmem:[%s9676_s16 + $0xd0] sm:$0xff] }
 0x1d0   : > { %v1005_v27 = vmul.f32 %v10563_v52, %v10216_v34  ;;  %8517 = vmatmul.mubr.msk.f32.gmra.mrb[28].mxu0 %vm533_vm0, %v2581_v55  ;;  %v2434_v50 = vmul.f32 %v10626_v18, %v10652_v59  ;;  %v1209_v3 = vmul.f32 %v10565_v57, %v1781_v24  ;;  %v1413_v36 = vmul.f32 %v10597_v4, %v10617_v12  ;;  %v694_v24 = vld [vmem:[%s9669_s9 + $0xd0] sm:$0xff] }
 0x1d1   : > { %v1617_v23 = vmul.f32 %v10604_v46, %v10230_v43  ;;  %2889 = vmatprep.mubr.f32.mxu0 %v10374_v53  ;;  %v2378_v34 = vadd.f32 %v10602_v48, %v2174_v11  ;;  %v1851_v63 = vadd.f32 %v1819_v35, %v1647_v9  ;;  %v1444_v22 = vadd.f32 %v1412_v49, %v1240_v33  ;;  %v10686_v55 = vld [vmem:[#allocation2 + $0x6f] sm:$0xff] }
 0x1d2   : > { %v1037_v29 = vadd.f32 %v1005_v27, %v865_v45  ;;  %792 = vst.msk [vmem:[#allocation3 + $0x1c8] sm:$0xff] %vm533_vm0, %v759_v58  ;;  %v1821_v56 = vmul.f32 %v10606_v44, %v10631_v1  ;;  %v2026_v7 = vmul.f32 %v10609_v0, %v10662_v8  ;;  %v2231_v2 = vmul.f32 %v10611_v47, %v10327_v51  ;;  %v760_v45 = vld [vmem:[%s9676_s16 + $0xd8] sm:$0xff] }
 0x1d3   : > { %v866_v48 = vmul.f32 %v10561_v10, %v1374_v31  ;;  %727 = vst [vmem:[#allocation2 + $0x1c8] sm:$0xff] %v694_v24  ;;  %v2582_v35 = vadd.f32 %v2550_v60, %v2378_v34  ;;  %v2056_v49 = vadd.f32 %v2024_v42, %v1851_v63  ;;  %v1648_v26 = vadd.f32 %v1616_v30, %v1444_v22  ;;  %v695_v58 = vld [vmem:[%s9669_s9 + $0xd8] sm:$0xff] }
 0x1d4   : > { %v1241_v62 = vadd.f32 %v1209_v3, %v1037_v29  ;;  %v2435_v11 = vmul.f32 %v10626_v18, %v10675_v19  ;;  %v1006_v9 = vmul.f32 %v10563_v52, %v10219_v13  ;;  %v1210_v33 = vmul.f32 %v10565_v57, %v1782_v21  ;;  %793 = vst.msk [vmem:[#allocation3 + $0x1d0] sm:$0xff] %vm533_vm0, %v760_v45  ;;  %v10700_v3 = vld [vmem:[#allocation2 + $0x71] sm:$0xff]  ;;  %v10712_v29 = vld [vmem:[#allocation2 + $0x87] sm:$0xff] }
 0x1d5   : > { %v1414_v31 = vmul.f32 %v10597_v4, %v10641_v14  ;;  %8518 = vmatmul.mubr.msk.f32.gmra.mrb[30].mxu0 %vm533_vm0, %v2582_v35  ;;  %v2261_v60 = vadd.f32 %v2229_v20, %v2056_v49  ;;  %v1852_v42 = vadd.f32 %v1820_v28, %v1648_v26  ;;  %v1618_v27 = vmul.f32 %v10604_v46, %v10233_v15 }
 0x1d6   : > { %v1445_v30 = vadd.f32 %v1413_v36, %v1241_v62  ;;  %3056 = vmatprep.mubr.f32.mxu0 %v10374_v53  ;;  %v1038_v13 = vadd.f32 %v1006_v9, %v866_v48  ;;  %v1822_v21 = vmul.f32 %v10606_v44, %v10652_v59  ;;  %v2027_v34 = vmul.f32 %v10609_v0, %v10686_v55 }
 0x1d7   : > { %v2232_v20 = vmul.f32 %v10611_v47, %v10344_v25  ;;  %728 = vst [vmem:[#allocation2 + $0x1d0] sm:$0xff] %v695_v58  ;;  %v2465_v28 = vadd.f32 %v2433_v17, %v2261_v60  ;;  %v2057_v36 = vadd.f32 %v2025_v37, %v1852_v42  ;;  %v867_v22 = vmul.f32 %v10561_v10, %v10617_v12  ;;  %v10739_v58 = vld [vmem:[#allocation2 + $0x8f] sm:$0xff] }
 0x1d8   : > { %v1649_v63 = vadd.f32 %v1617_v23, %v1445_v30  ;;  %v1242_v24 = vadd.f32 %v1210_v33, %v1038_v13  ;;  %v2436_v48 = vmul.f32 %v10626_v18, %v10700_v3  ;;  %v1007_v35 = vmul.f32 %v10563_v52, %v10230_v43 }
 0x1d9   : > { %v1211_v49 = vmul.f32 %v10565_v57, %v10631_v1  ;;  %3057 = vmatmul.mubr.f32.vlgmr.msra.gmra.mrb[0].mxu0 %v2465_v28  ;;  %v2262_v26 = vadd.f32 %v2230_v54, %v2057_v36  ;;  %v1415_v37 = vmul.f32 %v10597_v4, %v10662_v8  ;;  %v1619_v12 = vmul.f32 %v10604_v46, %v10327_v51  ;;  %v10729_v1 = vld [vmem:[#allocation2 + $0x89] sm:$0xff]  ;;  %v10750_v36 = vld [vmem:[#allocation2 + $0x91] sm:$0xff] }
 0x1da   : > { %v1853_v17 = vadd.f32 %v1821_v56, %v1649_v63  ;;  %3062 = vmatprep.mubr.f32.mxu0 %v10374_v53  ;;  %v1446_v23 = vadd.f32 %v1414_v31, %v1242_v24  ;;  %v1039_v62 = vadd.f32 %v1007_v35, %v867_v22  ;;  %v1823_v45 = vmul.f32 %v10606_v44, %v10675_v19 }
 0x1db   : > { %v2028_v43 = vmul.f32 %v10609_v0, %v10712_v29  ;;  %v2466_v54 = vadd.f32 %v2434_v50, %v2262_v26  ;;  %v2233_v9 = vmul.f32 %v10611_v47, %v10348_v41  ;;  %v868_v33 = vmul.f32 %v10561_v10, %v10641_v14 }
 0x1dc   : > { %v2058_v56 = vadd.f32 %v2026_v7, %v1853_v17  ;;  %v1650_v60 = vadd.f32 %v1618_v27, %v1446_v23  ;;  %v1243_v42 = vadd.f32 %v1211_v49, %v1039_v62  ;;  %v1008_v31 = vmul.f32 %v10563_v52, %v10233_v15  ;;  %v10760_v17 = vld [vmem:[#allocation2 + $0xa7] sm:$0xff] }
 0x1dd   : > { %v1212_v30 = vmul.f32 %v10565_v57, %v10652_v59  ;;  %3063 = vmatmul.mubr.f32.gmra.mrb[2].mxu0 %v2466_v54  ;;  %v2437_v50 = vmul.f32 %v10626_v18, %v10729_v1  ;;  %v1416_v7 = vmul.f32 %v10597_v4, %v10686_v55  ;;  %v1620_v14 = vmul.f32 %v10604_v46, %v10344_v25 }
 0x1de   : > { %v2263_v13 = vadd.f32 %v2231_v2, %v2058_v56  ;;  %3068 = vmatprep.mubr.f32.mxu0 %v10374_v53  ;;  %v1854_v15 = vadd.f32 %v1822_v21, %v1650_v60  ;;  %v1447_v27 = vadd.f32 %v1415_v37, %v1243_v42  ;;  %v1040_v28 = vadd.f32 %v1008_v31, %v868_v33  ;;  %v761_v37 = vld [vmem:[%s9676_s16 + $0xe0] sm:$0xff]  ;;  %v10773_v56 = vld [vmem:[#allocation2 + $0xa9] sm:$0xff] }
 0x1df   : > { %v1824_v59 = vmul.f32 %v10606_v44, %v10700_v3  ;;  %v2029_v63 = vmul.f32 %v10609_v0, %v10739_v58  ;;  %v2234_v22 = vmul.f32 %v10611_v47, %v10351_v61  ;;  %v869_v24 = vmul.f32 %v10561_v10, %v10662_v8  ;;  %794 = vst.msk [vmem:[#allocation3 + $0x1e8] sm:$0xff] %vm533_vm0, %v761_v37  ;;  %v696_v33 = vld [vmem:[%s9669_s9 + $0xe0] sm:$0xff] }
 0x1e0   : > { %v2467_v2 = vadd.f32 %v2435_v11, %v2263_v13  ;;  %v2059_v35 = vadd.f32 %v2027_v34, %v1854_v15  ;;  %v1651_v49 = vadd.f32 %v1619_v12, %v1447_v27  ;;  %v1244_v21 = vadd.f32 %v1212_v30, %v1040_v28  ;;  %729 = vst [vmem:[#allocation2 + $0x1e8] sm:$0xff] %v696_v33  ;;  %v762_v15 = vld [vmem:[%s9676_s16 + $0xe8] sm:$0xff] }
 0x1e1   : > { %v1009_v26 = vmul.f32 %v10563_v52, %v10327_v51  ;;  %v2438_v11 = vmul.f32 %v10626_v18, %v10750_v36  ;;  %v1213_v23 = vmul.f32 %v10565_v57, %v10675_v19  ;;  %v1417_v8 = vmul.f32 %v10597_v4, %v10712_v29  ;;  %795 = vst.msk [vmem:[#allocation3 + $0x1f0] sm:$0xff] %vm533_vm0, %v762_v15 }
 0x1e2   : > { %3069 = vmatmul.mubr.f32.gmra.mrb[4].mxu0 %v2467_v2  ;;  %v1621_v34 = vmul.f32 %v10604_v46, %v10348_v41  ;;  %v2264_v51 = vadd.f32 %v2232_v20, %v2059_v35  ;;  %v1855_v12 = vadd.f32 %v1823_v45, %v1651_v49  ;;  %v1448_v62 = vadd.f32 %v1416_v7, %v1244_v21  ;;  %v10784_v7 = vld [vmem:[#allocation2 + $0xaf] sm:$0xff] }
 0x1e3   : > { %3074 = vmatprep.mubr.f32.mxu0 %v10374_v53  ;;  %v1041_v54 = vadd.f32 %v1009_v26, %v869_v24  ;;  %v1825_v19 = vmul.f32 %v10606_v44, %v10729_v1  ;;  %v2030_v60 = vmul.f32 %v10609_v0, %v10760_v17  ;;  %v2235_v42 = vmul.f32 %v10611_v47, %v10366_v5  ;;  %v10798_v35 = vld [vmem:[#allocation2 + $0xb1] sm:$0xff]  ;;  %v697_v49 = vld [vmem:[%s9669_s9 + $0xe8] sm:$0xff] }
 0x1e4   : > { %v870_v31 = vmul.f32 %v10561_v10, %v10686_v55  ;;  %v2468_v20 = vadd.f32 %v2436_v48, %v2264_v51  ;;  %v2060_v45 = vadd.f32 %v2028_v43, %v1855_v12  ;;  %v1652_v30 = vadd.f32 %v1620_v14, %v1448_v62  ;;  %730 = vst [vmem:[#allocation2 + $0x1f0] sm:$0xff] %v697_v49 }
 0x1e5   : > { %v1245_v13 = vadd.f32 %v1213_v23, %v1041_v54  ;;  %v2439_v27 = vmul.f32 %v10626_v18, %v10773_v56  ;;  %v1010_v28 = vmul.f32 %v10563_v52, %v10344_v25  ;;  %v1214_v2 = vmul.f32 %v10565_v57, %v10700_v3 }
 0x1e6   : > { %v1418_v55 = vmul.f32 %v10597_v4, %v10739_v58  ;;  %3075 = vmatmul.mubr.f32.gmra.mrb[6].mxu0 %v2468_v20  ;;  %v2265_v48 = vadd.f32 %v2233_v9, %v2060_v45  ;;  %v1856_v43 = vadd.f32 %v1824_v59, %v1652_v30  ;;  %v1622_v24 = vmul.f32 %v10604_v46, %v10351_v61 }
 0x1e7   : > { %v1449_v14 = vadd.f32 %v1417_v8, %v1245_v13  ;;  %3080 = vmatprep.mubr.f32.mxu0 %v10374_v53  ;;  %v1042_v25 = vadd.f32 %v1010_v28, %v870_v31  ;;  %v1826_v3 = vmul.f32 %v10606_v44, %v10750_v36  ;;  %v2031_v21 = vmul.f32 %v10609_v0, %v10784_v7  ;;  %v10810_v8 = vld [vmem:[#allocation2 + $0xc7] sm:$0xff] }
 0x1e8   : > { %v2236_v9 = vmul.f32 %v10611_v47, %v10369_v39  ;;  %v2469_v59 = vadd.f32 %v2437_v50, %v2265_v48  ;;  %v2061_v26 = vadd.f32 %v2029_v63, %v1856_v43  ;;  %v871_v23 = vmul.f32 %v10561_v10, %v10712_v29 }
 0x1e9   : > { %v1653_v37 = vadd.f32 %v1621_v34, %v1449_v14  ;;  %v1246_v51 = vadd.f32 %v1214_v2, %v1042_v25  ;;  %v2440_v12 = vmul.f32 %v10626_v18, %v10798_v35  ;;  %v1011_v62 = vmul.f32 %v10563_v52, %v10348_v41 }
 0x1ea   : > { %v1215_v54 = vmul.f32 %v10565_v57, %v10729_v1  ;;  %3081 = vmatmul.mubr.f32.gmra.mrb[8].mxu0 %v2469_v59  ;;  %v2266_v33 = vadd.f32 %v2234_v22, %v2061_v26  ;;  %v1419_v63 = vmul.f32 %v10597_v4, %v10760_v17  ;;  %v1623_v29 = vmul.f32 %v10604_v46, %v10366_v5  ;;  %v10827_v1 = vld [vmem:[#allocation2 + $0xc9] sm:$0xff] }
 0x1eb   : > { %v1857_v50 = vadd.f32 %v1825_v19, %v1653_v37  ;;  %3086 = vmatprep.mubr.f32.mxu0 %v10374_v53  ;;  %v1450_v34 = vadd.f32 %v1418_v55, %v1246_v51  ;;  %v1043_v31 = vadd.f32 %v1011_v62, %v871_v23  ;;  %v1827_v20 = vmul.f32 %v10606_v44, %v10773_v56  ;;  %v10837_v55 = vld [vmem:[#allocation2 + $0xcf] sm:$0xff]  ;;  %v10858_v51 = vld [vmem:[#allocation2 + $0xe7] sm:$0xff] }
 0x1ec   : > { %v2032_v41 = vmul.f32 %v10609_v0, %v10810_v8  ;;  %v2470_v22 = vadd.f32 %v2438_v11, %v2266_v33  ;;  %v2237_v45 = vmul.f32 %v10611_v47, %v10372_v32  ;;  %v872_v30 = vmul.f32 %v10561_v10, %v10739_v58  ;;  %v763_v62 = vld [vmem:[%s9676_s16 + $0xf0] sm:$0xff] }
 0x1ed   : > { %v2062_v19 = vadd.f32 %v2030_v60, %v1857_v50  ;;  %v1654_v13 = vadd.f32 %v1622_v24, %v1450_v34  ;;  %v1247_v15 = vadd.f32 %v1215_v54, %v1043_v31  ;;  %v1012_v28 = vmul.f32 %v10563_v52, %v10351_v61  ;;  %v10848_v24 = vld [vmem:[#allocation2 + $0xd1] sm:$0xff]  ;;  %796 = vst.msk [vmem:[#allocation3 + $0x208] sm:$0xff] %vm533_vm0, %v763_v62  ;;  %v10908_v62 = vld [vmem:[#allocation2 + $0x107] sm:$0xff] }
 0x1ee   : > { %v1216_v2 = vmul.f32 %v10565_v57, %v10750_v36  ;;  %3087 = vmatmul.mubr.f32.gmra.mrb[10].mxu0 %v2470_v22  ;;  %v2441_v11 = vmul.f32 %v10626_v18, %v10827_v1  ;;  %v1420_v60 = vmul.f32 %v10597_v4, %v10784_v7  ;;  %v1624_v58 = vmul.f32 %v10604_v46, %v10369_v39  ;;  %v698_v34 = vld [vmem:[%s9669_s9 + $0xf0] sm:$0xff] }
 0x1ef   : > { %v2267_v48 = vadd.f32 %v2235_v42, %v2062_v19  ;;  %3092 = vmatprep.mubr.f32.mxu0 %v10374_v53  ;;  %v1858_v61 = vadd.f32 %v1826_v3, %v1654_v13  ;;  %v1451_v43 = vadd.f32 %v1419_v63, %v1247_v15  ;;  %v1044_v14 = vadd.f32 %v1012_v28, %v872_v30  ;;  %v16435_v22 = vld [vmem:[#allocation28_spill] sm:$0xff] }
 0x1f0   : > { %v1828_v36 = vmul.f32 %v10606_v44, %v10798_v35  ;;  %v2033_v49 = vmul.f32 %v10609_v0, %v10837_v55  ;;  %v2238_v25 = vmul.f32 %v10611_v47, %v10389_v38  ;;  %v873_v59 = vmul.f32 %v10561_v10, %v10760_v17  ;;  %731 = vst [vmem:[#allocation2 + $0x208] sm:$0xff] %v698_v34  ;;  %v10882_v28 = vld [vmem:[#allocation2 + $0xef] sm:$0xff] }
 0x1f1   : > { %v2471_v42 = vadd.f32 %v2439_v27, %v2267_v48  ;;  %v2063_v26 = vadd.f32 %v2031_v21, %v1858_v61  ;;  %v1655_v37 = vadd.f32 %v1623_v29, %v1451_v43  ;;  %v1248_v3 = vadd.f32 %v1216_v2, %v1044_v14  ;;  %v10871_v29 = vld [vmem:[#allocation2 + $0xe9] sm:$0xff]  ;;  %v764_v2 = vld [vmem:[%s9676_s16 + $0xf8] sm:$0xff] }
 0x1f2   : > { %v1013_v23 = vmul.f32 %v10563_v52, %v10366_v5  ;;  %v2442_v27 = vmul.f32 %v10626_v18, %v10848_v24  ;;  %v1217_v54 = vmul.f32 %v10565_v57, %v10773_v56  ;;  %v1421_v17 = vmul.f32 %v10597_v4, %v10810_v8  ;;  %797 = vst.msk [vmem:[#allocation3 + $0x210] sm:$0xff] %vm533_vm0, %v764_v2  ;;  %v10896_v14 = vld [vmem:[#allocation2 + $0xf1] sm:$0xff] }
 0x1f3   : > { %3093 = vmatmul.mubr.f32.gmra.mrb[12].mxu0 %v2471_v42  ;;  %v1625_v21 = vmul.f32 %v10604_v46, %v10372_v32  ;;  %v2268_v5 = vadd.f32 %v2236_v9, %v2063_v26  ;;  %v1859_v33 = vadd.f32 %v1827_v20, %v1655_v37  ;;  %v1452_v50 = vadd.f32 %v1420_v60, %v1248_v3  ;;  %v699_v42 = vld [vmem:[%s9669_s9 + $0xf8] sm:$0xff] }
 0x1f4   : > { %3098 = vmatprep.mubr.f32.mxu0 %v10374_v53  ;;  %v1045_v63 = vadd.f32 %v1013_v23, %v873_v59  ;;  %v1829_v56 = vmul.f32 %v10606_v44, %v10827_v1  ;;  %v2034_v31 = vmul.f32 %v10609_v0, %v10858_v51  ;;  %v2239_v19 = vmul.f32 %v10611_v47, %v16435_v22  ;;  %v16436_v26 = vld [vmem:[#allocation29_spill] sm:$0xff] }
 0x1f5   : > { %v874_v30 = vmul.f32 %v10561_v10, %v10784_v7  ;;  %v2472_v9 = vadd.f32 %v2440_v12, %v2268_v5  ;;  %v2064_v20 = vadd.f32 %v2032_v41, %v1859_v33  ;;  %v1656_v13 = vadd.f32 %v1624_v58, %v1452_v50  ;;  %732 = vst [vmem:[#allocation2 + $0x210] sm:$0xff] %v699_v42 }
 0x1f6   : > { %v1249_v15 = vadd.f32 %v1217_v54, %v1045_v63  ;;  %v2443_v48 = vmul.f32 %v10626_v18, %v10871_v29  ;;  %v1014_v60 = vmul.f32 %v10563_v52, %v10369_v39  ;;  %v1218_v61 = vmul.f32 %v10565_v57, %v10798_v35 }
 0x1f7   : > { %v1422_v7 = vmul.f32 %v10597_v4, %v10837_v55  ;;  %3099 = vmatmul.mubr.f32.gmra.mrb[14].mxu0 %v2472_v9  ;;  %v2269_v12 = vadd.f32 %v2237_v45, %v2064_v20  ;;  %v1860_v41 = vadd.f32 %v1828_v36, %v1656_v13  ;;  %v1626_v43 = vmul.f32 %v10604_v46, %v10389_v38 }
 0x1f8   : > { %v1453_v58 = vadd.f32 %v1421_v17, %v1249_v15  ;;  %3104 = vmatprep.mubr.f32.mxu0 %v10374_v53  ;;  %v1046_v39 = vadd.f32 %v1014_v60, %v874_v30  ;;  %v1830_v35 = vmul.f32 %v10606_v44, %v10848_v24  ;;  %v2035_v59 = vmul.f32 %v10609_v0, %v10882_v28  ;;  %v10935_v15 = vld [vmem:[#allocation2 + $0x10f] sm:$0xff] }
 0x1f9   : > { %v2240_v45 = vmul.f32 %v10611_v47, %v16436_v26  ;;  %v2473_v36 = vadd.f32 %v2441_v11, %v2269_v12  ;;  %v2065_v37 = vadd.f32 %v2033_v49, %v1860_v41  ;;  %v875_v23 = vmul.f32 %v10561_v10, %v10810_v8  ;;  %v10945_v60 = vld [vmem:[#allocation2 + $0x8] sm:$0xff] }
 0x1fa   : > { %v1657_v3 = vadd.f32 %v1625_v21, %v1453_v58  ;;  %v1250_v54 = vadd.f32 %v1218_v61, %v1046_v39  ;;  %v2444_v17 = vmul.f32 %v10626_v18, %v10896_v14  ;;  %v1015_v5 = vmul.f32 %v10563_v52, %v10372_v32 }
 0x1fb   : > { %v1219_v33 = vmul.f32 %v10565_v57, %v10827_v1  ;;  %3105 = vmatmul.mubr.f32.gmra.mrb[16].mxu0 %v2473_v36  ;;  %v2270_v50 = vadd.f32 %v2238_v25, %v2065_v37  ;;  %v1423_v49 = vmul.f32 %v10597_v4, %v10858_v51  ;;  %v1627_v8 = vmul.f32 %v10604_v46, %v16435_v22  ;;  %v10925_v1 = vld [vmem:[#allocation2 + $0x109] sm:$0xff] }
 0x1fc   : > { %v1861_v11 = vadd.f32 %v1829_v56, %v1657_v3  ;;  %3110 = vmatprep.mubr.f32.mxu0 %v10374_v53  ;;  %v1454_v21 = vadd.f32 %v1422_v7, %v1250_v54  ;;  %v1047_v63 = vadd.f32 %v1015_v5, %v875_v23  ;;  %v1831_v34 = vmul.f32 %v10606_v44, %v10871_v29  ;;  %v10950_v7 = vld [vmem:[#allocation2 + $0x111] sm:$0xff]  ;;  %v10961_v37 = vld [vmem:[#allocation2 + $0x127] sm:$0xff] }
 0x1fd   : > { %v2036_v32 = vmul.f32 %v10609_v0, %v10908_v62  ;;  %v2474_v25 = vadd.f32 %v2442_v27, %v2270_v50  ;;  %v2241_v30 = vmul.f32 %v10611_v47, %v10408_v40  ;;  %v876_v22 = vmul.f32 %v10561_v10, %v10837_v55  ;;  %16437 = vst [vmem:[#allocation28_spill] sm:$0xff] %v10961_v37 }
 0x1fe   : > { %v2066_v56 = vadd.f32 %v2034_v31, %v1861_v11  ;;  %v1658_v9 = vadd.f32 %v1626_v43, %v1454_v21  ;;  %v1251_v53 = vadd.f32 %v1219_v33, %v1047_v63  ;;  %v1016_v20 = vmul.f32 %v10563_v52, %v10389_v38  ;;  %v10974_v33 = vld [vmem:[#allocation2 + $0x129] sm:$0xff] }
 0x1ff   : > { %v1220_v13 = vmul.f32 %v10565_v57, %v10848_v24  ;;  %3111 = vmatmul.mubr.f32.gmra.mrb[18].mxu0 %v2474_v25  ;;  %v10939_v27 = vmul.f32 %v10626_v18, %v10925_v1  ;;  %v1424_v31 = vmul.f32 %v10597_v4, %v10882_v28  ;;  %v1628_v55 = vmul.f32 %v10604_v46, %v16436_v26  ;;  %v8858_v26 = vld [vmem:[#allocation2 + $0xe8] sm:$0xff] }
 0x200   : > { %v2271_v2 = vadd.f32 %v2239_v19, %v2066_v56  ;;  %3116 = vmatprep.mubr.f32.mxu0 %v10945_v60  ;;  %v1862_v38 = vadd.f32 %v1830_v35, %v1658_v9  ;;  %v1455_v24 = vadd.f32 %v1423_v49, %v1251_v53  ;;  %v1048_v61 = vadd.f32 %v1016_v20, %v876_v22  ;;  %v10980_v11 = vld [vmem:[#allocation2 + $0x128] sm:$0xff]  ;;  %v8860_v56 = vld [vmem:[#allocation2 + $0xf0] sm:$0xff] }
 0x201   : > { %v1832_v19 = vmul.f32 %v10606_v44, %v10896_v14  ;;  %v2037_v41 = vmul.f32 %v10609_v0, %v10935_v15  ;;  %v10956_v58 = vmul.f32 %v10611_v47, %v10411_v16  ;;  %v877_v43 = vmul.f32 %v10561_v10, %v10858_v51  ;;  %16438 = vst [vmem:[#allocation29_spill] sm:$0xff] %v10974_v33 }
 0x202   : > { %v2475_v12 = vadd.f32 %v2443_v48, %v2271_v2  ;;  %v2067_v42 = vadd.f32 %v2035_v59, %v1862_v38  ;;  %v1659_v39 = vadd.f32 %v1627_v8, %v1455_v24  ;;  %v1252_v35 = vadd.f32 %v1220_v13, %v1048_v61  ;;  %16439 = vst [vmem:[#allocation30_spill] sm:$0xff] %v10980_v11  ;;  %v10999_v13 = vld [vmem:[#allocation2 + $0x110] sm:$0xff] }
 0x203   : > { %v1017_v36 = vmul.f32 %v8858_v26, %v10563_v52  ;;  %v10965_v48 = vmul.f32 %v10626_v18, %v10950_v7  ;;  %v1221_v16 = vmul.f32 %v10565_v57, %v10871_v29  ;;  %v1425_v3 = vmul.f32 %v10597_v4, %v10908_v62  ;;  %v1287_v38 = vld [vmem:[#allocation3 + $0x109] sm:$0xff] }
 0x204   : > { %3117 = vmatmul.mubr.f32.gmra.mrb[20].mxu0 %v2475_v12  ;;  %v1629_v51 = vmul.f32 %v10604_v46, %v10408_v40  ;;  %v2272_v59 = vadd.f32 %v2240_v45, %v2067_v42  ;;  %v1863_v23 = vadd.f32 %v1831_v34, %v1659_v39  ;;  %v1456_v54 = vadd.f32 %v1424_v31, %v1252_v35  ;;  %v10988_v34 = vld [vmem:[#allocation2 + $0x12f] sm:$0xff]  ;;  %v11018_v12 = vld [vmem:[#allocation3 + $0x127] sm:$0xff] }
 0x205   : > { %3122 = vmatprep.mubr.f32.mxu0 %v10945_v60  ;;  %v1049_v5 = vadd.f32 %v1017_v36, %v877_v43  ;;  %v1833_v50 = vmul.f32 %v10606_v44, %v10925_v1  ;;  %v2038_v29 = vmul.f32 %v10609_v0, %v10961_v37  ;;  %v10984_v49 = vmul.f32 %v10980_v11, %v10611_v47  ;;  %v11003_v31 = vld [vmem:[#allocation2 + $0x131] sm:$0xff]  ;;  %v11020_v43 = vld [vmem:[#allocation3 + $0x128] sm:$0xff] }
 0x206   : > { %v878_v40 = vmul.f32 %v10561_v10, %v10882_v28  ;;  %v2476_v45 = vadd.f32 %v2444_v17, %v2272_v59  ;;  %v2068_v8 = vadd.f32 %v2036_v32, %v1863_v23  ;;  %v1660_v21 = vadd.f32 %v1628_v55, %v1456_v54  ;;  %v911_v28 = vld [vmem:[#allocation3 + $0x107] sm:$0xff]  ;;  %v11012_v61 = vld [vmem:[#allocation2 + $0x130] sm:$0xff] }
 0x207   : > { %v1253_v63 = vadd.f32 %v1221_v16, %v1049_v5  ;;  %v10992_v25 = vmul.f32 %v10626_v18, %v10974_v33  ;;  %v1018_v22 = vmul.f32 %v8860_v56, %v10563_v52  ;;  %v1222_v9 = vmul.f32 %v10565_v57, %v10896_v14  ;;  %v1083_v55 = vld [vmem:[#allocation3 + $0x108] sm:$0xff] }
 0x208   : > { %v1426_v53 = vmul.f32 %v10597_v4, %v10935_v15  ;;  %3123 = vmatmul.mubr.f32.gmra.mrb[22].mxu0 %v2476_v45  ;;  %v2273_v17 = vadd.f32 %v2241_v30, %v2068_v8  ;;  %v1864_v32 = vadd.f32 %v1832_v19, %v1660_v21  ;;  %v1630_v2 = vmul.f32 %v10999_v13, %v10604_v46  ;;  %v11023_v26 = vld [vmem:[#allocation11] ss:$0 sm:$0xff]  ;;  %v11034_v54 = vld [vmem:[#allocation11 + $0x1] ss:$0 sm:$0xff]  ;;  %v11043_v8 = vld [vmem:[#allocation11 + $0x3] ss:$0 sm:$0xff] }
 0x209   : > { %v1457_v20 = vadd.f32 %v1425_v3, %v1253_v63  ;;  %3128 = vmatprep.mubr.f32.mxu0 %v10945_v60  ;;  %v1050_v14 = vadd.f32 %v1018_v22, %v878_v40  ;;  %v1834_v24 = vmul.f32 %v10606_v44, %v10950_v7  ;;  %v11010_v30 = vmul.f32 %v10609_v0, %v10988_v34  ;;  %v11026_v16 = vld [vmem:[#allocation3 + $0x129] sm:$0xff] }
 0x20a   : > { %v11016_v19 = vmul.f32 %v11012_v61, %v10611_v47  ;;  %v2477_v42 = vadd.f32 %v10939_v27, %v2273_v17  ;;  %v2069_v39 = vadd.f32 %v2037_v41, %v1864_v32  ;;  %v949_v36 = vmul.f32 %v11023_v26, %v911_v28  ;;  %v11028_v3 = vld [vmem:[#allocation3 + $0x147] sm:$0xff]  ;;  %v11052_v28 = vld [vmem:[#allocation11 + $0x5] ss:$0 sm:$0xff] }
 0x20b   : > { %v1661_v35 = vadd.f32 %v1629_v51, %v1457_v20  ;;  %v1254_v59 = vadd.f32 %v1222_v9, %v1050_v14  ;;  %v11032_v23 = vmul.f32 %v10626_v18, %v11003_v31  ;;  %v1121_v5 = vmul.f32 %v11034_v54, %v1083_v55  ;;  %v11037_v27 = vld [vmem:[#allocation11 + $0x2] ss:$0 sm:$0xff]  ;;  %v11047_v63 = vld [vmem:[#allocation11 + $0x4] ss:$0 sm:$0xff] }
 0x20c   : > { %v1325_v41 = vmul.f32 %v11037_v27, %v1287_v38  ;;  %v11040_v51 = vld [vmem:[#allocation3 + $0x148] sm:$0xff]  ;;  %3129 = vmatmul.mubr.f32.gmra.mrb[24].mxu0 %v2477_v42  ;;  %v2274_v40 = vadd.f32 %v10956_v58, %v2069_v39  ;;  %v1529_v21 = vmul.f32 %v11043_v8, %v11018_v12  ;;  %v1733_v56 = vmul.f32 %v11047_v63, %v11020_v43  ;;  %v11063_v38 = vld [vmem:[#allocation11 + $0x7] ss:$0 sm:$0xff] }
 0x20d   : > { %16440 = vst [vmem:[#allocation31_spill] sm:$0xff] %v11040_v51  ;;  %v1865_v45 = vadd.f32 %v1833_v50, %v1661_v35  ;;  %3134 = vmatprep.mubr.f32.mxu0 %v10945_v60  ;;  %v1458_v22 = vadd.f32 %v1426_v53, %v1254_v59  ;;  %v1153_v9 = vadd.f32 %v1121_v5, %v949_v36  ;;  %v11056_v50 = vld [vmem:[#allocation11 + $0x6] ss:$0 sm:$0xff]  ;;  %v8871_v35 = vld [vmem:[#allocation2 + $0x108] sm:$0xff] }
 0x20e   : > { %v1937_v58 = vmul.f32 %v11052_v28, %v11026_v16  ;;  %v2143_v17 = vmul.f32 %v11056_v50, %v11028_v3  ;;  %v11060_v32 = vld [vmem:[#allocation3 + $0x149] sm:$0xff]  ;;  %v2478_v20 = vadd.f32 %v10965_v48, %v2274_v40  ;;  %v2347_v53 = vmul.f32 %v11063_v38, %v11040_v51 }
 0x20f   : > { %16441 = vst [vmem:[#allocation32_spill] sm:$0xff] %v11060_v32  ;;  %v2070_v55 = vadd.f32 %v2038_v29, %v1865_v45  ;;  %v879_v14 = vmul.f32 %v10561_v10, %v10908_v62  ;;  %v1662_v42 = vadd.f32 %v1630_v2, %v1458_v22  ;;  %v1357_v39 = vadd.f32 %v1325_v41, %v1153_v9  ;;  %v11072_v5 = vld [vmem:[#allocation2 + $0x147] sm:$0xff]  ;;  %v912_v48 = vld [vmem:[#allocation3 + $0x10f] sm:$0xff] }
 0x210   : > { %v1019_v36 = vmul.f32 %v8871_v35, %v10563_v52  ;;  %v1223_v59 = vmul.f32 %v10565_v57, %v10925_v1  ;;  %3135 = vmatmul.mubr.f32.gmra.mrb[26].mxu0 %v2478_v20  ;;  %v2551_v40 = vmul.f32 %v10622_v6, %v11060_v32  ;;  %v1427_v62 = vmul.f32 %v10597_v4, %v10961_v37  ;;  %v11081_v41 = vld [vmem:[#allocation2 + $0x149] sm:$0xff]  ;;  %v1288_v20 = vld [vmem:[#allocation3 + $0x111] sm:$0xff] }
 0x211   : > { %v2275_v29 = vadd.f32 %v10984_v49, %v2070_v55  ;;  %v1631_v2 = vmul.f32 %v10980_v11, %v10604_v46  ;;  %v1084_v45 = vld [vmem:[#allocation3 + $0x110] sm:$0xff]  ;;  %3140 = vmatprep.mubr.f32.mxu0 %v10945_v60  ;;  %v1866_v1 = vadd.f32 %v1834_v24, %v1662_v42  ;;  %v1561_v22 = vadd.f32 %v1529_v21, %v1357_v39  ;;  %v11093_v32 = vld [vmem:[#allocation2 + $0x148] sm:$0xff] }
 0x212   : > { %v1051_v9 = vadd.f32 %v1019_v36, %v879_v14  ;;  %v1835_v49 = vmul.f32 %v10606_v44, %v10974_v33  ;;  %v11086_v55 = vld [vmem:[#allocation3 + $0x12f] sm:$0xff]  ;;  %v2040_v11 = vmul.f32 %v10609_v0, %v11072_v5  ;;  %16444 = vst [vmem:[#allocation35_spill] sm:$0xff] %v11093_v32  ;;  %v2245_v24 = vmul.f32 %v11093_v32, %v10611_v47 }
 0x213   : > { %16442 = vst [vmem:[#allocation33_spill] sm:$0xff] %v11086_v55  ;;  %v11088_v35 = vld [vmem:[#allocation3 + $0x130] sm:$0xff]  ;;  %v2479_v37 = vadd.f32 %v10992_v25, %v2275_v29  ;;  %v950_v21 = vmul.f32 %v11023_v26, %v912_v48  ;;  %v2071_v14 = vadd.f32 %v11010_v30, %v1866_v1  ;;  %v1765_v42 = vadd.f32 %v1733_v56, %v1561_v22 }
 0x214   : > { %16443 = vst [vmem:[#allocation34_spill] sm:$0xff] %v11088_v35  ;;  %v1255_v39 = vadd.f32 %v1223_v59, %v1051_v9  ;;  %v1122_v36 = vmul.f32 %v11034_v54, %v1084_v45  ;;  %v11100_v33 = vld [vmem:[#allocation3 + $0x131] sm:$0xff]  ;;  %v2449_v29 = vmul.f32 %v10626_v18, %v11081_v41  ;;  %v1326_v32 = vmul.f32 %v11037_v27, %v1288_v20 }
 0x215   : > { %v11102_v51 = vld [vmem:[#allocation3 + $0x14f] sm:$0xff]  ;;  %3141 = vmatmul.mubr.f32.gmra.mrb[28].mxu0 %v2479_v37  ;;  %v1530_v48 = vmul.f32 %v11043_v8, %v11086_v55  ;;  %v1734_v30 = vmul.f32 %v11047_v63, %v11088_v35  ;;  %v2276_v56 = vadd.f32 %v11016_v19, %v2071_v14  ;;  %v1969_v59 = vadd.f32 %v1937_v58, %v1765_v42 }
 0x216   : > { %v11104_v25 = vld [vmem:[#allocation3 + $0x150] sm:$0xff]  ;;  %3146 = vmatprep.mubr.f32.mxu0 %v10945_v60  ;;  %v1459_v45 = vadd.f32 %v1427_v62, %v1255_v39  ;;  %v1154_v1 = vadd.f32 %v1122_v36, %v950_v21  ;;  %v1938_v37 = vmul.f32 %v11052_v28, %v11100_v33  ;;  %v2144_v9 = vmul.f32 %v11056_v50, %v11102_v51 }
 0x217   : > { %v11115_v22 = vld [vmem:[#allocation3 + $0x151] sm:$0xff]  ;;  %v2348_v20 = vmul.f32 %v11063_v38, %v11104_v25  ;;  %v880_v35 = vmul.f32 %v10561_v10, %v10935_v15  ;;  %v2480_v55 = vadd.f32 %v11032_v23, %v2276_v56  ;;  %v2175_v19 = vadd.f32 %v2143_v17, %v1969_v59  ;;  %v11151_v56 = vld [vmem:[#allocation3 + $0x167] sm:$0xff] }
 0x218   : > { %v1663_v58 = vadd.f32 %v1631_v2, %v1459_v45  ;;  %v1358_v62 = vadd.f32 %v1326_v32, %v1154_v1  ;;  %v11126_v21 = vld [vmem:[#allocation2 + $0x14f] sm:$0xff]  ;;  %v2552_v14 = vmul.f32 %v10622_v6, %v11115_v22  ;;  %v1020_v42 = vmul.f32 %v10999_v13, %v10563_v52  ;;  %16448 = vst [vmem:[#allocation39_spill] sm:$0xff] %v11151_v56 }
 0x219   : > { %16445 = vst [vmem:[#allocation36_spill] sm:$0xff] %v11126_v21  ;;  %v1224_v39 = vmul.f32 %v10565_v57, %v10950_v7  ;;  %v1428_v36 = vmul.f32 %v10597_v4, %v10988_v34  ;;  %3147 = vmatmul.mubr.f32.gmra.mrb[30].mxu0 %v2480_v55  ;;  %v2379_v10 = vadd.f32 %v2347_v53, %v2175_v19  ;;  %v11138_v32 = vld [vmem:[#allocation2 + $0x151] sm:$0xff]  ;;  %v11161_v19 = vld [vmem:[#allocation3 + $0x168] sm:$0xff] }
 0x21a   : > { %v1867_v15 = vadd.f32 %v1835_v49, %v1663_v58  ;;  %v1562_v23 = vadd.f32 %v1530_v48, %v1358_v62  ;;  %v1632_v17 = vmul.f32 %v11012_v61, %v10604_v46  ;;  %16446 = vst [vmem:[#allocation37_spill] sm:$0xff] %v11138_v32  ;;  %3152 = vmatprep.mubr.f32.mxu0 %v10945_v60  ;;  %v11145_v7 = vld [vmem:[#allocation2 + $0x150] sm:$0xff]  ;;  %16449 = vst [vmem:[#allocation40_spill] sm:$0xff] %v11161_v19 }
 0x21b   : > { %v1052_v2 = vadd.f32 %v1020_v42, %v880_v35  ;;  %v1836_v52 = vmul.f32 %v10606_v44, %v11003_v31  ;;  %v2041_v57 = vmul.f32 %v10609_v0, %v11126_v21  ;;  %16447 = vst [vmem:[#allocation38_spill] sm:$0xff] %v11145_v7  ;;  %v2246_v13 = vmul.f32 %v11145_v7, %v10611_v47 }
 0x21c   : > { %v2583_v53 = vadd.f32 %v2551_v40, %v2379_v10  ;;  %v2072_v49 = vadd.f32 %v2040_v11, %v1867_v15  ;;  %v1766_v55 = vadd.f32 %v1734_v30, %v1562_v23  ;;  %v951_v48 = vmul.f32 %v11023_v26, %v11018_v12  ;;  %v16450_v30 = vld [vmem:[#allocation31_spill] sm:$0xff]  ;;  %v11177_v23 = vld [vmem:[#allocation10] ss:$0 sm:$0xff] }
 0x21d   : > { %v1256_v35 = vadd.f32 %v1224_v39, %v1052_v2  ;;  %v11155_v59 = vmul.f32 %v10626_v18, %v11138_v32  ;;  %v1123_v45 = vmul.f32 %v11034_v54, %v11020_v43  ;;  %v1327_v1 = vmul.f32 %v11037_v27, %v11026_v16  ;;  %v16451_v43 = vld [vmem:[#allocation32_spill] sm:$0xff] }
 0x21e   : > { %8519 = vmatmul.mubr.msk.f32.vlgmr.msra.gmra.mrb[0].mxu1 %vm533_vm0, %v2583_v53  ;;  %v2277_v11 = vadd.f32 %v2245_v24, %v2072_v49  ;;  %v1970_v40 = vadd.f32 %v1938_v37, %v1766_v55  ;;  %v1531_v12 = vmul.f32 %v11043_v8, %v11028_v3  ;;  %v1735_v58 = vmul.f32 %v11047_v63, %v16450_v30  ;;  %v11173_v10 = vld [vmem:[#allocation3 + $0x169] sm:$0xff]  ;;  %v11181_v55 = vld [vmem:[#allocation10 + $0x1] ss:$0 sm:$0xff] }
 0x21f   : > { %2901 = vmatprep.mubr.f32.mxu1 %v10945_v60  ;;  %v1460_v62 = vadd.f32 %v1428_v36, %v1256_v35  ;;  %v1155_v42 = vadd.f32 %v1123_v45, %v951_v48  ;;  %v1939_v39 = vmul.f32 %v11052_v28, %v16451_v43  ;;  %v2145_v16 = vmul.f32 %v11056_v50, %v11151_v56  ;;  %v16452_v2 = vld [vmem:[#allocation28_spill] sm:$0xff]  ;;  %v16453_v48 = vld [vmem:[#allocation30_spill] sm:$0xff]  ;;  %v11185_v45 = vld [vmem:[#allocation10 + $0x2] ss:$0 sm:$0xff] }
 0x220   : > { %v2481_v24 = vadd.f32 %v2449_v29, %v2277_v11  ;;  %v2176_v37 = vadd.f32 %v2144_v9, %v1970_v40  ;;  %v2349_v15 = vmul.f32 %v11063_v38, %v11161_v19  ;;  %v881_v53 = vmul.f32 %v11177_v23, %v16452_v2  ;;  %v16454_v56 = vld [vmem:[#allocation29_spill] sm:$0xff]  ;;  %v11189_v9 = vld [vmem:[#allocation2 + $0x167] sm:$0xff] }
 0x221   : > { %v1664_v36 = vadd.f32 %v1632_v17, %v1460_v62  ;;  %v1359_v49 = vadd.f32 %v1327_v1, %v1155_v42  ;;  %v1021_v35 = vmul.f32 %v11181_v55, %v16453_v48  ;;  %v1225_v29 = vmul.f32 %v11185_v45, %v16454_v56  ;;  %v16455_v1 = vld [vmem:[#allocation35_spill] sm:$0xff] }
 0x222   : > { %3153 = vmatmul.mubr.f32.gmra.mrb[32].mxu0 %v2481_v24  ;;  %v2380_v11 = vadd.f32 %v2348_v20, %v2176_v37  ;;  %v2553_v40 = vmul.f32 %v10622_v6, %v11173_v10  ;;  %v1429_v17 = vmul.f32 %v10597_v4, %v11072_v5  ;;  %v1633_v62 = vmul.f32 %v16455_v1, %v10604_v46  ;;  %v11200_v19 = vld [vmem:[#allocation2 + $0x169] sm:$0xff]  ;;  %v16456_v46 = vld [vmem:[#allocation33_spill] sm:$0xff] }
 0x223   : > { %3158 = vmatprep.mubr.f32.mxu0 %v10945_v60  ;;  %v1868_v42 = vadd.f32 %v1836_v52, %v1664_v36  ;;  %v1563_v2 = vadd.f32 %v1531_v12, %v1359_v49  ;;  %v1053_v48 = vadd.f32 %v1021_v35, %v881_v53  ;;  %v1837_v56 = vmul.f32 %v10606_v44, %v11081_v41  ;;  %v11204_v24 = vld [vmem:[#allocation2 + $0x168] sm:$0xff]  ;;  %v16457_v36 = vld [vmem:[#allocation34_spill] sm:$0xff] }
 0x224   : > { %v2584_v20 = vadd.f32 %v2552_v14, %v2380_v11  ;;  %v2042_v6 = vmul.f32 %v10609_v0, %v11189_v9  ;;  %v2247_v4 = vmul.f32 %v11204_v24, %v10611_v47  ;;  %v952_v37 = vmul.f32 %v11023_v26, %v16456_v46  ;;  %v11212_v49 = vld [vmem:[#allocation3 + $0x16f] sm:$0xff] }
 0x225   : > { %v2073_v52 = vadd.f32 %v2041_v57, %v1868_v42  ;;  %v1767_v12 = vadd.f32 %v1735_v58, %v1563_v2  ;;  %v1257_v53 = vadd.f32 %v1225_v29, %v1053_v48  ;;  %v1124_v44 = vmul.f32 %v11034_v54, %v16457_v36  ;;  %16458 = vst [vmem:[#allocation31_spill] sm:$0xff] %v11212_v49  ;;  %v11214_v14 = vld [vmem:[#allocation3 + $0x170] sm:$0xff] }
 0x226   : > { %16459 = vst [vmem:[#allocation32_spill] sm:$0xff] %v11214_v14  ;;  %8520 = vmatmul.mubr.msk.f32.gmra.mrb[2].mxu1 %vm533_vm0, %v2584_v20  ;;  %v11219_v0 = vmul.f32 %v10626_v18, %v11200_v19  ;;  %v1328_v47 = vmul.f32 %v11037_v27, %v11100_v33  ;;  %v1532_v57 = vmul.f32 %v11043_v8, %v11102_v51  ;;  %v11228_v2 = vld [vmem:[#allocation3 + $0x171] sm:$0xff] }
 0x227   : > { %v1736_v58 = vmul.f32 %v11047_v63, %v11104_v25  ;;  %v2278_v35 = vadd.f32 %v2246_v13, %v2073_v52  ;;  %2907 = vmatprep.mubr.f32.mxu1 %v10945_v60  ;;  %v1971_v29 = vadd.f32 %v1939_v39, %v1767_v12  ;;  %v1461_v11 = vadd.f32 %v1429_v17, %v1257_v53  ;;  %v11241_v52 = vld [vmem:[#allocation11 + $0x8] ss:$0 sm:$0xff] }
 0x228   : > { %v1156_v42 = vadd.f32 %v1124_v44, %v952_v37  ;;  %16460 = vst [vmem:[#allocation28_spill] sm:$0xff] %v11228_v2  ;;  %v1940_v18 = vmul.f32 %v11052_v28, %v11115_v22  ;;  %v2146_v33 = vmul.f32 %v11056_v50, %v11212_v49  ;;  %v2350_v48 = vmul.f32 %v11063_v38, %v11214_v14  ;;  %v11239_v37 = vld [vmem:[#allocation2 + $0x16f] sm:$0xff] }
 0x229   : > { %v882_v20 = vmul.f32 %v11177_v23, %v10988_v34  ;;  %v2482_v13 = vadd.f32 %v11155_v59, %v2278_v35  ;;  %v2177_v46 = vadd.f32 %v2145_v16, %v1971_v29  ;;  %v1665_v39 = vadd.f32 %v1633_v62, %v1461_v11  ;;  %16461 = vst [vmem:[#allocation30_spill] sm:$0xff] %v11239_v37  ;;  %v11251_v34 = vld [vmem:[#allocation10 + $0x3] ss:$0 sm:$0xff]  ;;  %v11259_v29 = vld [vmem:[#allocation2 + $0x171] sm:$0xff] }
 0x22a   : > { %v1360_v17 = vadd.f32 %v1328_v47, %v1156_v42  ;;  %v11245_v12 = vmul.f32 %v11241_v52, %v11228_v2  ;;  %v1022_v53 = vmul.f32 %v11181_v55, %v11012_v61  ;;  %v1226_v36 = vmul.f32 %v11185_v45, %v11003_v31  ;;  %v11255_v47 = vld [vmem:[#allocation10 + $0x4] ss:$0 sm:$0xff]  ;;  %16462 = vst [vmem:[#allocation29_spill] sm:$0xff] %v11259_v29  ;;  %v11262_v31 = vld [vmem:[#allocation10 + $0x5] ss:$0 sm:$0xff] }
 0x22b   : > { %v1430_v59 = vmul.f32 %v11251_v34, %v11126_v21  ;;  %3159 = vmatmul.mubr.f32.gmra.mrb[34].mxu0 %v2482_v13  ;;  %v2381_v16 = vadd.f32 %v2349_v15, %v2177_v46  ;;  %v1869_v62 = vadd.f32 %v1837_v56, %v1665_v39  ;;  %v1634_v35 = vmul.f32 %v11255_v47, %v11145_v7  ;;  %v11266_v42 = vld [vmem:[#allocation10 + $0x6] ss:$0 sm:$0xff]  ;;  %v11270_v56 = vld [vmem:[#allocation2 + $0x170] sm:$0xff]  ;;  %v11280_v7 = vld [vmem:[#allocation10 + $0x8] ss:$0 sm:$0xff] }
 0x22c   : > { %v1564_v44 = vadd.f32 %v1532_v57, %v1360_v17  ;;  %3164 = vmatprep.mubr.f32.mxu0 %v10945_v60  ;;  %v1054_v61 = vadd.f32 %v1022_v53, %v882_v20  ;;  %v1838_v11 = vmul.f32 %v11262_v31, %v11138_v32  ;;  %v2043_v15 = vmul.f32 %v11266_v42, %v11239_v37  ;;  %v11272_v57 = vld [vmem:[#allocation10 + $0x7] ss:$0 sm:$0xff] }
 0x22d   : > { %16463 = vst [vmem:[#allocation35_spill] sm:$0xff] %v11270_v56  ;;  %v2248_v13 = vmul.f32 %v11272_v57, %v11270_v56  ;;  %v2585_v46 = vadd.f32 %v2553_v40, %v2381_v16  ;;  %v2074_v39 = vadd.f32 %v2042_v6, %v1869_v62  ;;  %v953_v17 = vmul.f32 %v11023_v26, %v11028_v3  ;;  %v11278_v53 = vld [vmem:[#allocation3 + $0x187] sm:$0xff] }
 0x22e   : > { %v1768_v20 = vadd.f32 %v1736_v58, %v1564_v44  ;;  %16464 = vst [vmem:[#allocation33_spill] sm:$0xff] %v11278_v53  ;;  %v1258_v32 = vadd.f32 %v1226_v36, %v1054_v61  ;;  %v2452_v37 = vmul.f32 %v11280_v7, %v11259_v29  ;;  %v1125_v21 = vmul.f32 %v11034_v54, %v16450_v30  ;;  %v11288_v40 = vld [vmem:[#allocation3 + $0x188] sm:$0xff] }
 0x22f   : > { %v1329_v56 = vmul.f32 %v11037_v27, %v16451_v43  ;;  %8521 = vmatmul.mubr.msk.f32.gmra.mrb[4].mxu1 %vm533_vm0, %v2585_v46  ;;  %v2279_v6 = vadd.f32 %v2247_v4, %v2074_v39  ;;  %v16465_v58 = vld [vmem:[#allocation39_spill] sm:$0xff]  ;;  %v16466_v16 = vld [vmem:[#allocation40_spill] sm:$0xff]  ;;  %v1941_v30 = vmul.f32 %v11052_v28, %v11173_v10  ;;  %v2147_v43 = vmul.f32 %v11056_v50, %v11278_v53 }
 0x230   : > { %v1972_v3 = vadd.f32 %v1940_v18, %v1768_v20  ;;  %v1533_v36 = vmul.f32 %v11043_v8, %v16465_v58  ;;  %v1737_v62 = vmul.f32 %v11047_v63, %v16466_v16  ;;  %2913 = vmatprep.mubr.f32.mxu1 %v10945_v60  ;;  %v1462_v44 = vadd.f32 %v1430_v59, %v1258_v32  ;;  %v11300_v29 = vld [vmem:[#allocation3 + $0x189] sm:$0xff] }
 0x231   : > { %v1157_v61 = vadd.f32 %v1125_v21, %v953_v17  ;;  %v2483_v4 = vadd.f32 %v11219_v0, %v2279_v6  ;;  %v2351_v46 = vmul.f32 %v11063_v38, %v11288_v40  ;;  %v883_v39 = vmul.f32 %v11177_v23, %v11072_v5  ;;  %v11311_v17 = vld [vmem:[#allocation2 + $0x187] sm:$0xff] }
 0x232   : > { %v2178_v18 = vadd.f32 %v2146_v33, %v1972_v3  ;;  %v1666_v20 = vadd.f32 %v1634_v35, %v1462_v44  ;;  %v1023_v21 = vmul.f32 %v11181_v55, %v16455_v1  ;;  %v1227_v59 = vmul.f32 %v11185_v45, %v11081_v41  ;;  %v11322_v6 = vld [vmem:[#allocation2 + $0x189] sm:$0xff] }
 0x233   : > { %v1361_v32 = vadd.f32 %v1329_v56, %v1157_v61  ;;  %3165 = vmatmul.mubr.f32.gmra.mrb[36].mxu0 %v2483_v4  ;;  %v2555_v0 = vmul.f32 %v11241_v52, %v11300_v29  ;;  %v1431_v33 = vmul.f32 %v11251_v34, %v11189_v9  ;;  %v1635_v5 = vmul.f32 %v11255_v47, %v11204_v24  ;;  %v11327_v44 = vld [vmem:[#allocation2 + $0x188] sm:$0xff] }
 0x234   : > { %v2382_v53 = vadd.f32 %v2350_v48, %v2178_v18  ;;  %3170 = vmatprep.mubr.f32.mxu0 %v10945_v60  ;;  %v1870_v35 = vadd.f32 %v1838_v11, %v1666_v20  ;;  %v1055_v56 = vadd.f32 %v1023_v21, %v883_v39  ;;  %v1839_v41 = vmul.f32 %v11262_v31, %v11200_v19  ;;  %v11335_v20 = vld [vmem:[#allocation3 + $0x18f] sm:$0xff] }
 0x235   : > { %v1565_v1 = vadd.f32 %v1533_v36, %v1361_v32  ;;  %16467 = vst [vmem:[#allocation34_spill] sm:$0xff] %v11322_v6  ;;  %v2044_v3 = vmul.f32 %v11266_v42, %v11311_v17  ;;  %v2249_v61 = vmul.f32 %v11327_v44, %v11272_v57  ;;  %v954_v11 = vmul.f32 %v11023_v26, %v11102_v51 }
 0x236   : > { %v2586_v48 = vadd.f32 %v11245_v12, %v2382_v53  ;;  %v2075_v36 = vadd.f32 %v2043_v15, %v1870_v35  ;;  %v1259_v18 = vadd.f32 %v1227_v59, %v1055_v56  ;;  %v1126_v39 = vmul.f32 %v11034_v54, %v11104_v25  ;;  %16468 = vst [vmem:[#allocation39_spill] sm:$0xff] %v11335_v20  ;;  %v11337_v12 = vld [vmem:[#allocation3 + $0x190] sm:$0xff] }
 0x237   : > { %v1769_v4 = vadd.f32 %v1737_v62, %v1565_v1  ;;  %16469 = vst [vmem:[#allocation40_spill] sm:$0xff] %v11337_v12  ;;  %v2453_v53 = vmul.f32 %v11280_v7, %v11322_v6  ;;  %v1330_v32 = vmul.f32 %v11037_v27, %v11115_v22  ;;  %v1534_v51 = vmul.f32 %v11043_v8, %v11212_v49  ;;  %v11349_v35 = vld [vmem:[#allocation3 + $0x191] sm:$0xff] }
 0x238   : > { %8522 = vmatmul.mubr.msk.f32.gmra.mrb[6].mxu1 %vm533_vm0, %v2586_v48  ;;  %v1738_v15 = vmul.f32 %v11047_v63, %v11214_v14  ;;  %v2280_v62 = vadd.f32 %v2248_v13, %v2075_v36  ;;  %v1463_v21 = vadd.f32 %v1431_v33, %v1259_v18  ;;  %v1158_v59 = vadd.f32 %v1126_v39, %v954_v11  ;;  %v16470_v48 = vld [vmem:[#allocation36_spill] sm:$0xff]  ;;  %v16473_v39 = vld [vmem:[#allocation37_spill] sm:$0xff] }
 0x239   : > { %2919 = vmatprep.mubr.f32.mxu1 %v10945_v60  ;;  %v1973_v25 = vadd.f32 %v1941_v30, %v1769_v4  ;;  %v1942_v1 = vmul.f32 %v11052_v28, %v11228_v2  ;;  %v2148_v22 = vmul.f32 %v11056_v50, %v11335_v20  ;;  %v2352_v56 = vmul.f32 %v11063_v38, %v11337_v12  ;;  %v11359_v33 = vld [vmem:[#allocation2 + $0x18f] sm:$0xff]  ;;  %v16472_v4 = vld [vmem:[#allocation38_spill] sm:$0xff] }
 0x23a   : > { %v884_v14 = vmul.f32 %v11177_v23, %v16470_v48  ;;  %v2484_v13 = vadd.f32 %v2452_v37, %v2280_v62  ;;  %v1667_v49 = vadd.f32 %v1635_v5, %v1463_v21  ;;  %v1362_v30 = vadd.f32 %v1330_v32, %v1158_v59  ;;  %16471 = vst [vmem:[#allocation36_spill] sm:$0xff] %v11359_v33  ;;  %v16474_v2 = vld [vmem:[#allocation30_spill] sm:$0xff]  ;;  %v16475_v5 = vld [vmem:[#allocation35_spill] sm:$0xff]  ;;  %v11371_v62 = vld [vmem:[#allocation2 + $0x191] sm:$0xff] }
 0x23b   : > { %v2179_v36 = vadd.f32 %v2147_v43, %v1973_v25  ;;  %v2556_v11 = vmul.f32 %v11241_v52, %v11349_v35  ;;  %v1024_v18 = vmul.f32 %v11181_v55, %v16472_v4  ;;  %v1228_v20 = vmul.f32 %v11185_v45, %v16473_v39  ;;  %v16476_v21 = vld [vmem:[#allocation29_spill] sm:$0xff] }
 0x23c   : > { %v1432_v12 = vmul.f32 %v11251_v34, %v16474_v2  ;;  %3171 = vmatmul.mubr.f32.gmra.mrb[38].mxu0 %v2484_v13  ;;  %v1871_v37 = vadd.f32 %v1839_v41, %v1667_v49  ;;  %v1566_v43 = vadd.f32 %v1534_v51, %v1362_v30  ;;  %v1636_v32 = vmul.f32 %v16475_v5, %v11255_v47  ;;  %v11378_v39 = vld [vmem:[#allocation2 + $0x190] sm:$0xff] }
 0x23d   : > { %v2383_v48 = vadd.f32 %v2351_v46, %v2179_v36  ;;  %3176 = vmatprep.mubr.f32.mxu0 %v10945_v60  ;;  %v1056_v25 = vadd.f32 %v1024_v18, %v884_v14  ;;  %v1840_v59 = vmul.f32 %v11262_v31, %v16476_v21  ;;  %v2045_v4 = vmul.f32 %v11266_v42, %v11359_v33  ;;  %v11384_v36 = vld [vmem:[#allocation3 + $0x1a7] sm:$0xff] }
 0x23e   : > { %v2250_v49 = vmul.f32 %v11378_v39, %v11272_v57  ;;  %v2076_v41 = vadd.f32 %v2044_v3, %v1871_v37  ;;  %v1770_v51 = vadd.f32 %v1738_v15, %v1566_v43  ;;  %v955_v13 = vmul.f32 %v11023_v26, %v16465_v58  ;;  %v11392_v21 = vld [vmem:[#allocation3 + $0x1a8] sm:$0xff]  ;;  %v16477_v15 = vld [vmem:[#allocation33_spill] sm:$0xff] }
 0x23f   : > { %v2587_v46 = vadd.f32 %v2555_v0, %v2383_v48  ;;  %v1260_v14 = vadd.f32 %v1228_v20, %v1056_v25  ;;  %v2454_v30 = vmul.f32 %v11280_v7, %v11371_v62  ;;  %v1127_v18 = vmul.f32 %v11034_v54, %v16466_v16  ;;  %v11404_v43 = vld [vmem:[#allocation3 + $0x1a9] sm:$0xff] }
 0x240   : > { %v1331_v33 = vmul.f32 %v11037_v27, %v11173_v10  ;;  %v2281_v0 = vadd.f32 %v2249_v61, %v2076_v41  ;;  %v1974_v3 = vadd.f32 %v1942_v1, %v1770_v51  ;;  %v1535_v58 = vmul.f32 %v11043_v8, %v16477_v15 }
 0x241   : > { %8523 = vmatmul.mubr.msk.f32.gmra.mrb[8].mxu1 %vm533_vm0, %v2587_v46  ;;  %v1739_v20 = vmul.f32 %v11047_v63, %v11288_v40  ;;  %v1464_v48 = vadd.f32 %v1432_v12, %v1260_v14  ;;  %v1159_v37 = vadd.f32 %v1127_v18, %v955_v13  ;;  %v1943_v16 = vmul.f32 %v11052_v28, %v11300_v29  ;;  %v11414_v14 = vld [vmem:[#allocation2 + $0x1a7] sm:$0xff] }
 0x242   : > { %2925 = vmatprep.mubr.f32.mxu1 %v10945_v60  ;;  %v2149_v10 = vmul.f32 %v11056_v50, %v11384_v36  ;;  %v2485_v61 = vadd.f32 %v2453_v53, %v2281_v0  ;;  %v2180_v1 = vadd.f32 %v2148_v22, %v1974_v3  ;;  %v2353_v25 = vmul.f32 %v11063_v38, %v11392_v21  ;;  %v11425_v0 = vld [vmem:[#allocation2 + $0x1a9] sm:$0xff] }
 0x243   : > { %v885_v46 = vmul.f32 %v11177_v23, %v11189_v9  ;;  %v1668_v41 = vadd.f32 %v1636_v32, %v1464_v48  ;;  %v1363_v51 = vadd.f32 %v1331_v33, %v1159_v37  ;;  %v1025_v12 = vmul.f32 %v11204_v24, %v11181_v55  ;;  %16478 = vst [vmem:[#allocation38_spill] sm:$0xff] %v11414_v14  ;;  %v11429_v48 = vld [vmem:[#allocation2 + $0x1a8] sm:$0xff] }
 0x244   : > { %v1229_v13 = vmul.f32 %v11185_v45, %v11200_v19  ;;  %3177 = vmatmul.mubr.f32.gmra.mrb[40].mxu0 %v2485_v61  ;;  %v2384_v18 = vadd.f32 %v2352_v56, %v2180_v1  ;;  %v2557_v53 = vmul.f32 %v11241_v52, %v11404_v43  ;;  %v1433_v22 = vmul.f32 %v11251_v34, %v11311_v17  ;;  %v16481_v61 = vld [vmem:[#allocation31_spill] sm:$0xff] }
 0x245   : > { %v1637_v9 = vmul.f32 %v11327_v44, %v11255_v47  ;;  %3182 = vmatprep.mubr.f32.mxu0 %v10945_v60  ;;  %v1872_v33 = vadd.f32 %v1840_v59, %v1668_v41  ;;  %v1567_v24 = vadd.f32 %v1535_v58, %v1363_v51  ;;  %v1057_v32 = vadd.f32 %v1025_v12, %v885_v46  ;;  %v16482_v41 = vld [vmem:[#allocation32_spill] sm:$0xff] }
 0x246   : > { %v1841_v19 = vmul.f32 %v11262_v31, %v11322_v6  ;;  %16479 = vst [vmem:[#allocation37_spill] sm:$0xff] %v11425_v0  ;;  %v2588_v56 = vadd.f32 %v2556_v11, %v2384_v18  ;;  %v2046_v3 = vmul.f32 %v11266_v42, %v11414_v14  ;;  %16480 = vst [vmem:[#allocation30_spill] sm:$0xff] %v11429_v48  ;;  %v11437_v12 = vld [vmem:[#allocation3 + $0x1af] sm:$0xff]  ;;  %v16486_v6 = vld [vmem:[#allocation39_spill] sm:$0xff] }
 0x247   : > { %v2251_v37 = vmul.f32 %v11429_v48, %v11272_v57  ;;  %v956_v1 = vmul.f32 %v11023_v26, %v16481_v61  ;;  %v2077_v59 = vadd.f32 %v2045_v4, %v1872_v33  ;;  %v1771_v58 = vadd.f32 %v1739_v20, %v1567_v24  ;;  %16483 = vst [vmem:[#allocation35_spill] sm:$0xff] %v11437_v12  ;;  %v11439_v11 = vld [vmem:[#allocation3 + $0x1b0] sm:$0xff] }
 0x248   : > { %v1261_v46 = vadd.f32 %v1229_v13, %v1057_v32  ;;  %v1128_v51 = vmul.f32 %v11034_v54, %v16482_v41  ;;  %16484 = vst [vmem:[#allocation33_spill] sm:$0xff] %v11439_v11  ;;  %8524 = vmatmul.mubr.msk.f32.gmra.mrb[10].mxu1 %vm533_vm0, %v2588_v56  ;;  %v2455_v18 = vmul.f32 %v11280_v7, %v11425_v0  ;;  %v16485_v14 = vld [vmem:[#allocation28_spill] sm:$0xff] }
 0x249   : > { %v1332_v48 = vmul.f32 %v11037_v27, %v16485_v14  ;;  %v1536_v4 = vmul.f32 %v11043_v8, %v16486_v6  ;;  %v16487_v20 = vld [vmem:[#allocation40_spill] sm:$0xff]  ;;  %v2282_v33 = vadd.f32 %v2250_v49, %v2077_v59  ;;  %2931 = vmatprep.mubr.f32.mxu1 %v10945_v60  ;;  %v1975_v24 = vadd.f32 %v1943_v16, %v1771_v58 }
 0x24a   : > { %v1740_v13 = vmul.f32 %v11047_v63, %v16487_v20  ;;  %v1465_v32 = vadd.f32 %v1433_v22, %v1261_v46  ;;  %v1160_v61 = vadd.f32 %v1128_v51, %v956_v1  ;;  %v11451_v41 = vld [vmem:[#allocation3 + $0x1b1] sm:$0xff]  ;;  %v1944_v56 = vmul.f32 %v11052_v28, %v11349_v35 }
 0x24b   : > { %v2150_v14 = vmul.f32 %v11056_v50, %v11437_v12  ;;  %v2354_v6 = vmul.f32 %v11063_v38, %v11439_v11  ;;  %v886_v20 = vmul.f32 %v11177_v23, %v16474_v2  ;;  %v2486_v49 = vadd.f32 %v2454_v30, %v2282_v33  ;;  %v11461_v22 = vld [vmem:[#allocation2 + $0x1af] sm:$0xff] }
 0x24c   : > { %v2181_v59 = vadd.f32 %v2149_v10, %v1975_v24  ;;  %v1669_v0 = vadd.f32 %v1637_v9, %v1465_v32  ;;  %v1364_v16 = vadd.f32 %v1332_v48, %v1160_v61  ;;  %v2558_v1 = vmul.f32 %v11241_v52, %v11451_v41  ;;  %v16488_v46 = vld [vmem:[#allocation29_spill] sm:$0xff]  ;;  %v16489_v12 = vld [vmem:[#allocation36_spill] sm:$0xff] }
 0x24d   : > { %v1026_v58 = vmul.f32 %v16475_v5, %v11181_v55  ;;  %v1230_v51 = vmul.f32 %v11185_v45, %v16488_v46  ;;  %v1434_v11 = vmul.f32 %v11251_v34, %v16489_v12  ;;  %3183 = vmatmul.mubr.f32.gmra.mrb[42].mxu0 %v2486_v49  ;;  %v1638_v9 = vmul.f32 %v11378_v39, %v11255_v47  ;;  %v11473_v48 = vld [vmem:[#allocation2 + $0x1b1] sm:$0xff]  ;;  %v11486_v49 = vld [vmem:[#allocation3 + $0x1c7] sm:$0xff] }
 0x24e   : > { %v2385_v2 = vadd.f32 %v2353_v25, %v2181_v59  ;;  %v1873_v30 = vadd.f32 %v1841_v19, %v1669_v0  ;;  %v1568_v10 = vadd.f32 %v1536_v4, %v1364_v16  ;;  %3188 = vmatprep.mubr.f32.mxu0 %v10945_v60  ;;  %v1842_v5 = vmul.f32 %v11262_v31, %v11371_v62  ;;  %v11480_v32 = vld [vmem:[#allocation2 + $0x1b0] sm:$0xff]  ;;  %v11494_v46 = vld [vmem:[#allocation3 + $0x1c8] sm:$0xff] }
 0x24f   : > { %v1058_v33 = vadd.f32 %v1026_v58, %v886_v20  ;;  %v2047_v24 = vmul.f32 %v11266_v42, %v11461_v22  ;;  %v2252_v25 = vmul.f32 %v11480_v32, %v11272_v57  ;;  %v957_v61 = vmul.f32 %v11023_v26, %v16477_v15 }
 0x250   : > { %v2589_v19 = vadd.f32 %v2557_v53, %v2385_v2  ;;  %v2078_v0 = vadd.f32 %v2046_v3, %v1873_v30  ;;  %v1772_v4 = vadd.f32 %v1740_v13, %v1568_v10  ;;  %v2456_v59 = vmul.f32 %v11280_v7, %v11473_v48  ;;  %v11506_v30 = vld [vmem:[#allocation3 + $0x1c9] sm:$0xff] }
 0x251   : > { %v1262_v20 = vadd.f32 %v1230_v51, %v1058_v33  ;;  %v1129_v16 = vmul.f32 %v11034_v54, %v11288_v40  ;;  %v1333_v58 = vmul.f32 %v11037_v27, %v11300_v29  ;;  %v1537_v15 = vmul.f32 %v11043_v8, %v11384_v36  ;;  %16490 = vst [vmem:[#allocation31_spill] sm:$0xff] %v11506_v30 }
 0x252   : > { %8525 = vmatmul.mubr.msk.f32.gmra.mrb[12].mxu1 %vm533_vm0, %v2589_v19  ;;  %v2283_v53 = vadd.f32 %v2251_v37, %v2078_v0  ;;  %v1976_v3 = vadd.f32 %v1944_v56, %v1772_v4  ;;  %v1741_v13 = vmul.f32 %v11047_v63, %v11392_v21  ;;  %v1945_v40 = vmul.f32 %v11052_v28, %v11404_v43  ;;  %v16491_v4 = vld [vmem:[#allocation34_spill] sm:$0xff] }
 0x253   : > { %2937 = vmatprep.mubr.f32.mxu1 %v10945_v60  ;;  %v1466_v51 = vadd.f32 %v1434_v11, %v1262_v20  ;;  %v1161_v2 = vadd.f32 %v1129_v16, %v957_v61  ;;  %v2151_v29 = vmul.f32 %v11056_v50, %v11486_v49  ;;  %v2355_v10 = vmul.f32 %v11063_v38, %v11494_v46  ;;  %v11516_v20 = vld [vmem:[#allocation2 + $0x1c7] sm:$0xff] }
 0x254   : > { %v2487_v37 = vadd.f32 %v2455_v18, %v2283_v53  ;;  %v2182_v56 = vadd.f32 %v2150_v14, %v1976_v3  ;;  %v887_v33 = vmul.f32 %v11177_v23, %v11311_v17  ;;  %v1027_v11 = vmul.f32 %v11327_v44, %v11181_v55  ;;  %16492 = vst [vmem:[#allocation32_spill] sm:$0xff] %v11516_v20  ;;  %v16493_v14 = vld [vmem:[#allocation38_spill] sm:$0xff] }
 0x255   : > { %v1670_v19 = vadd.f32 %v1638_v9, %v1466_v51  ;;  %v1365_v0 = vadd.f32 %v1333_v58, %v1161_v2  ;;  %v1231_v61 = vmul.f32 %v11185_v45, %v16491_v4  ;;  %v2559_v18 = vmul.f32 %v11241_v52, %v11506_v30  ;;  %v16494_v17 = vld [vmem:[#allocation30_spill] sm:$0xff]  ;;  %v16495_v51 = vld [vmem:[#allocation37_spill] sm:$0xff]  ;;  %v11527_v4 = vld [vmem:[#allocation2 + $0x1c9] sm:$0xff] }
 0x256   : > { %3189 = vmatmul.mubr.f32.gmra.mrb[44].mxu0 %v2487_v37  ;;  %v2386_v16 = vadd.f32 %v2354_v6, %v2182_v56  ;;  %v1435_v53 = vmul.f32 %v11251_v34, %v16493_v14  ;;  %v1639_v9 = vmul.f32 %v16494_v17, %v11255_v47  ;;  %v1059_v3 = vadd.f32 %v1027_v11, %v887_v33  ;;  %v11531_v56 = vld [vmem:[#allocation2 + $0x1c8] sm:$0xff] }
 0x257   : > { %3194 = vmatprep.mubr.f32.mxu0 %v10945_v60  ;;  %v1874_v58 = vadd.f32 %v1842_v5, %v1670_v19  ;;  %v1569_v44 = vadd.f32 %v1537_v15, %v1365_v0  ;;  %v1843_v2 = vmul.f32 %v11262_v31, %v16495_v51  ;;  %16496 = vst [vmem:[#allocation28_spill] sm:$0xff] %v11527_v4  ;;  %16497 = vst [vmem:[#allocation29_spill] sm:$0xff] %v11531_v56  ;;  %v16498_v17 = vld [vmem:[#allocation39_spill] sm:$0xff]  ;;  %v16499_v19 = vld [vmem:[#allocation40_spill] sm:$0xff] }
 0x258   : > { %v2590_v6 = vadd.f32 %v2558_v1, %v2386_v16  ;;  %v2048_v37 = vmul.f32 %v11266_v42, %v11516_v20  ;;  %v2253_v14 = vmul.f32 %v11531_v56, %v11272_v57  ;;  %v958_v30 = vmul.f32 %v11023_v26, %v16498_v17  ;;  %v11539_v11 = vld [vmem:[#allocation3 + $0x1cf] sm:$0xff]  ;;  %v16500_v20 = vld [vmem:[#allocation35_spill] sm:$0xff] }
 0x259   : > { %v2079_v5 = vadd.f32 %v2047_v24, %v1874_v58  ;;  %v1773_v15 = vadd.f32 %v1741_v13, %v1569_v44  ;;  %v1263_v33 = vadd.f32 %v1231_v61, %v1059_v3  ;;  %v1130_v0 = vmul.f32 %v11034_v54, %v16499_v19  ;;  %v11541_v1 = vld [vmem:[#allocation3 + $0x1d0] sm:$0xff] }
 0x25a   : > { %8526 = vmatmul.mubr.msk.f32.gmra.mrb[14].mxu1 %vm533_vm0, %v2590_v6  ;;  %v2457_v16 = vmul.f32 %v11280_v7, %v11527_v4  ;;  %v1334_v56 = vmul.f32 %v11037_v27, %v11349_v35  ;;  %v1538_v24 = vmul.f32 %v11043_v8, %v16500_v20  ;;  %v16501_v13 = vld [vmem:[#allocation33_spill] sm:$0xff]  ;;  %v1946_v6 = vmul.f32 %v11052_v28, %v11451_v41 }
 0x25b   : > { %v1742_v61 = vmul.f32 %v11047_v63, %v16501_v13  ;;  %v2284_v17 = vadd.f32 %v2252_v25, %v2079_v5  ;;  %2943 = vmatprep.mubr.f32.mxu1 %v10945_v60  ;;  %v1977_v58 = vadd.f32 %v1945_v40, %v1773_v15  ;;  %v1467_v44 = vadd.f32 %v1435_v53, %v1263_v33  ;;  %v11553_v19 = vld [vmem:[#allocation3 + $0x1d1] sm:$0xff] }
 0x25c   : > { %v1162_v3 = vadd.f32 %v1130_v0, %v958_v30  ;;  %v2152_v35 = vmul.f32 %v11056_v50, %v11539_v11  ;;  %v2356_v20 = vmul.f32 %v11063_v38, %v11541_v1  ;;  %v888_v13 = vmul.f32 %v11177_v23, %v16489_v12  ;;  %v11563_v53 = vld [vmem:[#allocation2 + $0x1cf] sm:$0xff] }
 0x25d   : > { %v2488_v25 = vadd.f32 %v2456_v59, %v2284_v17  ;;  %v2183_v5 = vadd.f32 %v2151_v29, %v1977_v58  ;;  %v1671_v4 = vadd.f32 %v1639_v9, %v1467_v44  ;;  %v2560_v30 = vmul.f32 %v11241_v52, %v11553_v19  ;;  %v11582_v58 = vld [vmem:[#allocation2 + $0x1d0] sm:$0xff] }
 0x25e   : > { %v1366_v40 = vadd.f32 %v1334_v56, %v1162_v3  ;;  %v1028_v15 = vmul.f32 %v11378_v39, %v11181_v55  ;;  %v1232_v33 = vmul.f32 %v11185_v45, %v11371_v62  ;;  %v1436_v0 = vmul.f32 %v11251_v34, %v11461_v22  ;;  %v11575_v56 = vld [vmem:[#allocation2 + $0x1d1] sm:$0xff]  ;;  %v11588_v3 = vld [vmem:[#allocation3 + $0x1e7] sm:$0xff] }
 0x25f   : > { %3195 = vmatmul.mubr.f32.gmra.mrb[46].mxu0 %v2488_v25  ;;  %v2387_v12 = vadd.f32 %v2355_v10, %v2183_v5  ;;  %v1875_v59 = vadd.f32 %v1843_v2, %v1671_v4  ;;  %v1640_v9 = vmul.f32 %v11480_v32, %v11255_v47  ;;  %v1844_v39 = vmul.f32 %v11262_v31, %v11473_v48 }
 0x260   : > { %v1570_v29 = vadd.f32 %v1538_v24, %v1366_v40  ;;  %3200 = vmatprep.mubr.f32.mxu0 %v10945_v60  ;;  %v1060_v17 = vadd.f32 %v1028_v15, %v888_v13  ;;  %v2049_v62 = vmul.f32 %v11266_v42, %v11563_v53  ;;  %v2254_v10 = vmul.f32 %v11582_v58, %v11272_v57  ;;  %v11596_v15 = vld [vmem:[#allocation3 + $0x1e8] sm:$0xff] }
 0x261   : > { %v2591_v2 = vadd.f32 %v2559_v18, %v2387_v12  ;;  %v2080_v4 = vadd.f32 %v2048_v37, %v1875_v59  ;;  %v959_v44 = vmul.f32 %v11023_v26, %v11384_v36  ;;  %16502 = vst [vmem:[#allocation36_spill] sm:$0xff] %v11588_v3  ;;  %v2458_v25 = vmul.f32 %v11280_v7, %v11575_v56 }
 0x262   : > { %v1774_v24 = vadd.f32 %v1742_v61, %v1570_v29  ;;  %v1264_v13 = vadd.f32 %v1232_v33, %v1060_v17  ;;  %v1131_v5 = vmul.f32 %v11034_v54, %v11392_v21  ;;  %v1335_v40 = vmul.f32 %v11037_v27, %v11404_v43  ;;  %16503 = vst [vmem:[#allocation34_spill] sm:$0xff] %v11596_v15  ;;  %v16504_v21 = vld [vmem:[#allocation31_spill] sm:$0xff] }
 0x263   : > { %8527 = vmatmul.mubr.msk.f32.gmra.mrb[16].mxu1 %vm533_vm0, %v2591_v2  ;;  %v2285_v18 = vadd.f32 %v2253_v14, %v2080_v4  ;;  %v1539_v36 = vmul.f32 %v11043_v8, %v11486_v49  ;;  %v1743_v61 = vmul.f32 %v11047_v63, %v11494_v46  ;;  %v1947_v59 = vmul.f32 %v11052_v28, %v16504_v21  ;;  %v11608_v29 = vld [vmem:[#allocation3 + $0x1e9] sm:$0xff]  ;;  %v16506_v2 = vld [vmem:[#allocation38_spill] sm:$0xff] }
 0x264   : > { %v1978_v37 = vadd.f32 %v1946_v6, %v1774_v24  ;;  %2949 = vmatprep.mubr.f32.mxu1 %v10945_v60  ;;  %v1468_v33 = vadd.f32 %v1436_v0, %v1264_v13  ;;  %v1163_v12 = vadd.f32 %v1131_v5, %v959_v44  ;;  %v2153_v43 = vmul.f32 %v11056_v50, %v11588_v3  ;;  %v16507_v0 = vld [vmem:[#allocation30_spill] sm:$0xff]  ;;  %v11618_v5 = vld [vmem:[#allocation2 + $0x1e7] sm:$0xff] }
 0x265   : > { %16505 = vst [vmem:[#allocation37_spill] sm:$0xff] %v11608_v29  ;;  %v2489_v14 = vadd.f32 %v2457_v16, %v2285_v18  ;;  %v2357_v17 = vmul.f32 %v11063_v38, %v11596_v15  ;;  %v889_v4 = vmul.f32 %v11177_v23, %v16506_v2  ;;  %v1029_v44 = vmul.f32 %v16507_v0, %v11181_v55  ;;  %v16510_v2 = vld [vmem:[#allocation28_spill] sm:$0xff] }
 0x266   : > { %v2184_v6 = vadd.f32 %v2152_v35, %v1978_v37  ;;  %v1672_v24 = vadd.f32 %v1640_v9, %v1468_v33  ;;  %v1367_v60 = vadd.f32 %v1335_v40, %v1163_v12  ;;  %v1233_v13 = vmul.f32 %v11185_v45, %v16495_v51  ;;  %v16508_v35 = vld [vmem:[#allocation32_spill] sm:$0xff]  ;;  %v16509_v37 = vld [vmem:[#allocation29_spill] sm:$0xff] }
 0x267   : > { %3201 = vmatmul.mubr.f32.gmra.mrb[48].mxu0 %v2489_v14  ;;  %v2561_v16 = vmul.f32 %v11241_v52, %v11608_v29  ;;  %v1437_v18 = vmul.f32 %v11251_v34, %v16508_v35  ;;  %v1641_v9 = vmul.f32 %v16509_v37, %v11255_v47  ;;  %v11626_v40 = vld [vmem:[#allocation2 + $0x8] sm:$0xff]  ;;  %v1061_v51 = vadd.f32 %v1029_v44, %v889_v4 }
 0x268   : > { %v2388_v3 = vadd.f32 %v2356_v20, %v2184_v6  ;;  %3206 = vmatprep.mubr.f32.mxu0 %v11626_v40  ;;  %v1876_v33 = vadd.f32 %v1844_v39, %v1672_v24  ;;  %v1571_v12 = vadd.f32 %v1539_v36, %v1367_v60  ;;  %v1845_v14 = vmul.f32 %v11262_v31, %v16510_v2  ;;  %v11631_v20 = vld [vmem:[#allocation2 + $0x1e9] sm:$0xff]  ;;  %v16513_v24 = vld [vmem:[#allocation33_spill] sm:$0xff] }
 0x269   : > { %v2050_v0 = vmul.f32 %v11266_v42, %v11618_v5  ;;  %v11635_v35 = vld [vmem:[#allocation2 + $0x1e8] sm:$0xff]  ;;  %v1265_v4 = vadd.f32 %v1233_v13, %v1061_v51  ;;  %v1132_v60 = vmul.f32 %v11034_v54, %v16513_v24 }
 0x26a   : > { %v2592_v6 = vadd.f32 %v2560_v30, %v2388_v3  ;;  %16511 = vst [vmem:[#allocation39_spill] sm:$0xff] %v11635_v35  ;;  %v2255_v37 = vmul.f32 %v11635_v35, %v11272_v57  ;;  %v16512_v29 = vld [vmem:[#allocation35_spill] sm:$0xff]  ;;  %v2081_v39 = vadd.f32 %v2049_v62, %v1876_v33  ;;  %v1775_v36 = vadd.f32 %v1743_v61, %v1571_v12  ;;  %v11643_v44 = vld [vmem:[#allocation3 + $0x1ef] sm:$0xff]  ;;  %v11696_v24 = vld [vmem:[#allocation11] ss:$0 sm:$0xff] }
 0x26b   : > { %v960_v15 = vmul.f32 %v11023_v26, %v16512_v29  ;;  %v11645_v30 = vld [vmem:[#allocation3 + $0x1f0] sm:$0xff]  ;;  %v11650_v3 = vmul.f32 %v11280_v7, %v11631_v20  ;;  %v1336_v35 = vmul.f32 %v11037_v27, %v11451_v41  ;;  %v1540_v26 = vmul.f32 %v11043_v8, %v11539_v11 }
 0x26c   : > { %16514 = vst [vmem:[#allocation40_spill] sm:$0xff] %v11645_v30  ;;  %8528 = vmatmul.mubr.msk.f32.gmra.mrb[18].mxu1 %vm533_vm0, %v2592_v6  ;;  %v1744_v62 = vmul.f32 %v11047_v63, %v11541_v1  ;;  %v2286_v54 = vadd.f32 %v2254_v10, %v2081_v39  ;;  %v1979_v61 = vadd.f32 %v1947_v59, %v1775_v36  ;;  %v11659_v33 = vld [vmem:[#allocation3 + $0x1f1] sm:$0xff] }
 0x26d   : > { %2955 = vmatprep.mubr.f32.mxu1 %v11626_v40  ;;  %v1469_v29 = vadd.f32 %v1437_v18, %v1265_v4  ;;  %v1164_v13 = vadd.f32 %v1132_v60, %v960_v15  ;;  %v1948_v12 = vmul.f32 %v11052_v28, %v11553_v19  ;;  %v2154_v27 = vmul.f32 %v11056_v50, %v11643_v44  ;;  %v11669_v18 = vld [vmem:[#allocation2 + $0x1ef] sm:$0xff] }
 0x26e   : > { %v2358_v8 = vmul.f32 %v11063_v38, %v11645_v30  ;;  %v890_v63 = vmul.f32 %v11177_v23, %v11461_v22  ;;  %v2490_v41 = vadd.f32 %v2458_v25, %v2286_v54  ;;  %v2185_v10 = vadd.f32 %v2153_v43, %v1979_v61  ;;  %v11690_v39 = vld [vmem:[#allocation2 + $0x1f0] sm:$0xff] }
 0x26f   : > { %v1673_v51 = vadd.f32 %v1641_v9, %v1469_v29  ;;  %v1368_v59 = vadd.f32 %v1336_v35, %v1164_v13  ;;  %v11673_v15 = vmul.f32 %v11241_v52, %v11659_v33  ;;  %v1030_v28 = vmul.f32 %v11480_v32, %v11181_v55  ;;  %v11683_v9 = vld [vmem:[#allocation2 + $0x1f1] sm:$0xff]  ;;  %v11706_v29 = vld [vmem:[#allocation11 + $0x1] ss:$0 sm:$0xff] }
 0x270   : > { %v1234_v50 = vmul.f32 %v11185_v45, %v11473_v48  ;;  %v1438_v38 = vmul.f32 %v11251_v34, %v11563_v53  ;;  %3207 = vmatmul.mubr.f32.gmra.mrb[50].mxu0 %v2490_v41  ;;  %v2389_v22 = vadd.f32 %v2357_v17, %v2185_v10  ;;  %v1642_v35 = vmul.f32 %v11582_v58, %v11255_v47  ;;  %v11717_v41 = vld [vmem:[#allocation11 + $0x3] ss:$0 sm:$0xff] }
 0x271   : > { %v1877_v25 = vadd.f32 %v1845_v14, %v1673_v51  ;;  %v1572_v43 = vadd.f32 %v1540_v26, %v1368_v59  ;;  %16515 = vst [vmem:[#allocation31_spill] sm:$0xff] %v11683_v9  ;;  %3212 = vmatprep.mubr.f32.mxu0 %v11626_v40  ;;  %v1062_v6 = vadd.f32 %v1030_v28, %v890_v63  ;;  %v11700_v26 = vld [vmem:[#allocation3 + $0x207] sm:$0xff]  ;;  %v16518_v28 = vld [vmem:[#allocation34_spill] sm:$0xff] }
 0x272   : > { %v1846_v32 = vmul.f32 %v11262_v31, %v11575_v56  ;;  %v2051_v48 = vmul.f32 %v11266_v42, %v11669_v18  ;;  %v11694_v17 = vmul.f32 %v11690_v39, %v11272_v57  ;;  %v2593_v14 = vadd.f32 %v2561_v16, %v2389_v22  ;;  %16516 = vst [vmem:[#allocation38_spill] sm:$0xff] %v11700_v26  ;;  %v11710_v16 = vld [vmem:[#allocation11 + $0x2] ss:$0 sm:$0xff]  ;;  %v11721_v59 = vld [vmem:[#allocation11 + $0x4] ss:$0 sm:$0xff] }
 0x273   : > { %v2082_v36 = vadd.f32 %v2050_v0, %v1877_v25  ;;  %v1776_v4 = vadd.f32 %v1744_v62, %v1572_v43  ;;  %v961_v60 = vmul.f32 %v11696_v24, %v11486_v49  ;;  %v1266_v54 = vadd.f32 %v1234_v50, %v1062_v6  ;;  %v11714_v62 = vld [vmem:[#allocation3 + $0x208] sm:$0xff]  ;;  %v16519_v25 = vld [vmem:[#allocation37_spill] sm:$0xff] }
 0x274   : > { %v11704_v61 = vmul.f32 %v11280_v7, %v11683_v9  ;;  %v1133_v13 = vmul.f32 %v11706_v29, %v11494_v46  ;;  %v1337_v0 = vmul.f32 %v11710_v16, %v16504_v21  ;;  %8529 = vmatmul.mubr.msk.f32.gmra.mrb[20].mxu1 %vm533_vm0, %v2593_v14  ;;  %v16517_v10 = vld [vmem:[#allocation36_spill] sm:$0xff]  ;;  %v1745_v46 = vmul.f32 %v11721_v59, %v16518_v28  ;;  %v16521_v28 = vld [vmem:[#allocation29_spill] sm:$0xff] }
 0x275   : > { %v2287_v49 = vadd.f32 %v2255_v37, %v2082_v36  ;;  %v1980_v63 = vadd.f32 %v1948_v12, %v1776_v4  ;;  %v1541_v51 = vmul.f32 %v11717_v41, %v16517_v10  ;;  %2961 = vmatprep.mubr.f32.mxu1 %v11626_v40  ;;  %v1470_v50 = vadd.f32 %v1438_v38, %v1266_v54  ;;  %v11726_v22 = vld [vmem:[#allocation11 + $0x5] ss:$0 sm:$0xff]  ;;  %v11730_v12 = vld [vmem:[#allocation11 + $0x6] ss:$0 sm:$0xff]  ;;  %v11737_v4 = vld [vmem:[#allocation11 + $0x7] ss:$0 sm:$0xff] }
 0x276   : > { %v1165_v21 = vadd.f32 %v1133_v13, %v961_v60  ;;  %v1949_v37 = vmul.f32 %v11726_v22, %v16519_v25  ;;  %v2155_v43 = vmul.f32 %v11730_v12, %v11700_v26  ;;  %v11734_v6 = vld [vmem:[#allocation3 + $0x209] sm:$0xff]  ;;  %v2359_v38 = vmul.f32 %v11737_v4, %v11714_v62 }
 0x277   : > { %v2491_v14 = vadd.f32 %v11650_v3, %v2287_v49  ;;  %v2186_v36 = vadd.f32 %v2154_v27, %v1980_v63  ;;  %v16520_v60 = vld [vmem:[#allocation32_spill] sm:$0xff]  ;;  %v1674_v13 = vadd.f32 %v1642_v35, %v1470_v50  ;;  %v1031_v10 = vmul.f32 %v16521_v28, %v11181_v55  ;;  %v16522_v63 = vld [vmem:[#allocation39_spill] sm:$0xff] }
 0x278   : > { %v891_v54 = vmul.f32 %v11177_v23, %v16520_v60  ;;  %v1369_v25 = vadd.f32 %v1337_v0, %v1165_v21  ;;  %v1235_v26 = vmul.f32 %v11185_v45, %v16510_v2  ;;  %v11747_v9 = vld [vmem:[#allocation2 + $0x207] sm:$0xff]  ;;  %v2563_v27 = vmul.f32 %v11241_v52, %v11734_v6 }
 0x279   : > { %3213 = vmatmul.mubr.f32.gmra.mrb[52].mxu0 %v2491_v14  ;;  %v2390_v3 = vadd.f32 %v2358_v8, %v2186_v36  ;;  %v1439_v49 = vmul.f32 %v11251_v34, %v11618_v5  ;;  %v1643_v35 = vmul.f32 %v16522_v63, %v11255_v47  ;;  %v1878_v0 = vadd.f32 %v1846_v32, %v1674_v13  ;;  %v11758_v21 = vld [vmem:[#allocation2 + $0x209] sm:$0xff] }
 0x27a   : > { %3218 = vmatprep.mubr.f32.mxu0 %v11626_v40  ;;  %v1573_v28 = vadd.f32 %v1541_v51, %v1369_v25  ;;  %v1063_v50 = vadd.f32 %v1031_v10, %v891_v54  ;;  %v1847_v2 = vmul.f32 %v11262_v31, %v11631_v20  ;;  %v2052_v14 = vmul.f32 %v11266_v42, %v11747_v9  ;;  %v11763_v36 = vld [vmem:[#allocation2 + $0x208] sm:$0xff] }
 0x27b   : > { %v2594_v8 = vadd.f32 %v11673_v15, %v2390_v3  ;;  %16523 = vst [vmem:[#allocation30_spill] sm:$0xff] %v11763_v36  ;;  %v2257_v60 = vmul.f32 %v11763_v36, %v11272_v57  ;;  %v962_v32 = vmul.f32 %v11696_v24, %v11539_v11  ;;  %v2083_v51 = vadd.f32 %v2051_v48, %v1878_v0  ;;  %v11771_v13 = vld [vmem:[#allocation3 + $0x20f] sm:$0xff] }
 0x27c   : > { %v1777_v10 = vadd.f32 %v1745_v46, %v1573_v28  ;;  %v1267_v25 = vadd.f32 %v1235_v26, %v1063_v50  ;;  %v1134_v54 = vmul.f32 %v11706_v29, %v11541_v1  ;;  %v11773_v15 = vld [vmem:[#allocation3 + $0x210] sm:$0xff]  ;;  %v2461_v3 = vmul.f32 %v11280_v7, %v11758_v21 }
 0x27d   : > { %16524 = vst [vmem:[#allocation28_spill] sm:$0xff] %v11773_v15  ;;  %8530 = vmatmul.mubr.msk.f32.gmra.mrb[22].mxu1 %vm533_vm0, %v2594_v8  ;;  %v1338_v36 = vmul.f32 %v11710_v16, %v11553_v19  ;;  %v1542_v11 = vmul.f32 %v11717_v41, %v11643_v44  ;;  %v1746_v48 = vmul.f32 %v11721_v59, %v11645_v30  ;;  %v11786_v28 = vld [vmem:[#allocation3 + $0x211] sm:$0xff] }
 0x27e   : > { %v2288_v1 = vadd.f32 %v11694_v17, %v2083_v51  ;;  %2967 = vmatprep.mubr.f32.mxu1 %v11626_v40  ;;  %v1981_v26 = vadd.f32 %v1949_v37, %v1777_v10  ;;  %v1471_v46 = vadd.f32 %v1439_v49, %v1267_v25  ;;  %v1166_v0 = vadd.f32 %v1134_v54, %v962_v32  ;;  %v11797_v32 = vld [vmem:[#allocation2 + $0x20f] sm:$0xff] }
 0x27f   : > { %v1950_v50 = vmul.f32 %v11726_v22, %v11659_v33  ;;  %v2156_v19 = vmul.f32 %v11730_v12, %v11771_v13  ;;  %v2360_v8 = vmul.f32 %v11737_v4, %v11773_v15  ;;  %v892_v30 = vmul.f32 %v11177_v23, %v11563_v53  ;;  %16525 = vst [vmem:[#allocation35_spill] sm:$0xff] %v11797_v32 }
 0x280   : > { %v2492_v17 = vadd.f32 %v11704_v61, %v2288_v1  ;;  %v2187_v51 = vadd.f32 %v2155_v43, %v1981_v26  ;;  %v1675_v37 = vadd.f32 %v1643_v35, %v1471_v46  ;;  %v1370_v49 = vadd.f32 %v1338_v36, %v1166_v0  ;;  %v11809_v35 = vld [vmem:[#allocation2 + $0x211] sm:$0xff]  ;;  %v16526_v1 = vld [vmem:[#allocation31_spill] sm:$0xff] }
 0x281   : > { %v2564_v10 = vmul.f32 %v11241_v52, %v11786_v28  ;;  %v1032_v25 = vmul.f32 %v11582_v58, %v11181_v55  ;;  %v1236_v54 = vmul.f32 %v11185_v45, %v11575_v56  ;;  %v1440_v15 = vmul.f32 %v11251_v34, %v11669_v18  ;;  %v11816_v56 = vld [vmem:[#allocation2 + $0x210] sm:$0xff]  ;;  %v2119_v0 = vld [vmem:[#allocation3 + $0x227] sm:$0xff] }
 0x282   : > { %3219 = vmatmul.mubr.f32.gmra.mrb[54].mxu0 %v2492_v17  ;;  %v2391_v23 = vadd.f32 %v2359_v38, %v2187_v51  ;;  %v1879_v53 = vadd.f32 %v1847_v2, %v1675_v37  ;;  %v1574_v61 = vadd.f32 %v1542_v11, %v1370_v49  ;;  %v1644_v43 = vmul.f32 %v11690_v39, %v11255_v47  ;;  %v16527_v26 = vld [vmem:[#allocation36_spill] sm:$0xff]  ;;  %v16528_v51 = vld [vmem:[#allocation34_spill] sm:$0xff]  ;;  %v16529_v49 = vld [vmem:[#allocation37_spill] sm:$0xff] }
 0x283   : > { %3224 = vmatprep.mubr.f32.mxu0 %v11626_v40  ;;  %v1064_v36 = vadd.f32 %v1032_v25, %v892_v30  ;;  %v1848_v55 = vmul.f32 %v11262_v31, %v16526_v1  ;;  %v2053_v45 = vmul.f32 %v11266_v42, %v11797_v32  ;;  %v2258_v58 = vmul.f32 %v11816_v56, %v11272_v57  ;;  %v2323_v32 = vld [vmem:[#allocation3 + $0x228] sm:$0xff] }
 0x284   : > { %v2595_v38 = vadd.f32 %v2563_v27, %v2391_v23  ;;  %v2084_v2 = vadd.f32 %v2052_v14, %v1879_v53  ;;  %v1778_v11 = vadd.f32 %v1746_v48, %v1574_v61  ;;  %v963_v46 = vmul.f32 %v11696_v24, %v16527_v26  ;;  %v16530_v48 = vld [vmem:[#allocation38_spill] sm:$0xff] }
 0x285   : > { %v1268_v17 = vadd.f32 %v1236_v54, %v1064_v36  ;;  %v11824_v30 = vmul.f32 %v11280_v7, %v11809_v35  ;;  %v1135_v37 = vmul.f32 %v11706_v29, %v16528_v51  ;;  %v1339_v25 = vmul.f32 %v11710_v16, %v16529_v49  ;;  %v2527_v51 = vld [vmem:[#allocation3 + $0x229] sm:$0xff] }
 0x286   : > { %8531 = vmatmul.mubr.msk.f32.gmra.mrb[24].mxu1 %vm533_vm0, %v2595_v38  ;;  %v2289_v27 = vadd.f32 %v2257_v60, %v2084_v2  ;;  %v1982_v14 = vadd.f32 %v1950_v50, %v1778_v11  ;;  %v1543_v23 = vmul.f32 %v11717_v41, %v16530_v48  ;;  %v1747_v54 = vmul.f32 %v11721_v59, %v11714_v62  ;;  %v8905_v50 = vld [vmem:[#allocation10] ss:$0 sm:$0xff]  ;;  %v8906_v48 = vld [vmem:[#allocation10 + $0x1] ss:$0 sm:$0xff] }
 0x287   : > { %2973 = vmatprep.mubr.f32.mxu1 %v11626_v40  ;;  %v1472_v53 = vadd.f32 %v1440_v15, %v1268_v17  ;;  %v1167_v61 = vadd.f32 %v1135_v37, %v963_v46  ;;  %v1951_v36 = vmul.f32 %v11726_v22, %v11734_v6  ;;  %v2157_v26 = vmul.f32 %v11730_v12, %v2119_v0  ;;  %v8907_v46 = vld [vmem:[#allocation10 + $0x2] ss:$0 sm:$0xff]  ;;  %v2016_v6 = vld [vmem:[#allocation2 + $0x227] sm:$0xff] }
 0x288   : > { %v2493_v49 = vadd.f32 %v2461_v3, %v2289_v27  ;;  %v2188_v38 = vadd.f32 %v2156_v19, %v1982_v14  ;;  %v11840_v60 = vmul.f32 %v11737_v4, %v2323_v32  ;;  %v893_v2 = vmul.f32 %v8905_v50, %v11618_v5  ;;  %v16531_v32 = vld [vmem:[#allocation30_spill] sm:$0xff]  ;;  %v16532_v14 = vld [vmem:[#allocation40_spill] sm:$0xff] }
 0x289   : > { %v1676_v11 = vadd.f32 %v1644_v43, %v1472_v53  ;;  %v1371_v62 = vadd.f32 %v1339_v25, %v1167_v61  ;;  %v1033_v15 = vmul.f32 %v8906_v48, %v16522_v63  ;;  %v1237_v17 = vmul.f32 %v8907_v46, %v11631_v20  ;;  %v2425_v25 = vld [vmem:[#allocation2 + $0x229] sm:$0xff]  ;;  %v2528_v61 = vld [vmem:[#allocation3 + $0x231] sm:$0xff] }
 0x28a   : > { %3225 = vmatmul.mubr.f32.gmra.mrb[56].mxu0 %v2493_v49  ;;  %v2392_v0 = vadd.f32 %v2360_v8, %v2188_v38  ;;  %v11846_v3 = vmul.f32 %v11241_v52, %v2527_v51  ;;  %v1441_v19 = vmul.f32 %v11251_v34, %v11747_v9  ;;  %v1645_v5 = vmul.f32 %v16531_v32, %v11255_v47  ;;  %v2120_v53 = vld [vmem:[#allocation3 + $0x22f] sm:$0xff] }
 0x28b   : > { %3230 = vmatprep.mubr.f32.mxu0 %v11626_v40  ;;  %v1880_v43 = vadd.f32 %v1848_v55, %v1676_v11  ;;  %v1575_v37 = vadd.f32 %v1543_v23, %v1371_v62  ;;  %v1065_v63 = vadd.f32 %v1033_v15, %v893_v2  ;;  %v1849_v20 = vmul.f32 %v11262_v31, %v11758_v21  ;;  %v2324_v31 = vld [vmem:[#allocation3 + $0x230] sm:$0xff]  ;;  %v11897_v62 = vld [vmem:[#allocation17 + $0x20] sm:$0xff] }
 0x28c   : > { %v2596_v27 = vadd.f32 %v2564_v10, %v2392_v0  ;;  %v11856_v8 = vmul.f32 %v11266_v42, %v2016_v6  ;;  %v11860_v52 = vmul.f32 %v11626_v40, %v11272_v57  ;;  %v964_v34 = vmul.f32 %v11696_v24, %v11643_v44  ;;  %v16533_v44 = vld [vmem:[#allocation28_spill] sm:$0xff] }
 0x28d   : > { %v2085_v47 = vadd.f32 %v2053_v45, %v1880_v43  ;;  %v1779_v9 = vadd.f32 %v1747_v54, %v1575_v37  ;;  %v1269_v55 = vadd.f32 %v1237_v17, %v1065_v63  ;;  %v1136_v23 = vmul.f32 %v11706_v29, %v16532_v14  ;;  %v2017_v51 = vld [vmem:[#allocation2 + $0x22f] sm:$0xff]  ;;  %v11932_v14 = vld [vmem:[#allocation17 + $0x98] sm:$0xff] }
 0x28e   : > { %8532 = vmatmul.mubr.msk.f32.gmra.mrb[26].mxu1 %vm533_vm0, %v2596_v27  ;;  %v11868_v42 = vmul.f32 %v11280_v7, %v2425_v25  ;;  %v1340_v57 = vmul.f32 %v11710_v16, %v11659_v33  ;;  %v1544_v21 = vmul.f32 %v11717_v41, %v11771_v13  ;;  %v1748_v24 = vmul.f32 %v11721_v59, %v16533_v44  ;;  %v7782_v49 = vld [vmem:[#allocation17 + $0x8] sm:$0xff]  ;;  %v7784_v59 = vld [vmem:[#allocation17 + $0x18] sm:$0xff]  ;;  %v11888_v13 = vld [vmem:[#allocation17] sm:$0xff] }
 0x28f   : > { %v2290_v10 = vadd.f32 %v2258_v58, %v2085_v47  ;;  %2979 = vmatprep.mubr.f32.mxu1 %v11626_v40  ;;  %v1983_v29 = vadd.f32 %v1951_v36, %v1779_v9  ;;  %v1473_v45 = vadd.f32 %v1441_v19, %v1269_v55  ;;  %v1168_v54 = vadd.f32 %v1136_v23, %v964_v34  ;;  %v11890_v58 = vld [vmem:[#allocation17 + $0x10] sm:$0xff]  ;;  %v11906_v0 = vld [vmem:[#allocation17 + $0x48] sm:$0xff]  ;;  %v11908_v19 = vld [vmem:[#allocation17 + $0x58] sm:$0xff] }
 0x290   : > { %v11879_v7 = vmul.f32 %v11726_v22, %v11786_v28  ;;  %v11882_v33 = vmul.f32 %v11730_v12, %v2120_v53  ;;  %v11885_v16 = vmul.f32 %v11737_v4, %v2324_v31  ;;  %v894_v41 = vmul.f32 %v8905_v50, %v11669_v18  ;;  %v2426_v22 = vld [vmem:[#allocation2 + $0x231] sm:$0xff]  ;;  %v11895_v12 = vld [vmem:[#allocation17 + $0x38] sm:$0xff]  ;;  %v11910_v32 = vld [vmem:[#allocation17 + $0x40] sm:$0xff] }
 0x291   : > { %v2494_v36 = vadd.f32 %v11824_v30, %v2290_v10  ;;  %v2189_v38 = vadd.f32 %v2157_v26, %v1983_v29  ;;  %v1677_v2 = vadd.f32 %v1645_v5, %v1473_v45  ;;  %v1372_v11 = vadd.f32 %v1340_v57, %v1168_v54  ;;  %v11893_v28 = vld [vmem:[#allocation17 + $0x28] sm:$0xff]  ;;  %v11899_v4 = vld [vmem:[#allocation17 + $0x30] sm:$0xff]  ;;  %v8909_v30 = vld [vmem:[#allocation10 + $0x3] ss:$0 sm:$0xff] }
 0x292   : > { %v8908_v18 = vld [vmem:[#allocation11 + $0x8] ss:$0 sm:$0xff]  ;;  %v1034_v15 = vmul.f32 %v8906_v48, %v11690_v39  ;;  %v1238_v17 = vmul.f32 %v8907_v46, %v16526_v1  ;;  %v16534_v26 = vld [vmem:[#allocation35_spill] sm:$0xff]  ;;  %v11912_v5 = vld [vmem:[#allocation17 + $0x50] sm:$0xff]  ;;  %v8615_v55 = vpack.c.bf16 %v7784_v59, %v7782_v49 }
 0x293   : > { %v11901_v50 = vmul.f32 %v8908_v18, %v2528_v61  ;;  %v1442_v6 = vmul.f32 %v8909_v30, %v16534_v26  ;;  %3231 = vmatmul.mubr.f32.gmra.mrb[58].mxu0 %v2494_v36  ;;  %v2393_v43 = vadd.f32 %v11840_v60, %v2189_v38  ;;  %v1881_v37 = vadd.f32 %v1849_v20, %v1677_v2  ;;  %v8910_v25 = vld [vmem:[#allocation10 + $0x4] ss:$0 sm:$0xff]  ;;  %v11916_v1 = vld [vmem:[#allocation17 + $0x68] sm:$0xff]  ;;  %v11920_v46 = vld [vmem:[#allocation17 + $0x60] sm:$0xff] }
 0x294   : > { %v1576_v63 = vadd.f32 %v1544_v21, %v1372_v11  ;;  %v1646_v39 = vmul.f32 %v8910_v25, %v11816_v56  ;;  %v11918_v48 = vld [vmem:[#allocation17 + $0x78] sm:$0xff]  ;;  %v11922_v27 = vld [vmem:[#allocation17 + $0x70] sm:$0xff]  ;;  %3236 = vmatprep.mubr.f32.mxu0 %v11626_v40  ;;  %v1066_v34 = vadd.f32 %v1034_v15, %v894_v41  ;;  %v11930_v56 = vld [vmem:[#allocation17 + $0x88] sm:$0xff]  ;;  %8616 = vmatprep.subr.bf16.mxu1 %v8615_v55 }
 0x295   : > { %v8911_v47 = vld [vmem:[#allocation10 + $0x5] ss:$0 sm:$0xff]  ;;  %v8912_v60 = vld [vmem:[#allocation10 + $0x6] ss:$0 sm:$0xff]  ;;  %v11934_v23 = vld [vmem:[#allocation17 + $0x80] sm:$0xff]  ;;  %v2597_v31 = vadd.f32 %v11846_v3, %v2393_v43  ;;  %v2086_v57 = vadd.f32 %v11856_v8, %v1881_v37  ;;  %v8619_v3 = vpack.c.bf16 %v11895_v12, %v11893_v28  ;;  %v8621_v8 = vpack.c.bf16 %v11899_v4, %v11897_v62 }
 0x296   : > { %v11926_v9 = vmul.f32 %v8911_v47, %v11809_v35  ;;  %v11928_v20 = vmul.f32 %v8912_v60, %v2017_v51  ;;  %v11936_v53 = vld [vmem:[#allocation17 + $0x90] sm:$0xff]  ;;  %v1780_v21 = vadd.f32 %v1748_v24, %v1576_v63  ;;  %v8617_v35 = vpack.c.bf16 %v11890_v58, %v11888_v13  ;;  %v11942_v44 = vld [vmem:[#allocation17 + $0xa8] sm:$0xff]  ;;  %v11944_v10 = vld [vmem:[#allocation17 + $0xb8] sm:$0xff] }
 0x297   : > { %v11946_v29 = vld [vmem:[#allocation17 + $0xa0] sm:$0xff]  ;;  %v1270_v45 = vadd.f32 %v1238_v17, %v1066_v34  ;;  %v11954_v24 = vld [vmem:[#allocation17 + $0xb0] sm:$0xff]  ;;  %v11956_v51 = vld [vmem:[#allocation17 + $0xc8] sm:$0xff]  ;;  %8533 = vmatmul.mubr.msk.f32.gmra.mrb[28].mxu1 %vm533_vm0, %v2597_v31  ;;  %v2291_v41 = vadd.f32 %v11860_v52, %v2086_v57  ;;  %v8623_v13 = vpack.c.bf16 %v11908_v19, %v11906_v0  ;;  %v8625_v58 = vpack.c.bf16 %v11912_v5, %v11910_v32 }
 0x298   : > { %v8913_v54 = vld [vmem:[#allocation10 + $0x8] ss:$0 sm:$0xff]  ;;  %v11958_v49 = vld [vmem:[#allocation17 + $0xd8] sm:$0xff]  ;;  %v1984_v59 = vadd.f32 %v11879_v7, %v1780_v21  ;;  %v11969_v38 = vld [vmem:[#allocation17 + $0xd0] sm:$0xff]  ;;  %2985 = vmatprep.mubr.f32.mxu1 %v11626_v40  ;;  %8618 = vmatpush1.bf16.msra.mxu1 %v8617_v35  ;;  %v8629_v7 = vpack.c.bf16 %v11922_v27, %v11920_v46  ;;  %v3251_v28 = vlaneseq  ;;  %v8631_v17 = vpack.c.bf16 %v11932_v14, %v11930_v56 }
 0x299   : > { %v11948_v61 = vmul.f32 %v8913_v54, %v2426_v22  ;;  %v11967_v36 = vld [vmem:[#allocation17 + $0xc0] sm:$0xff]  ;;  %v11971_v2 = vld [vmem:[#allocation17 + $0xe8] sm:$0xff]  ;;  %v1474_v11 = vadd.f32 %v1442_v6, %v1270_v45  ;;  %v8627_v22 = vpack.c.bf16 %v11918_v48, %v11916_v1  ;;  %v11978_v12 = vld [vmem:[#allocation17 + $0xf8] sm:$0xff]  ;;  %v2495_v18 = vadd.f32 %v11868_v42, %v2291_v41  ;;  %8620 = vmatprep.subr.bf16.mxu1 %v8619_v3 }
 0x29a   : > { %v11980_v62 = vld [vmem:[#allocation17 + $0xe0] sm:$0xff]  ;;  %v11982_v4 = vld [vmem:[#allocation17 + $0xf0] sm:$0xff]  ;;  %v2190_v15 = vadd.f32 %v11882_v33, %v1984_v59  ;;  %v8633_v30 = vpack.c.bf16 %v11936_v53, %v11934_v23  ;;  %v11990_v26 = vld [vmem:[#allocation17 + $0x108] sm:$0xff]  ;;  %v3252_v43 = vshrl.u32 %v3251_v28, 7 }
 0x29b   : > { %v11992_v6 = vld [vmem:[#allocation17 + $0x118] sm:$0xff]  ;;  %v11994_v0 = vld [vmem:[#allocation17 + $0x100] sm:$0xff]  ;;  %v1678_v19 = vadd.f32 %v1646_v39, %v1474_v11  ;;  %v12000_v37 = vld [vmem:[#allocation17 + $0x110] sm:$0xff]  ;;  %3237 = vmatmul.mubr.f32.gmra.mrb[60].mxu0 %v2495_v18 }
 0x29c   : > { %v12002_v63 = vld [vmem:[#allocation17 + $0x128] sm:$0xff]  ;;  %v12004_v25 = vld [vmem:[#allocation17 + $0x138] sm:$0xff]  ;;  %v2394_v1 = vadd.f32 %v11885_v16, %v2190_v15  ;;  %v12013_v60 = vld [vmem:[#allocation17 + $0x120] sm:$0xff]  ;;  %3242 = vmatprep.mubr.f32.mxu0 %v11626_v40  ;;  %8622 = vmatpush1.bf16.msra.mxu1 %v8621_v8  ;;  %v12019_v16 = vsub.s32 0, %v3252_v43  ;;  %v12021_v57 = vsub.s32 1, %v3252_v43 }
 0x29d   : > { %v3249_v48 = vld [vmem:[#allocation14] sm:$0x3]  ;;  %v12015_v55 = vld [vmem:[#allocation17 + $0x130] sm:$0xff]  ;;  %v1882_v31 = vadd.f32 %v11926_v9, %v1678_v19  ;;  %8624 = vmatprep.subr.bf16.mxu1 %v8623_v13  ;;  %v816_v8 = vld [vmem:[#allocation16] sm:$0x3] }
 0x29e   : > { %16535 = vst [vmem:[#allocation33_spill] sm:$0xff] %v12019_v16  ;;  %16536 = vst [vmem:[#allocation32_spill] sm:$0xff] %v12021_v57  ;;  %v817_v35 = vld [vmem:[#allocation16 + $0x2] sm:$0x3]  ;;  %v2598_v45 = vadd.f32 %v11901_v50, %v2394_v1  ;;  %v818_v41 = vld [vmem:[#allocation16 + $0x4] sm:$0x3]  ;;  %v12034_v28 = vrot.slane %v3249_v48, %v12019_v16  ;;  %v12039_v18 = vrot.slane %v816_v8, %v12021_v57 }
 0x29f   : > { %v3455_v59 = vld [vmem:[#allocation4 + $0x8] sm:$0x80]  ;;  %v2087_v11 = vadd.f32 %v11928_v20, %v1882_v31  ;;  %v3457_v13 = vld [vmem:[#allocation4 + $0x18] sm:$0xff]  ;;  %v12043_v43 = vrot.slane %v3249_v48, %v12021_v57  ;;  %v12046_v20 = vrot.slane %v817_v35, %v12019_v16  ;;  %v12049_v31 = vrot.slane %v817_v35, %v12021_v57  ;;  %v821_v5 = vld [vmem:[#allocation16 + $0xa] sm:$0x3] }
 0x2a0   : > { %v3658_v15 = vld [vmem:[#allocation4 + $0x28] sm:$0xff]  ;;  %v4118_v19 = vld [vmem:[#allocation4 + $0x18] sm:$0xfe]  ;;  %8534 = vmatmul.mubr.msk.f32.gmra.mrb[30].mxu1 %vm533_vm0, %v2598_v45  ;;  %v12052_v50 = vrot.slane %v818_v41, %v12021_v57  ;;  %v3562_v45 = vmul.f32 %v12039_v18, %v3455_v59  ;;  %v3564_v48 = vmul.f32 %v12039_v18, %v3457_v13  ;;  %v823_v59 = vld [vmem:[#allocation16 + $0xe] sm:$0x3] }
 0x2a1   : > { %v820_v1 = vld [vmem:[#allocation16 + $0x8] sm:$0x3]  ;;  %16537 = vst [vmem:[#allocation29_spill] sm:$0xff] %v12046_v20  ;;  %16538 = vst [vmem:[#allocation39_spill] sm:$0xff] %v12049_v31  ;;  %v2292_v9 = vadd.f32 %v11860_v52, %v2087_v11  ;;  %8626 = vmatpush1.bf16.msra.mxu1 %v8625_v58  ;;  %v819_v3 = vld [vmem:[#allocation16 + $0x6] sm:$0x3]  ;;  %v3701_v54 = vmul.f32 %v12049_v31, %v3457_v13  ;;  %v12062_v35 = vmul.f32 %v12049_v31, %v3658_v15 }
 0x2a2   : > { %8628 = vmatprep.subr.bf16.mxu1 %v8627_v22  ;;  %v4193_v21 = vmul.f32 %v12052_v50, %v4118_v19  ;;  %v12066_v52 = vmul.f32 %v12052_v50, %v3658_v15  ;;  %v4738_v11 = vld [vmem:[#allocation4 + $0x48] sm:$0x80]  ;;  %v822_v58 = vld [vmem:[#allocation16 + $0xc] sm:$0x3]  ;;  %v12070_v47 = vrot.slane %v819_v3, %v12021_v57  ;;  %v12073_v22 = vrot.slane %v820_v1, %v12019_v16  ;;  %v3454_v14 = vld [vmem:[#allocation4] sm:$0x80] }
 0x2a3   : > { %v2496_v32 = vadd.f32 %v11948_v61, %v2292_v9  ;;  %v12076_v13 = vrot.slane %v820_v1, %v12021_v57  ;;  %v3830_v34 = vrot.slane %v3701_v54, 1  ;;  %v3833_v19 = vrot.slane %v12062_v35, 1  ;;  %v6116_v33 = vld [vmem:[#allocation4 + $0x88] sm:$0x80]  ;;  %v3459_v42 = vld [vmem:[#allocation4 + $0x28] sm:$0x7f] }
 0x2a4   : > { %16539 = vst [vmem:[#allocation31_spill] sm:$0xff] %v12073_v22  ;;  %v4386_v15 = vrot.slane %v4193_v21, 2  ;;  %v16105_v39 = vrot.slane %v12066_v52, 2  ;;  %v4845_v61 = vmul.f32 %v12070_v47, %v4738_v11  ;;  %v12085_v9 = vrot.slane %v821_v5, %v12021_v57  ;;  %v824_v21 = vld [vmem:[#allocation16 + $0x10] sm:$0x3] }
 0x2a5   : > { %3243 = vmatmul.mubr.f32.gmra.mrb[62].mxu0 %v2496_v32  ;;  %8630 = vmatpush1.bf16.msra.mxu1 %v8629_v7  ;;  %v12088_v1 = vrot.slane %v822_v58, %v12021_v57  ;;  %v3834_v54 = vsel %vm3828_vm1, %v3830_v34, %v3833_v19  ;;  %v4022_v35 = vadd.f32 %v3830_v34, %v3562_v45 }
 0x2a6   : > { %8632 = vmatprep.subr.bf16.mxu1 %v8631_v17  ;;  %v4390_v46 = vsel %vm4384_vm2, %v4386_v15, %v16105_v39  ;;  %v12098_v27 = vrot.slane %v823_v59, %v12019_v16  ;;  %v4024_v7 = vadd.f32 %v3834_v54, %v3564_v48  ;;  %v12104_v32 = vrot.slane %v823_v59, %v12021_v57  ;;  %v4117_v39 = vld [vmem:[#allocation4 + $0x10] sm:$0xfe]  ;;  %v6115_v54 = vld [vmem:[#allocation4 + $0x80] sm:$0x80] }
 0x2a7   : > { %v12101_v11 = vmul.f32 %v12088_v1, %v6116_v33  ;;  %v12107_v56 = vrot.slane %v824_v21, %v12021_v57  ;;  %v4642_v17 = vadd.f32 %v4386_v15, %v4022_v35  ;;  %v12110_v34 = vrot.slane %v816_v8, %v12019_v16  ;;  %v4737_v33 = vld [vmem:[#allocation4 + $0x40] sm:$0x80] }
 0x2a8   : > { %16540 = vst [vmem:[#allocation36_spill] sm:$0xff] %v12098_v27  ;;  %16542 = vst [vmem:[#allocation37_spill] sm:$0xff] %v12104_v32  ;;  %v3700_v45 = vmul.f32 %v11626_v40, %v12046_v20  ;;  %v12115_v48 = vrot.slane %v818_v41, %v12019_v16  ;;  %v12120_v59 = vadd.f32 %v4390_v46, %v4024_v7 }
 0x2a9   : > { %16541 = vst [vmem:[#allocation34_spill] sm:$0xff] %v12101_v11  ;;  %16543 = vst [vmem:[#allocation38_spill] sm:$0xff] %v12110_v34  ;;  %8634 = vmatpush1.bf16.msra.mxu1 %v8633_v30  ;;  %v12123_v15 = vrot.slane %v819_v3, %v12019_v16  ;;  %v12126_v8 = vrot.slane %v821_v5, %v12019_v16  ;;  %v12129_v35 = vrot.slane %v822_v58, %v12019_v16  ;;  %v4120_v3 = vld [vmem:[#allocation4 + $0x38] sm:$0x1] }
 0x2aa   : > { %v16545_v41 = vpack.c.bf16 %v11944_v10, %v11942_v44  ;;  %v12134_v57 = vadd.f32 %v4845_v61, %v4642_v17  ;;  %v3561_v23 = vmul.f32 %v12110_v34, %v3454_v14  ;;  %v3563_v53 = vmul.f32 %v11626_v40, %v12110_v34  ;;  %v5498_v44 = vld [vmem:[#allocation4 + $0x78] sm:$0x1]  ;;  %v3458_v61 = vld [vmem:[#allocation4 + $0x20] sm:$0x7f] }
 0x2ab   : > { %16544 = vst [vmem:[#allocation30_spill] sm:$0xff] %v12126_v8  ;;  %v3829_v30 = vrot.slane %v3700_v45, 1  ;;  %v4192_v5 = vmul.f32 %v12115_v48, %v4117_v39  ;;  %v4194_v58 = vmul.f32 %v11626_v40, %v12115_v48  ;;  %v4844_v46 = vmul.f32 %v12123_v15, %v4737_v33  ;;  %v6876_v10 = vld [vmem:[#allocation4 + $0xb8] sm:$0x1] }
 0x2ac   : > { %8636 = vmatprep.subr.bf16.mxu1 %v16545_v41  ;;  %v12144_v7 = vmul.f32 %v12129_v35, %v6115_v54  ;;  %v12147_v14 = vrot.slane %v824_v21, %v12019_v16  ;;  %v3566_v45 = vmul.f32 %v12039_v18, %v3459_v42  ;;  %v4119_v41 = vld [vmem:[#allocation4 + $0x30] sm:$0x1]  ;;  %v16547_v39 = vpack.c.bf16 %v11954_v24, %v11946_v29 }
 0x2ad   : > { %v4021_v17 = vadd.f32 %v3829_v30, %v3561_v23  ;;  %v4023_v40 = vadd.f32 %v3829_v30, %v3563_v53  ;;  %v4385_v31 = vrot.slane %v4192_v5, 2  ;;  %v4387_v33 = vrot.slane %v4194_v58, 2  ;;  %v5497_v29 = vld [vmem:[#allocation4 + $0x70] sm:$0x1] }
 0x2ae   : > { %16546 = vst [vmem:[#allocation40_spill] sm:$0xff] %v12147_v14  ;;  %8638 = vmatpush1.bf16.msra.mxu1 %v16547_v39  ;;  %v4197_v54 = vmul.f32 %v12052_v50, %v4120_v3  ;;  %v16548_v32 = vpack.c.bf16 %v11958_v49, %v11956_v51  ;;  %v4026_v23 = vadd.f32 %v3833_v19, %v3566_v45  ;;  %v6875_v58 = vld [vmem:[#allocation4 + $0xb0] sm:$0x1]  ;;  %v3461_v39 = vld [vmem:[#allocation4 + $0x48] sm:$0x80]  ;;  %v3058_v51 = vpop.f32.mrb[0].mxu0 }
 0x2af   : > { %v12158_v21 = vmul.f32 %v12085_v9, %v5498_v44  ;;  %v12161_v42 = vmul.f32 %v12107_v56, %v6876_v10  ;;  %v3565_v16 = vmul.f32 %v12110_v34, %v3458_v61  ;;  %v4388_v24 = vsel %vm4384_vm2, %v4385_v31, %v4387_v33  ;;  %v4744_v10 = vld [vmem:[#allocation4 + $0x88] sm:$0x80]  ;;  %v3060_v61 = vpop.f32.mrb[1].mxu0 }
 0x2b0   : > { %8640 = vmatprep.subr.bf16.mxu1 %v16548_v32  ;;  %v4641_v53 = vadd.f32 %v4385_v31, %v4021_v17  ;;  %v4393_v5 = vrot.slane %v4197_v54, 2  ;;  %v4196_v3 = vmul.f32 %v12115_v48, %v4119_v41  ;;  %v4643_v49 = vadd.f32 %v4388_v24, %v4023_v40 }
 0x2b1   : > { %v4025_v44 = vadd.f32 %v3829_v30, %v3565_v16  ;;  %v3261_v45 = vadd.f32 %v12034_v28, %v3058_v51  ;;  %v16549_v11 = vpack.c.bf16 %v11969_v38, %v11967_v36  ;;  %v16550_v17 = vrot.slane %v12066_v52, 2  ;;  %v6122_v38 = vld [vmem:[#allocation4 + $0xc8] sm:$0x80] }
 0x2b2   : > { %v4940_v31 = vadd.f32 %v4844_v46, %v4641_v53  ;;  %v4391_v54 = vrot.slane %v4196_v3, 2  ;;  %v3262_v40 = vadd.f32 %v12043_v43, %v3060_v61  ;;  %v16551_v24 = vpack.c.bf16 %v11978_v12, %v11971_v2  ;;  %v3460_v2 = vld [vmem:[#allocation4 + $0x40] sm:$0x80] }
 0x2b3   : > { %8642 = vmatpush1.bf16.msra.mxu1 %v16549_v11  ;;  %v4394_v41 = vsel %vm4384_vm2, %v16550_v17, %v4393_v5  ;;  %v12182_v30 = vmul.f32 %v12126_v8, %v5497_v29  ;;  %v12185_v36 = vmul.f32 %v12147_v14, %v6875_v58  ;;  %v3325_v11 = vmax.f32 %v3261_v45, 0.0  ;;  %v4743_v58 = vld [vmem:[#allocation4 + $0x80] sm:$0x80]  ;;  %v4124_v17 = vld [vmem:[#allocation4 + $0x78] sm:$0x1] }
 0x2b4   : > { %8644 = vmatprep.subr.bf16.mxu1 %v16551_v24  ;;  %v12179_v16 = vadd.f32 %v4394_v41, %v4026_v23  ;;  %v4392_v52 = vsel %vm4384_vm2, %v4387_v33, %v4391_v54  ;;  %v12189_v46 = vmul.f32 %v12039_v18, %v3461_v39  ;;  %v12192_v53 = vmul.f32 %v12070_v47, %v4744_v10  ;;  %v3064_v23 = vpop.f32.mrb[2].mxu0  ;;  %v6121_v61 = vld [vmem:[#allocation4 + $0xc0] sm:$0x80] }
 0x2b5   : > { %v3326_v12 = vmax.f32 %v3262_v40, 0.0  ;;  %v12194_v5 = vadd.f32 %v4392_v52, %v4025_v44  ;;  %3390 = vst [vmem:[#allocation4 + $0x50] sm:$0xff] %v3325_v11  ;;  %v3263_v51 = vadd.f32 %v12034_v28, %v3064_v23  ;;  %v3066_v33 = vpop.f32.mrb[3].mxu0  ;;  %v16552_v39 = vpack.c.bf16 %v11982_v4, %v11980_v62 }
 0x2b6   : > { %v4846_v10 = vmul.f32 %v12123_v15, %v3325_v11  ;;  %v5079_v45 = vmul.f32 %v12073_v22, %v3325_v11  ;;  %v12205_v44 = vmul.f32 %v12088_v1, %v6122_v38  ;;  %v3264_v41 = vadd.f32 %v12043_v43, %v3066_v33  ;;  %v3070_v33 = vpop.f32.mrb[4].mxu0 }
 0x2b7   : > { %8646 = vmatpush1.bf16.msra.mxu1 %v16552_v39  ;;  %3391 = vst.msk [vmem:[#allocation4 + $0x58] sm:$0xff] %vm533_vm0, %v3326_v12  ;;  %v16553_v54 = vpack.c.bf16 %v11992_v6, %v11990_v26  ;;  %v3567_v62 = vmul.f32 %v12110_v34, %v3460_v2  ;;  %v12214_v4 = vmul.f32 %v12110_v34, %v3325_v11  ;;  %v3327_v24 = vmax.f32 %v3263_v51, 0.0  ;;  %v3072_v2 = vpop.f32.mrb[5].mxu0 }
 0x2b8   : > { %v12217_v40 = vmul.f32 %v12046_v20, %v3325_v11  ;;  %v4942_v38 = vadd.f32 %v4846_v10, %v4643_v49  ;;  %v5207_v52 = vrot.slane %v5079_v45, 1  ;;  %v12220_v23 = vmul.f32 %v12123_v15, %v4743_v58  ;;  %v5502_v45 = vld [vmem:[#allocation4 + $0xb8] sm:$0x1] }
 0x2b9   : > { %8648 = vmatprep.subr.bf16.mxu1 %v16553_v54  ;;  %v3328_v12 = vmax.f32 %v3264_v41, 0.0  ;;  %v12224_v26 = vmul.f32 %v12129_v35, %v6121_v61  ;;  %v12227_v6 = vmul.f32 %v12052_v50, %v4124_v17  ;;  %3392 = vst [vmem:[#allocation4 + $0x60] sm:$0xff] %v3327_v24  ;;  %v3265_v11 = vadd.f32 %v12034_v28, %v3070_v33  ;;  %v6880_v61 = vld [vmem:[#allocation4 + $0xf8] sm:$0x1] }
 0x2ba   : > { %16554 = vst [vmem:[#allocation28_spill] sm:$0xff] %v12220_v23  ;;  %v16111_v39 = vrot.slane %v12217_v40, 1  ;;  %v16557_v49 = vpack.c.bf16 %v12000_v37, %v11994_v0  ;;  %v12234_v58 = vmul.f32 %v12073_v22, %v3327_v24  ;;  %v5399_v51 = vadd.f32 %v5207_v52, %v4940_v31 }
 0x2bb   : > { %16555 = vst [vmem:[#allocation35_spill] sm:$0xff] %v12224_v26  ;;  %16556 = vst [vmem:[#allocation41_spill] sm:$0xff] %v12227_v6  ;;  %v12237_v10 = vmul.f32 %v12126_v8, %v3327_v24  ;;  %v3266_v17 = vadd.f32 %v12043_v43, %v3072_v2  ;;  %v16558_v41 = vpack.c.bf16 %v12004_v25, %v12002_v63  ;;  %v12254_v54 = vmax.f32 %v3265_v11, 0.0 }
 0x2bc   : > { %8650 = vmatpush1.bf16.msra.mxu1 %v16557_v49  ;;  %3393 = vst.msk [vmem:[#allocation4 + $0x68] sm:$0xff] %vm533_vm0, %v3328_v12  ;;  %v12245_v0 = vmul.f32 %v12046_v20, %v3327_v24  ;;  %v12249_v37 = vadd.f32 %v16111_v39, %v3567_v62  ;;  %v12252_v31 = vmul.f32 %v12115_v48, %v3327_v24  ;;  %v16112_v12 = vrot.slane %v12234_v58, 1  ;;  %v5495_v25 = vld [vmem:[#allocation4 + $0x50] sm:$0xfe]  ;;  %v3076_v24 = vpop.f32.mrb[6].mxu0 }
 0x2bd   : > { %8652 = vmatprep.subr.bf16.mxu1 %v16558_v41  ;;  %v3330_v63 = vmax.f32 %v3266_v17, 0.0  ;;  %v12261_v41 = vmul.f32 %v12085_v9, %v5502_v45  ;;  %v12264_v62 = vmul.f32 %v12107_v56, %v6880_v61  ;;  %3394 = vst [vmem:[#allocation4 + $0x90] sm:$0xff] %v12254_v54  ;;  %v16562_v11 = vpack.c.bf16 %v12015_v55, %v12013_v60  ;;  %v3078_v55 = vpop.f32.mrb[7].mxu0 }
 0x2be   : > { %16559 = vst [vmem:[#allocation42_spill] sm:$0xff] %v12249_v37  ;;  %v12270_v39 = vld [vmem:[#allocation4 + $0x58] sm:$0xff]  ;;  %v5210_v17 = vsel %vm3828_vm1, %v5207_v52, %v16112_v12  ;;  %v5570_v45 = vmul.f32 %v12126_v8, %v5495_v25  ;;  %v6224_v61 = vmul.f32 %v12129_v35, %v12254_v54  ;;  %v6457_v49 = vmul.f32 %v12098_v27, %v12254_v54 }
 0x2bf   : > { %16560 = vst [vmem:[#allocation43_spill] sm:$0xff] %v12261_v41  ;;  %16561 = vst [vmem:[#allocation44_spill] sm:$0xff] %v12264_v62  ;;  %v5496_v2 = vld [vmem:[#allocation4 + $0x58] sm:$0xfe]  ;;  %v3267_v60 = vadd.f32 %v12034_v28, %v3076_v24  ;;  %v5080_v3 = vmul.f32 %v12076_v13, %v12270_v39  ;;  %v3268_v25 = vadd.f32 %v12043_v43, %v3078_v55  ;;  %v3082_v62 = vpop.f32.mrb[8].mxu0  ;;  %v16563_v6 = vrot.slane %v12237_v10, 2 }
 0x2c0   : > { %8654 = vmatpush1.bf16.msra.mxu1 %v16562_v11  ;;  %3395 = vst.msk [vmem:[#allocation4 + $0x98] sm:$0xff] %vm533_vm0, %v3330_v63  ;;  %v4847_v11 = vmul.f32 %v12070_v47, %v12270_v39  ;;  %v5571_v52 = vmul.f32 %v12085_v9, %v5496_v2  ;;  %v5401_v12 = vadd.f32 %v5210_v17, %v4942_v38  ;;  %v5762_v29 = vrot.slane %v5570_v45, 2  ;;  %v4741_v20 = vld [vmem:[#allocation4 + $0x60] sm:$0x7f] }
 0x2c1   : > { %v6585_v32 = vrot.slane %v6457_v49, 1  ;;  %v12288_v19 = vmax.f32 %v3267_v60, 0.0  ;;  %v5208_v33 = vrot.slane %v5080_v3, 1  ;;  %v3332_v34 = vmax.f32 %v3268_v25, 0.0 }
 0x2c2   : > { %v4943_v63 = vadd.f32 %v4847_v11, %v12120_v59  ;;  %v5763_v24 = vrot.slane %v5571_v52, 2  ;;  %v5765_v2 = vsel %vm4384_vm2, %v5762_v29, %v16563_v6  ;;  %v6018_v26 = vadd.f32 %v5762_v29, %v5399_v51  ;;  %v3084_v59 = vpop.f32.mrb[9].mxu0 }
 0x2c3   : > { %v12291_v41 = vld [vmem:[#allocation4 + $0x68] sm:$0xff]  ;;  %v12297_v38 = vmul.f32 %v12123_v15, %v4741_v20  ;;  %3396 = vst [vmem:[#allocation4 + $0xa0] sm:$0xff] %v12288_v19  ;;  %v3269_v49 = vadd.f32 %v12034_v28, %v3082_v62  ;;  %v5400_v17 = vadd.f32 %v5208_v33, %v12134_v57  ;;  %3397 = vst.msk [vmem:[#allocation4 + $0xa8] sm:$0xff] %vm533_vm0, %v3332_v34  ;;  %v3088_v25 = vpop.f32.mrb[10].mxu0 }
 0x2c4   : > { %v12303_v3 = vmul.f32 %v12076_v13, %v12291_v41  ;;  %v12308_v45 = vmul.f32 %v12085_v9, %v12291_v41  ;;  %v3270_v20 = vadd.f32 %v12043_v43, %v3084_v59  ;;  %v6020_v29 = vadd.f32 %v5765_v2, %v5401_v12  ;;  %v6873_v11 = vld [vmem:[#allocation4 + $0x90] sm:$0xfe] }
 0x2c5   : > { %v6318_v6 = vadd.f32 %v12144_v7, %v6018_v26  ;;  %v12315_v51 = vmul.f32 %v12098_v27, %v12288_v19  ;;  %v12317_v62 = vmax.f32 %v3269_v49, 0.0  ;;  %v6019_v55 = vadd.f32 %v5763_v24, %v5400_v17  ;;  %v3090_v49 = vpop.f32.mrb[11].mxu0  ;;  %v16566_v27 = vld [vmem:[#allocation37_spill] sm:$0xff] }
 0x2c6   : > { %v16122_v60 = vrot.slane %v12303_v3, 1  ;;  %v5766_v57 = vrot.slane %v12308_v45, 2  ;;  %v3334_v52 = vmax.f32 %v3270_v20, 0.0  ;;  %v6320_v12 = vadd.f32 %v6224_v61, %v6020_v29  ;;  %v3094_v37 = vpop.f32.mrb[12].mxu0 }
 0x2c7   : > { %16564 = vst [vmem:[#allocation45_spill] sm:$0xff] %v12317_v62  ;;  %v12321_v34 = vld [vmem:[#allocation4 + $0x98] sm:$0xff]  ;;  %v6777_v26 = vadd.f32 %v6585_v32, %v6318_v6  ;;  %3398 = vst [vmem:[#allocation4 + $0xd0] sm:$0xff] %v12317_v62  ;;  %v3271_v2 = vadd.f32 %v12034_v28, %v3088_v25  ;;  %v3272_v61 = vadd.f32 %v12043_v43, %v3090_v49 }
 0x2c8   : > { %v6874_v59 = vld [vmem:[#allocation4 + $0x98] sm:$0xfe]  ;;  %v5212_v45 = vsel %vm3828_vm1, %v5208_v33, %v16122_v60  ;;  %v5767_v17 = vsel %vm4384_vm2, %v5763_v24, %v5766_v57  ;;  %v6225_v20 = vmul.f32 %v12088_v1, %v12321_v34  ;;  %3399 = vst.msk [vmem:[#allocation4 + $0xd8] sm:$0xff] %vm533_vm0, %v3334_v52  ;;  %v6458_v25 = vmul.f32 %v16566_v27, %v12321_v34 }
 0x2c9   : > { %v5402_v29 = vadd.f32 %v5212_v45, %v4943_v63  ;;  %v16565_v6 = vld [vmem:[#allocation34_spill] sm:$0xff]  ;;  %v12337_v62 = vmax.f32 %v3271_v2, 0.0  ;;  %v6949_v23 = vmul.f32 %v12107_v56, %v6874_v59  ;;  %v16568_v33 = vrot.slane %v12315_v51, 1  ;;  %v3096_v2 = vpop.f32.mrb[13].mxu0 }
 0x2ca   : > { %v6319_v7 = vadd.f32 %v16565_v6, %v6019_v55  ;;  %v6948_v60 = vmul.f32 %v12147_v14, %v6873_v11  ;;  %v3336_v52 = vmax.f32 %v3272_v61, 0.0  ;;  %v6586_v63 = vrot.slane %v6458_v25, 1  ;;  %v12346_v6 = vld [vmem:[#allocation4 + $0xa8] sm:$0xff] }
 0x2cb   : > { %16567 = vst [vmem:[#allocation34_spill] sm:$0xff] %v12337_v62  ;;  %v6588_v24 = vsel %vm3828_vm1, %v6585_v32, %v16568_v33  ;;  %v6021_v49 = vadd.f32 %v5767_v17, %v5402_v29  ;;  %3400 = vst [vmem:[#allocation4 + $0xe0] sm:$0xff] %v12337_v62  ;;  %v3273_v55 = vadd.f32 %v12034_v28, %v3094_v37  ;;  %v7141_v59 = vrot.slane %v6949_v23, 2  ;;  %v4742_v32 = vld [vmem:[#allocation4 + $0x68] sm:$0x7f] }
 0x2cc   : > { %v6779_v45 = vadd.f32 %v6588_v24, %v6320_v12  ;;  %v6950_v8 = vmul.f32 %v12147_v14, %v12288_v19  ;;  %v7140_v22 = vrot.slane %v6948_v60, 2  ;;  %3401 = vst.msk [vmem:[#allocation4 + $0xe8] sm:$0xff] %vm533_vm0, %v3336_v52  ;;  %v3274_v11 = vadd.f32 %v12043_v43, %v3096_v2  ;;  %v3100_v2 = vpop.f32.mrb[14].mxu0  ;;  %v6120_v62 = vld [vmem:[#allocation4 + $0xa8] sm:$0x7f] }
 0x2cd   : > { %v6321_v17 = vadd.f32 %v6225_v20, %v6021_v49  ;;  %v12354_v12 = vmul.f32 %v16566_v27, %v12346_v6  ;;  %v6778_v61 = vadd.f32 %v6586_v63, %v6319_v7  ;;  %v3337_v37 = vmax.f32 %v3273_v55, 0.0 }
 0x2ce   : > { %v6951_v29 = vmul.f32 %v12107_v56, %v12346_v6  ;;  %v7142_v23 = vrot.slane %v6950_v8, 2  ;;  %v7396_v25 = vadd.f32 %v7140_v22, %v6777_v26  ;;  %v3338_v33 = vmax.f32 %v3274_v11, 0.0  ;;  %v3102_v26 = vpop.f32.mrb[15].mxu0 }
 0x2cf   : > { %v6589_v60 = vrot.slane %v12354_v12, 1  ;;  %v7397_v24 = vadd.f32 %v7141_v59, %v6778_v61  ;;  %v4849_v52 = vmul.f32 %v12070_v47, %v4742_v32  ;;  %3402 = vst [vmem:[#allocation4 + $0x110] sm:$0xff] %v3337_v37  ;;  %v16569_v7 = vrot.slane %v12158_v21, 2 }
 0x2d0   : > { %v7144_v20 = vrot.slane %v6951_v29, 2  ;;  %v7143_v49 = vsel %vm4384_vm2, %v7140_v22, %v7142_v23  ;;  %v7589_v14 = vrot.slane %v7396_v25, 7  ;;  %3403 = vst.msk [vmem:[#allocation4 + $0x118] sm:$0xff] %vm533_vm0, %v3338_v33  ;;  %v3275_v8 = vadd.f32 %v12034_v28, %v3100_v2  ;;  %v6119_v29 = vld [vmem:[#allocation4 + $0xa0] sm:$0x7f] }
 0x2d1   : > { %v5771_v55 = vsel %vm4384_vm2, %v5766_v57, %v16569_v7  ;;  %v6590_v11 = vsel %vm3828_vm1, %v6586_v63, %v6589_v60  ;;  %v7592_v12 = vrot.slane %v7397_v24, 7  ;;  %v12367_v32 = vadd.f32 %v7143_v49, %v6779_v45  ;;  %v3106_v45 = vpop.f32.mrb[16].mxu0 }
 0x2d2   : > { %v3276_v61 = vadd.f32 %v12043_v43, %v3102_v26  ;;  %v6780_v37 = vadd.f32 %v6590_v11, %v6321_v17  ;;  %v7145_v22 = vsel %vm4384_vm2, %v7141_v59, %v7144_v20  ;;  %v4945_v21 = vadd.f32 %v4849_v52, %v12179_v16  ;;  %v3108_v52 = vpop.f32.mrb[17].mxu0 }
 0x2d3   : > { %v3339_v57 = vmax.f32 %v3275_v8, 0.0  ;;  %v7590_v25 = vrot.slane %v12367_v32, 7  ;;  %v6227_v33 = vmul.f32 %v12088_v1, %v6120_v62  ;;  %v16570_v2 = vrot.slane %v12161_v42, 2 }
 0x2d4   : > { %v3340_v24 = vmax.f32 %v3276_v61, 0.0  ;;  %v12377_v49 = vadd.f32 %v7145_v22, %v6780_v37  ;;  %v16571_v17 = vrot.slane %v12303_v3, 1  ;;  %v4944_v16 = vadd.f32 %v12297_v38, %v12194_v5  ;;  %v4122_v37 = vld [vmem:[#allocation4 + $0x58] sm:$0xfe] }
 0x2d5   : > { %v7149_v63 = vsel %vm4384_vm2, %v7144_v20, %v16570_v2  ;;  %3404 = vst [vmem:[#allocation4 + $0x120] sm:$0xff] %v3339_v57  ;;  %v3277_v59 = vadd.f32 %v12034_v28, %v3106_v45  ;;  %v7591_v42 = vsel %vm7588_vm3, %v7589_v14, %v7590_v25  ;;  %v16572_v62 = vrot.slane %v12182_v30, 2  ;;  %v3112_v2 = vpop.f32.mrb[18].mxu0 }
 0x2d6   : > { %v5404_v7 = vadd.f32 %v16571_v17, %v4945_v21  ;;  %v16573_v20 = vrot.slane %v12237_v10, 2  ;;  %v6226_v3 = vmul.f32 %v12129_v35, %v6119_v29  ;;  %3405 = vst.msk [vmem:[#allocation4 + $0x128] sm:$0xff] %vm533_vm0, %v3340_v24  ;;  %v3278_v5 = vadd.f32 %v12043_v43, %v3108_v52  ;;  %v16576_v21 = vld [vmem:[#allocation39_spill] sm:$0xff] }
 0x2d7   : > { %v7593_v38 = vrot.slane %v12377_v49, 7  ;;  %v16574_v11 = vrot.slane %v12234_v58, 1  ;;  %v3341_v14 = vmax.f32 %v3277_v59, 0.0  ;;  %v16575_v30 = vrot.slane %v12185_v36, 2  ;;  %v3114_v49 = vpop.f32.mrb[19].mxu0 }
 0x2d8   : > { %v5769_v8 = vsel %vm4384_vm2, %v16573_v20, %v16572_v62  ;;  %v6023_v26 = vadd.f32 %v5771_v55, %v5404_v7  ;;  %v3570_v22 = vmul.f32 %v12270_v39, %v12039_v18  ;;  %v3705_v29 = vmul.f32 %v12270_v39, %v16576_v21 }
 0x2d9   : > { %v5403_v61 = vadd.f32 %v16574_v11, %v4944_v16  ;;  %v7147_v10 = vsel %vm4384_vm2, %v7142_v23, %v16575_v30  ;;  %v3342_v57 = vmax.f32 %v3278_v5, 0.0  ;;  %v7594_v24 = vsel %vm7588_vm3, %v7592_v12, %v7593_v38  ;;  %3406 = vst [vmem:[#allocation4 + $0x150] sm:$0xff] %v3341_v14  ;;  %v5500_v30 = vld [vmem:[#allocation4 + $0x98] sm:$0xfe] }
 0x2da   : > { %v6323_v55 = vadd.f32 %v6227_v33, %v6023_v26  ;;  %v3279_v58 = vadd.f32 %v12034_v28, %v3112_v2  ;;  %8535 = vmatprep.mubr.msk.f32.mxu1 %vm533_vm0, %v7594_v24  ;;  %v12410_v36 = vmul.f32 %v12291_v41, %v16576_v21  ;;  %v3836_v23 = vrot.slane %v3705_v29, 1 }
 0x2db   : > { %v6022_v45 = vadd.f32 %v5769_v8, %v5403_v61  ;;  %v4199_v17 = vmul.f32 %v12052_v50, %v4122_v37  ;;  %3407 = vst.msk [vmem:[#allocation4 + $0x158] sm:$0xff] %vm533_vm0, %v3342_v57  ;;  %v3280_v39 = vadd.f32 %v12043_v43, %v3114_v49  ;;  %7962 = vmatmul.mubr.f32.vlgmr.msra.gmra.mrb[32].mxu1 %v7591_v42  ;;  %v3118_v8 = vpop.f32.mrb[20].mxu0  ;;  %v16577_v26 = vrot.slane %v12315_v51, 1 }
 0x2dc   : > { %v6782_v12 = vadd.f32 %v6589_v60, %v6323_v55  ;;  %v12417_v7 = vmul.f32 %v12291_v41, %v12052_v50  ;;  %v3343_v16 = vmax.f32 %v3279_v58, 0.0  ;;  %v16138_v59 = vrot.slane %v12410_v36, 1  ;;  %v12438_v55 = vld [vmem:[#allocation4 + $0xd8] sm:$0xff] }
 0x2dd   : > { %v6322_v33 = vadd.f32 %v6226_v3, %v6022_v45  ;;  %v4028_v52 = vadd.f32 %v3836_v23, %v12189_v46  ;;  %v4396_v62 = vrot.slane %v4199_v17, 2  ;;  %v3344_v20 = vmax.f32 %v3280_v39, 0.0  ;;  %v3120_v3 = vpop.f32.mrb[21].mxu0 }
 0x2de   : > { %v7401_v5 = vadd.f32 %v7149_v63, %v6782_v12  ;;  %v4399_v42 = vrot.slane %v12417_v7, 2  ;;  %3408 = vst [vmem:[#allocation4 + $0x160] sm:$0xff] %v3343_v16  ;;  %v3281_v60 = vadd.f32 %v12034_v28, %v3118_v8  ;;  %v3840_v41 = vsel %vm3828_vm1, %v3836_v23, %v16138_v59  ;;  %v12451_v12 = vld [vmem:[#allocation4 + $0xe8] sm:$0xff] }
 0x2df   : > { %v6781_v11 = vadd.f32 %v16577_v26, %v6322_v33  ;;  %v4648_v61 = vadd.f32 %v4396_v62, %v4028_v52  ;;  %v4853_v46 = vmul.f32 %v12321_v34, %v12070_v47  ;;  %3409 = vst.msk [vmem:[#allocation4 + $0x168] sm:$0xff] %vm533_vm0, %v3344_v20  ;;  %v3282_v51 = vadd.f32 %v12043_v43, %v3120_v3  ;;  %v6878_v20 = vld [vmem:[#allocation4 + $0xd8] sm:$0xfe]  ;;  %v6126_v59 = vld [vmem:[#allocation4 + $0xe8] sm:$0x7f] }
 0x2e0   : > { %v7597_v63 = vrot.slane %v7401_v5, 7  ;;  %v4030_v14 = vadd.f32 %v3840_v41, %v3570_v22  ;;  %v3345_v29 = vmax.f32 %v3281_v60, 0.0  ;;  %v4400_v57 = vsel %vm4384_vm2, %v4396_v62, %v4399_v42 }
 0x2e1   : > { %v7400_v37 = vadd.f32 %v7147_v10, %v6781_v11  ;;  %v4947_v2 = vadd.f32 %v12192_v53, %v4648_v61  ;;  %v5084_v24 = vmul.f32 %v12321_v34, %v12076_v13  ;;  %v3346_v58 = vmax.f32 %v3282_v51, 0.0  ;;  %v3124_v10 = vpop.f32.mrb[22].mxu0  ;;  %v4121_v51 = vld [vmem:[#allocation4 + $0x50] sm:$0xfe] }
 0x2e2   : > { %v7598_v45 = vsel %vm7588_vm3, %v7593_v38, %v7597_v63  ;;  %v4650_v23 = vadd.f32 %v4400_v57, %v4030_v14  ;;  %3410 = vst [vmem:[#allocation4 + $0x190] sm:$0xff] %v3345_v29  ;;  %v12444_v22 = vmul.f32 %v12346_v6, %v12076_v13  ;;  %v5577_v53 = vmul.f32 %v12085_v9, %v5500_v30  ;;  %v3126_v16 = vpop.f32.mrb[23].mxu0 }
 0x2e3   : > { %v7595_v49 = vrot.slane %v7400_v37, 7  ;;  %8536 = vmatprep.mubr.msk.f32.mxu1 %vm533_vm0, %v7598_v45  ;;  %v5214_v17 = vrot.slane %v5084_v24, 1  ;;  %v12449_v39 = vmul.f32 %v12346_v6, %v12085_v9  ;;  %3411 = vst.msk [vmem:[#allocation4 + $0x198] sm:$0xff] %vm533_vm0, %v3346_v58  ;;  %v3283_v33 = vadd.f32 %v12034_v28, %v3124_v10  ;;  %v12473_v37 = vpop.f32.mrb[24].mxu0 }
 0x2e4   : > { %v4949_v52 = vadd.f32 %v4853_v46, %v4650_v23  ;;  %v6231_v62 = vmul.f32 %v12088_v1, %v12438_v55  ;;  %v3284_v8 = vadd.f32 %v12043_v43, %v3126_v16  ;;  %v16133_v5 = vrot.slane %v12444_v22, 1 }
 0x2e5   : > { %v7596_v38 = vsel %vm7588_vm3, %v7590_v25, %v7595_v49  ;;  %v5406_v26 = vadd.f32 %v5214_v17, %v4947_v2  ;;  %v5773_v11 = vrot.slane %v5577_v53, 2  ;;  %v3347_v60 = vmax.f32 %v3283_v33, 0.0  ;;  %v12479_v2 = vpop.f32.mrb[25].mxu0  ;;  %v5499_v33 = vld [vmem:[#allocation4 + $0x90] sm:$0xfe] }
 0x2e6   : > { %7968 = vmatmul.mubr.f32.gmra.mrb[34].mxu1 %v7596_v38  ;;  %v16136_v32 = vrot.slane %v12449_v39, 2  ;;  %v6462_v25 = vmul.f32 %v16566_v27, %v12438_v55  ;;  %v12467_v3 = vmul.f32 %v16566_v27, %v12451_v12  ;;  %v3348_v41 = vmax.f32 %v3284_v8, 0.0  ;;  %v12501_v8 = vpop.f32.mrb[26].mxu0 }
 0x2e7   : > { %v5218_v61 = vsel %vm3828_vm1, %v5214_v17, %v16133_v5  ;;  %v6025_v46 = vadd.f32 %v5773_v11, %v5406_v26  ;;  %v6955_v63 = vmul.f32 %v12107_v56, %v6878_v20  ;;  %3412 = vst [vmem:[#allocation4 + $0x1a0] sm:$0xff] %v3347_v60  ;;  %v12485_v45 = vmul.f32 %v12107_v56, %v12451_v12  ;;  %v16580_v60 = vld [vmem:[#allocation31_spill] sm:$0xff] }
 0x2e8   : > { %v5408_v14 = vadd.f32 %v5218_v61, %v4949_v52  ;;  %v5777_v30 = vsel %vm4384_vm2, %v5773_v11, %v16136_v32  ;;  %v6592_v29 = vrot.slane %v6462_v25, 1  ;;  %v16131_v57 = vrot.slane %v12467_v3, 1  ;;  %3413 = vst.msk [vmem:[#allocation4 + $0x1a8] sm:$0xff] %vm533_vm0, %v3348_v41  ;;  %v12509_v41 = vpop.f32.mrb[27].mxu0 }
 0x2e9   : > { %v6325_v24 = vadd.f32 %v12205_v44, %v6025_v46  ;;  %v7151_v58 = vrot.slane %v6955_v63, 2  ;;  %v16578_v49 = vrot.slane %v12245_v0, 1  ;;  %v16579_v23 = vrot.slane %v12217_v40, 1  ;;  %v16581_v63 = vld [vmem:[#allocation30_spill] sm:$0xff] }
 0x2ea   : > { %v6027_v17 = vadd.f32 %v5777_v30, %v5408_v14  ;;  %v6596_v53 = vsel %vm3828_vm1, %v6592_v29, %v16131_v57  ;;  %v4198_v44 = vmul.f32 %v12115_v48, %v4121_v51  ;;  %v16135_v52 = vrot.slane %v12485_v45, 2  ;;  %v16582_v30 = vld [vmem:[#allocation42_spill] sm:$0xff] }
 0x2eb   : > { %v3838_v10 = vsel %vm3828_vm1, %v16579_v23, %v16578_v49  ;;  %v6784_v16 = vadd.f32 %v6592_v29, %v6325_v24  ;;  %v16132_v20 = vrot.slane %v12252_v31, 2  ;;  %v4852_v40 = vmul.f32 %v12123_v15, %v12254_v54 }
 0x2ec   : > { %v4029_v38 = vadd.f32 %v3838_v10, %v12214_v4  ;;  %v6327_v26 = vadd.f32 %v6231_v62, %v6027_v17  ;;  %v4395_v11 = vrot.slane %v4198_v44, 2  ;;  %v5083_v25 = vmul.f32 %v16580_v60, %v12254_v54  ;;  %v12524_v44 = vpop.f32.mrb[28].mxu0 }
 0x2ed   : > { %v12507_v4 = vmul.f32 %v16580_v60, %v12288_v19  ;;  %v7155_v61 = vsel %vm4384_vm2, %v7151_v58, %v16135_v52  ;;  %v7403_v46 = vadd.f32 %v7151_v58, %v6784_v16  ;;  %v5576_v51 = vmul.f32 %v16581_v63, %v5499_v33  ;;  %v6877_v58 = vld [vmem:[#allocation4 + $0xd0] sm:$0xfe]  ;;  %16583 = vst [vmem:[#allocation37_spill] sm:$0xff] %v12524_v44  ;;  %v4748_v52 = vld [vmem:[#allocation4 + $0xa8] sm:$0x7f] }
 0x2ee   : > { %v12517_v62 = vmul.f32 %v16581_v63, %v12288_v19  ;;  %v6786_v14 = vadd.f32 %v6596_v53, %v6327_v26  ;;  %v4398_v54 = vsel %vm4384_vm2, %v4395_v11, %v16132_v20  ;;  %v4647_v29 = vadd.f32 %v4395_v11, %v16582_v30  ;;  %v16584_v19 = vld [vmem:[#allocation28_spill] sm:$0xff]  ;;  %v16585_v26 = vld [vmem:[#allocation45_spill] sm:$0xff]  ;;  %v12532_v20 = vpop.f32.mrb[29].mxu0 }
 0x2ef   : > { %v5213_v24 = vrot.slane %v5083_v25, 1  ;;  %v7602_v49 = vrot.slane %v7403_v46, 7  ;;  %v4649_v23 = vadd.f32 %v4398_v54, %v4029_v38  ;;  %v16134_v10 = vrot.slane %v12507_v4, 1  ;;  %16586 = vst [vmem:[#allocation39_spill] sm:$0xff] %v12532_v20  ;;  %v16587_v25 = vld [vmem:[#allocation36_spill] sm:$0xff]  ;;  %v16596_v20 = vld [vmem:[#allocation43_spill] sm:$0xff] }
 0x2f0   : > { %v5772_v17 = vrot.slane %v5576_v51, 2  ;;  %v12526_v33 = vadd.f32 %v7155_v61, %v6786_v14  ;;  %v4946_v16 = vadd.f32 %v16584_v19, %v4647_v29  ;;  %v16137_v53 = vrot.slane %v12517_v62, 2  ;;  %v16588_v51 = vld [vmem:[#allocation34_spill] sm:$0xff]  ;;  %v16589_v29 = vld [vmem:[#allocation40_spill] sm:$0xff] }
 0x2f1   : > { %v6230_v57 = vmul.f32 %v12129_v35, %v16585_v26  ;;  %v4948_v11 = vadd.f32 %v4852_v40, %v4649_v23  ;;  %v5216_v38 = vsel %vm3828_vm1, %v5213_v24, %v16134_v10  ;;  %v6461_v46 = vmul.f32 %v16587_v25, %v16585_v26  ;;  %v3465_v23 = vld [vmem:[#allocation4 + $0x68] sm:$0x7f] }
 0x2f2   : > { %v12541_v61 = vmul.f32 %v16587_v25, %v16588_v51  ;;  %v16139_v14 = vrot.slane %v12526_v33, 7  ;;  %v5405_v54 = vadd.f32 %v5213_v24, %v4946_v16  ;;  %v5775_v30 = vsel %vm4384_vm2, %v5772_v17, %v16137_v53 }
 0x2f3   : > { %v6954_v40 = vmul.f32 %v16589_v29, %v6877_v58  ;;  %v5407_v19 = vadd.f32 %v5216_v38, %v4948_v11  ;;  %v6591_v5 = vrot.slane %v6461_v46, 1  ;;  %v12551_v26 = vmul.f32 %v16589_v29, %v16588_v51  ;;  %v12558_v58 = vpop.f32.mrb[30].mxu0 }
 0x2f4   : > { %v16140_v10 = vrot.slane %v12541_v61, 1  ;;  %v7604_v24 = vsel %vm7588_vm3, %v7602_v49, %v16139_v14  ;;  %v6024_v16 = vadd.f32 %v5772_v17, %v5405_v54  ;;  %v3285_v53 = vadd.f32 %v12034_v28, %v12473_v37  ;;  %16590 = vst [vmem:[#allocation30_spill] sm:$0xff] %v12558_v58  ;;  %v12566_v49 = vpop.f32.mrb[31].mxu0  ;;  %v16592_v17 = vld [vmem:[#allocation35_spill] sm:$0xff]  ;;  %v16593_v37 = vld [vmem:[#allocation41_spill] sm:$0xff] }
 0x2f5   : > { %v7150_v32 = vrot.slane %v6954_v40, 2  ;;  %8537 = vmatprep.mubr.msk.f32.mxu1 %vm533_vm0, %v7604_v24  ;;  %v6026_v11 = vadd.f32 %v5775_v30, %v5407_v19  ;;  %v16141_v46 = vrot.slane %v12551_v26, 2  ;;  %v3572_v51 = vmul.f32 %v12039_v18, %v3465_v23  ;;  %16591 = vst [vmem:[#allocation42_spill] sm:$0xff] %v12566_v49  ;;  %v3464_v24 = vld [vmem:[#allocation4 + $0x60] sm:$0x7f] }
 0x2f6   : > { %v6594_v38 = vsel %vm3828_vm1, %v6591_v5, %v16140_v10  ;;  %v6324_v54 = vadd.f32 %v16592_v17, %v6024_v16  ;;  %v3349_v40 = vmax.f32 %v3285_v53, 0.0  ;;  %v16594_v14 = vrot.slane %v16593_v37, 2  ;;  %v4123_v53 = vld [vmem:[#allocation4 + $0x70] sm:$0x1] }
 0x2f7   : > { %v4855_v19 = vmul.f32 %v12070_v47, %v4748_v52  ;;  %v6326_v10 = vadd.f32 %v6230_v57, %v6026_v11  ;;  %v7153_v23 = vsel %vm4384_vm2, %v7150_v32, %v16141_v46  ;;  %v16595_v58 = vrot.slane %v12410_v36, 1  ;;  %v16597_v37 = vld [vmem:[#allocation44_spill] sm:$0xff]  ;;  %v4747_v57 = vld [vmem:[#allocation4 + $0xa0] sm:$0x7f] }
 0x2f8   : > { %v4404_v30 = vsel %vm4384_vm2, %v4399_v42, %v16594_v14  ;;  %v5780_v16 = vrot.slane %v16596_v20, 2  ;;  %v6783_v17 = vadd.f32 %v6591_v5, %v6324_v54  ;;  %3414 = vst [vmem:[#allocation4 + $0x1d0] sm:$0xff] %v3349_v40  ;;  %v6233_v7 = vmul.f32 %v12088_v1, %v6126_v59  ;;  %v12585_v14 = vpop.f32.mrb[0].mxu1  ;;  %v16600_v20 = vld [vmem:[#allocation38_spill] sm:$0xff]  ;;  %v5501_v5 = vld [vmem:[#allocation4 + $0xb0] sm:$0x1] }
 0x2f9   : > { %v4032_v49 = vadd.f32 %v16595_v58, %v3572_v51  ;;  %v7158_v42 = vrot.slane %v16597_v37, 2  ;;  %v3286_v52 = vadd.f32 %v12043_v43, %v12479_v2  ;;  %16598 = vst [vmem:[#allocation28_spill] sm:$0xff] %v12585_v14  ;;  %v6785_v11 = vadd.f32 %v6594_v38, %v6326_v10  ;;  %v6125_v54 = vld [vmem:[#allocation4 + $0xe0] sm:$0x7f]  ;;  %v12591_v40 = vpop.f32.mrb[1].mxu1 }
 0x2fa   : > { %v16599_v36 = vrot.slane %v12449_v39, 2  ;;  %v3571_v51 = vmul.f32 %v16600_v20, %v3464_v24  ;;  %16601 = vst [vmem:[#allocation45_spill] sm:$0xff] %v12591_v40  ;;  %v7402_v59 = vadd.f32 %v7150_v32, %v6783_v17  ;;  %v16602_v37 = vrot.slane %v12485_v45, 2  ;;  %v6879_v10 = vld [vmem:[#allocation4 + $0xf0] sm:$0x1] }
 0x2fb   : > { %v4652_v46 = vadd.f32 %v4404_v30, %v4032_v49  ;;  %v3350_v44 = vmax.f32 %v3286_v52, 0.0  ;;  %v4202_v14 = vmul.f32 %v12115_v48, %v4123_v53  ;;  %v12597_v38 = vadd.f32 %v7153_v23, %v6785_v11 }
 0x2fc   : > { %v5781_v58 = vsel %vm4384_vm2, %v16599_v36, %v5780_v16  ;;  %v7159_v2 = vsel %vm4384_vm2, %v16602_v37, %v7158_v42  ;;  %v16603_v49 = vrot.slane %v12245_v0, 1  ;;  %v4854_v24 = vmul.f32 %v12123_v15, %v4747_v57  ;;  %v3467_v16 = vld [vmem:[#allocation4 + $0x88] sm:$0x80]  ;;  %v12605_v42 = vpop.f32.mrb[32].mxu0 }
 0x2fd   : > { %v4951_v39 = vadd.f32 %v4855_v19, %v4652_v46  ;;  %v7599_v36 = vrot.slane %v7402_v59, 7  ;;  %3415 = vst.msk [vmem:[#allocation4 + $0x1d8] sm:$0xff] %vm533_vm0, %v3350_v44  ;;  %v4401_v32 = vrot.slane %v4202_v14, 2  ;;  %v5580_v45 = vmul.f32 %v16581_v63, %v5501_v5  ;;  %16604 = vst [vmem:[#allocation34_spill] sm:$0xff] %v12605_v42  ;;  %v12613_v52 = vpop.f32.mrb[33].mxu0 }
 0x2fe   : > { %v4031_v30 = vadd.f32 %v16603_v49, %v3571_v51  ;;  %v6232_v17 = vmul.f32 %v12129_v35, %v6125_v54  ;;  %v16146_v23 = vrot.slane %v12597_v38, 7  ;;  %v16605_v46 = vrot.slane %v12444_v22, 1  ;;  %16606 = vst [vmem:[#allocation40_spill] sm:$0xff] %v12613_v52  ;;  %v4750_v37 = vld [vmem:[#allocation4 + $0xc8] sm:$0x80]  ;;  %v16632_v52 = vld [vmem:[#allocation37_spill] sm:$0xff] }
 0x2ff   : > { %v6958_v0 = vmul.f32 %v16589_v29, %v6879_v10  ;;  %v3287_v53 = vadd.f32 %v12034_v28, %v12501_v8  ;;  %v16607_v44 = vrot.slane %v12252_v31, 2  ;;  %v5778_v14 = vrot.slane %v5580_v45, 2  ;;  %v4126_v8 = vld [vmem:[#allocation4 + $0x98] sm:$0xfe]  ;;  %v5506_v42 = vld [vmem:[#allocation4 + $0xf8] sm:$0x1] }
 0x300   : > { %v5410_v19 = vadd.f32 %v16605_v46, %v4951_v39  ;;  %v3288_v11 = vadd.f32 %v12043_v43, %v12509_v41  ;;  %v3574_v51 = vmul.f32 %v12039_v18, %v3467_v16  ;;  %v7601_v22 = vsel %vm7588_vm3, %v7599_v36, %v16146_v23  ;;  %v12629_v16 = vpop.f32.mrb[2].mxu1 }
 0x301   : > { %v4402_v57 = vsel %vm4384_vm2, %v16607_v44, %v4401_v32  ;;  %v7156_v59 = vrot.slane %v6958_v0, 2  ;;  %7974 = vmatmul.mubr.f32.gmra.mrb[36].mxu1 %v7601_v22  ;;  %v16608_v31 = vrot.slane %v12517_v62, 2  ;;  %v3351_v39 = vmax.f32 %v3287_v53, 0.0  ;;  %16609 = vst [vmem:[#allocation35_spill] sm:$0xff] %v12629_v16  ;;  %v12636_v46 = vpop.f32.mrb[3].mxu1 }
 0x302   : > { %v6029_v5 = vadd.f32 %v5781_v58, %v5410_v19  ;;  %v4651_v54 = vadd.f32 %v4402_v57, %v4031_v30  ;;  %v3352_v49 = vmax.f32 %v3288_v11, 0.0  ;;  %v3576_v41 = vmul.f32 %v12321_v34, %v12039_v18  ;;  %16611 = vst [vmem:[#allocation41_spill] sm:$0xff] %v12636_v46 }
 0x303   : > { %v5779_v10 = vsel %vm4384_vm2, %v16608_v31, %v5778_v14  ;;  %v16610_v58 = vrot.slane %v12551_v26, 2  ;;  %v3709_v36 = vmul.f32 %v12321_v34, %v16576_v21  ;;  %3416 = vst [vmem:[#allocation4 + $0x1e0] sm:$0xff] %v3351_v39  ;;  %v12641_v62 = vmul.f32 %v12346_v6, %v16576_v21  ;;  %v5504_v14 = vld [vmem:[#allocation4 + $0xd8] sm:$0xfe] }
 0x304   : > { %v6329_v32 = vadd.f32 %v6233_v7, %v6029_v5  ;;  %v4950_v45 = vadd.f32 %v4854_v24, %v4651_v54  ;;  %3417 = vst.msk [vmem:[#allocation4 + $0x1e8] sm:$0xff] %vm533_vm0, %v3352_v49  ;;  %v4205_v19 = vmul.f32 %v12052_v50, %v4126_v8  ;;  %v12646_v7 = vmul.f32 %v12346_v6, %v12052_v50  ;;  %v6128_v8 = vld [vmem:[#allocation4 + $0x108] sm:$0x80] }
 0x305   : > { %v7157_v30 = vsel %vm4384_vm2, %v16610_v58, %v7156_v59  ;;  %v4857_v26 = vmul.f32 %v12070_v47, %v4750_v37  ;;  %v16612_v24 = vrot.slane %v12467_v3, 1  ;;  %v16613_v0 = vrot.slane %v12507_v4, 1  ;;  %v12663_v37 = vpop.f32.mrb[34].mxu0 }
 0x306   : > { %v3842_v44 = vrot.slane %v3709_v36, 1  ;;  %v4859_v57 = vmul.f32 %v12438_v55, %v12070_v47  ;;  %v16144_v11 = vrot.slane %v12641_v62, 1  ;;  %v4406_v22 = vrot.slane %v4205_v19, 2  ;;  %16614 = vst [vmem:[#allocation43_spill] sm:$0xff] %v12663_v37  ;;  %v12674_v36 = vld [vmem:[#allocation4 + $0x118] sm:$0xff] }
 0x307   : > { %v6788_v34 = vadd.f32 %v16612_v24, %v6329_v32  ;;  %v5409_v53 = vadd.f32 %v16613_v0, %v4950_v45  ;;  %v16143_v5 = vrot.slane %v12646_v7, 2  ;;  %v5088_v6 = vmul.f32 %v12438_v55, %v12076_v13 }
 0x308   : > { %v4034_v3 = vadd.f32 %v3842_v44, %v3574_v51  ;;  %v12661_v4 = vmul.f32 %v12451_v12, %v12076_v13  ;;  %v3846_v31 = vsel %vm3828_vm1, %v3842_v44, %v16144_v11  ;;  %v12679_v24 = vmul.f32 %v12451_v12, %v12085_v9 }
 0x309   : > { %v7407_v54 = vadd.f32 %v7159_v2, %v6788_v34  ;;  %v6028_v59 = vadd.f32 %v5779_v10, %v5409_v53  ;;  %v4410_v39 = vsel %vm4384_vm2, %v4406_v22, %v16143_v5  ;;  %v5220_v49 = vrot.slane %v5088_v6, 1  ;;  %v12672_v10 = vpop.f32.mrb[35].mxu0  ;;  %v12682_v53 = vld [vmem:[#allocation4 + $0x128] sm:$0xff] }
 0x30a   : > { %v5583_v2 = vmul.f32 %v12085_v9, %v5504_v14  ;;  %16615 = vst [vmem:[#allocation44_spill] sm:$0xff] %v12672_v10  ;;  %v4036_v45 = vadd.f32 %v3846_v31, %v3576_v41  ;;  %v4654_v58 = vadd.f32 %v4406_v22, %v4034_v3  ;;  %v16142_v19 = vrot.slane %v12661_v4, 1 }
 0x30b   : > { %v7607_v51 = vrot.slane %v7407_v54, 7  ;;  %v6328_v32 = vadd.f32 %v6232_v17, %v6028_v59  ;;  %v6235_v0 = vmul.f32 %v12088_v1, %v6128_v8  ;;  %v16616_v44 = vrot.slane %v12526_v33, 7  ;;  %v6882_v54 = vld [vmem:[#allocation4 + $0x118] sm:$0xfe]  ;;  %v12689_v59 = vpop.f32.mrb[4].mxu1 }
 0x30c   : > { %v5783_v34 = vrot.slane %v5583_v2, 2  ;;  %v16617_v17 = vrot.slane %v12541_v61, 1  ;;  %v4656_v22 = vadd.f32 %v4410_v39, %v4036_v45  ;;  %v4953_v6 = vadd.f32 %v4857_v26, %v4654_v58  ;;  %16618 = vst [vmem:[#allocation38_spill] sm:$0xff] %v12689_v59  ;;  %v12700_v31 = vpop.f32.mrb[5].mxu1  ;;  %v3468_v45 = vld [vmem:[#allocation4 + $0x90] sm:$0xff] }
 0x30d   : > { %v7608_v14 = vsel %vm7588_vm3, %v16616_v44, %v7607_v51  ;;  %v5224_v3 = vsel %vm3828_vm1, %v5220_v49, %v16142_v19  ;;  %v16145_v8 = vrot.slane %v12679_v24, 2  ;;  %v6237_v33 = vmul.f32 %v12088_v1, %v12674_v36  ;;  %16619 = vst [vmem:[#allocation46_spill] sm:$0xff] %v12700_v31  ;;  %v12715_v19 = vpop.f32.mrb[36].mxu0  ;;  %v16623_v31 = vld [vmem:[#allocation29_spill] sm:$0xff] }
 0x30e   : > { %v6787_v41 = vadd.f32 %v16617_v17, %v6328_v32  ;;  %8538 = vmatprep.mubr.msk.f32.mxu1 %vm533_vm0, %v7608_v14  ;;  %v6466_v61 = vmul.f32 %v16566_v27, %v12674_v36  ;;  %v4955_v39 = vadd.f32 %v4859_v57, %v4656_v22  ;;  %v5412_v2 = vadd.f32 %v5220_v49, %v4953_v6  ;;  %v3466_v32 = vld [vmem:[#allocation4 + $0x80] sm:$0x80]  ;;  %v4125_v6 = vld [vmem:[#allocation4 + $0x90] sm:$0xfe]  ;;  %v12720_v23 = vpop.f32.mrb[37].mxu0 }
 0x30f   : > { %v12704_v51 = vmul.f32 %v16566_v27, %v12682_v53  ;;  %v5787_v58 = vsel %vm4384_vm2, %v5783_v34, %v16145_v8  ;;  %v6961_v14 = vmul.f32 %v12107_v56, %v6882_v54  ;;  %v12712_v17 = vmul.f32 %v12107_v56, %v12682_v53  ;;  %v3661_v22 = vld [vmem:[#allocation4 + $0xa0] sm:$0xff]  ;;  %16620 = vst [vmem:[#allocation47_spill] sm:$0xff] %v12715_v19 }
 0x310   : > { %v7406_v26 = vadd.f32 %v7157_v30, %v6787_v41  ;;  %v6598_v44 = vrot.slane %v6466_v61, 1  ;;  %v5414_v57 = vadd.f32 %v5224_v3, %v4955_v39  ;;  %v6031_v49 = vadd.f32 %v5783_v34, %v5412_v2  ;;  %v4749_v8 = vld [vmem:[#allocation4 + $0xc0] sm:$0x80]  ;;  %16621 = vst [vmem:[#allocation48_spill] sm:$0xff] %v12720_v23 }
 0x311   : > { %v16147_v41 = vrot.slane %v12704_v51, 1  ;;  %v7161_v5 = vrot.slane %v6961_v14, 2  ;;  %v16148_v11 = vrot.slane %v12712_v17, 2  ;;  %v3573_v61 = vmul.f32 %v16600_v20, %v3466_v32  ;;  %v12728_v14 = vld [vmem:[#allocation4 + $0xd0] sm:$0xff] }
 0x312   : > { %v7605_v30 = vrot.slane %v7406_v26, 7  ;;  %v3575_v54 = vmul.f32 %v16600_v20, %v3468_v45  ;;  %v16622_v26 = vrot.slane %v12597_v38, 7  ;;  %v6033_v3 = vadd.f32 %v5787_v58, %v5414_v57 }
 0x313   : > { %v6331_v39 = vadd.f32 %v6235_v0, %v6031_v49  ;;  %v6602_v2 = vsel %vm3828_vm1, %v6598_v44, %v16147_v41  ;;  %v7165_v32 = vsel %vm4384_vm2, %v7161_v5, %v16148_v11  ;;  %v3708_v19 = vmul.f32 %v16623_v31, %v3468_v45  ;;  %v12742_v49 = vld [vmem:[#allocation4 + $0xe0] sm:$0xff] }
 0x314   : > { %v7606_v34 = vsel %vm7588_vm3, %v16622_v26, %v7605_v30  ;;  %v12735_v23 = vmul.f32 %v16623_v31, %v3661_v22  ;;  %v4204_v38 = vmul.f32 %v12115_v48, %v4125_v6  ;;  %v6333_v58 = vadd.f32 %v6237_v33, %v6033_v3  ;;  %16624 = vst [vmem:[#allocation49_spill] sm:$0xff] %v12742_v49  ;;  %v5503_v26 = vld [vmem:[#allocation4 + $0xd0] sm:$0xfe] }
 0x315   : > { %7980 = vmatmul.mubr.f32.gmra.mrb[38].mxu1 %v7606_v34  ;;  %v6790_v0 = vadd.f32 %v6598_v44, %v6331_v39  ;;  %v12739_v30 = vmul.f32 %v12115_v48, %v3661_v22  ;;  %v4856_v57 = vmul.f32 %v12123_v15, %v4749_v8  ;;  %v12744_v34 = vpop.f32.mrb[6].mxu1  ;;  %v3841_v41 = vrot.slane %v3708_v19, 1 }
 0x316   : > { %16625 = vst [vmem:[#allocation50_spill] sm:$0xff] %v12744_v34  ;;  %v16149_v45 = vrot.slane %v12735_v23, 1  ;;  %v4405_v11 = vrot.slane %v4204_v38, 2  ;;  %v4858_v59 = vmul.f32 %v12123_v15, %v12728_v14  ;;  %v12749_v6 = vpop.f32.mrb[7].mxu1  ;;  %v6792_v33 = vadd.f32 %v6602_v2, %v6333_v58  ;;  %v6127_v34 = vld [vmem:[#allocation4 + $0x100] sm:$0x80] }
 0x317   : > { %16626 = vst [vmem:[#allocation51_spill] sm:$0xff] %v12749_v6  ;;  %v7409_v44 = vadd.f32 %v7161_v5, %v6790_v0  ;;  %v16150_v22 = vrot.slane %v12739_v30, 2  ;;  %v5087_v8 = vmul.f32 %v16580_v60, %v12728_v14  ;;  %v4033_v19 = vadd.f32 %v3841_v41, %v3573_v61  ;;  %v12767_v0 = vld [vmem:[#allocation4 + $0x110] sm:$0xff] }
 0x318   : > { %v3844_v3 = vsel %vm3828_vm1, %v3841_v41, %v16149_v45  ;;  %v12759_v39 = vmul.f32 %v16580_v60, %v12742_v49  ;;  %v5582_v38 = vmul.f32 %v16581_v63, %v5503_v26  ;;  %v12762_v6 = vadd.f32 %v7165_v32, %v6792_v33  ;;  %16627 = vst [vmem:[#allocation52_spill] sm:$0xff] %v12767_v0  ;;  %v12774_v26 = vld [vmem:[#allocation4 + $0x120] sm:$0xff]  ;;  %v12776_v32 = vpop.f32.mrb[38].mxu0 }
 0x319   : > { %v7612_v5 = vrot.slane %v7409_v44, 7  ;;  %v4035_v2 = vadd.f32 %v3844_v3, %v3575_v54  ;;  %v4408_v58 = vsel %vm4384_vm2, %v4405_v11, %v16150_v22  ;;  %v4653_v10 = vadd.f32 %v4405_v11, %v4033_v19  ;;  %16628 = vst [vmem:[#allocation53_spill] sm:$0xff] %v12774_v26  ;;  %16629 = vst [vmem:[#allocation54_spill] sm:$0xff] %v12776_v32  ;;  %v6881_v22 = vld [vmem:[#allocation4 + $0x110] sm:$0xfe]  ;;  %v12780_v46 = vpop.f32.mrb[39].mxu0 }
 0x31a   : > { %v5219_v45 = vrot.slane %v5087_v8, 1  ;;  %v16151_v41 = vrot.slane %v12759_v39, 1  ;;  %v12772_v61 = vmul.f32 %v16581_v63, %v12742_v49  ;;  %v16152_v54 = vrot.slane %v12762_v6, 7  ;;  %16630 = vst [vmem:[#allocation55_spill] sm:$0xff] %v12780_v46  ;;  %v3470_v60 = vld [vmem:[#allocation4 + $0xa0] sm:$0x7f] }
 0x31b   : > { %v4655_v33 = vadd.f32 %v4408_v58, %v4035_v2  ;;  %v5782_v44 = vrot.slane %v5582_v38, 2  ;;  %v6234_v3 = vmul.f32 %v12129_v35, %v6127_v34  ;;  %v4952_v11 = vadd.f32 %v4856_v57, %v4653_v10  ;;  %v3471_v57 = vld [vmem:[#allocation4 + $0xa8] sm:$0x7f] }
 0x31c   : > { %v5222_v8 = vsel %vm3828_vm1, %v5219_v45, %v16151_v41  ;;  %v16153_v19 = vrot.slane %v12772_v61, 2  ;;  %v6236_v37 = vmul.f32 %v12129_v35, %v12767_v0  ;;  %v7614_v2 = vsel %vm7588_vm3, %v7612_v5, %v16152_v54  ;;  %v4128_v5 = vld [vmem:[#allocation4 + $0xb8] sm:$0x1] }
 0x31d   : > { %v4954_v38 = vadd.f32 %v4858_v59, %v4655_v33  ;;  %v6465_v34 = vmul.f32 %v16587_v25, %v12767_v0  ;;  %v12795_v10 = vmul.f32 %v16587_v25, %v12774_v26  ;;  %8539 = vmatprep.mubr.msk.f32.mxu1 %vm533_vm0, %v7614_v2  ;;  %v5411_v58 = vadd.f32 %v5219_v45, %v4952_v11  ;;  %v12806_v33 = vpop.f32.mrb[8].mxu1  ;;  %v4754_v11 = vld [vmem:[#allocation4 + $0xe8] sm:$0x7f] }
 0x31e   : > { %v5785_v41 = vsel %vm4384_vm2, %v5782_v44, %v16153_v19  ;;  %v6960_v46 = vmul.f32 %v16589_v29, %v6881_v22  ;;  %v12804_v59 = vmul.f32 %v16589_v29, %v12774_v26  ;;  %16631 = vst [vmem:[#allocation56_spill] sm:$0xff] %v12806_v33  ;;  %v3289_v45 = vadd.f32 %v12034_v28, %v16632_v52  ;;  %v6132_v25 = vld [vmem:[#allocation4 + $0x128] sm:$0x7f]  ;;  %v6884_v33 = vld [vmem:[#allocation4 + $0x138] sm:$0x1] }
 0x31f   : > { %v5413_v54 = vadd.f32 %v5222_v8, %v4954_v38  ;;  %v6597_v32 = vrot.slane %v6465_v34, 1  ;;  %v16160_v16 = vrot.slane %v12795_v10, 1  ;;  %v6030_v2 = vadd.f32 %v5782_v44, %v5411_v58 }
 0x320   : > { %v7160_v40 = vrot.slane %v6960_v46, 2  ;;  %v16163_v19 = vrot.slane %v12804_v59, 2  ;;  %v3578_v22 = vmul.f32 %v12039_v18, %v3471_v57  ;;  %v3353_v38 = vmax.f32 %v3289_v45, 0.0 }
 0x321   : > { %v6032_v26 = vadd.f32 %v5785_v41, %v5413_v54  ;;  %v6600_v8 = vsel %vm3828_vm1, %v6597_v32, %v16160_v16  ;;  %v4209_v34 = vmul.f32 %v12052_v50, %v4128_v5  ;;  %v6330_v52 = vadd.f32 %v6234_v3, %v6030_v2  ;;  %v4127_v41 = vld [vmem:[#allocation4 + $0xb0] sm:$0x1]  ;;  %v16634_v2 = vld [vmem:[#allocation39_spill] sm:$0xff] }
 0x322   : > { %v7163_v46 = vsel %vm4384_vm2, %v7160_v40, %v16163_v19  ;;  %v16633_v44 = vrot.slane %v12641_v62, 1  ;;  %v4861_v58 = vmul.f32 %v12070_v47, %v4754_v11  ;;  %3418 = vst [vmem:[#allocation4 + $0x210] sm:$0xff] %v3353_v38  ;;  %v5587_v45 = vmul.f32 %v12085_v9, %v5506_v42  ;;  %v4753_v38 = vld [vmem:[#allocation4 + $0xe0] sm:$0x7f] }
 0x323   : > { %v6332_v54 = vadd.f32 %v6236_v37, %v6032_v26  ;;  %v4413_v0 = vrot.slane %v4209_v34, 2  ;;  %v6239_v5 = vmul.f32 %v12088_v1, %v6132_v25  ;;  %v6789_v16 = vadd.f32 %v6597_v32, %v6330_v52  ;;  %v5505_v52 = vld [vmem:[#allocation4 + $0xf0] sm:$0x1] }
 0x324   : > { %v4038_v57 = vadd.f32 %v16633_v44, %v3578_v22  ;;  %v6965_v3 = vmul.f32 %v12107_v56, %v6884_v33  ;;  %v3290_v49 = vadd.f32 %v12043_v43, %v16634_v2  ;;  %v3577_v19 = vmul.f32 %v16600_v20, %v3470_v60  ;;  %v6131_v33 = vld [vmem:[#allocation4 + $0x120] sm:$0x7f] }
 0x325   : > { %v6791_v62 = vadd.f32 %v6600_v8, %v6332_v54  ;;  %v16635_v22 = vrot.slane %v12646_v7, 2  ;;  %v5790_v37 = vrot.slane %v5587_v45, 2  ;;  %v4208_v26 = vmul.f32 %v12115_v48, %v4127_v41  ;;  %v6883_v54 = vld [vmem:[#allocation4 + $0x130] sm:$0x1]  ;;  %v12840_v45 = vpop.f32.mrb[9].mxu1  ;;  %v12842_v41 = vpop.f32.mrb[40].mxu0 }
 0x326   : > { %v7408_v42 = vadd.f32 %v7160_v40, %v6789_v16  ;;  %v7168_v25 = vrot.slane %v6965_v3, 2  ;;  %v3354_v32 = vmax.f32 %v3290_v49, 0.0  ;;  %v16636_v2 = vrot.slane %v12679_v24, 2  ;;  %16638 = vst [vmem:[#allocation37_spill] sm:$0xff] %v12840_v45  ;;  %16639 = vst [vmem:[#allocation39_spill] sm:$0xff] %v12842_v41 }
 0x327   : > { %v4414_v11 = vsel %vm4384_vm2, %v16635_v22, %v4413_v0  ;;  %v12833_v44 = vadd.f32 %v7163_v46, %v6791_v62  ;;  %v16637_v7 = vrot.slane %v12735_v23, 1  ;;  %v4411_v0 = vrot.slane %v4208_v26, 2  ;;  %v16643_v26 = vld [vmem:[#allocation30_spill] sm:$0xff]  ;;  %v5510_v41 = vld [vmem:[#allocation4 + $0x138] sm:$0x1] }
 0x328   : > { %v4658_v34 = vadd.f32 %v4414_v11, %v4038_v57  ;;  %v5791_v60 = vsel %vm4384_vm2, %v16636_v2, %v5790_v37  ;;  %v7609_v40 = vrot.slane %v7408_v42, 7  ;;  %v16640_v49 = vrot.slane %v12712_v17, 2  ;;  %3419 = vst.msk [vmem:[#allocation4 + $0x218] sm:$0xff] %vm533_vm0, %v3354_v32  ;;  %v3473_v57 = vld [vmem:[#allocation4 + $0xc8] sm:$0x80] }
 0x329   : > { %v4037_v8 = vadd.f32 %v16637_v7, %v3577_v19  ;;  %v4860_v24 = vmul.f32 %v12123_v15, %v4753_v38  ;;  %v7610_v23 = vrot.slane %v12833_v44, 7  ;;  %v16641_v19 = vrot.slane %v12739_v30, 2  ;;  %v4130_v7 = vld [vmem:[#allocation4 + $0xd8] sm:$0xfe] }
 0x32a   : > { %v4957_v16 = vadd.f32 %v4861_v58, %v4658_v34  ;;  %v7169_v46 = vsel %vm4384_vm2, %v16640_v49, %v7168_v25  ;;  %v5586_v62 = vmul.f32 %v16581_v63, %v5505_v52  ;;  %v6238_v22 = vmul.f32 %v12129_v35, %v6131_v33  ;;  %v16644_v34 = vld [vmem:[#allocation42_spill] sm:$0xff] }
 0x32b   : > { %v4412_v3 = vsel %vm4384_vm2, %v16641_v19, %v4411_v0  ;;  %v16642_v58 = vrot.slane %v12661_v4, 1  ;;  %v6964_v37 = vmul.f32 %v16589_v29, %v6883_v54  ;;  %v3291_v38 = vadd.f32 %v12034_v28, %v16643_v26 }
 0x32c   : > { %v4657_v11 = vadd.f32 %v4412_v3, %v4037_v8  ;;  %v7611_v42 = vsel %vm7588_vm3, %v7609_v40, %v7610_v23  ;;  %v5788_v30 = vrot.slane %v5586_v62, 2  ;;  %v3292_v25 = vadd.f32 %v12043_v43, %v16644_v34  ;;  %v4756_v8 = vld [vmem:[#allocation4 + $0x108] sm:$0x80] }
 0x32d   : > { %v5416_v17 = vadd.f32 %v16642_v58, %v4957_v16  ;;  %v3580_v32 = vmul.f32 %v12039_v18, %v3473_v57  ;;  %7986 = vmatmul.mubr.f32.gmra.mrb[40].mxu1 %v7611_v42  ;;  %v7166_v33 = vrot.slane %v6964_v37, 2  ;;  %v3355_v2 = vmax.f32 %v3291_v38, 0.0 }
 0x32e   : > { %v4956_v4 = vadd.f32 %v4860_v24, %v4657_v11  ;;  %v16645_v0 = vrot.slane %v12772_v61, 2  ;;  %v3356_v16 = vmax.f32 %v3292_v25, 0.0  ;;  %v3582_v40 = vmul.f32 %v12438_v55, %v12039_v18 }
 0x32f   : > { %v6035_v52 = vadd.f32 %v5791_v60, %v5416_v17  ;;  %v3713_v49 = vmul.f32 %v12438_v55, %v16576_v21  ;;  %v16646_v57 = vrot.slane %v12759_v39, 1  ;;  %v16647_v24 = vrot.slane %v12804_v59, 2  ;;  %3420 = vst [vmem:[#allocation4 + $0x220] sm:$0xff] %v3355_v2 }
 0x330   : > { %v5789_v54 = vsel %vm4384_vm2, %v16645_v0, %v5788_v30  ;;  %v12880_v61 = vmul.f32 %v12451_v12, %v16576_v21  ;;  %3421 = vst.msk [vmem:[#allocation4 + $0x228] sm:$0xff] %vm533_vm0, %v3356_v16  ;;  %v4211_v58 = vmul.f32 %v12052_v50, %v4130_v7  ;;  %v12886_v55 = vmul.f32 %v12451_v12, %v12052_v50  ;;  %v5508_v12 = vld [vmem:[#allocation4 + $0x118] sm:$0xfe] }
 0x331   : > { %v6335_v19 = vadd.f32 %v6239_v5, %v6035_v52  ;;  %v5415_v60 = vadd.f32 %v16646_v57, %v4956_v4  ;;  %v7167_v3 = vsel %vm4384_vm2, %v16647_v24, %v7166_v33  ;;  %v3848_v62 = vrot.slane %v3713_v49, 1  ;;  %v6134_v4 = vld [vmem:[#allocation4 + $0x148] sm:$0x80] }
 0x332   : > { %v4863_v39 = vmul.f32 %v12070_v47, %v4756_v8  ;;  %v16648_v59 = vrot.slane %v12704_v51, 1  ;;  %v16170_v11 = vrot.slane %v12880_v61, 1  ;;  %v4865_v37 = vmul.f32 %v12674_v36, %v12070_v47  ;;  %v12907_v8 = vpop.f32.mrb[41].mxu0 }
 0x333   : > { %v6034_v17 = vadd.f32 %v5789_v54, %v5415_v60  ;;  %v4040_v26 = vadd.f32 %v3848_v62, %v3580_v32  ;;  %v4416_v38 = vrot.slane %v4211_v58, 2  ;;  %v16169_v42 = vrot.slane %v12886_v55, 2  ;;  %16649 = vst [vmem:[#allocation30_spill] sm:$0xff] %v12907_v8  ;;  %v6886_v58 = vld [vmem:[#allocation4 + $0x158] sm:$0xfe] }
 0x334   : > { %v6794_v5 = vadd.f32 %v16648_v59, %v6335_v19  ;;  %v5092_v30 = vmul.f32 %v12674_v36, %v12076_v13  ;;  %v3852_v51 = vsel %vm3828_vm1, %v3848_v62, %v16170_v11  ;;  %v12902_v52 = vmul.f32 %v12682_v53, %v12076_v13  ;;  %v12915_v19 = vld [vmem:[#allocation4 + $0x158] sm:$0xff]  ;;  %v12922_v62 = vld [vmem:[#allocation4 + $0x168] sm:$0xff]  ;;  %v6885_v11 = vld [vmem:[#allocation4 + $0x150] sm:$0xfe] }
 0x335   : > { %v6334_v25 = vadd.f32 %v6238_v22, %v6034_v17  ;;  %v4042_v33 = vadd.f32 %v3852_v51, %v3582_v40  ;;  %v4420_v32 = vsel %vm4384_vm2, %v4416_v38, %v16169_v42  ;;  %v4660_v2 = vadd.f32 %v4416_v38, %v4040_v26 }
 0x336   : > { %v7413_v34 = vadd.f32 %v7169_v46, %v6794_v5  ;;  %v5226_v7 = vrot.slane %v5092_v30, 1  ;;  %v12909_v46 = vpop.f32.mrb[10].mxu1  ;;  %v16651_v0 = vrot.slane %v12795_v10, 1  ;;  %v16165_v16 = vrot.slane %v12902_v52, 1 }
 0x337   : > { %16650 = vst [vmem:[#allocation42_spill] sm:$0xff] %v12909_v46  ;;  %v5589_v49 = vmul.f32 %v12085_v9, %v5508_v12  ;;  %v4662_v40 = vadd.f32 %v4420_v32, %v4042_v33  ;;  %v4959_v57 = vadd.f32 %v4863_v39, %v4660_v2  ;;  %v12919_v60 = vmul.f32 %v12682_v53, %v12085_v9 }
 0x338   : > { %v7617_v22 = vrot.slane %v7413_v34, 7  ;;  %v6793_v54 = vadd.f32 %v16651_v0, %v6334_v25  ;;  %v6241_v24 = vmul.f32 %v12088_v1, %v6134_v4  ;;  %v16652_v10 = vrot.slane %v12762_v6, 7  ;;  %v12934_v34 = vpop.f32.mrb[11].mxu1  ;;  %v12936_v6 = vpop.f32.mrb[42].mxu0  ;;  %v3472_v4 = vld [vmem:[#allocation4 + $0xc0] sm:$0x80] }
 0x339   : > { %v5230_v17 = vsel %vm3828_vm1, %v5226_v7, %v16165_v16  ;;  %v5793_v26 = vrot.slane %v5589_v49, 2  ;;  %v4961_v39 = vadd.f32 %v4865_v37, %v4662_v40  ;;  %v5418_v38 = vadd.f32 %v5226_v7, %v4959_v57  ;;  %16653 = vst [vmem:[#allocation57_spill] sm:$0xff] %v12934_v34  ;;  %16654 = vst [vmem:[#allocation58_spill] sm:$0xff] %v12936_v6  ;;  %v12945_v33 = vpop.f32.mrb[43].mxu0  ;;  %v4129_v57 = vld [vmem:[#allocation4 + $0xd0] sm:$0xfe] }
 0x33a   : > { %v7618_v59 = vsel %vm7588_vm3, %v16652_v10, %v7617_v22  ;;  %v7412_v5 = vadd.f32 %v7167_v3, %v6793_v54  ;;  %v16168_v30 = vrot.slane %v12919_v60, 2  ;;  %v6243_v12 = vmul.f32 %v12088_v1, %v12915_v19  ;;  %16655 = vst [vmem:[#allocation59_spill] sm:$0xff] %v12945_v33  ;;  %v16658_v16 = vld [vmem:[#allocation31_spill] sm:$0xff]  ;;  %v13001_v42 = vpop.f32.mrb[12].mxu1 }
 0x33b   : > { %8540 = vmatprep.mubr.msk.f32.mxu1 %vm533_vm0, %v7618_v59  ;;  %v6470_v3 = vmul.f32 %v16566_v27, %v12915_v19  ;;  %v12942_v51 = vmul.f32 %v16566_v27, %v12922_v62  ;;  %v6967_v37 = vmul.f32 %v12107_v56, %v6886_v58  ;;  %v5420_v32 = vadd.f32 %v5230_v17, %v4961_v39  ;;  %v4755_v17 = vld [vmem:[#allocation4 + $0x100] sm:$0x80]  ;;  %v16656_v39 = vld [vmem:[#allocation49_spill] sm:$0xff]  ;;  %v4760_v34 = vld [vmem:[#allocation4 + $0x128] sm:$0x7f] }
 0x33c   : > { %v7615_v25 = vrot.slane %v7412_v5, 7  ;;  %v5797_v2 = vsel %vm4384_vm2, %v5793_v26, %v16168_v30  ;;  %v6037_v7 = vadd.f32 %v5793_v26, %v5418_v38  ;;  %v12952_v22 = vmul.f32 %v12107_v56, %v12922_v62 }
 0x33d   : > { %v6604_v54 = vrot.slane %v6470_v3, 1  ;;  %v16164_v49 = vrot.slane %v12942_v51, 1  ;;  %v7171_v40 = vrot.slane %v6967_v37, 2  ;;  %v6039_v58 = vadd.f32 %v5797_v2, %v5420_v32 }
 0x33e   : > { %v7616_v0 = vsel %vm7588_vm3, %v7610_v23, %v7615_v25  ;;  %v6337_v10 = vadd.f32 %v6241_v24, %v6037_v7  ;;  %v16166_v59 = vrot.slane %v12952_v22, 2  ;;  %v3579_v5 = vmul.f32 %v16600_v20, %v3472_v4 }
 0x33f   : > { %7992 = vmatmul.mubr.f32.gmra.mrb[42].mxu1 %v7616_v0  ;;  %v6608_v26 = vsel %vm3828_vm1, %v6604_v54, %v16164_v49  ;;  %v3581_v44 = vmul.f32 %v12728_v14, %v16600_v20  ;;  %v3712_v23 = vmul.f32 %v12728_v14, %v16623_v31  ;;  %v12969_v38 = vmul.f32 %v16656_v39, %v16623_v31 }
 0x340   : > { %v6339_v24 = vadd.f32 %v6243_v12, %v6039_v58  ;;  %v6796_v25 = vadd.f32 %v6604_v54, %v6337_v10  ;;  %v7175_v3 = vsel %vm4384_vm2, %v7171_v40, %v16166_v59  ;;  %v4210_v37 = vmul.f32 %v12115_v48, %v4129_v57  ;;  %v16657_v12 = vld [vmem:[#allocation52_spill] sm:$0xff] }
 0x341   : > { %v3847_v4 = vrot.slane %v3712_v23, 1  ;;  %v16167_v32 = vrot.slane %v12969_v38, 1  ;;  %v12978_v2 = vmul.f32 %v16656_v39, %v12115_v48  ;;  %v4862_v14 = vmul.f32 %v12123_v15, %v4755_v17  ;;  %v5507_v58 = vld [vmem:[#allocation4 + $0x110] sm:$0xfe]  ;;  %16661 = vst [vmem:[#allocation52_spill] sm:$0xff] %v13001_v42 }
 0x342   : > { %v6798_v7 = vadd.f32 %v6608_v26, %v6339_v24  ;;  %v7415_v0 = vadd.f32 %v7171_v40, %v6796_v25  ;;  %v4415_v49 = vrot.slane %v4210_v37, 2  ;;  %v4864_v54 = vmul.f32 %v16657_v12, %v12123_v15  ;;  %v16659_v40 = vld [vmem:[#allocation53_spill] sm:$0xff]  ;;  %v6133_v25 = vld [vmem:[#allocation4 + $0x140] sm:$0x80] }
 0x343   : > { %v3850_v57 = vsel %vm3828_vm1, %v3847_v4, %v16167_v32  ;;  %v4039_v10 = vadd.f32 %v3847_v4, %v3579_v5  ;;  %v16171_v23 = vrot.slane %v12978_v2, 2  ;;  %v5091_v39 = vmul.f32 %v16657_v12, %v16658_v16  ;;  %v12995_v37 = vld [vmem:[#allocation4 + $0x150] sm:$0xff] }
 0x344   : > { %v12989_v59 = vadd.f32 %v7175_v3, %v6798_v7  ;;  %v7622_v17 = vrot.slane %v7415_v0, 7  ;;  %v4041_v26 = vadd.f32 %v3850_v57, %v3581_v44  ;;  %v12993_v24 = vmul.f32 %v16659_v40, %v16658_v16  ;;  %16660 = vst [vmem:[#allocation49_spill] sm:$0xff] %v12995_v37  ;;  %v13009_v57 = vld [vmem:[#allocation4 + $0x160] sm:$0xff] }
 0x345   : > { %v4418_v5 = vsel %vm4384_vm2, %v4415_v49, %v16171_v23  ;;  %v4659_v4 = vadd.f32 %v4415_v49, %v4039_v10  ;;  %v5225_v32 = vrot.slane %v5091_v39, 1  ;;  %v5588_v30 = vmul.f32 %v16581_v63, %v5507_v58  ;;  %16662 = vst [vmem:[#allocation60_spill] sm:$0xff] %v13009_v57 }
 0x346   : > { %v16172_v3 = vrot.slane %v12989_v59, 7  ;;  %v4661_v44 = vadd.f32 %v4418_v5, %v4041_v26  ;;  %v16173_v7 = vrot.slane %v12993_v24, 1  ;;  %v13007_v0 = vmul.f32 %v16659_v40, %v16581_v63 }
 0x347   : > { %v4958_v33 = vadd.f32 %v4862_v14, %v4659_v4  ;;  %v5792_v23 = vrot.slane %v5588_v30, 2  ;;  %v6240_v49 = vmul.f32 %v12129_v35, %v6133_v25  ;;  %v6242_v58 = vmul.f32 %v12129_v35, %v12995_v37  ;;  %v16663_v30 = vld [vmem:[#allocation36_spill] sm:$0xff] }
 0x348   : > { %v7624_v10 = vsel %vm7588_vm3, %v7622_v17, %v16172_v3  ;;  %v4960_v39 = vadd.f32 %v4864_v54, %v4661_v44  ;;  %v5228_v26 = vsel %vm3828_vm1, %v5225_v32, %v16173_v7  ;;  %v16174_v5 = vrot.slane %v13007_v0, 2  ;;  %v3477_v17 = vld [vmem:[#allocation4 + $0xe8] sm:$0x7f]  ;;  %v4132_v7 = vld [vmem:[#allocation4 + $0xf8] sm:$0x1] }
 0x349   : > { %8541 = vmatprep.mubr.msk.f32.mxu1 %vm533_vm0, %v7624_v10  ;;  %v5417_v14 = vadd.f32 %v5225_v32, %v4958_v33  ;;  %v6469_v25 = vmul.f32 %v16663_v30, %v12995_v37  ;;  %v13026_v4 = vmul.f32 %v16663_v30, %v13009_v57  ;;  %v6966_v42 = vmul.f32 %v16589_v29, %v6885_v11  ;;  %v16664_v33 = vld [vmem:[#allocation28_spill] sm:$0xff]  ;;  %v16665_v32 = vld [vmem:[#allocation34_spill] sm:$0xff] }
 0x34a   : > { %v5419_v54 = vadd.f32 %v5228_v26, %v4960_v39  ;;  %v5795_v44 = vsel %vm4384_vm2, %v5792_v23, %v16174_v5  ;;  %v13034_v3 = vmul.f32 %v16589_v29, %v13009_v57  ;;  %v3155_v10 = vadd.f32 %v16665_v32, %v16664_v33  ;;  %v6138_v30 = vld [vmem:[#allocation4 + $0x168] sm:$0x7f] }
 0x34b   : > { %v6036_v6 = vadd.f32 %v5792_v23, %v5417_v14  ;;  %v6603_v46 = vrot.slane %v6469_v25, 1  ;;  %v16179_v8 = vrot.slane %v13026_v4, 1  ;;  %v7170_v11 = vrot.slane %v6966_v42, 2  ;;  %v6888_v25 = vld [vmem:[#allocation4 + $0x178] sm:$0x1] }
 0x34c   : > { %v6038_v45 = vadd.f32 %v5795_v44, %v5419_v54  ;;  %v16183_v39 = vrot.slane %v13034_v3, 2  ;;  %v3293_v26 = vadd.f32 %v12034_v28, %v3155_v10  ;;  %v3584_v5 = vmul.f32 %v12039_v18, %v3477_v17  ;;  %v3476_v42 = vld [vmem:[#allocation4 + $0xe0] sm:$0x7f] }
 0x34d   : > { %v6336_v57 = vadd.f32 %v6240_v49, %v6036_v6  ;;  %v6606_v33 = vsel %vm3828_vm1, %v6603_v46, %v16179_v8  ;;  %v4215_v23 = vmul.f32 %v12052_v50, %v4132_v7  ;;  %v4867_v14 = vmul.f32 %v12070_v47, %v4760_v34  ;;  %v4131_v6 = vld [vmem:[#allocation4 + $0xf0] sm:$0x1] }
 0x34e   : > { %v6338_v54 = vadd.f32 %v6242_v58, %v6038_v45  ;;  %v7173_v44 = vsel %vm4384_vm2, %v7170_v11, %v16183_v39  ;;  %v3357_v32 = vmax.f32 %v3293_v26, 0.0  ;;  %v16666_v17 = vrot.slane %v12880_v61, 1  ;;  %v16667_v45 = vld [vmem:[#allocation45_spill] sm:$0xff]  ;;  %v16668_v58 = vld [vmem:[#allocation40_spill] sm:$0xff] }
 0x34f   : > { %v6795_v49 = vadd.f32 %v6603_v46, %v6336_v57  ;;  %v4423_v16 = vrot.slane %v4215_v23, 2  ;;  %v5593_v8 = vmul.f32 %v12085_v9, %v5510_v41  ;;  %v6245_v7 = vmul.f32 %v12088_v1, %v6138_v30  ;;  %v5509_v41 = vld [vmem:[#allocation4 + $0x130] sm:$0x1] }
 0x350   : > { %v4044_v10 = vadd.f32 %v16666_v17, %v3584_v5  ;;  %v6797_v37 = vadd.f32 %v6606_v33, %v6338_v54  ;;  %3422 = vst [vmem:[#allocation4 + $0x250] sm:$0xff] %v3357_v32  ;;  %v6971_v34 = vmul.f32 %v12107_v56, %v6888_v25  ;;  %v3157_v40 = vadd.f32 %v16668_v58, %v16667_v45  ;;  %v4759_v54 = vld [vmem:[#allocation4 + $0x120] sm:$0x7f]  ;;  %v13074_v45 = vpop.f32.mrb[13].mxu1  ;;  %v13076_v58 = vpop.f32.mrb[44].mxu0 }
 0x351   : > { %v3583_v39 = vmul.f32 %v16600_v20, %v3476_v42  ;;  %v7414_v26 = vadd.f32 %v7170_v11, %v6795_v49  ;;  %v16669_v61 = vrot.slane %v12886_v55, 2  ;;  %v5800_v46 = vrot.slane %v5593_v8, 2  ;;  %v6137_v32 = vld [vmem:[#allocation4 + $0x160] sm:$0x7f]  ;;  %v6887_v49 = vld [vmem:[#allocation4 + $0x170] sm:$0x1] }
 0x352   : > { %v4214_v57 = vmul.f32 %v12115_v48, %v4131_v6  ;;  %v13062_v23 = vadd.f32 %v7173_v44, %v6797_v37  ;;  %v7178_v33 = vrot.slane %v6971_v34, 2  ;;  %v3294_v25 = vadd.f32 %v12043_v43, %v3157_v40  ;;  %v3479_v34 = vld [vmem:[#allocation4 + $0x108] sm:$0x80]  ;;  %16673 = vst [vmem:[#allocation28_spill] sm:$0xff] %v13074_v45  ;;  %16674 = vst [vmem:[#allocation34_spill] sm:$0xff] %v13076_v58 }
 0x353   : > { %v4424_v5 = vsel %vm4384_vm2, %v16669_v61, %v4423_v16  ;;  %v7619_v17 = vrot.slane %v7414_v26, 7  ;;  %v16670_v42 = vrot.slane %v12919_v60, 2  ;;  %v16671_v55 = vrot.slane %v12969_v38, 1 }
 0x354   : > { %v4664_v30 = vadd.f32 %v4424_v5, %v4044_v10  ;;  %v4421_v8 = vrot.slane %v4214_v57, 2  ;;  %v7620_v6 = vrot.slane %v13062_v23, 7  ;;  %v16672_v44 = vrot.slane %v12952_v22, 2 }
 0x355   : > { %v5801_v11 = vsel %vm4384_vm2, %v16670_v42, %v5800_v46  ;;  %v4043_v16 = vadd.f32 %v16671_v55, %v3583_v39  ;;  %v3358_v40 = vmax.f32 %v3294_v25, 0.0  ;;  %v16675_v60 = vrot.slane %v12978_v2, 2 }
 0x356   : > { %v4963_v37 = vadd.f32 %v4867_v14, %v4664_v30  ;;  %v7179_v10 = vsel %vm4384_vm2, %v16672_v44, %v7178_v33  ;;  %v4866_v39 = vmul.f32 %v12123_v15, %v4759_v54  ;;  %v5592_v26 = vmul.f32 %v16581_v63, %v5509_v41  ;;  %v16677_v30 = vld [vmem:[#allocation35_spill] sm:$0xff]  ;;  %v16679_v41 = vld [vmem:[#allocation41_spill] sm:$0xff]  ;;  %v16680_v54 = vld [vmem:[#allocation44_spill] sm:$0xff] }
 0x357   : > { %v4422_v38 = vsel %vm4384_vm2, %v16675_v60, %v4421_v8  ;;  %v6244_v14 = vmul.f32 %v12129_v35, %v6137_v32  ;;  %v7621_v22 = vsel %vm7588_vm3, %v7619_v17, %v7620_v6  ;;  %v16676_v61 = vrot.slane %v12902_v52, 1  ;;  %3423 = vst.msk [vmem:[#allocation4 + $0x258] sm:$0xff] %vm533_vm0, %v3358_v40  ;;  %v16678_v33 = vld [vmem:[#allocation43_spill] sm:$0xff] }
 0x358   : > { %v4663_v46 = vadd.f32 %v4422_v38, %v4043_v16  ;;  %v6970_v2 = vmul.f32 %v16589_v29, %v6887_v49  ;;  %7998 = vmatmul.mubr.f32.gmra.mrb[44].mxu1 %v7621_v22  ;;  %v5798_v57 = vrot.slane %v5592_v26, 2  ;;  %v3161_v25 = vadd.f32 %v16678_v33, %v16677_v30  ;;  %v4762_v22 = vld [vmem:[#allocation4 + $0x148] sm:$0x80] }
 0x359   : > { %v5422_v5 = vadd.f32 %v16676_v61, %v4963_v37  ;;  %v3163_v32 = vadd.f32 %v16680_v54, %v16679_v41  ;;  %v3586_v42 = vmul.f32 %v12039_v18, %v3479_v34  ;;  %v3588_v52 = vmul.f32 %v12674_v36, %v12039_v18  ;;  %v4134_v37 = vld [vmem:[#allocation4 + $0x118] sm:$0xfe] }
 0x35a   : > { %v4962_v17 = vadd.f32 %v4866_v39, %v4663_v46  ;;  %v7176_v8 = vrot.slane %v6970_v2, 2  ;;  %v16681_v16 = vrot.slane %v13007_v0, 2  ;;  %v3295_v44 = vadd.f32 %v12034_v28, %v3161_v25  ;;  %v5512_v54 = vld [vmem:[#allocation4 + $0x158] sm:$0xfe] }
 0x35b   : > { %v6041_v55 = vadd.f32 %v5801_v11, %v5422_v5  ;;  %v3296_v40 = vadd.f32 %v12043_v43, %v3163_v32  ;;  %v3717_v60 = vmul.f32 %v12674_v36, %v16576_v21  ;;  %v16682_v11 = vrot.slane %v12993_v24, 1 }
 0x35c   : > { %v5799_v49 = vsel %vm4384_vm2, %v16681_v16, %v5798_v57  ;;  %v16683_v39 = vrot.slane %v13034_v3, 2  ;;  %v13112_v0 = vmul.f32 %v12682_v53, %v16576_v21  ;;  %v3359_v61 = vmax.f32 %v3295_v44, 0.0  ;;  %v13136_v16 = vpop.f32.mrb[45].mxu0 }
 0x35d   : > { %v6341_v38 = vadd.f32 %v6245_v7, %v6041_v55  ;;  %v5421_v34 = vadd.f32 %v16682_v11, %v4962_v17  ;;  %v3360_v5 = vmax.f32 %v3296_v40, 0.0  ;;  %v3854_v46 = vrot.slane %v3717_v60, 1  ;;  %16685 = vst [vmem:[#allocation45_spill] sm:$0xff] %v13136_v16  ;;  %v6140_v60 = vld [vmem:[#allocation4 + $0x188] sm:$0x80] }
 0x35e   : > { %v7177_v26 = vsel %vm4384_vm2, %v16683_v39, %v7176_v8  ;;  %v4217_v2 = vmul.f32 %v12052_v50, %v4134_v37  ;;  %v16684_v36 = vrot.slane %v12942_v51, 1  ;;  %v16189_v24 = vrot.slane %v13112_v0, 1  ;;  %3424 = vst [vmem:[#allocation4 + $0x260] sm:$0xff] %v3359_v61 }
 0x35f   : > { %v6040_v57 = vadd.f32 %v5799_v49, %v5421_v34  ;;  %v13120_v3 = vmul.f32 %v12682_v53, %v12052_v50  ;;  %3425 = vst.msk [vmem:[#allocation4 + $0x268] sm:$0xff] %vm533_vm0, %v3360_v5  ;;  %v4046_v30 = vadd.f32 %v3854_v46, %v3586_v42  ;;  %v4869_v25 = vmul.f32 %v12070_v47, %v4762_v22  ;;  %v13138_v49 = vpop.f32.mrb[14].mxu1  ;;  %v13147_v22 = vld [vmem:[#allocation4 + $0x198] sm:$0xff] }
 0x360   : > { %v6800_v7 = vadd.f32 %v16684_v36, %v6341_v38  ;;  %v4426_v33 = vrot.slane %v4217_v2, 2  ;;  %v4871_v41 = vmul.f32 %v12915_v19, %v12070_v47  ;;  %v3858_v55 = vsel %vm3828_vm1, %v3854_v46, %v16189_v24  ;;  %16686 = vst [vmem:[#allocation40_spill] sm:$0xff] %v13138_v49  ;;  %v13156_v36 = vld [vmem:[#allocation4 + $0x1a8] sm:$0xff] }
 0x361   : > { %v6340_v32 = vadd.f32 %v6244_v14, %v6040_v57  ;;  %v16188_v53 = vrot.slane %v13120_v3, 2  ;;  %v4048_v17 = vadd.f32 %v3858_v55, %v3588_v52  ;;  %v5096_v42 = vmul.f32 %v12915_v19, %v12076_v13  ;;  %v4766_v49 = vld [vmem:[#allocation4 + $0x168] sm:$0x7f] }
 0x362   : > { %v7419_v51 = vadd.f32 %v7179_v10, %v6800_v7  ;;  %v4666_v8 = vadd.f32 %v4426_v33, %v4046_v30  ;;  %v13134_v37 = vmul.f32 %v12922_v62, %v12076_v13  ;;  %v16687_v14 = vrot.slane %v13026_v4, 1  ;;  %v6890_v7 = vld [vmem:[#allocation4 + $0x198] sm:$0xfe] }
 0x363   : > { %v4430_v52 = vsel %vm4384_vm2, %v4426_v33, %v16188_v53  ;;  %v5595_v40 = vmul.f32 %v12085_v9, %v5512_v54  ;;  %v5232_v34 = vrot.slane %v5096_v42, 1  ;;  %v16688_v61 = vrot.slane %v12989_v59, 7  ;;  %v13173_v42 = vpop.f32.mrb[15].mxu1 }
 0x364   : > { %v7627_v10 = vrot.slane %v7419_v51, 7  ;;  %v6799_v44 = vadd.f32 %v16687_v14, %v6340_v32  ;;  %v4668_v38 = vadd.f32 %v4430_v52, %v4048_v17  ;;  %v4965_v11 = vadd.f32 %v4869_v25, %v4666_v8  ;;  %v3478_v8 = vld [vmem:[#allocation4 + $0x100] sm:$0x80]  ;;  %16689 = vst [vmem:[#allocation35_spill] sm:$0xff] %v13173_v42 }
 0x365   : > { %v16185_v39 = vrot.slane %v13134_v37, 1  ;;  %v13154_v46 = vmul.f32 %v12922_v62, %v12085_v9  ;;  %v5803_v2 = vrot.slane %v5595_v40, 2  ;;  %v6247_v59 = vmul.f32 %v12088_v1, %v6140_v60  ;;  %v16704_v42 = vld [vmem:[#allocation47_spill] sm:$0xff] }
 0x366   : > { %v7628_v5 = vsel %vm7588_vm3, %v16688_v61, %v7627_v10  ;;  %v7418_v4 = vadd.f32 %v7177_v26, %v6799_v44  ;;  %v4967_v57 = vadd.f32 %v4871_v41, %v4668_v38  ;;  %v5424_v33 = vadd.f32 %v5232_v34, %v4965_v11  ;;  %v13175_v10 = vpop.f32.mrb[46].mxu0  ;;  %v13189_v38 = vpop.f32.mrb[16].mxu1 }
 0x367   : > { %8542 = vmatprep.mubr.msk.f32.mxu1 %vm533_vm0, %v7628_v5  ;;  %v5236_v30 = vsel %vm3828_vm1, %v5232_v34, %v16185_v39  ;;  %v16186_v26 = vrot.slane %v13154_v46, 2  ;;  %v6249_v54 = vmul.f32 %v12088_v1, %v13147_v22  ;;  %v6474_v51 = vmul.f32 %v16566_v27, %v13147_v22  ;;  %16690 = vst [vmem:[#allocation43_spill] sm:$0xff] %v13175_v10  ;;  %v13187_v60 = vpop.f32.mrb[47].mxu0  ;;  %v13192_v5 = vpop.f32.mrb[17].mxu1 }
 0x368   : > { %v7625_v25 = vrot.slane %v7418_v4, 7  ;;  %v5426_v32 = vadd.f32 %v5236_v30, %v4967_v57  ;;  %v6043_v55 = vadd.f32 %v5803_v2, %v5424_v33  ;;  %v13170_v41 = vmul.f32 %v16566_v27, %v13156_v36  ;;  %16691 = vst [vmem:[#allocation41_spill] sm:$0xff] %v13187_v60  ;;  %16692 = vst [vmem:[#allocation44_spill] sm:$0xff] %v13189_v38  ;;  %v13194_v4 = vpop.f32.mrb[48].mxu0  ;;  %v4761_v33 = vld [vmem:[#allocation4 + $0x140] sm:$0x80] }
 0x369   : > { %v6973_v17 = vmul.f32 %v12107_v56, %v6890_v7  ;;  %v5807_v44 = vsel %vm4384_vm2, %v5803_v2, %v16186_v26  ;;  %v6610_v52 = vrot.slane %v6474_v51, 1  ;;  %v13185_v40 = vmul.f32 %v12107_v56, %v13156_v36  ;;  %16693 = vst [vmem:[#allocation61_spill] sm:$0xff] %v13192_v5  ;;  %16694 = vst [vmem:[#allocation62_spill] sm:$0xff] %v13194_v4  ;;  %v16696_v26 = vld [vmem:[#allocation49_spill] sm:$0xff]  ;;  %v13248_v4 = vpop.f32.mrb[49].mxu0 }
 0x36a   : > { %v7626_v14 = vsel %vm7588_vm3, %v7620_v6, %v7625_v25  ;;  %v6045_v11 = vadd.f32 %v5807_v44, %v5426_v32  ;;  %v6343_v34 = vadd.f32 %v6247_v59, %v6043_v55  ;;  %v16184_v23 = vrot.slane %v13170_v41, 1  ;;  %v4133_v6 = vld [vmem:[#allocation4 + $0x110] sm:$0xfe]  ;;  %16701 = vst [vmem:[#allocation64_spill] sm:$0xff] %v13248_v4  ;;  %v3483_v60 = vld [vmem:[#allocation4 + $0x128] sm:$0x7f] }
 0x36b   : > { %8004 = vmatmul.mubr.f32.gmra.mrb[46].mxu1 %v7626_v14  ;;  %v7181_v61 = vrot.slane %v6973_v17, 2  ;;  %v16187_v2 = vrot.slane %v13185_v40, 2  ;;  %v3585_v7 = vmul.f32 %v16600_v20, %v3478_v8  ;;  %v3587_v57 = vmul.f32 %v16657_v12, %v16600_v20  ;;  %v16695_v32 = vld [vmem:[#allocation53_spill] sm:$0xff] }
 0x36c   : > { %v3716_v30 = vmul.f32 %v16657_v12, %v16623_v31  ;;  %v6345_v59 = vadd.f32 %v6249_v54, %v6045_v11  ;;  %v6614_v25 = vsel %vm3828_vm1, %v6610_v52, %v16184_v23  ;;  %v6802_v51 = vadd.f32 %v6610_v52, %v6343_v34  ;;  %v6889_v5 = vld [vmem:[#allocation4 + $0x190] sm:$0xfe] }
 0x36d   : > { %v13207_v55 = vmul.f32 %v16695_v32, %v16623_v31  ;;  %v7185_v17 = vsel %vm4384_vm2, %v7181_v61, %v16187_v2  ;;  %v4216_v14 = vmul.f32 %v12115_v48, %v4133_v6  ;;  %v13215_v12 = vmul.f32 %v16695_v32, %v12115_v48 }
 0x36e   : > { %v3853_v8 = vrot.slane %v3716_v30, 1  ;;  %v6804_v54 = vadd.f32 %v6614_v25, %v6345_v59  ;;  %v7421_v44 = vadd.f32 %v7181_v61, %v6802_v51  ;;  %v4868_v52 = vmul.f32 %v12123_v15, %v4761_v33  ;;  %v5511_v30 = vld [vmem:[#allocation4 + $0x150] sm:$0xfe]  ;;  %v16697_v61 = vld [vmem:[#allocation31_spill] sm:$0xff] }
 0x36f   : > { %v16190_v11 = vrot.slane %v13207_v55, 1  ;;  %v4425_v23 = vrot.slane %v4216_v14, 2  ;;  %v16191_v39 = vrot.slane %v13215_v12, 2  ;;  %v4870_v2 = vmul.f32 %v16696_v26, %v12123_v15  ;;  %v6139_v51 = vld [vmem:[#allocation4 + $0x180] sm:$0x80]  ;;  %v16698_v14 = vld [vmem:[#allocation60_spill] sm:$0xff] }
 0x370   : > { %v4045_v34 = vadd.f32 %v3853_v8, %v3585_v7  ;;  %v13222_v53 = vadd.f32 %v7185_v17, %v6804_v54  ;;  %v7632_v6 = vrot.slane %v7421_v44, 7  ;;  %v5095_v25 = vmul.f32 %v16696_v26, %v16697_v61  ;;  %v13236_v17 = vld [vmem:[#allocation4 + $0x190] sm:$0xff] }
 0x371   : > { %v3856_v59 = vsel %vm3828_vm1, %v3853_v8, %v16190_v11  ;;  %v4428_v7 = vsel %vm4384_vm2, %v4425_v23, %v16191_v39  ;;  %v13234_v24 = vmul.f32 %v16698_v14, %v16697_v61  ;;  %16699 = vst [vmem:[#allocation53_spill] sm:$0xff] %v13236_v17  ;;  %v5594_v8 = vmul.f32 %v16581_v63, %v5511_v30 }
 0x372   : > { %v4047_v33 = vadd.f32 %v3856_v59, %v3587_v57  ;;  %v4665_v32 = vadd.f32 %v4425_v23, %v4045_v34  ;;  %v16192_v54 = vrot.slane %v13222_v53, 7  ;;  %v5231_v44 = vrot.slane %v5095_v25, 1  ;;  %v13246_v34 = vld [vmem:[#allocation4 + $0x1a0] sm:$0xff] }
 0x373   : > { %v13242_v11 = vmul.f32 %v16698_v14, %v16581_v63  ;;  %v16193_v39 = vrot.slane %v13234_v24, 1  ;;  %v6246_v23 = vmul.f32 %v12129_v35, %v6139_v51  ;;  %16700 = vst [vmem:[#allocation63_spill] sm:$0xff] %v13246_v34  ;;  %v5802_v30 = vrot.slane %v5594_v8, 2  ;;  %v16707_v14 = vld [vmem:[#allocation48_spill] sm:$0xff] }
 0x374   : > { %v4667_v57 = vadd.f32 %v4428_v7, %v4047_v33  ;;  %v4964_v59 = vadd.f32 %v4868_v52, %v4665_v32  ;;  %v7634_v25 = vsel %vm7588_vm3, %v7632_v6, %v16192_v54  ;;  %v6248_v33 = vmul.f32 %v12129_v35, %v13236_v17  ;;  %v16702_v32 = vld [vmem:[#allocation36_spill] sm:$0xff] }
 0x375   : > { %v16194_v38 = vrot.slane %v13242_v11, 2  ;;  %8543 = vmatprep.mubr.msk.f32.mxu1 %vm533_vm0, %v7634_v25  ;;  %v5234_v51 = vsel %vm3828_vm1, %v5231_v44, %v16193_v39  ;;  %v6473_v4 = vmul.f32 %v16702_v32, %v13236_v17  ;;  %v13267_v8 = vmul.f32 %v16702_v32, %v13246_v34  ;;  %v16703_v39 = vld [vmem:[#allocation38_spill] sm:$0xff] }
 0x376   : > { %v4966_v52 = vadd.f32 %v4870_v2, %v4667_v57  ;;  %v5423_v7 = vadd.f32 %v5231_v44, %v4964_v59  ;;  %v6972_v25 = vmul.f32 %v16589_v29, %v6889_v5  ;;  %v13272_v2 = vmul.f32 %v16589_v29, %v13246_v34  ;;  %v4136_v57 = vld [vmem:[#allocation4 + $0x138] sm:$0x1]  ;;  %v16706_v17 = vld [vmem:[#allocation46_spill] sm:$0xff] }
 0x377   : > { %v5805_v6 = vsel %vm4384_vm2, %v5802_v30, %v16194_v38  ;;  %v6609_v54 = vrot.slane %v6473_v4, 1  ;;  %v3167_v10 = vadd.f32 %v16704_v42, %v16703_v39  ;;  %v16199_v38 = vrot.slane %v13267_v8, 1  ;;  %v6892_v4 = vld [vmem:[#allocation4 + $0x1b8] sm:$0x1] }
 0x378   : > { %v5425_v44 = vadd.f32 %v5234_v51, %v4966_v52  ;;  %v6042_v59 = vadd.f32 %v5802_v30, %v5423_v7  ;;  %v7180_v16 = vrot.slane %v6972_v25, 2  ;;  %v16204_v45 = vrot.slane %v13272_v2, 2  ;;  %v5514_v52 = vld [vmem:[#allocation4 + $0x178] sm:$0x1]  ;;  %v6144_v30 = vld [vmem:[#allocation4 + $0x1a8] sm:$0x7f] }
 0x379   : > { %v3590_v58 = vmul.f32 %v12039_v18, %v3483_v60  ;;  %v3297_v34 = vadd.f32 %v12034_v28, %v3167_v10  ;;  %v4221_v61 = vmul.f32 %v12052_v50, %v4136_v57  ;;  %v6612_v39 = vsel %vm3828_vm1, %v6609_v54, %v16199_v38  ;;  %v3482_v7 = vld [vmem:[#allocation4 + $0x120] sm:$0x7f] }
 0x37a   : > { %v6044_v5 = vadd.f32 %v5805_v6, %v5425_v44  ;;  %v6342_v32 = vadd.f32 %v6246_v23, %v6042_v59  ;;  %v7183_v42 = vsel %vm4384_vm2, %v7180_v16, %v16204_v45  ;;  %v16705_v51 = vrot.slane %v13112_v0, 1  ;;  %v4135_v45 = vld [vmem:[#allocation4 + $0x130] sm:$0x1] }
 0x37b   : > { %v4873_v23 = vmul.f32 %v12070_v47, %v4766_v49  ;;  %v3361_v25 = vmax.f32 %v3297_v34, 0.0  ;;  %v4433_v57 = vrot.slane %v4221_v61, 2  ;;  %v5599_v44 = vmul.f32 %v12085_v9, %v5514_v52  ;;  %v5513_v52 = vld [vmem:[#allocation4 + $0x170] sm:$0x1] }
 0x37c   : > { %v4050_v60 = vadd.f32 %v16705_v51, %v3590_v58  ;;  %v6344_v10 = vadd.f32 %v6248_v33, %v6044_v5  ;;  %v6801_v6 = vadd.f32 %v6609_v54, %v6342_v32  ;;  %v6251_v59 = vmul.f32 %v12088_v1, %v6144_v30  ;;  %v4765_v5 = vld [vmem:[#allocation4 + $0x160] sm:$0x7f] }
 0x37d   : > { %v6977_v38 = vmul.f32 %v12107_v56, %v6892_v4  ;;  %v3169_v31 = vadd.f32 %v16707_v14, %v16706_v17  ;;  %3426 = vst [vmem:[#allocation4 + $0x290] sm:$0xff] %v3361_v25  ;;  %v16708_v58 = vrot.slane %v13120_v3, 2  ;;  %v3589_v54 = vmul.f32 %v16600_v20, %v3482_v7  ;;  %v6143_v3 = vld [vmem:[#allocation4 + $0x1a0] sm:$0x7f] }
 0x37e   : > { %v6803_v26 = vadd.f32 %v6612_v39, %v6344_v10  ;;  %v7420_v0 = vadd.f32 %v7180_v16, %v6801_v6  ;;  %v5810_v34 = vrot.slane %v5599_v44, 2  ;;  %v16709_v17 = vrot.slane %v13207_v55, 1  ;;  %v6891_v39 = vld [vmem:[#allocation4 + $0x1b0] sm:$0x1] }
 0x37f   : > { %v4434_v49 = vsel %vm4384_vm2, %v16708_v58, %v4433_v57  ;;  %v7188_v33 = vrot.slane %v6977_v38, 2  ;;  %v3298_v32 = vadd.f32 %v12043_v43, %v3169_v31  ;;  %v4220_v4 = vmul.f32 %v12115_v48, %v4135_v45  ;;  %v16714_v57 = vld [vmem:[#allocation54_spill] sm:$0xff] }
 0x380   : > { %v4670_v61 = vadd.f32 %v4434_v49, %v4050_v60  ;;  %v13300_v30 = vadd.f32 %v7183_v42, %v6803_v26  ;;  %v7629_v14 = vrot.slane %v7420_v0, 7  ;;  %v4049_v16 = vadd.f32 %v16709_v17, %v3589_v54  ;;  %v3485_v0 = vld [vmem:[#allocation4 + $0x148] sm:$0x80] }
 0x381   : > { %v16710_v7 = vrot.slane %v13154_v46, 2  ;;  %v16711_v38 = vrot.slane %v13185_v40, 2  ;;  %v3362_v10 = vmax.f32 %v3298_v32, 0.0  ;;  %v4431_v42 = vrot.slane %v4220_v4, 2  ;;  %v16713_v40 = vld [vmem:[#allocation50_spill] sm:$0xff] }
 0x382   : > { %v4969_v51 = vadd.f32 %v4873_v23, %v4670_v61  ;;  %v7630_v26 = vrot.slane %v13300_v30, 7  ;;  %v4872_v55 = vmul.f32 %v12123_v15, %v4765_v5  ;;  %v5598_v6 = vmul.f32 %v16581_v63, %v5513_v52  ;;  %v16716_v61 = vld [vmem:[#allocation51_spill] sm:$0xff]  ;;  %v4138_v4 = vld [vmem:[#allocation4 + $0x158] sm:$0xfe] }
 0x383   : > { %v5811_v60 = vsel %vm4384_vm2, %v16710_v7, %v5810_v34  ;;  %v7189_v31 = vsel %vm4384_vm2, %v16711_v38, %v7188_v33  ;;  %v16712_v45 = vrot.slane %v13134_v37, 1  ;;  %3427 = vst.msk [vmem:[#allocation4 + $0x298] sm:$0xff] %vm533_vm0, %v3362_v10  ;;  %v6250_v46 = vmul.f32 %v12129_v35, %v6143_v3  ;;  %v16717_v34 = vld [vmem:[#allocation55_spill] sm:$0xff]  ;;  %v4768_v7 = vld [vmem:[#allocation4 + $0x188] sm:$0x80]  ;;  %v16731_v30 = vld [vmem:[#allocation29_spill] sm:$0xff] }
 0x384   : > { %v6976_v23 = vmul.f32 %v16589_v29, %v6891_v39  ;;  %v3173_v44 = vadd.f32 %v16714_v57, %v16713_v40  ;;  %v7631_v58 = vsel %vm7588_vm3, %v7629_v14, %v7630_v26  ;;  %v16715_v49 = vrot.slane %v13215_v12, 2 }
 0x385   : > { %v5428_v25 = vadd.f32 %v16712_v45, %v4969_v51  ;;  %v5808_v37 = vrot.slane %v5598_v6, 2  ;;  %v3175_v33 = vadd.f32 %v16717_v34, %v16716_v61  ;;  %8010 = vmatmul.mubr.f32.gmra.mrb[48].mxu1 %v7631_v58  ;;  %v16718_v3 = vrot.slane %v13242_v11, 2 }
 0x386   : > { %v4432_v54 = vsel %vm4384_vm2, %v16715_v49, %v4431_v42  ;;  %v7186_v52 = vrot.slane %v6976_v23, 2  ;;  %v3299_v17 = vadd.f32 %v12034_v28, %v3173_v44  ;;  %v3592_v12 = vmul.f32 %v12039_v18, %v3485_v0 }
 0x387   : > { %v6047_v32 = vadd.f32 %v5811_v60, %v5428_v25  ;;  %v4669_v5 = vadd.f32 %v4432_v54, %v4049_v16  ;;  %v5809_v39 = vsel %vm4384_vm2, %v16718_v3, %v5808_v37  ;;  %v3300_v14 = vadd.f32 %v12043_v43, %v3175_v33  ;;  %v13376_v3 = vpop.f32.mrb[50].mxu0 }
 0x388   : > { %v3594_v51 = vmul.f32 %v12915_v19, %v12039_v18  ;;  %v16719_v16 = vrot.slane %v13272_v2, 2  ;;  %v3363_v42 = vmax.f32 %v3299_v17, 0.0  ;;  %v3721_v11 = vmul.f32 %v12915_v19, %v16576_v21  ;;  %v5516_v19 = vld [vmem:[#allocation4 + $0x198] sm:$0xfe]  ;;  %v6146_v17 = vld [vmem:[#allocation4 + $0x1c8] sm:$0x80] }
 0x389   : > { %v6347_v38 = vadd.f32 %v6251_v59, %v6047_v32  ;;  %v4968_v10 = vadd.f32 %v4872_v55, %v4669_v5  ;;  %v3364_v6 = vmax.f32 %v3300_v14, 0.0  ;;  %v13344_v45 = vmul.f32 %v12922_v62, %v16576_v21  ;;  %16723 = vst [vmem:[#allocation47_spill] sm:$0xff] %v13376_v3 }
 0x38a   : > { %v7187_v60 = vsel %vm4384_vm2, %v16719_v16, %v7186_v52  ;;  %v4223_v25 = vmul.f32 %v12052_v50, %v4138_v4  ;;  %v16720_v23 = vrot.slane %v13170_v41, 1  ;;  %v16721_v59 = vrot.slane %v13234_v24, 1  ;;  %3428 = vst [vmem:[#allocation4 + $0x2a0] sm:$0xff] %v3363_v42  ;;  %v13374_v4 = vpop.f32.mrb[18].mxu1 }
 0x38b   : > { %v13353_v2 = vmul.f32 %v12922_v62, %v12052_v50  ;;  %v4875_v57 = vmul.f32 %v12070_v47, %v4768_v7  ;;  %3429 = vst.msk [vmem:[#allocation4 + $0x2a8] sm:$0xff] %vm533_vm0, %v3364_v6  ;;  %v3860_v44 = vrot.slane %v3721_v11, 1  ;;  %v16213_v0 = vrot.slane %v13344_v45, 1  ;;  %16722 = vst [vmem:[#allocation38_spill] sm:$0xff] %v13374_v4  ;;  %v5518_v4 = vld [vmem:[#allocation4 + $0x1b8] sm:$0x1] }
 0x38c   : > { %v6806_v40 = vadd.f32 %v16720_v23, %v6347_v38  ;;  %v5427_v55 = vadd.f32 %v16721_v59, %v4968_v10  ;;  %v4436_v58 = vrot.slane %v4223_v25, 2  ;;  %v4877_v41 = vmul.f32 %v13147_v22, %v12070_v47  ;;  %v13383_v38 = vld [vmem:[#allocation4 + $0x1d8] sm:$0xff]  ;;  %v13394_v23 = vld [vmem:[#allocation4 + $0x1e8] sm:$0xff] }
 0x38d   : > { %v16212_v54 = vrot.slane %v13353_v2, 2  ;;  %v5100_v62 = vmul.f32 %v13147_v22, %v12076_v13  ;;  %v3864_v37 = vsel %vm3828_vm1, %v3860_v44, %v16213_v0  ;;  %v4052_v61 = vadd.f32 %v3860_v44, %v3592_v12 }
 0x38e   : > { %v7425_v49 = vadd.f32 %v7189_v31, %v6806_v40  ;;  %v6046_v24 = vadd.f32 %v5809_v39, %v5427_v55  ;;  %v13368_v34 = vmul.f32 %v13156_v36, %v12076_v13  ;;  %v5601_v33 = vmul.f32 %v12085_v9, %v5516_v19  ;;  %v6894_v40 = vld [vmem:[#allocation4 + $0x1d8] sm:$0xfe] }
 0x38f   : > { %v4054_v31 = vadd.f32 %v3864_v37, %v3594_v51  ;;  %v4440_v52 = vsel %vm4384_vm2, %v4436_v58, %v16212_v54  ;;  %v4672_v39 = vadd.f32 %v4436_v58, %v4052_v61  ;;  %v5238_v14 = vrot.slane %v5100_v62, 1  ;;  %v13387_v51 = vpop.f32.mrb[51].mxu0  ;;  %v6893_v54 = vld [vmem:[#allocation4 + $0x1d0] sm:$0xfe] }
 0x390   : > { %v7637_v32 = vrot.slane %v7425_v49, 7  ;;  %v6346_v5 = vadd.f32 %v6250_v46, %v6046_v24  ;;  %v16207_v12 = vrot.slane %v13368_v34, 1  ;;  %v13381_v7 = vmul.f32 %v13156_v36, %v12085_v9  ;;  %v13385_v46 = vpop.f32.mrb[19].mxu1  ;;  %16725 = vst [vmem:[#allocation48_spill] sm:$0xff] %v13387_v51  ;;  %v3484_v24 = vld [vmem:[#allocation4 + $0x140] sm:$0x80] }
 0x391   : > { %16724 = vst [vmem:[#allocation46_spill] sm:$0xff] %v13385_v46  ;;  %v16726_v10 = vrot.slane %v13222_v53, 7  ;;  %v16727_v42 = vrot.slane %v13267_v8, 1  ;;  %v4674_v11 = vadd.f32 %v4440_v52, %v4054_v31  ;;  %v5813_v25 = vrot.slane %v5601_v33, 2 }
 0x392   : > { %v4971_v59 = vadd.f32 %v4875_v57, %v4672_v39  ;;  %v5242_v55 = vsel %vm3828_vm1, %v5238_v14, %v16207_v12  ;;  %v16209_v19 = vrot.slane %v13381_v7, 2  ;;  %v6253_v53 = vmul.f32 %v12088_v1, %v6146_v17  ;;  %v4137_v39 = vld [vmem:[#allocation4 + $0x150] sm:$0xfe] }
 0x393   : > { %v7638_v16 = vsel %vm7588_vm3, %v16726_v10, %v7637_v32  ;;  %v6805_v6 = vadd.f32 %v16727_v42, %v6346_v5  ;;  %v4973_v58 = vadd.f32 %v4877_v41, %v4674_v11  ;;  %v6255_v8 = vmul.f32 %v12088_v1, %v13383_v38  ;;  %v16728_v42 = vld [vmem:[#allocation49_spill] sm:$0xff]  ;;  %v4767_v11 = vld [vmem:[#allocation4 + $0x180] sm:$0x80] }
 0x394   : > { %8544 = vmatprep.mubr.msk.f32.mxu1 %vm533_vm0, %v7638_v16  ;;  %v6478_v49 = vmul.f32 %v16566_v27, %v13383_v38  ;;  %v5430_v62 = vadd.f32 %v5238_v14, %v4971_v59  ;;  %v5817_v57 = vsel %vm4384_vm2, %v5813_v25, %v16209_v19  ;;  %v13411_v37 = vmul.f32 %v16566_v27, %v13394_v23  ;;  %v5515_v12 = vld [vmem:[#allocation4 + $0x190] sm:$0xfe] }
 0x395   : > { %v7424_v44 = vadd.f32 %v7187_v60, %v6805_v6  ;;  %v6979_v61 = vmul.f32 %v12107_v56, %v6894_v40  ;;  %v5432_v41 = vadd.f32 %v5242_v55, %v4973_v58  ;;  %v13416_v32 = vmul.f32 %v12107_v56, %v13394_v23  ;;  %v13426_v40 = vpop.f32.mrb[20].mxu1 }
 0x396   : > { %v6616_v33 = vrot.slane %v6478_v49, 1  ;;  %v6049_v5 = vadd.f32 %v5813_v25, %v5430_v62  ;;  %v16206_v31 = vrot.slane %v13411_v37, 1  ;;  %v3591_v17 = vmul.f32 %v16600_v20, %v3484_v24  ;;  %16729 = vst [vmem:[#allocation50_spill] sm:$0xff] %v13426_v40  ;;  %v13428_v25 = vpop.f32.mrb[52].mxu0  ;;  %v13439_v49 = vpop.f32.mrb[21].mxu1 }
 0x397   : > { %v7635_v60 = vrot.slane %v7424_v44, 7  ;;  %v7191_v52 = vrot.slane %v6979_v61, 2  ;;  %v6051_v10 = vadd.f32 %v5817_v57, %v5432_v41  ;;  %v16208_v16 = vrot.slane %v13416_v32, 2  ;;  %16730 = vst [vmem:[#allocation54_spill] sm:$0xff] %v13428_v25  ;;  %v16732_v44 = vld [vmem:[#allocation60_spill] sm:$0xff]  ;;  %16733 = vst [vmem:[#allocation51_spill] sm:$0xff] %v13439_v49 }
 0x398   : > { %v3593_v6 = vmul.f32 %v16728_v42, %v16600_v20  ;;  %v6349_v59 = vadd.f32 %v6253_v53, %v6049_v5  ;;  %v6620_v55 = vsel %vm3828_vm1, %v6616_v33, %v16206_v31  ;;  %v13437_v58 = vmul.f32 %v16732_v44, %v16731_v30  ;;  %v13479_v0 = vpop.f32.mrb[53].mxu0  ;;  %v4772_v25 = vld [vmem:[#allocation4 + $0x1a8] sm:$0x7f] }
 0x399   : > { %v7636_v14 = vsel %vm7588_vm3, %v7630_v26, %v7635_v60  ;;  %v3720_v26 = vmul.f32 %v16728_v42, %v16731_v30  ;;  %v6351_v24 = vadd.f32 %v6255_v8, %v6051_v10  ;;  %v7195_v62 = vsel %vm4384_vm2, %v7191_v52, %v16208_v16  ;;  %v16734_v10 = vld [vmem:[#allocation53_spill] sm:$0xff]  ;;  %16739 = vst [vmem:[#allocation60_spill] sm:$0xff] %v13479_v0 }
 0x39a   : > { %8016 = vmatmul.mubr.f32.gmra.mrb[50].mxu1 %v7636_v14  ;;  %v4222_v53 = vmul.f32 %v12115_v48, %v4137_v39  ;;  %v13447_v57 = vmul.f32 %v16732_v44, %v12115_v48  ;;  %v6808_v61 = vadd.f32 %v6616_v33, %v6349_v59  ;;  %v16210_v41 = vrot.slane %v13437_v58, 1  ;;  %v16735_v33 = vld [vmem:[#allocation31_spill] sm:$0xff] }
 0x39b   : > { %v3859_v60 = vrot.slane %v3720_v26, 1  ;;  %v4874_v5 = vmul.f32 %v12123_v15, %v4767_v11  ;;  %v6810_v14 = vadd.f32 %v6620_v55, %v6351_v24  ;;  %v4876_v31 = vmul.f32 %v16734_v10, %v12123_v15  ;;  %v16736_v24 = vld [vmem:[#allocation63_spill] sm:$0xff] }
 0x39c   : > { %v4435_v42 = vrot.slane %v4222_v53, 2  ;;  %v16211_v8 = vrot.slane %v13447_v57, 2  ;;  %v7427_v16 = vadd.f32 %v7191_v52, %v6808_v61  ;;  %v5099_v59 = vmul.f32 %v16734_v10, %v16735_v33  ;;  %v6145_v52 = vld [vmem:[#allocation4 + $0x1c0] sm:$0x80]  ;;  %v13468_v61 = vld [vmem:[#allocation4 + $0x1d0] sm:$0xff] }
 0x39d   : > { %v3862_v39 = vsel %vm3828_vm1, %v3859_v60, %v16210_v41  ;;  %v4051_v44 = vadd.f32 %v3859_v60, %v3591_v17  ;;  %v13459_v26 = vadd.f32 %v7195_v62, %v6810_v14  ;;  %v13466_v53 = vmul.f32 %v16736_v24, %v16735_v33  ;;  %16737 = vst [vmem:[#allocation55_spill] sm:$0xff] %v13468_v61 }
 0x39e   : > { %v4053_v11 = vadd.f32 %v3862_v39, %v3593_v6  ;;  %v4438_v55 = vsel %vm4384_vm2, %v4435_v42, %v16211_v8  ;;  %v7642_v19 = vrot.slane %v7427_v16, 7  ;;  %v5237_v17 = vrot.slane %v5099_v59, 1  ;;  %v13477_v8 = vld [vmem:[#allocation4 + $0x1e0] sm:$0xff] }
 0x39f   : > { %v4671_v41 = vadd.f32 %v4435_v42, %v4051_v44  ;;  %v5600_v60 = vmul.f32 %v16581_v63, %v5515_v12  ;;  %v16214_v62 = vrot.slane %v13459_v26, 7  ;;  %v16215_v6 = vrot.slane %v13466_v53, 1  ;;  %16738 = vst [vmem:[#allocation49_spill] sm:$0xff] %v13477_v8 }
 0x3a0   : > { %v4673_v14 = vadd.f32 %v4438_v55, %v4053_v11  ;;  %v13475_v39 = vmul.f32 %v16736_v24, %v16581_v63  ;;  %v6252_v42 = vmul.f32 %v12129_v35, %v6145_v52  ;;  %v6254_v12 = vmul.f32 %v12129_v35, %v13468_v61 }
 0x3a1   : > { %v4970_v49 = vadd.f32 %v4874_v5, %v4671_v41  ;;  %v5812_v16 = vrot.slane %v5600_v60, 2  ;;  %v7644_v44 = vsel %vm7588_vm3, %v7642_v19, %v16214_v62  ;;  %v5240_v11 = vsel %vm3828_vm1, %v5237_v17, %v16215_v6  ;;  %v16740_v5 = vld [vmem:[#allocation36_spill] sm:$0xff]  ;;  %v4140_v6 = vld [vmem:[#allocation4 + $0x178] sm:$0x1] }
 0x3a2   : > { %v4972_v59 = vadd.f32 %v4876_v31, %v4673_v14  ;;  %v16216_v55 = vrot.slane %v13475_v39, 2  ;;  %8545 = vmatprep.mubr.msk.f32.mxu1 %vm533_vm0, %v7644_v44  ;;  %v6477_v52 = vmul.f32 %v16740_v5, %v13468_v61  ;;  %v13496_v60 = vmul.f32 %v16740_v5, %v13477_v8  ;;  %v3489_v19 = vld [vmem:[#allocation4 + $0x168] sm:$0x7f] }
 0x3a3   : > { %v5429_v41 = vadd.f32 %v5237_v17, %v4970_v49  ;;  %v6978_v0 = vmul.f32 %v16589_v29, %v6893_v54  ;;  %v13504_v62 = vmul.f32 %v16589_v29, %v13477_v8  ;;  %v16741_v49 = vld [vmem:[#allocation56_spill] sm:$0xff]  ;;  %v16742_v17 = vld [vmem:[#allocation39_spill] sm:$0xff] }
 0x3a4   : > { %v5431_v31 = vadd.f32 %v5240_v11, %v4972_v59  ;;  %v5815_v14 = vsel %vm4384_vm2, %v5812_v16, %v16216_v55  ;;  %v3179_v44 = vadd.f32 %v16742_v17, %v16741_v49  ;;  %v6615_v51 = vrot.slane %v6477_v52, 1  ;;  %v6150_v5 = vld [vmem:[#allocation4 + $0x1e8] sm:$0x7f]  ;;  %v6896_v52 = vld [vmem:[#allocation4 + $0x1f8] sm:$0x1] }
 0x3a5   : > { %v6048_v40 = vadd.f32 %v5812_v16, %v5429_v41  ;;  %v16221_v46 = vrot.slane %v13496_v60, 1  ;;  %v7190_v54 = vrot.slane %v6978_v0, 2  ;;  %v16225_v59 = vrot.slane %v13504_v62, 2  ;;  %v3488_v0 = vld [vmem:[#allocation4 + $0x160] sm:$0x7f] }
 0x3a6   : > { %v6050_v3 = vadd.f32 %v5815_v14, %v5431_v31  ;;  %v3301_v11 = vadd.f32 %v12034_v28, %v3179_v44  ;;  %v3596_v55 = vmul.f32 %v12039_v18, %v3489_v19  ;;  %v4227_v16 = vmul.f32 %v12052_v50, %v4140_v6 }
 0x3a7   : > { %v6348_v8 = vadd.f32 %v6252_v42, %v6048_v40  ;;  %v6618_v49 = vsel %vm3828_vm1, %v6615_v51, %v16221_v46  ;;  %v4879_v41 = vmul.f32 %v12070_v47, %v4772_v25  ;;  %v7193_v14 = vsel %vm4384_vm2, %v7190_v54, %v16225_v59  ;;  %v4139_v40 = vld [vmem:[#allocation4 + $0x170] sm:$0x1] }
 0x3a8   : > { %v6350_v31 = vadd.f32 %v6254_v12, %v6050_v3  ;;  %v3365_v17 = vmax.f32 %v3301_v11, 0.0  ;;  %v16743_v19 = vrot.slane %v13344_v45, 1  ;;  %v4443_v33 = vrot.slane %v4227_v16, 2  ;;  %v16744_v3 = vld [vmem:[#allocation37_spill] sm:$0xff]  ;;  %v16745_v12 = vld [vmem:[#allocation30_spill] sm:$0xff] }
 0x3a9   : > { %v6807_v42 = vadd.f32 %v6615_v51, %v6348_v8  ;;  %v5605_v46 = vmul.f32 %v12085_v9, %v5518_v4  ;;  %v6257_v6 = vmul.f32 %v12088_v1, %v6150_v5  ;;  %v6983_v25 = vmul.f32 %v12107_v56, %v6896_v52  ;;  %v4771_v4 = vld [vmem:[#allocation4 + $0x1a0] sm:$0x7f] }
 0x3aa   : > { %v4056_v44 = vadd.f32 %v16743_v19, %v3596_v55  ;;  %v6809_v61 = vadd.f32 %v6618_v49, %v6350_v31  ;;  %3430 = vst [vmem:[#allocation4 + $0x2d0] sm:$0xff] %v3365_v17  ;;  %v3181_v24 = vadd.f32 %v16745_v12, %v16744_v3  ;;  %v3595_v59 = vmul.f32 %v16600_v20, %v3488_v0  ;;  %v5517_v31 = vld [vmem:[#allocation4 + $0x1b0] sm:$0x1]  ;;  %v6149_v17 = vld [vmem:[#allocation4 + $0x1e0] sm:$0x7f] }
 0x3ab   : > { %v7426_v11 = vadd.f32 %v7190_v54, %v6807_v42  ;;  %v16746_v45 = vrot.slane %v13353_v2, 2  ;;  %v5820_v51 = vrot.slane %v5605_v46, 2  ;;  %v4226_v8 = vmul.f32 %v12115_v48, %v4139_v40  ;;  %v6895_v42 = vld [vmem:[#allocation4 + $0x1f0] sm:$0x1] }
 0x3ac   : > { %v13532_v16 = vadd.f32 %v7193_v14, %v6809_v61  ;;  %v7198_v49 = vrot.slane %v6983_v25, 2  ;;  %v3302_v52 = vadd.f32 %v12043_v43, %v3181_v24  ;;  %v16747_v0 = vrot.slane %v13381_v7, 2  ;;  %v3491_v25 = vld [vmem:[#allocation4 + $0x188] sm:$0x80] }
 0x3ad   : > { %v4444_v55 = vsel %vm4384_vm2, %v16746_v45, %v4443_v33  ;;  %v7639_v19 = vrot.slane %v7426_v11, 7  ;;  %v16748_v2 = vrot.slane %v13437_v58, 1  ;;  %v4441_v46 = vrot.slane %v4226_v8, 2  ;;  %v16753_v8 = vld [vmem:[#allocation58_spill] sm:$0xff] }
 0x3ae   : > { %v4676_v5 = vadd.f32 %v4444_v55, %v4056_v44  ;;  %v5821_v54 = vsel %vm4384_vm2, %v16747_v0, %v5820_v51  ;;  %v7640_v40 = vrot.slane %v13532_v16, 7  ;;  %v16749_v14 = vrot.slane %v13416_v32, 2  ;;  %v16752_v51 = vld [vmem:[#allocation42_spill] sm:$0xff] }
 0x3af   : > { %v4055_v33 = vadd.f32 %v16748_v2, %v3595_v59  ;;  %v3366_v24 = vmax.f32 %v3302_v52, 0.0  ;;  %v16750_v3 = vrot.slane %v13447_v57, 2  ;;  %v4878_v12 = vmul.f32 %v12123_v15, %v4771_v4  ;;  %v4142_v2 = vld [vmem:[#allocation4 + $0x198] sm:$0xfe] }
 0x3b0   : > { %v4975_v61 = vadd.f32 %v4879_v41, %v4676_v5  ;;  %v7199_v44 = vsel %vm4384_vm2, %v16749_v14, %v7198_v49  ;;  %v5604_v58 = vmul.f32 %v16581_v63, %v5517_v31  ;;  %v6256_v59 = vmul.f32 %v12129_v35, %v6149_v17  ;;  %v16754_v5 = vld [vmem:[#allocation57_spill] sm:$0xff]  ;;  %v16755_v49 = vld [vmem:[#allocation59_spill] sm:$0xff] }
 0x3b1   : > { %v4442_v7 = vsel %vm4384_vm2, %v16750_v3, %v4441_v46  ;;  %v7641_v41 = vsel %vm7588_vm3, %v7639_v19, %v7640_v40  ;;  %v16751_v32 = vrot.slane %v13368_v34, 1  ;;  %3431 = vst.msk [vmem:[#allocation4 + $0x2d8] sm:$0xff] %vm533_vm0, %v3366_v24  ;;  %v6982_v57 = vmul.f32 %v16589_v29, %v6895_v42 }
 0x3b2   : > { %v4675_v45 = vadd.f32 %v4442_v7, %v4055_v33  ;;  %8022 = vmatmul.mubr.f32.gmra.mrb[52].mxu1 %v7641_v41  ;;  %v5818_v55 = vrot.slane %v5604_v58, 2  ;;  %v3185_v4 = vadd.f32 %v16753_v8, %v16752_v51  ;;  %v3187_v52 = vadd.f32 %v16755_v49, %v16754_v5 }
 0x3b3   : > { %v5434_v11 = vadd.f32 %v16751_v32, %v4975_v61  ;;  %v3598_v31 = vmul.f32 %v12039_v18, %v3491_v25  ;;  %v7196_v0 = vrot.slane %v6982_v57, 2  ;;  %v3600_v34 = vmul.f32 %v13147_v22, %v12039_v18 }
 0x3b4   : > { %v4974_v19 = vadd.f32 %v4878_v12, %v4675_v45  ;;  %v16756_v33 = vrot.slane %v13475_v39, 2  ;;  %v3303_v42 = vadd.f32 %v12034_v28, %v3185_v4  ;;  %v3304_v61 = vadd.f32 %v12043_v43, %v3187_v52  ;;  %v4774_v12 = vld [vmem:[#allocation4 + $0x1c8] sm:$0x80]  ;;  %v5520_v4 = vld [vmem:[#allocation4 + $0x1d8] sm:$0xfe] }
 0x3b5   : > { %v6053_v17 = vadd.f32 %v5821_v54, %v5434_v11  ;;  %v3725_v14 = vmul.f32 %v13147_v22, %v16576_v21  ;;  %v16757_v54 = vrot.slane %v13466_v53, 1  ;;  %v16758_v3 = vrot.slane %v13504_v62, 2 }
 0x3b6   : > { %v5819_v46 = vsel %vm4384_vm2, %v16756_v33, %v5818_v55  ;;  %v13578_v39 = vmul.f32 %v13156_v36, %v16576_v21  ;;  %v3367_v58 = vmax.f32 %v3303_v42, 0.0  ;;  %v3368_v41 = vmax.f32 %v3304_v61, 0.0  ;;  %v13610_v42 = vpop.f32.mrb[54].mxu0 }
 0x3b7   : > { %v6353_v24 = vadd.f32 %v6257_v6, %v6053_v17  ;;  %v5433_v25 = vadd.f32 %v16757_v54, %v4974_v19  ;;  %v7197_v7 = vsel %vm4384_vm2, %v16758_v3, %v7196_v0  ;;  %v3866_v32 = vrot.slane %v3725_v14, 1  ;;  %16762 = vst [vmem:[#allocation56_spill] sm:$0xff] %v13610_v42  ;;  %v13617_v3 = vpop.f32.mrb[55].mxu0 }
 0x3b8   : > { %v4229_v11 = vmul.f32 %v12052_v50, %v4142_v2  ;;  %v16759_v22 = vrot.slane %v13411_v37, 1  ;;  %v16233_v53 = vrot.slane %v13578_v39, 1  ;;  %v13586_v62 = vmul.f32 %v13156_v36, %v12052_v50  ;;  %3432 = vst [vmem:[#allocation4 + $0x2e0] sm:$0xff] %v3367_v58  ;;  %3433 = vst.msk [vmem:[#allocation4 + $0x2e8] sm:$0xff] %vm533_vm0, %v3368_v41  ;;  %v13656_v16 = vpop.f32.mrb[56].mxu0 }
 0x3b9   : > { %v6052_v45 = vadd.f32 %v5819_v46, %v5433_v25  ;;  %v4058_v57 = vadd.f32 %v3866_v32, %v3598_v31  ;;  %v4881_v51 = vmul.f32 %v12070_v47, %v4774_v12  ;;  %v4883_v8 = vmul.f32 %v13383_v38, %v12070_v47  ;;  %v6152_v46 = vld [vmem:[#allocation4 + $0x208] sm:$0x80]  ;;  %v13613_v25 = vld [vmem:[#allocation4 + $0x218] sm:$0xff]  ;;  %16764 = vst [vmem:[#allocation37_spill] sm:$0xff] %v13617_v3  ;;  %v4778_v3 = vld [vmem:[#allocation4 + $0x1e8] sm:$0x7f] }
 0x3ba   : > { %v6812_v6 = vadd.f32 %v16759_v22, %v6353_v24  ;;  %v4446_v55 = vrot.slane %v4229_v11, 2  ;;  %v3870_v49 = vsel %vm3828_vm1, %v3866_v32, %v16233_v53  ;;  %v16232_v36 = vrot.slane %v13586_v62, 2  ;;  %v13626_v22 = vld [vmem:[#allocation4 + $0x228] sm:$0xff]  ;;  %16767 = vst [vmem:[#allocation42_spill] sm:$0xff] %v13656_v16  ;;  %v16778_v16 = vld [vmem:[#allocation34_spill] sm:$0xff] }
 0x3bb   : > { %v6352_v5 = vadd.f32 %v6256_v59, %v6052_v45  ;;  %v4060_v52 = vadd.f32 %v3870_v49, %v3600_v34  ;;  %v5104_v31 = vmul.f32 %v13383_v38, %v12076_v13  ;;  %v13600_v19 = vmul.f32 %v13394_v23, %v12076_v13  ;;  %v13608_v34 = vpop.f32.mrb[22].mxu1 }
 0x3bc   : > { %v7431_v37 = vadd.f32 %v7199_v44, %v6812_v6  ;;  %v4678_v17 = vadd.f32 %v4446_v55, %v4058_v57  ;;  %v16760_v2 = vrot.slane %v13496_v60, 1  ;;  %v4450_v59 = vsel %vm4384_vm2, %v4446_v55, %v16232_v36  ;;  %16761 = vst [vmem:[#allocation53_spill] sm:$0xff] %v13608_v34  ;;  %v13615_v60 = vpop.f32.mrb[23].mxu1  ;;  %v6898_v6 = vld [vmem:[#allocation4 + $0x218] sm:$0xfe] }
 0x3bd   : > { %v5607_v33 = vmul.f32 %v12085_v9, %v5520_v4  ;;  %v4680_v61 = vadd.f32 %v4450_v59, %v4060_v52  ;;  %v5244_v24 = vrot.slane %v5104_v31, 1  ;;  %v16227_v54 = vrot.slane %v13600_v19, 1  ;;  %16763 = vst [vmem:[#allocation39_spill] sm:$0xff] %v13615_v60  ;;  %v6897_v36 = vld [vmem:[#allocation4 + $0x210] sm:$0xfe] }
 0x3be   : > { %v7647_v0 = vrot.slane %v7431_v37, 7  ;;  %v6811_v44 = vadd.f32 %v16760_v2, %v6352_v5  ;;  %v4977_v14 = vadd.f32 %v4881_v51, %v4678_v17  ;;  %v16765_v12 = vrot.slane %v13459_v26, 7  ;;  %v3490_v17 = vld [vmem:[#allocation4 + $0x180] sm:$0x80] }
 0x3bf   : > { %v13624_v32 = vmul.f32 %v13394_v23, %v12085_v9  ;;  %v5823_v11 = vrot.slane %v5607_v33, 2  ;;  %v4979_v45 = vadd.f32 %v4883_v8, %v4680_v61  ;;  %v5248_v57 = vsel %vm3828_vm1, %v5244_v24, %v16227_v54 }
 0x3c0   : > { %v7648_v58 = vsel %vm7588_vm3, %v16765_v12, %v7647_v0  ;;  %v7430_v41 = vadd.f32 %v7197_v7, %v6811_v44  ;;  %v5436_v55 = vadd.f32 %v5244_v24, %v4977_v14  ;;  %v6259_v26 = vmul.f32 %v12088_v1, %v6152_v46  ;;  %v4141_v14 = vld [vmem:[#allocation4 + $0x190] sm:$0xfe]  ;;  %v13654_v24 = vpop.f32.mrb[24].mxu1 }
 0x3c1   : > { %8546 = vmatprep.mubr.msk.f32.mxu1 %vm533_vm0, %v7648_v58  ;;  %v16229_v7 = vrot.slane %v13624_v32, 2  ;;  %v6261_v4 = vmul.f32 %v12088_v1, %v13613_v25  ;;  %v6482_v37 = vmul.f32 %v16566_v27, %v13613_v25  ;;  %v5438_v5 = vadd.f32 %v5248_v57, %v4979_v45  ;;  %16766 = vst [vmem:[#allocation30_spill] sm:$0xff] %v13654_v24 }
 0x3c2   : > { %v7645_v51 = vrot.slane %v7430_v41, 7  ;;  %v6055_v49 = vadd.f32 %v5823_v11, %v5436_v55  ;;  %v13640_v8 = vmul.f32 %v16566_v27, %v13626_v22  ;;  %v6985_v52 = vmul.f32 %v12107_v56, %v6898_v6  ;;  %v13664_v6 = vpop.f32.mrb[25].mxu1 }
 0x3c3   : > { %v5827_v0 = vsel %vm4384_vm2, %v5823_v11, %v16229_v7  ;;  %v6622_v2 = vrot.slane %v6482_v37, 1  ;;  %v13651_v44 = vmul.f32 %v12107_v56, %v13626_v22  ;;  %v3597_v12 = vmul.f32 %v16600_v20, %v3490_v17  ;;  %v4773_v11 = vld [vmem:[#allocation4 + $0x1c0] sm:$0x80]  ;;  %16768 = vst [vmem:[#allocation58_spill] sm:$0xff] %v13664_v6 }
 0x3c4   : > { %v7646_v31 = vsel %vm7588_vm3, %v7640_v40, %v7645_v51  ;;  %v6057_v59 = vadd.f32 %v5827_v0, %v5438_v5  ;;  %v6355_v33 = vadd.f32 %v6259_v26, %v6055_v49  ;;  %v16226_v46 = vrot.slane %v13640_v8, 1  ;;  %v16769_v26 = vld [vmem:[#allocation63_spill] sm:$0xff] }
 0x3c5   : > { %8028 = vmatmul.mubr.f32.gmra.mrb[54].mxu1 %v7646_v31  ;;  %v7201_v61 = vrot.slane %v6985_v52, 2  ;;  %v16228_v40 = vrot.slane %v13651_v44, 2  ;;  %v3599_v58 = vmul.f32 %v16734_v10, %v16600_v20  ;;  %v3724_v41 = vmul.f32 %v16734_v10, %v16731_v30 }
 0x3c6   : > { %v6357_v45 = vadd.f32 %v6261_v4, %v6057_v59  ;;  %v6626_v57 = vsel %vm3828_vm1, %v6622_v2, %v16226_v46  ;;  %v6814_v55 = vadd.f32 %v6622_v2, %v6355_v33  ;;  %v13671_v51 = vmul.f32 %v16769_v26, %v16731_v30  ;;  %v16770_v33 = vld [vmem:[#allocation55_spill] sm:$0xff] }
 0x3c7   : > { %v7205_v37 = vsel %vm4384_vm2, %v7201_v61, %v16228_v40  ;;  %v3865_v5 = vrot.slane %v3724_v41, 1  ;;  %v4228_v10 = vmul.f32 %v12115_v48, %v4141_v14  ;;  %v13679_v49 = vmul.f32 %v16769_v26, %v12115_v48  ;;  %v5519_v41 = vld [vmem:[#allocation4 + $0x1d0] sm:$0xfe] }
 0x3c8   : > { %v6816_v4 = vadd.f32 %v6626_v57, %v6357_v45  ;;  %v7433_v52 = vadd.f32 %v7201_v61, %v6814_v55  ;;  %v16231_v17 = vrot.slane %v13671_v51, 1  ;;  %v4880_v31 = vmul.f32 %v12123_v15, %v4773_v11  ;;  %v16771_v61 = vld [vmem:[#allocation31_spill] sm:$0xff] }
 0x3c9   : > { %v4057_v0 = vadd.f32 %v3865_v5, %v3597_v12  ;;  %v4445_v2 = vrot.slane %v4228_v10, 2  ;;  %v16230_v59 = vrot.slane %v13679_v49, 2  ;;  %v4882_v46 = vmul.f32 %v16770_v33, %v12123_v15  ;;  %v6151_v55 = vld [vmem:[#allocation4 + $0x200] sm:$0x80]  ;;  %v16772_v10 = vld [vmem:[#allocation49_spill] sm:$0xff] }
 0x3ca   : > { %v13686_v54 = vadd.f32 %v7205_v37, %v6816_v4  ;;  %v7652_v14 = vrot.slane %v7433_v52, 7  ;;  %v3868_v45 = vsel %vm3828_vm1, %v3865_v5, %v16231_v17  ;;  %v5103_v57 = vmul.f32 %v16770_v33, %v16771_v61  ;;  %v13700_v37 = vld [vmem:[#allocation4 + $0x210] sm:$0xff]  ;;  %v13712_v17 = vld [vmem:[#allocation4 + $0x220] sm:$0xff] }
 0x3cb   : > { %v4059_v11 = vadd.f32 %v3868_v45, %v3599_v58  ;;  %v4448_v12 = vsel %vm4384_vm2, %v4445_v2, %v16230_v59  ;;  %v4677_v26 = vadd.f32 %v4445_v2, %v4057_v0  ;;  %v13698_v40 = vmul.f32 %v16772_v10, %v16771_v61  ;;  %16773 = vst [vmem:[#allocation57_spill] sm:$0xff] %v13700_v37  ;;  %v13708_v58 = vpop.f32.mrb[57].mxu0 }
 0x3cc   : > { %v16234_v4 = vrot.slane %v13686_v54, 7  ;;  %v5243_v52 = vrot.slane %v5103_v57, 1  ;;  %v5606_v5 = vmul.f32 %v16581_v63, %v5519_v41  ;;  %v13706_v7 = vmul.f32 %v16772_v10, %v16581_v63  ;;  %16774 = vst [vmem:[#allocation59_spill] sm:$0xff] %v13708_v58  ;;  %16775 = vst [vmem:[#allocation63_spill] sm:$0xff] %v13712_v17  ;;  %v3495_v58 = vld [vmem:[#allocation4 + $0x1a8] sm:$0x7f] }
 0x3cd   : > { %v4679_v45 = vadd.f32 %v4448_v12, %v4059_v11  ;;  %v4976_v59 = vadd.f32 %v4880_v31, %v4677_v26  ;;  %v16235_v0 = vrot.slane %v13698_v40, 1  ;;  %v6258_v2 = vmul.f32 %v12129_v35, %v6151_v55  ;;  %v16776_v12 = vld [vmem:[#allocation36_spill] sm:$0xff]  ;;  %v16781_v10 = vld [vmem:[#allocation45_spill] sm:$0xff] }
 0x3ce   : > { %v7654_v57 = vsel %vm7588_vm3, %v7652_v14, %v16234_v4  ;;  %v5822_v41 = vrot.slane %v5606_v5, 2  ;;  %v16236_v53 = vrot.slane %v13706_v7, 2  ;;  %v6260_v6 = vmul.f32 %v12129_v35, %v13700_v37 }
 0x3cf   : > { %8547 = vmatprep.mubr.msk.f32.mxu1 %vm533_vm0, %v7654_v57  ;;  %v4978_v31 = vadd.f32 %v4882_v46, %v4679_v45  ;;  %v5246_v55 = vsel %vm3828_vm1, %v5243_v52, %v16235_v0  ;;  %v5435_v11 = vadd.f32 %v5243_v52, %v4976_v59  ;;  %v6481_v26 = vmul.f32 %v16776_v12, %v13700_v37  ;;  %v4144_v45 = vld [vmem:[#allocation4 + $0x1b8] sm:$0x1]  ;;  %v16777_v0 = vld [vmem:[#allocation52_spill] sm:$0xff] }
 0x3d0   : > { %v5825_v14 = vsel %vm4384_vm2, %v5822_v41, %v16236_v53  ;;  %v13731_v5 = vmul.f32 %v16776_v12, %v13712_v17  ;;  %v6984_v57 = vmul.f32 %v16589_v29, %v6897_v36  ;;  %v13736_v46 = vmul.f32 %v16589_v29, %v13712_v17  ;;  %v16780_v37 = vld [vmem:[#allocation28_spill] sm:$0xff] }
 0x3d1   : > { %v5437_v59 = vadd.f32 %v5246_v55, %v4978_v31  ;;  %v6054_v52 = vadd.f32 %v5822_v41, %v5435_v11  ;;  %v6621_v4 = vrot.slane %v6481_v26, 1  ;;  %v3191_v24 = vadd.f32 %v16778_v16, %v16777_v0  ;;  %v5522_v31 = vld [vmem:[#allocation4 + $0x1f8] sm:$0x1]  ;;  %v6156_v41 = vld [vmem:[#allocation4 + $0x228] sm:$0x7f] }
 0x3d2   : > { %v16241_v53 = vrot.slane %v13731_v5, 1  ;;  %v7200_v60 = vrot.slane %v6984_v57, 2  ;;  %v16246_v42 = vrot.slane %v13736_v46, 2  ;;  %v3602_v34 = vmul.f32 %v12039_v18, %v3495_v58  ;;  %v6900_v55 = vld [vmem:[#allocation4 + $0x238] sm:$0x1] }
 0x3d3   : > { %v6056_v36 = vadd.f32 %v5825_v14, %v5437_v59  ;;  %v6354_v12 = vadd.f32 %v6258_v2, %v6054_v52  ;;  %v3305_v17 = vadd.f32 %v12034_v28, %v3191_v24  ;;  %v4233_v61 = vmul.f32 %v12052_v50, %v4144_v45  ;;  %v3494_v26 = vld [vmem:[#allocation4 + $0x1a0] sm:$0x7f] }
 0x3d4   : > { %v6624_v16 = vsel %vm3828_vm1, %v6621_v4, %v16241_v53  ;;  %v7203_v0 = vsel %vm4384_vm2, %v7200_v60, %v16246_v42  ;;  %v16779_v11 = vrot.slane %v13578_v39, 1  ;;  %v4885_v2 = vmul.f32 %v12070_v47, %v4778_v3  ;;  %v4143_v42 = vld [vmem:[#allocation4 + $0x1b0] sm:$0x1] }
 0x3d5   : > { %v6356_v24 = vadd.f32 %v6260_v6, %v6056_v36  ;;  %v6813_v14 = vadd.f32 %v6621_v4, %v6354_v12  ;;  %v3369_v57 = vmax.f32 %v3305_v17, 0.0  ;;  %v4453_v45 = vrot.slane %v4233_v61, 2  ;;  %v4777_v36 = vld [vmem:[#allocation4 + $0x1e0] sm:$0x7f] }
 0x3d6   : > { %v4062_v58 = vadd.f32 %v16779_v11, %v3602_v34  ;;  %v5611_v59 = vmul.f32 %v12085_v9, %v5522_v31  ;;  %v6263_v52 = vmul.f32 %v12088_v1, %v6156_v41  ;;  %v6989_v53 = vmul.f32 %v12107_v56, %v6900_v55  ;;  %v5521_v31 = vld [vmem:[#allocation4 + $0x1f0] sm:$0x1] }
 0x3d7   : > { %v3193_v30 = vadd.f32 %v16781_v10, %v16780_v37  ;;  %v6815_v33 = vadd.f32 %v6624_v16, %v6356_v24  ;;  %v7432_v39 = vadd.f32 %v7200_v60, %v6813_v14  ;;  %3434 = vst [vmem:[#allocation4 + $0x310] sm:$0xff] %v3369_v57  ;;  %v16782_v34 = vrot.slane %v13586_v62, 2  ;;  %v6155_v62 = vld [vmem:[#allocation4 + $0x220] sm:$0x7f]  ;;  %v6899_v16 = vld [vmem:[#allocation4 + $0x230] sm:$0x1] }
 0x3d8   : > { %v3601_v6 = vmul.f32 %v16600_v20, %v3494_v26  ;;  %v5830_v61 = vrot.slane %v5611_v59, 2  ;;  %v7208_v4 = vrot.slane %v6989_v53, 2  ;;  %v16783_v37 = vrot.slane %v13671_v51, 1 }
 0x3d9   : > { %v4454_v3 = vsel %vm4384_vm2, %v16782_v34, %v4453_v45  ;;  %v3306_v12 = vadd.f32 %v12043_v43, %v3193_v30  ;;  %v13764_v41 = vadd.f32 %v7203_v0, %v6815_v33  ;;  %v7649_v10 = vrot.slane %v7432_v39, 7  ;;  %v16788_v45 = vld [vmem:[#allocation43_spill] sm:$0xff]  ;;  %v3497_v39 = vld [vmem:[#allocation4 + $0x1c8] sm:$0x80] }
 0x3da   : > { %v4682_v17 = vadd.f32 %v4454_v3, %v4062_v58  ;;  %v4061_v60 = vadd.f32 %v16783_v37, %v3601_v6  ;;  %v4232_v55 = vmul.f32 %v12115_v48, %v4143_v42  ;;  %v16784_v26 = vrot.slane %v13624_v32, 2 }
 0x3db   : > { %v16785_v53 = vrot.slane %v13651_v44, 2  ;;  %v3370_v24 = vmax.f32 %v3306_v12, 0.0  ;;  %v7650_v33 = vrot.slane %v13764_v41, 7  ;;  %v4884_v51 = vmul.f32 %v12123_v15, %v4777_v36  ;;  %v16787_v44 = vld [vmem:[#allocation40_spill] sm:$0xff] }
 0x3dc   : > { %v4981_v11 = vadd.f32 %v4885_v2, %v4682_v17  ;;  %v5831_v58 = vsel %vm4384_vm2, %v16784_v26, %v5830_v61  ;;  %v4451_v0 = vrot.slane %v4232_v55, 2  ;;  %v5610_v14 = vmul.f32 %v16581_v63, %v5521_v31  ;;  %v16790_v17 = vld [vmem:[#allocation35_spill] sm:$0xff]  ;;  %v16791_v61 = vld [vmem:[#allocation41_spill] sm:$0xff] }
 0x3dd   : > { %v7209_v30 = vsel %vm4384_vm2, %v16785_v53, %v7208_v4  ;;  %v16786_v42 = vrot.slane %v13600_v19, 1  ;;  %3435 = vst.msk [vmem:[#allocation4 + $0x318] sm:$0xff] %vm533_vm0, %v3370_v24  ;;  %v6262_v32 = vmul.f32 %v12129_v35, %v6155_v62  ;;  %v6988_v2 = vmul.f32 %v16589_v29, %v6899_v16  ;;  %v16793_v16 = vld [vmem:[#allocation44_spill] sm:$0xff]  ;;  %v4146_v53 = vld [vmem:[#allocation4 + $0x1d8] sm:$0xfe] }
 0x3de   : > { %v3197_v59 = vadd.f32 %v16788_v45, %v16787_v44  ;;  %v7651_v34 = vsel %vm7588_vm3, %v7649_v10, %v7650_v33  ;;  %v16789_v3 = vrot.slane %v13679_v49, 2  ;;  %v5828_v19 = vrot.slane %v5610_v14, 2  ;;  %v16794_v49 = vld [vmem:[#allocation62_spill] sm:$0xff]  ;;  %v4145_v41 = vld [vmem:[#allocation4 + $0x1d0] sm:$0xfe] }
 0x3df   : > { %v5440_v57 = vadd.f32 %v16786_v42, %v4981_v11  ;;  %v3199_v4 = vadd.f32 %v16791_v61, %v16790_v17  ;;  %8034 = vmatmul.mubr.f32.gmra.mrb[56].mxu1 %v7651_v34  ;;  %v7206_v31 = vrot.slane %v6988_v2, 2  ;;  %v16792_v55 = vrot.slane %v13706_v7, 2  ;;  %v4780_v42 = vld [vmem:[#allocation4 + $0x208] sm:$0x80] }
 0x3e0   : > { %v4452_v6 = vsel %vm4384_vm2, %v16789_v3, %v4451_v0  ;;  %v3307_v37 = vadd.f32 %v12034_v28, %v3197_v59  ;;  %v3203_v11 = vadd.f32 %v16794_v49, %v16793_v16  ;;  %v3604_v26 = vmul.f32 %v12039_v18, %v3497_v39  ;;  %v13839_v16 = vpop.f32.mrb[58].mxu0 }
 0x3e1   : > { %v6059_v12 = vadd.f32 %v5831_v58, %v5440_v57  ;;  %v4681_v36 = vadd.f32 %v4452_v6, %v4061_v60  ;;  %v5829_v62 = vsel %vm4384_vm2, %v16792_v55, %v5828_v19  ;;  %v3308_v10 = vadd.f32 %v12043_v43, %v3199_v4  ;;  %16799 = vst [vmem:[#allocation34_spill] sm:$0xff] %v13839_v16 }
 0x3e2   : > { %v16795_v58 = vrot.slane %v13736_v46, 2  ;;  %v3371_v14 = vmax.f32 %v3307_v37, 0.0  ;;  %v3309_v7 = vadd.f32 %v12034_v28, %v3203_v11  ;;  %v3606_v2 = vmul.f32 %v13383_v38, %v12039_v18 }
 0x3e3   : > { %v6359_v24 = vadd.f32 %v6263_v52, %v6059_v12  ;;  %v4980_v0 = vadd.f32 %v4884_v51, %v4681_v36  ;;  %v3372_v57 = vmax.f32 %v3308_v10, 0.0  ;;  %v3729_v44 = vmul.f32 %v13383_v38, %v16576_v21  ;;  %v13837_v10 = vpop.f32.mrb[26].mxu1 }
 0x3e4   : > { %v7207_v60 = vsel %vm4384_vm2, %v16795_v58, %v7206_v31  ;;  %v16796_v45 = vrot.slane %v13640_v8, 1  ;;  %v16797_v52 = vrot.slane %v13698_v40, 1  ;;  %3436 = vst [vmem:[#allocation4 + $0x320] sm:$0xff] %v3371_v14  ;;  %v13815_v46 = vmul.f32 %v13394_v23, %v16576_v21  ;;  %v5524_v31 = vld [vmem:[#allocation4 + $0x218] sm:$0xfe]  ;;  %16798 = vst [vmem:[#allocation52_spill] sm:$0xff] %v13837_v10 }
 0x3e5   : > { %v4235_v39 = vmul.f32 %v12052_v50, %v4146_v53  ;;  %3437 = vst.msk [vmem:[#allocation4 + $0x328] sm:$0xff] %vm533_vm0, %v3372_v57  ;;  %v3373_v34 = vmax.f32 %v3309_v7, 0.0  ;;  %v3872_v3 = vrot.slane %v3729_v44, 1  ;;  %v13821_v38 = vmul.f32 %v13394_v23, %v12052_v50  ;;  %v13844_v53 = vld [vmem:[#allocation4 + $0x258] sm:$0xff] }
 0x3e6   : > { %v6818_v59 = vadd.f32 %v16796_v45, %v6359_v24  ;;  %v5439_v51 = vadd.f32 %v16797_v52, %v4980_v0  ;;  %v4887_v8 = vmul.f32 %v12070_v47, %v4780_v42  ;;  %v16255_v19 = vrot.slane %v13815_v46, 1  ;;  %v13846_v24 = vpop.f32.mrb[27].mxu1  ;;  %v13848_v0 = vpop.f32.mrb[59].mxu0 }
 0x3e7   : > { %v4456_v17 = vrot.slane %v4235_v39, 2  ;;  %3438 = vst [vmem:[#allocation4 + $0x350] sm:$0xff] %v3373_v34  ;;  %v4064_v61 = vadd.f32 %v3872_v3, %v3604_v26  ;;  %v16254_v4 = vrot.slane %v13821_v38, 2  ;;  %v4889_v12 = vmul.f32 %v13613_v25, %v12070_v47  ;;  %16800 = vst [vmem:[#allocation28_spill] sm:$0xff] %v13846_v24 }
 0x3e8   : > { %v7437_v6 = vadd.f32 %v7209_v30, %v6818_v59  ;;  %v6058_v40 = vadd.f32 %v5829_v62, %v5439_v51  ;;  %v5108_v36 = vmul.f32 %v13613_v25, %v12076_v13  ;;  %v3876_v30 = vsel %vm3828_vm1, %v3872_v3, %v16255_v19  ;;  %v6158_v62 = vld [vmem:[#allocation4 + $0x248] sm:$0x80]  ;;  %16801 = vst [vmem:[#allocation45_spill] sm:$0xff] %v13848_v0  ;;  %v6902_v51 = vld [vmem:[#allocation4 + $0x258] sm:$0xfe] }
 0x3e9   : > { %v13835_v55 = vmul.f32 %v13626_v22, %v12076_v13  ;;  %v4066_v49 = vadd.f32 %v3876_v30, %v3606_v2  ;;  %v4460_v11 = vsel %vm4384_vm2, %v4456_v17, %v16254_v4  ;;  %v4684_v26 = vadd.f32 %v4456_v17, %v4064_v61  ;;  %v6901_v4 = vld [vmem:[#allocation4 + $0x250] sm:$0xfe]  ;;  %v6162_v0 = vld [vmem:[#allocation4 + $0x268] sm:$0x7f] }
 0x3ea   : > { %v7657_v23 = vrot.slane %v7437_v6, 7  ;;  %v6358_v37 = vadd.f32 %v6262_v32, %v6058_v40  ;;  %v5250_v32 = vrot.slane %v5108_v36, 1  ;;  %v16802_v58 = vrot.slane %v13686_v54, 7  ;;  %v13863_v54 = vld [vmem:[#allocation4 + $0x268] sm:$0xff] }
 0x3eb   : > { %v16803_v42 = vrot.slane %v13731_v5, 1  ;;  %v16249_v7 = vrot.slane %v13835_v55, 1  ;;  %v5613_v2 = vmul.f32 %v12085_v9, %v5524_v31  ;;  %v4686_v44 = vadd.f32 %v4460_v11, %v4066_v49 }
 0x3ec   : > { %v7658_v14 = vsel %vm7588_vm3, %v16802_v58, %v7657_v23  ;;  %v4983_v45 = vadd.f32 %v4887_v8, %v4684_v26  ;;  %v13860_v59 = vmul.f32 %v13626_v22, %v12085_v9  ;;  %v6265_v52 = vmul.f32 %v12088_v1, %v6158_v62  ;;  %v3496_v23 = vld [vmem:[#allocation4 + $0x1c0] sm:$0x80]  ;;  %v13890_v58 = vpop.f32.mrb[28].mxu1 }
 0x3ed   : > { %v6817_v57 = vadd.f32 %v16803_v42, %v6358_v37  ;;  %8548 = vmatprep.mubr.msk.f32.mxu1 %vm533_vm0, %v7658_v14  ;;  %v5254_v5 = vsel %vm3828_vm1, %v5250_v32, %v16249_v7  ;;  %v5833_v34 = vrot.slane %v5613_v2, 2  ;;  %v6267_v3 = vmul.f32 %v12088_v1, %v13844_v53  ;;  %16804 = vst [vmem:[#allocation40_spill] sm:$0xff] %v13890_v58  ;;  %v13892_v14 = vpop.f32.mrb[60].mxu0  ;;  %v16806_v2 = vld [vmem:[#allocation61_spill] sm:$0xff] }
 0x3ee   : > { %v4985_v6 = vadd.f32 %v4889_v12, %v4686_v44  ;;  %v5442_v8 = vadd.f32 %v5250_v32, %v4983_v45  ;;  %v16251_v40 = vrot.slane %v13860_v59, 2  ;;  %v6486_v17 = vmul.f32 %v16566_v27, %v13844_v53  ;;  %16805 = vst [vmem:[#allocation43_spill] sm:$0xff] %v13892_v14  ;;  %v16807_v44 = vld [vmem:[#allocation64_spill] sm:$0xff]  ;;  %v4148_v14 = vld [vmem:[#allocation4 + $0x1f8] sm:$0x1] }
 0x3ef   : > { %v7436_v39 = vadd.f32 %v7207_v60, %v6817_v57  ;;  %v13875_v36 = vmul.f32 %v16566_v27, %v13863_v54  ;;  %v6991_v60 = vmul.f32 %v12107_v56, %v6902_v51  ;;  %v13880_v31 = vmul.f32 %v12107_v56, %v13863_v54  ;;  %v5526_v58 = vld [vmem:[#allocation4 + $0x238] sm:$0x1] }
 0x3f0   : > { %v5444_v37 = vadd.f32 %v5254_v5, %v4985_v6  ;;  %v5837_v12 = vsel %vm4384_vm2, %v5833_v34, %v16251_v40  ;;  %v6061_v30 = vadd.f32 %v5833_v34, %v5442_v8  ;;  %v6628_v62 = vrot.slane %v6486_v17, 1  ;;  %v16809_v6 = vld [vmem:[#allocation55_spill] sm:$0xff]  ;;  %v16810_v8 = vld [vmem:[#allocation29_spill] sm:$0xff] }
 0x3f1   : > { %v7655_v61 = vrot.slane %v7436_v39, 7  ;;  %v16248_v11 = vrot.slane %v13875_v36, 1  ;;  %v7211_v26 = vrot.slane %v6991_v60, 2  ;;  %v16250_v32 = vrot.slane %v13880_v31, 2  ;;  %v4779_v39 = vld [vmem:[#allocation4 + $0x200] sm:$0x80] }
 0x3f2   : > { %v6063_v42 = vadd.f32 %v5837_v12, %v5444_v37  ;;  %v6361_v57 = vadd.f32 %v6265_v52, %v6061_v30  ;;  %v3205_v45 = vadd.f32 %v16807_v44, %v16806_v2  ;;  %v3603_v51 = vmul.f32 %v16600_v20, %v3496_v23  ;;  %v16811_v37 = vld [vmem:[#allocation49_spill] sm:$0xff] }
 0x3f3   : > { %v7656_v49 = vsel %vm7588_vm3, %v7650_v33, %v7655_v61  ;;  %v13897_v33 = vpop.f32.mrb[29].mxu1  ;;  %v6632_v5 = vsel %vm3828_vm1, %v6628_v62, %v16248_v11  ;;  %v7215_v34 = vsel %vm4384_vm2, %v7211_v26, %v16250_v32  ;;  %v3605_v52 = vmul.f32 %v16809_v6, %v16600_v20  ;;  %v5523_v32 = vld [vmem:[#allocation4 + $0x210] sm:$0xfe] }
 0x3f4   : > { %8040 = vmatmul.mubr.f32.gmra.mrb[58].mxu1 %v7656_v49  ;;  %16808 = vst [vmem:[#allocation35_spill] sm:$0xff] %v13897_v33  ;;  %v3728_v17 = vmul.f32 %v16809_v6, %v16810_v8  ;;  %v6363_v61 = vadd.f32 %v6267_v3, %v6063_v42  ;;  %v6820_v60 = vadd.f32 %v6628_v62, %v6361_v57  ;;  %v3501_v33 = vld [vmem:[#allocation4 + $0x1e8] sm:$0x7f] }
 0x3f5   : > { %v3310_v23 = vadd.f32 %v12043_v43, %v3205_v45  ;;  %v13912_v12 = vmul.f32 %v16811_v37, %v16810_v8  ;;  %v4234_v49 = vmul.f32 %v12115_v48, %v4145_v41  ;;  %v13917_v2 = vmul.f32 %v16811_v37, %v12115_v48  ;;  %v16812_v45 = vld [vmem:[#allocation57_spill] sm:$0xff]  ;;  %v13941_v37 = vpop.f32.mrb[61].mxu0 }
 0x3f6   : > { %v3871_v30 = vrot.slane %v3728_v17, 1  ;;  %v4886_v44 = vmul.f32 %v12123_v15, %v4779_v39  ;;  %v6822_v11 = vadd.f32 %v6632_v5, %v6363_v61  ;;  %v7439_v7 = vadd.f32 %v7211_v26, %v6820_v60  ;;  %v16813_v39 = vld [vmem:[#allocation31_spill] sm:$0xff]  ;;  %16816 = vst [vmem:[#allocation44_spill] sm:$0xff] %v13941_v37 }
 0x3f7   : > { %v3374_v6 = vmax.f32 %v3310_v23, 0.0  ;;  %v16253_v3 = vrot.slane %v13912_v12, 1  ;;  %v4455_v42 = vrot.slane %v4234_v49, 2  ;;  %v16252_v57 = vrot.slane %v13917_v2, 2 }
 0x3f8   : > { %v4063_v62 = vadd.f32 %v3871_v30, %v3603_v51  ;;  %v4888_v17 = vmul.f32 %v16812_v45, %v12123_v15  ;;  %v13924_v41 = vadd.f32 %v7215_v34, %v6822_v11  ;;  %v7662_v40 = vrot.slane %v7439_v7, 7  ;;  %v6157_v51 = vld [vmem:[#allocation4 + $0x240] sm:$0x80]  ;;  %v13939_v7 = vld [vmem:[#allocation4 + $0x250] sm:$0xff] }
 0x3f9   : > { %3439 = vst.msk [vmem:[#allocation4 + $0x358] sm:$0xff] %vm533_vm0, %v3374_v6  ;;  %v3874_v26 = vsel %vm3828_vm1, %v3871_v30, %v16253_v3  ;;  %v5107_v5 = vmul.f32 %v16812_v45, %v16813_v39  ;;  %v4458_v60 = vsel %vm4384_vm2, %v4455_v42, %v16252_v57  ;;  %v16814_v11 = vld [vmem:[#allocation63_spill] sm:$0xff]  ;;  %16815 = vst [vmem:[#allocation41_spill] sm:$0xff] %v13939_v7 }
 0x3fa   : > { %v4065_v61 = vadd.f32 %v3874_v26, %v3605_v52  ;;  %v4683_v23 = vadd.f32 %v4455_v42, %v4063_v62  ;;  %v13937_v34 = vmul.f32 %v16814_v11, %v16813_v39  ;;  %v16256_v30 = vrot.slane %v13924_v41, 7  ;;  %v13951_v3 = vld [vmem:[#allocation4 + $0x260] sm:$0xff] }
 0x3fb   : > { %v5249_v49 = vrot.slane %v5107_v5, 1  ;;  %v5612_v6 = vmul.f32 %v16581_v63, %v5523_v32  ;;  %v13947_v52 = vmul.f32 %v16814_v11, %v16581_v63  ;;  %v6264_v42 = vmul.f32 %v12129_v35, %v6157_v51  ;;  %16817 = vst [vmem:[#allocation62_spill] sm:$0xff] %v13951_v3 }
 0x3fc   : > { %v4685_v26 = vadd.f32 %v4458_v60, %v4065_v61  ;;  %v4982_v57 = vadd.f32 %v4886_v44, %v4683_v23  ;;  %v16257_v62 = vrot.slane %v13937_v34, 1  ;;  %v7664_v19 = vsel %vm7588_vm3, %v7662_v40, %v16256_v30  ;;  %v16818_v60 = vld [vmem:[#allocation36_spill] sm:$0xff] }
 0x3fd   : > { %v5832_v5 = vrot.slane %v5612_v6, 2  ;;  %v16258_v32 = vrot.slane %v13947_v52, 2  ;;  %v6266_v37 = vmul.f32 %v12129_v35, %v13939_v7  ;;  %8549 = vmatprep.mubr.msk.f32.mxu1 %vm533_vm0, %v7664_v19  ;;  %v6485_v23 = vmul.f32 %v16818_v60, %v13939_v7 }
 0x3fe   : > { %v4984_v44 = vadd.f32 %v4888_v17, %v4685_v26  ;;  %v5252_v51 = vsel %vm3828_vm1, %v5249_v49, %v16257_v62  ;;  %v5441_v61 = vadd.f32 %v5249_v49, %v4982_v57  ;;  %v13970_v6 = vmul.f32 %v16818_v60, %v13951_v3  ;;  %v4784_v26 = vld [vmem:[#allocation4 + $0x228] sm:$0x7f] }
 0x3ff   : > { %v5835_v40 = vsel %vm4384_vm2, %v5832_v5, %v16258_v32  ;;  %v6990_v19 = vmul.f32 %v16589_v29, %v6901_v4  ;;  %v13975_v17 = vmul.f32 %v16589_v29, %v13951_v3  ;;  %v6627_v30 = vrot.slane %v6485_v23, 1  ;;  %v6904_v4 = vld [vmem:[#allocation4 + $0x278] sm:$0x1] }
 0x400   : > { %v5443_v57 = vadd.f32 %v5252_v51, %v4984_v44  ;;  %v6060_v49 = vadd.f32 %v5832_v5, %v5441_v61  ;;  %v3608_v62 = vmul.f32 %v12039_v18, %v3501_v33  ;;  %v16265_v32 = vrot.slane %v13970_v6, 1 }
 0x401   : > { %v7210_v24 = vrot.slane %v6990_v19, 2  ;;  %v16266_v16 = vrot.slane %v13975_v17, 2  ;;  %v4239_v10 = vmul.f32 %v12052_v50, %v4148_v14  ;;  %v16819_v3 = vrot.slane %v13815_v46, 1 }
 0x402   : > { %v6062_v60 = vadd.f32 %v5835_v40, %v5443_v57  ;;  %v6360_v39 = vadd.f32 %v6264_v42, %v6060_v49  ;;  %v4891_v5 = vmul.f32 %v12070_v47, %v4784_v26  ;;  %v6630_v33 = vsel %vm3828_vm1, %v6627_v30, %v16265_v32  ;;  %v16821_v26 = vld [vmem:[#allocation38_spill] sm:$0xff]  ;;  %v16822_v57 = vld [vmem:[#allocation47_spill] sm:$0xff] }
 0x403   : > { %v4068_v7 = vadd.f32 %v16819_v3, %v3608_v62  ;;  %v7213_v44 = vsel %vm4384_vm2, %v7210_v24, %v16266_v16  ;;  %v4463_v51 = vrot.slane %v4239_v10, 2  ;;  %v5617_v61 = vmul.f32 %v12085_v9, %v5526_v58  ;;  %v3500_v3 = vld [vmem:[#allocation4 + $0x1e0] sm:$0x7f]  ;;  %v16824_v16 = vld [vmem:[#allocation48_spill] sm:$0xff] }
 0x404   : > { %v6362_v14 = vadd.f32 %v6266_v37, %v6062_v60  ;;  %v6819_v23 = vadd.f32 %v6627_v30, %v6360_v39  ;;  %v6269_v42 = vmul.f32 %v12088_v1, %v6162_v0  ;;  %v6995_v46 = vmul.f32 %v12107_v56, %v6904_v4  ;;  %v16823_v32 = vld [vmem:[#allocation46_spill] sm:$0xff]  ;;  %v4147_v30 = vld [vmem:[#allocation4 + $0x1f0] sm:$0x1] }
 0x405   : > { %v16820_v62 = vrot.slane %v13821_v38, 2  ;;  %v5840_v19 = vrot.slane %v5617_v61, 2  ;;  %v3209_v49 = vadd.f32 %v16822_v57, %v16821_v26  ;;  %v3211_v10 = vadd.f32 %v16824_v16, %v16823_v32  ;;  %v4783_v61 = vld [vmem:[#allocation4 + $0x220] sm:$0x7f] }
 0x406   : > { %v6821_v11 = vadd.f32 %v6630_v33, %v6362_v14  ;;  %v7438_v58 = vadd.f32 %v7210_v24, %v6819_v23  ;;  %v7218_v39 = vrot.slane %v6995_v46, 2  ;;  %v16825_v0 = vrot.slane %v13860_v59, 2  ;;  %v6161_v33 = vld [vmem:[#allocation4 + $0x260] sm:$0x7f]  ;;  %v6903_v59 = vld [vmem:[#allocation4 + $0x270] sm:$0x1] }
 0x407   : > { %v4464_v40 = vsel %vm4384_vm2, %v16820_v62, %v4463_v51  ;;  %v3311_v38 = vadd.f32 %v12034_v28, %v3209_v49  ;;  %v3312_v4 = vadd.f32 %v12043_v43, %v3211_v10  ;;  %v3607_v51 = vmul.f32 %v16600_v20, %v3500_v3  ;;  %v5525_v62 = vld [vmem:[#allocation4 + $0x230] sm:$0x1]  ;;  %v3503_v3 = vld [vmem:[#allocation4 + $0x208] sm:$0x80] }
 0x408   : > { %v4688_v37 = vadd.f32 %v4464_v40, %v4068_v7  ;;  %v5841_v60 = vsel %vm4384_vm2, %v16825_v0, %v5840_v19  ;;  %v14006_v26 = vadd.f32 %v7213_v44, %v6821_v11  ;;  %v7659_v16 = vrot.slane %v7438_v58, 7  ;;  %v16829_v58 = vld [vmem:[#allocation50_spill] sm:$0xff] }
 0x409   : > { %v16826_v24 = vrot.slane %v13880_v31, 2  ;;  %v3375_v14 = vmax.f32 %v3311_v38, 0.0  ;;  %v3376_v23 = vmax.f32 %v3312_v4, 0.0  ;;  %v16827_v46 = vrot.slane %v13912_v12, 1  ;;  %v4150_v4 = vld [vmem:[#allocation4 + $0x218] sm:$0xfe] }
 0x40a   : > { %v4987_v32 = vadd.f32 %v4891_v5, %v4688_v37  ;;  %v4238_v19 = vmul.f32 %v12115_v48, %v4147_v30  ;;  %v7660_v57 = vrot.slane %v14006_v26, 7  ;;  %v16828_v11 = vrot.slane %v13835_v55, 1  ;;  %v16830_v37 = vld [vmem:[#allocation54_spill] sm:$0xff] }
 0x40b   : > { %v7219_v7 = vsel %vm4384_vm2, %v16826_v24, %v7218_v39  ;;  %v4067_v40 = vadd.f32 %v16827_v46, %v3607_v51  ;;  %v4890_v5 = vmul.f32 %v12123_v15, %v4783_v61  ;;  %v5616_v31 = vmul.f32 %v16581_v63, %v5525_v62  ;;  %3440 = vst [vmem:[#allocation4 + $0x360] sm:$0xff] %v3375_v14 }
 0x40c   : > { %v5446_v44 = vadd.f32 %v16828_v11, %v4987_v32  ;;  %3441 = vst.msk [vmem:[#allocation4 + $0x368] sm:$0xff] %vm533_vm0, %v3376_v23  ;;  %v4461_v49 = vrot.slane %v4238_v19, 2  ;;  %v6268_v10 = vmul.f32 %v12129_v35, %v6161_v33  ;;  %v6994_v12 = vmul.f32 %v16589_v29, %v6903_v59  ;;  %v4786_v23 = vld [vmem:[#allocation4 + $0x248] sm:$0x80] }
 0x40d   : > { %v3215_v39 = vadd.f32 %v16830_v37, %v16829_v58  ;;  %v7661_v55 = vsel %vm7588_vm3, %v7659_v16, %v7660_v57  ;;  %v5838_v0 = vrot.slane %v5616_v31, 2  ;;  %v3610_v38 = vmul.f32 %v12039_v18, %v3503_v3  ;;  %v5528_v31 = vld [vmem:[#allocation4 + $0x258] sm:$0xfe] }
 0x40e   : > { %v6065_v30 = vadd.f32 %v5841_v60, %v5446_v44  ;;  %8046 = vmatmul.mubr.f32.gmra.mrb[60].mxu1 %v7661_v55  ;;  %v16831_v51 = vrot.slane %v13917_v2, 2  ;;  %v7216_v62 = vrot.slane %v6994_v12, 2  ;;  %v3612_v24 = vmul.f32 %v13613_v25, %v12039_v18 }
 0x40f   : > { %v3313_v32 = vadd.f32 %v12034_v28, %v3215_v39  ;;  %v16832_v16 = vrot.slane %v13947_v52, 2  ;;  %v3733_v14 = vmul.f32 %v13613_v25, %v16576_v21  ;;  %v16833_v2 = vrot.slane %v13975_v17, 2 }
 0x410   : > { %v4462_v61 = vsel %vm4384_vm2, %v16831_v51, %v4461_v49  ;;  %v6365_v33 = vadd.f32 %v6269_v42, %v6065_v30  ;;  %v14044_v3 = vmul.f32 %v13626_v22, %v16576_v21  ;;  %v4241_v42 = vmul.f32 %v12052_v50, %v4150_v4 }
 0x411   : > { %v4687_v59 = vadd.f32 %v4462_v61, %v4067_v40  ;;  %v5839_v60 = vsel %vm4384_vm2, %v16832_v16, %v5838_v0  ;;  %v7217_v46 = vsel %vm4384_vm2, %v16833_v2, %v7216_v62  ;;  %v3377_v19 = vmax.f32 %v3313_v32, 0.0  ;;  %v6164_v61 = vld [vmem:[#allocation4 + $0x288] sm:$0x80]  ;;  %v14073_v62 = vpop.f32.mrb[30].mxu1  ;;  %v14075_v32 = vpop.f32.mrb[62].mxu0 }
 0x412   : > { %v16834_v40 = vrot.slane %v13875_v36, 1  ;;  %v3878_v44 = vrot.slane %v3733_v14, 1  ;;  %v14051_v25 = vmul.f32 %v13626_v22, %v12052_v50  ;;  %v16275_v17 = vrot.slane %v14044_v3, 1  ;;  %16836 = vst [vmem:[#allocation61_spill] sm:$0xff] %v14073_v62  ;;  %16837 = vst [vmem:[#allocation64_spill] sm:$0xff] %v14075_v32 }
 0x413   : > { %v4986_v11 = vadd.f32 %v4890_v5, %v4687_v59  ;;  %3442 = vst [vmem:[#allocation4 + $0x390] sm:$0xff] %v3377_v19  ;;  %v4466_v49 = vrot.slane %v4241_v42, 2  ;;  %v4893_v12 = vmul.f32 %v12070_v47, %v4786_v23  ;;  %v4895_v58 = vmul.f32 %v13844_v53, %v12070_v47  ;;  %v14082_v23 = vld [vmem:[#allocation4 + $0x298] sm:$0xff] }
 0x414   : > { %v6824_v52 = vadd.f32 %v16834_v40, %v6365_v33  ;;  %v16835_v36 = vrot.slane %v13937_v34, 1  ;;  %v4070_v5 = vadd.f32 %v3878_v44, %v3610_v38  ;;  %v16274_v55 = vrot.slane %v14051_v25, 2  ;;  %v6908_v32 = vld [vmem:[#allocation4 + $0x2b8] sm:$0x1] }
 0x415   : > { %v3882_v22 = vsel %vm3828_vm1, %v3878_v44, %v16275_v17  ;;  %v5112_v30 = vmul.f32 %v13844_v53, %v12076_v13  ;;  %v14067_v0 = vmul.f32 %v13863_v54, %v12076_v13  ;;  %v5619_v4 = vmul.f32 %v12085_v9, %v5528_v31  ;;  %v6906_v44 = vld [vmem:[#allocation4 + $0x298] sm:$0xfe] }
 0x416   : > { %v7443_v37 = vadd.f32 %v7219_v7, %v6824_v52  ;;  %v5445_v39 = vadd.f32 %v16835_v36, %v4986_v11  ;;  %v4072_v34 = vadd.f32 %v3882_v22, %v3612_v24  ;;  %v4470_v38 = vsel %vm4384_vm2, %v4466_v49, %v16274_v55  ;;  %v14084_v24 = vpop.f32.mrb[31].mxu1  ;;  %v14091_v11 = vld [vmem:[#allocation4 + $0x2a8] sm:$0xff] }
 0x417   : > { %v4690_v33 = vadd.f32 %v4466_v49, %v4070_v5  ;;  %v5256_v59 = vrot.slane %v5112_v30, 1  ;;  %v16269_v16 = vrot.slane %v14067_v0, 1  ;;  %v14080_v14 = vmul.f32 %v13863_v54, %v12085_v9  ;;  %16838 = vst [vmem:[#allocation55_spill] sm:$0xff] %v14084_v24  ;;  %v16850_v55 = vld [vmem:[#allocation36_spill] sm:$0xff] }
 0x418   : > { %v7667_v7 = vrot.slane %v7443_v37, 7  ;;  %v6064_v51 = vadd.f32 %v5839_v60, %v5445_v39  ;;  %v14086_v60 = vpop.f32.mrb[63].mxu0  ;;  %v16840_v2 = vrot.slane %v13924_v41, 7  ;;  %v4692_v40 = vadd.f32 %v4470_v38, %v4072_v34 }
 0x419   : > { %16839 = vst [vmem:[#allocation49_spill] sm:$0xff] %v14086_v60  ;;  %v5843_v52 = vrot.slane %v5619_v4, 2  ;;  %v4989_v31 = vadd.f32 %v4893_v12, %v4690_v33  ;;  %v5260_v49 = vsel %vm3828_vm1, %v5256_v59, %v16269_v16  ;;  %v16273_v37 = vrot.slane %v14080_v14, 2 }
 0x41a   : > { %v7668_v19 = vsel %vm7588_vm3, %v16840_v2, %v7667_v7  ;;  %v6364_v42 = vadd.f32 %v6268_v10, %v6064_v51  ;;  %v6271_v36 = vmul.f32 %v12088_v1, %v6164_v61  ;;  %v16841_v41 = vrot.slane %v13970_v6, 1  ;;  %v3502_v6 = vld [vmem:[#allocation4 + $0x200] sm:$0x80] }
 0x41b   : > { %8550 = vmatprep.mubr.msk.f32.mxu1 %vm533_vm0, %v7668_v19  ;;  %v4991_v10 = vadd.f32 %v4895_v58, %v4692_v40  ;;  %v6273_v5 = vmul.f32 %v12088_v1, %v14082_v23  ;;  %v6490_v22 = vmul.f32 %v16566_v27, %v14082_v23  ;;  %v5448_v30 = vadd.f32 %v5256_v59, %v4989_v31  ;;  %v16842_v2 = vld [vmem:[#allocation51_spill] sm:$0xff]  ;;  %v16843_v19 = vld [vmem:[#allocation60_spill] sm:$0xff] }
 0x41c   : > { %v6823_v39 = vadd.f32 %v16841_v41, %v6364_v42  ;;  %v5847_v12 = vsel %vm4384_vm2, %v5843_v52, %v16273_v37  ;;  %v14110_v4 = vmul.f32 %v16566_v27, %v14091_v11  ;;  %v6997_v7 = vmul.f32 %v12107_v56, %v6906_v44 }
 0x41d   : > { %v5450_v58 = vadd.f32 %v5260_v49, %v4991_v10  ;;  %v6634_v34 = vrot.slane %v6490_v22, 1  ;;  %v14115_v38 = vmul.f32 %v12107_v56, %v14091_v11  ;;  %v6067_v61 = vadd.f32 %v5843_v52, %v5448_v30  ;;  %v4785_v22 = vld [vmem:[#allocation4 + $0x240] sm:$0x80] }
 0x41e   : > { %v7442_v51 = vadd.f32 %v7217_v46, %v6823_v39  ;;  %v16268_v33 = vrot.slane %v14110_v4, 1  ;;  %v7221_v59 = vrot.slane %v6997_v7, 2  ;;  %v3217_v42 = vadd.f32 %v16843_v19, %v16842_v2  ;;  %v4149_v46 = vld [vmem:[#allocation4 + $0x210] sm:$0xfe] }
 0x41f   : > { %v6069_v31 = vadd.f32 %v5847_v12, %v5450_v58  ;;  %v16271_v41 = vrot.slane %v14115_v38, 2  ;;  %v3609_v44 = vmul.f32 %v16600_v20, %v3502_v6  ;;  %v6367_v49 = vadd.f32 %v6271_v36, %v6067_v61  ;;  %v16844_v58 = vld [vmem:[#allocation63_spill] sm:$0xff] }
 0x420   : > { %v7665_v40 = vrot.slane %v7442_v51, 7  ;;  %v6638_v39 = vsel %vm3828_vm1, %v6634_v34, %v16268_v33  ;;  %v3314_v52 = vadd.f32 %v12043_v43, %v3217_v42  ;;  %v3611_v10 = vmul.f32 %v16812_v45, %v16600_v20  ;;  %v5527_v42 = vld [vmem:[#allocation4 + $0x250] sm:$0xfe] }
 0x421   : > { %v6369_v12 = vadd.f32 %v6273_v5, %v6069_v31  ;;  %v7225_v7 = vsel %vm4384_vm2, %v7221_v59, %v16271_v41  ;;  %v3732_v36 = vmul.f32 %v16812_v45, %v16810_v8  ;;  %v6826_v6 = vadd.f32 %v6634_v34, %v6367_v49  ;;  %v16845_v31 = vld [vmem:[#allocation41_spill] sm:$0xff] }
 0x422   : > { %v7666_v30 = vsel %vm7588_vm3, %v7660_v57, %v7665_v40  ;;  %v3378_v51 = vmax.f32 %v3314_v52, 0.0  ;;  %v14138_v61 = vmul.f32 %v16844_v58, %v16810_v8  ;;  %v4240_v2 = vmul.f32 %v12115_v48, %v4149_v46  ;;  %v6905_v41 = vld [vmem:[#allocation4 + $0x290] sm:$0xfe] }
 0x423   : > { %8052 = vmatmul.mubr.f32.gmra.mrb[62].mxu1 %v7666_v30  ;;  %v6828_v26 = vadd.f32 %v6638_v39, %v6369_v12  ;;  %v3877_v19 = vrot.slane %v3732_v36, 1  ;;  %v14143_v57 = vmul.f32 %v16844_v58, %v12115_v48  ;;  %v4892_v5 = vmul.f32 %v12123_v15, %v4785_v22  ;;  %v16846_v30 = vld [vmem:[#allocation31_spill] sm:$0xff]  ;;  %v16847_v22 = vld [vmem:[#allocation62_spill] sm:$0xff] }
 0x424   : > { %v7445_v40 = vadd.f32 %v7221_v59, %v6826_v6  ;;  %3443 = vst.msk [vmem:[#allocation4 + $0x398] sm:$0xff] %vm533_vm0, %v3378_v51  ;;  %v16270_v45 = vrot.slane %v14138_v61, 1  ;;  %v4465_v34 = vrot.slane %v4240_v2, 2  ;;  %v4894_v49 = vmul.f32 %v16845_v31, %v12123_v15  ;;  %v6163_v58 = vld [vmem:[#allocation4 + $0x280] sm:$0x80] }
 0x425   : > { %v14150_v52 = vadd.f32 %v7225_v7, %v6828_v26  ;;  %v4069_v46 = vadd.f32 %v3877_v19, %v3609_v44  ;;  %v16272_v39 = vrot.slane %v14143_v57, 2  ;;  %v5111_v12 = vmul.f32 %v16845_v31, %v16846_v30 }
 0x426   : > { %v7672_v36 = vrot.slane %v7445_v40, 7  ;;  %v3880_v59 = vsel %vm3828_vm1, %v3877_v19, %v16270_v45  ;;  %v14160_v6 = vmul.f32 %v16847_v22, %v16846_v30  ;;  %v5618_v51 = vmul.f32 %v16581_v63, %v5527_v42  ;;  %v14167_v40 = vld [vmem:[#allocation4 + $0x290] sm:$0xff]  ;;  %v14174_v42 = vld [vmem:[#allocation4 + $0x2a0] sm:$0xff] }
 0x427   : > { %v16276_v7 = vrot.slane %v14150_v52, 7  ;;  %v4071_v44 = vadd.f32 %v3880_v59, %v3611_v10  ;;  %v4468_v2 = vsel %vm4384_vm2, %v4465_v34, %v16272_v39  ;;  %v4689_v26 = vadd.f32 %v4465_v34, %v4069_v46  ;;  %16848 = vst [vmem:[#allocation57_spill] sm:$0xff] %v14167_v40  ;;  %16849 = vst [vmem:[#allocation38_spill] sm:$0xff] %v14174_v42  ;;  %v3507_v46 = vld [vmem:[#allocation4 + $0x228] sm:$0x7f] }
 0x428   : > { %v5255_v33 = vrot.slane %v5111_v12, 1  ;;  %v16277_v19 = vrot.slane %v14160_v6, 1  ;;  %v14172_v16 = vmul.f32 %v16847_v22, %v16581_v63  ;;  %v5842_v45 = vrot.slane %v5618_v51, 2  ;;  %v16856_v22 = vld [vmem:[#allocation37_spill] sm:$0xff] }
 0x429   : > { %v7674_v10 = vsel %vm7588_vm3, %v7672_v36, %v16276_v7  ;;  %v4691_v59 = vadd.f32 %v4468_v2, %v4071_v44  ;;  %v4988_v39 = vadd.f32 %v4892_v5, %v4689_v26  ;;  %v6270_v34 = vmul.f32 %v12129_v35, %v6163_v58  ;;  %v4152_v2 = vld [vmem:[#allocation4 + $0x238] sm:$0x1]  ;;  %v4790_v26 = vld [vmem:[#allocation4 + $0x268] sm:$0x7f] }
 0x42a   : > { %8551 = vmatprep.mubr.msk.f32.mxu1 %vm533_vm0, %v7674_v10  ;;  %v5258_v12 = vsel %vm3828_vm1, %v5255_v33, %v16277_v19  ;;  %v16279_v51 = vrot.slane %v14172_v16, 2  ;;  %v6272_v37 = vmul.f32 %v12129_v35, %v14167_v40  ;;  %v6489_v17 = vmul.f32 %v16850_v55, %v14167_v40 }
 0x42b   : > { %v4990_v36 = vadd.f32 %v4894_v49, %v4691_v59  ;;  %v5447_v44 = vadd.f32 %v5255_v33, %v4988_v39  ;;  %v14191_v5 = vmul.f32 %v16850_v55, %v14174_v42  ;;  %v6996_v58 = vmul.f32 %v16589_v29, %v6905_v41  ;;  %v5530_v33 = vld [vmem:[#allocation4 + $0x278] sm:$0x1]  ;;  %v6168_v41 = vld [vmem:[#allocation4 + $0x2a8] sm:$0x7f] }
 0x42c   : > { %v5845_v10 = vsel %vm4384_vm2, %v5842_v45, %v16279_v51  ;;  %v6633_v7 = vrot.slane %v6489_v17, 1  ;;  %v14199_v19 = vmul.f32 %v16589_v29, %v14174_v42  ;;  %v3614_v49 = vmul.f32 %v12039_v18, %v3507_v46 }
 0x42d   : > { %v5449_v39 = vadd.f32 %v5258_v12, %v4990_v36  ;;  %v6066_v59 = vadd.f32 %v5842_v45, %v5447_v44  ;;  %v16285_v60 = vrot.slane %v14191_v5, 1  ;;  %v7220_v24 = vrot.slane %v6996_v58, 2  ;;  %v3506_v12 = vld [vmem:[#allocation4 + $0x220] sm:$0x7f] }
 0x42e   : > { %v16288_v62 = vrot.slane %v14199_v19, 2  ;;  %v16851_v55 = vrot.slane %v14044_v3, 1  ;;  %v4245_v17 = vmul.f32 %v12052_v50, %v4152_v2  ;;  %v4897_v42 = vmul.f32 %v12070_v47, %v4790_v26 }
 0x42f   : > { %v6068_v30 = vadd.f32 %v5845_v10, %v5449_v39  ;;  %v6366_v40 = vadd.f32 %v6270_v34, %v6066_v59  ;;  %v6636_v45 = vsel %vm3828_vm1, %v6633_v7, %v16285_v60  ;;  %v5623_v46 = vmul.f32 %v12085_v9, %v5530_v33  ;;  %v16852_v34 = vld [vmem:[#allocation53_spill] sm:$0xff]  ;;  %v16853_v10 = vld [vmem:[#allocation56_spill] sm:$0xff]  ;;  %v16855_v60 = vld [vmem:[#allocation39_spill] sm:$0xff] }
 0x430   : > { %v4074_v51 = vadd.f32 %v16851_v55, %v3614_v49  ;;  %v7223_v36 = vsel %vm4384_vm2, %v7220_v24, %v16288_v62  ;;  %v4473_v44 = vrot.slane %v4245_v17, 2  ;;  %v6275_v3 = vmul.f32 %v12088_v1, %v6168_v41  ;;  %v4151_v62 = vld [vmem:[#allocation4 + $0x230] sm:$0x1] }
 0x431   : > { %v7001_v55 = vmul.f32 %v12107_v56, %v6908_v32  ;;  %v6368_v58 = vadd.f32 %v6272_v37, %v6068_v30  ;;  %v6825_v2 = vadd.f32 %v6633_v7, %v6366_v40  ;;  %v5850_v26 = vrot.slane %v5623_v46, 2  ;;  %v4789_v7 = vld [vmem:[#allocation4 + $0x260] sm:$0x7f]  ;;  %v5529_v40 = vld [vmem:[#allocation4 + $0x270] sm:$0x1] }
 0x432   : > { %v3221_v49 = vadd.f32 %v16853_v10, %v16852_v34  ;;  %v16854_v39 = vrot.slane %v14051_v25, 2  ;;  %v3223_v8 = vadd.f32 %v16856_v22, %v16855_v60  ;;  %v3613_v17 = vmul.f32 %v16600_v20, %v3506_v12 }
 0x433   : > { %v7228_v59 = vrot.slane %v7001_v55, 2  ;;  %v6827_v41 = vadd.f32 %v6636_v45, %v6368_v58  ;;  %v7444_v31 = vadd.f32 %v7220_v24, %v6825_v2  ;;  %v16857_v37 = vrot.slane %v14080_v14, 2  ;;  %v6167_v45 = vld [vmem:[#allocation4 + $0x2a0] sm:$0x7f]  ;;  %v6907_v58 = vld [vmem:[#allocation4 + $0x2b0] sm:$0x1] }
 0x434   : > { %v4474_v33 = vsel %vm4384_vm2, %v16854_v39, %v4473_v44  ;;  %v16858_v25 = vrot.slane %v14115_v38, 2  ;;  %v3315_v44 = vadd.f32 %v12034_v28, %v3221_v49  ;;  %v3316_v60 = vadd.f32 %v12043_v43, %v3223_v8  ;;  %v3509_v2 = vld [vmem:[#allocation4 + $0x248] sm:$0x80] }
 0x435   : > { %v4694_v32 = vadd.f32 %v4474_v33, %v4074_v51  ;;  %v5851_v30 = vsel %vm4384_vm2, %v16857_v37, %v5850_v26  ;;  %v16859_v22 = vrot.slane %v14138_v61, 1  ;;  %v14235_v24 = vadd.f32 %v7223_v36, %v6827_v41  ;;  %v16862_v33 = vld [vmem:[#allocation42_spill] sm:$0xff] }
 0x436   : > { %v7229_v46 = vsel %vm4384_vm2, %v16858_v25, %v7228_v59  ;;  %v7669_v51 = vrot.slane %v7444_v31, 7  ;;  %v4244_v55 = vmul.f32 %v12115_v48, %v4151_v62  ;;  %v3379_v26 = vmax.f32 %v3315_v44, 0.0  ;;  %v4154_v41 = vld [vmem:[#allocation4 + $0x258] sm:$0xfe] }
 0x437   : > { %v4073_v12 = vadd.f32 %v16859_v22, %v3613_v17  ;;  %v4993_v14 = vadd.f32 %v4897_v42, %v4694_v32  ;;  %v3380_v38 = vmax.f32 %v3316_v60, 0.0  ;;  %v4896_v34 = vmul.f32 %v12123_v15, %v4789_v7  ;;  %v16861_v42 = vld [vmem:[#allocation30_spill] sm:$0xff] }
 0x438   : > { %v5622_v10 = vmul.f32 %v16581_v63, %v5529_v40  ;;  %v7670_v8 = vrot.slane %v14235_v24, 7  ;;  %v16860_v61 = vrot.slane %v14067_v0, 1  ;;  %v4471_v39 = vrot.slane %v4244_v55, 2  ;;  %3444 = vst [vmem:[#allocation4 + $0x3a0] sm:$0xff] %v3379_v26  ;;  %v4792_v55 = vld [vmem:[#allocation4 + $0x288] sm:$0x80] }
 0x439   : > { %v6274_v36 = vmul.f32 %v12129_v35, %v6167_v45  ;;  %3445 = vst.msk [vmem:[#allocation4 + $0x3a8] sm:$0xff] %vm533_vm0, %v3380_v38  ;;  %v7000_v31 = vmul.f32 %v16589_v29, %v6907_v58  ;;  %v3227_v59 = vadd.f32 %v16862_v33, %v16861_v42  ;;  %v3616_v17 = vmul.f32 %v12039_v18, %v3509_v2  ;;  %v16874_v24 = vld [vmem:[#allocation62_spill] sm:$0xff] }
 0x43a   : > { %v5452_v49 = vadd.f32 %v16860_v61, %v4993_v14  ;;  %v5848_v62 = vrot.slane %v5622_v10, 2  ;;  %v7671_v0 = vsel %vm7588_vm3, %v7669_v51, %v7670_v8  ;;  %v16863_v37 = vrot.slane %v14143_v57, 2 }
 0x43b   : > { %v3618_v40 = vmul.f32 %v13844_v53, %v12039_v18  ;;  %8058 = vmatmul.mubr.f32.gmra.mrb[64].mxu1 %v7671_v0  ;;  %v16864_v44 = vrot.slane %v14172_v16, 2  ;;  %v7226_v22 = vrot.slane %v7000_v31, 2  ;;  %v3317_v45 = vadd.f32 %v12034_v28, %v3227_v59 }
 0x43c   : > { %v6071_v32 = vadd.f32 %v5851_v30, %v5452_v49  ;;  %v4472_v7 = vsel %vm4384_vm2, %v16863_v37, %v4471_v39  ;;  %v3737_v30 = vmul.f32 %v13844_v53, %v16576_v21  ;;  %v14265_v57 = vmul.f32 %v13863_v54, %v16576_v21 }
 0x43d   : > { %v4693_v25 = vadd.f32 %v4472_v7, %v4073_v12  ;;  %v5849_v60 = vsel %vm4384_vm2, %v16864_v44, %v5848_v62  ;;  %v4247_v51 = vmul.f32 %v12052_v50, %v4154_v41  ;;  %v16865_v12 = vrot.slane %v14199_v19, 2 }
 0x43e   : > { %v6371_v14 = vadd.f32 %v6275_v3, %v6071_v32  ;;  %v3381_v2 = vmax.f32 %v3317_v45, 0.0  ;;  %v14273_v26 = vmul.f32 %v13863_v54, %v12052_v50  ;;  %v16866_v3 = vrot.slane %v14110_v4, 1  ;;  %v5532_v54 = vld [vmem:[#allocation4 + $0x298] sm:$0xfe]  ;;  %v6170_v32 = vld [vmem:[#allocation4 + $0x2c8] sm:$0x80] }
 0x43f   : > { %v4992_v58 = vadd.f32 %v4896_v34, %v4693_v25  ;;  %v7227_v16 = vsel %vm4384_vm2, %v16865_v12, %v7226_v22  ;;  %v3884_v38 = vrot.slane %v3737_v30, 1  ;;  %v16300_v10 = vrot.slane %v14265_v57, 1  ;;  %v14304_v45 = vld [vmem:[#allocation4 + $0x2e8] sm:$0xff] }
 0x440   : > { %v6830_v53 = vadd.f32 %v16866_v3, %v6371_v14  ;;  %v4476_v61 = vrot.slane %v4247_v51, 2  ;;  %v16867_v49 = vrot.slane %v14160_v6, 1  ;;  %3446 = vst [vmem:[#allocation4 + $0x3d0] sm:$0xff] %v3381_v2  ;;  %v16298_v19 = vrot.slane %v14273_v26, 2 }
 0x441   : > { %v4899_v34 = vmul.f32 %v12070_v47, %v4792_v55  ;;  %v4901_v62 = vmul.f32 %v14082_v23, %v12070_v47  ;;  %v3888_v4 = vsel %vm3828_vm1, %v3884_v38, %v16300_v10  ;;  %v4076_v42 = vadd.f32 %v3884_v38, %v3616_v17  ;;  %v6174_v10 = vld [vmem:[#allocation4 + $0x2e8] sm:$0x7f] }
 0x442   : > { %v5451_v39 = vadd.f32 %v16867_v49, %v4992_v58  ;;  %v7449_v31 = vadd.f32 %v7229_v46, %v6830_v53  ;;  %v5116_v33 = vmul.f32 %v14082_v23, %v12076_v13  ;;  %v4078_v59 = vadd.f32 %v3888_v4, %v3618_v40 }
 0x443   : > { %v4480_v41 = vsel %vm4384_vm2, %v4476_v61, %v16298_v19  ;;  %v14294_v0 = vmul.f32 %v14091_v11, %v12076_v13  ;;  %v4696_v37 = vadd.f32 %v4476_v61, %v4076_v42  ;;  %v5625_v25 = vmul.f32 %v12085_v9, %v5532_v54 }
 0x444   : > { %v6070_v6 = vadd.f32 %v5849_v60, %v5451_v39  ;;  %v7677_v46 = vrot.slane %v7449_v31, 7  ;;  %v5262_v7 = vrot.slane %v5116_v33, 1  ;;  %v4698_v44 = vadd.f32 %v4480_v41, %v4078_v59  ;;  %v14302_v60 = vld [vmem:[#allocation4 + $0x2d8] sm:$0xff]  ;;  %v3508_v31 = vld [vmem:[#allocation4 + $0x240] sm:$0x80] }
 0x445   : > { %v16292_v22 = vrot.slane %v14294_v0, 1  ;;  %v14300_v40 = vmul.f32 %v14091_v11, %v12085_v9  ;;  %v16868_v14 = vrot.slane %v14150_v52, 7  ;;  %v4995_v51 = vadd.f32 %v4899_v34, %v4696_v37 }
 0x446   : > { %v6370_v17 = vadd.f32 %v6274_v36, %v6070_v6  ;;  %v5853_v55 = vrot.slane %v5625_v25, 2  ;;  %v6277_v58 = vmul.f32 %v12088_v1, %v6170_v32  ;;  %v6910_v36 = vld [vmem:[#allocation4 + $0x2d8] sm:$0xfe]  ;;  %v16869_v12 = vrot.slane %v14191_v5, 1 }
 0x447   : > { %v7678_v30 = vsel %vm7588_vm3, %v16868_v14, %v7677_v46  ;;  %v4997_v3 = vadd.f32 %v4901_v62, %v4698_v44  ;;  %v5266_v53 = vsel %vm3828_vm1, %v5262_v7, %v16292_v22  ;;  %v16297_v38 = vrot.slane %v14300_v40, 2  ;;  %v16871_v46 = vld [vmem:[#allocation59_spill] sm:$0xff]  ;;  %v4153_v14 = vld [vmem:[#allocation4 + $0x250] sm:$0xfe] }
 0x448   : > { %8552 = vmatprep.mubr.msk.f32.mxu1 %vm533_vm0, %v7678_v30  ;;  %v6829_v2 = vadd.f32 %v16869_v12, %v6370_v17  ;;  %v5454_v52 = vadd.f32 %v5262_v7, %v4995_v51  ;;  %v6279_v61 = vmul.f32 %v12088_v1, %v14302_v60  ;;  %v6494_v49 = vmul.f32 %v16566_v27, %v14302_v60 }
 0x449   : > { %v14323_v39 = vmul.f32 %v16566_v27, %v14304_v45  ;;  %v5456_v34 = vadd.f32 %v5266_v53, %v4997_v3  ;;  %v5857_v62 = vsel %vm4384_vm2, %v5853_v55, %v16297_v38  ;;  %v7003_v54 = vmul.f32 %v12107_v56, %v6910_v36  ;;  %v16872_v36 = vld [vmem:[#allocation41_spill] sm:$0xff] }
 0x44a   : > { %v7448_v5 = vadd.f32 %v7227_v16, %v6829_v2  ;;  %v6073_v4 = vadd.f32 %v5853_v55, %v5454_v52  ;;  %v6640_v42 = vrot.slane %v6494_v49, 1  ;;  %v14332_v6 = vmul.f32 %v12107_v56, %v14304_v45  ;;  %v16870_v16 = vld [vmem:[#allocation58_spill] sm:$0xff]  ;;  %v16873_v53 = vld [vmem:[#allocation29_spill] sm:$0xff] }
 0x44b   : > { %v16290_v33 = vrot.slane %v14323_v39, 1  ;;  %v6075_v41 = vadd.f32 %v5857_v62, %v5456_v34  ;;  %v7231_v32 = vrot.slane %v7003_v54, 2  ;;  %v3229_v37 = vadd.f32 %v16871_v46, %v16870_v16  ;;  %v16875_v16 = vld [vmem:[#allocation57_spill] sm:$0xff] }
 0x44c   : > { %v7675_v59 = vrot.slane %v7448_v5, 7  ;;  %v6373_v7 = vadd.f32 %v6277_v58, %v6073_v4  ;;  %v16296_v17 = vrot.slane %v14332_v6, 2  ;;  %v3615_v44 = vmul.f32 %v16600_v20, %v3508_v31  ;;  %v4791_v58 = vld [vmem:[#allocation4 + $0x280] sm:$0x80]  ;;  %v5534_v38 = vld [vmem:[#allocation4 + $0x2b8] sm:$0x1] }
 0x44d   : > { %v6644_v25 = vsel %vm3828_vm1, %v6640_v42, %v16290_v33  ;;  %v6375_v51 = vadd.f32 %v6279_v61, %v6075_v41  ;;  %v3318_v55 = vadd.f32 %v12043_v43, %v3229_v37  ;;  %v3617_v12 = vmul.f32 %v16872_v36, %v16600_v20  ;;  %v5531_v37 = vld [vmem:[#allocation4 + $0x290] sm:$0xfe] }
 0x44e   : > { %v7676_v30 = vsel %vm7588_vm3, %v7670_v8, %v7675_v59  ;;  %v6832_v2 = vadd.f32 %v6640_v42, %v6373_v7  ;;  %v7235_v3 = vsel %vm4384_vm2, %v7231_v32, %v16296_v17  ;;  %v3736_v52 = vmul.f32 %v16872_v36, %v16873_v53  ;;  %v6909_v33 = vld [vmem:[#allocation4 + $0x2d0] sm:$0xfe] }
 0x44f   : > { %8064 = vmatmul.mubr.f32.gmra.mrb[66].mxu1 %v7676_v30  ;;  %v14354_v49 = vmul.f32 %v16874_v24, %v16873_v53  ;;  %v6834_v8 = vadd.f32 %v6644_v25, %v6375_v51  ;;  %v3382_v61 = vmax.f32 %v3318_v55, 0.0  ;;  %v4246_v5 = vmul.f32 %v12115_v48, %v4153_v14  ;;  %v16876_v14 = vld [vmem:[#allocation31_spill] sm:$0xff] }
 0x450   : > { %v14359_v34 = vmul.f32 %v16874_v24, %v12115_v48  ;;  %v7451_v62 = vadd.f32 %v7231_v32, %v6832_v2  ;;  %v3883_v54 = vrot.slane %v3736_v52, 1  ;;  %v4898_v4 = vmul.f32 %v12123_v15, %v4791_v58  ;;  %v6169_v51 = vld [vmem:[#allocation4 + $0x2c0] sm:$0x80]  ;;  %v16877_v2 = vld [vmem:[#allocation38_spill] sm:$0xff]  ;;  %v14382_v52 = vld [vmem:[#allocation4 + $0x2d0] sm:$0xff] }
 0x451   : > { %v16295_v31 = vrot.slane %v14354_v49, 1  ;;  %v14363_v42 = vadd.f32 %v7235_v3, %v6834_v8  ;;  %3447 = vst.msk [vmem:[#allocation4 + $0x3d8] sm:$0xff] %vm533_vm0, %v3382_v61  ;;  %v4475_v59 = vrot.slane %v4246_v5, 2  ;;  %v4900_v46 = vmul.f32 %v16875_v16, %v12123_v15  ;;  %16878 = vst [vmem:[#allocation47_spill] sm:$0xff] %v14382_v52  ;;  %v14389_v5 = vld [vmem:[#allocation4 + $0x2e0] sm:$0xff] }
 0x452   : > { %v16291_v41 = vrot.slane %v14359_v34, 2  ;;  %v7682_v7 = vrot.slane %v7451_v62, 7  ;;  %v4075_v25 = vadd.f32 %v3883_v54, %v3615_v44  ;;  %v5115_v30 = vmul.f32 %v16875_v16, %v16876_v14  ;;  %16879 = vst [vmem:[#allocation46_spill] sm:$0xff] %v14389_v5 }
 0x453   : > { %v3886_v32 = vsel %vm3828_vm1, %v3883_v54, %v16295_v31  ;;  %v16293_v55 = vrot.slane %v14363_v42, 7  ;;  %v14380_v3 = vmul.f32 %v16877_v2, %v16876_v14  ;;  %v5624_v44 = vmul.f32 %v16581_v63, %v5531_v37  ;;  %v16882_v14 = vld [vmem:[#allocation52_spill] sm:$0xff] }
 0x454   : > { %v4077_v36 = vadd.f32 %v3886_v32, %v3617_v12  ;;  %v4478_v58 = vsel %vm4384_vm2, %v4475_v59, %v16291_v41  ;;  %v4695_v24 = vadd.f32 %v4475_v59, %v4075_v25  ;;  %v5261_v8 = vrot.slane %v5115_v30, 1  ;;  %v3513_v41 = vld [vmem:[#allocation4 + $0x268] sm:$0x7f] }
 0x455   : > { %v14387_v61 = vmul.f32 %v16877_v2, %v16581_v63  ;;  %v7684_v12 = vsel %vm7588_vm3, %v7682_v7, %v16293_v55  ;;  %v16294_v54 = vrot.slane %v14380_v3, 1  ;;  %v6276_v32 = vmul.f32 %v12129_v35, %v6169_v51 }
 0x456   : > { %v4697_v62 = vadd.f32 %v4478_v58, %v4077_v36  ;;  %8553 = vmatprep.mubr.msk.f32.mxu1 %vm533_vm0, %v7684_v12  ;;  %v4994_v59 = vadd.f32 %v4898_v4, %v4695_v24  ;;  %v5852_v37 = vrot.slane %v5624_v44, 2  ;;  %v6278_v30 = vmul.f32 %v12129_v35, %v14382_v52  ;;  %v16880_v36 = vld [vmem:[#allocation36_spill] sm:$0xff]  ;;  %v4156_v4 = vld [vmem:[#allocation4 + $0x278] sm:$0x1] }
 0x457   : > { %v16299_v25 = vrot.slane %v14387_v61, 2  ;;  %v5264_v7 = vsel %vm3828_vm1, %v5261_v8, %v16294_v54  ;;  %v6493_v58 = vmul.f32 %v16880_v36, %v14382_v52  ;;  %v14407_v51 = vmul.f32 %v16880_v36, %v14389_v5 }
 0x458   : > { %v4996_v22 = vadd.f32 %v4900_v46, %v4697_v62  ;;  %v5453_v24 = vadd.f32 %v5261_v8, %v4994_v59  ;;  %v7002_v12 = vmul.f32 %v16589_v29, %v6909_v33  ;;  %v14415_v46 = vmul.f32 %v16589_v29, %v14389_v5  ;;  %v4796_v62 = vld [vmem:[#allocation4 + $0x2a8] sm:$0x7f]  ;;  %v6912_v33 = vld [vmem:[#allocation4 + $0x2f8] sm:$0x1] }
 0x459   : > { %v5855_v44 = vsel %vm4384_vm2, %v5852_v37, %v16299_v25  ;;  %v6639_v54 = vrot.slane %v6493_v58, 1  ;;  %v16305_v31 = vrot.slane %v14407_v51, 1  ;;  %v3620_v17 = vmul.f32 %v12039_v18, %v3513_v41 }
 0x45a   : > { %v5455_v55 = vadd.f32 %v5264_v7, %v4996_v22  ;;  %v6072_v19 = vadd.f32 %v5852_v37, %v5453_v24  ;;  %v7230_v8 = vrot.slane %v7002_v12, 2  ;;  %v16308_v59 = vrot.slane %v14415_v46, 2 }
 0x45b   : > { %v4251_v25 = vmul.f32 %v12052_v50, %v4156_v4  ;;  %v6642_v5 = vsel %vm3828_vm1, %v6639_v54, %v16305_v31  ;;  %v16881_v22 = vrot.slane %v14265_v57, 1  ;;  %v4903_v58 = vmul.f32 %v12070_v47, %v4796_v62  ;;  %v16883_v31 = vld [vmem:[#allocation34_spill] sm:$0xff] }
 0x45c   : > { %v6074_v36 = vadd.f32 %v5855_v44, %v5455_v55  ;;  %v6372_v41 = vadd.f32 %v6276_v32, %v6072_v19  ;;  %v7233_v37 = vsel %vm4384_vm2, %v7230_v8, %v16308_v59  ;;  %v5629_v4 = vmul.f32 %v12085_v9, %v5534_v38  ;;  %v3512_v57 = vld [vmem:[#allocation4 + $0x260] sm:$0x7f]  ;;  %v16886_v59 = vld [vmem:[#allocation45_spill] sm:$0xff] }
 0x45d   : > { %v4080_v7 = vadd.f32 %v16881_v22, %v3620_v17  ;;  %v4483_v24 = vrot.slane %v4251_v25, 2  ;;  %v6281_v55 = vmul.f32 %v12088_v1, %v6174_v10  ;;  %v7007_v44 = vmul.f32 %v12107_v56, %v6912_v33  ;;  %v16885_v22 = vld [vmem:[#allocation28_spill] sm:$0xff] }
 0x45e   : > { %v6374_v12 = vadd.f32 %v6278_v30, %v6074_v36  ;;  %v3233_v52 = vadd.f32 %v16883_v31, %v16882_v14  ;;  %v6831_v17 = vadd.f32 %v6639_v54, %v6372_v41  ;;  %v16884_v62 = vrot.slane %v14273_v26, 2  ;;  %v4155_v36 = vld [vmem:[#allocation4 + $0x270] sm:$0x1]  ;;  %v4795_v54 = vld [vmem:[#allocation4 + $0x2a0] sm:$0x7f] }
 0x45f   : > { %v5860_v32 = vrot.slane %v5629_v4, 2  ;;  %v3235_v25 = vadd.f32 %v16886_v59, %v16885_v22  ;;  %v7238_v30 = vrot.slane %v7007_v44, 2  ;;  %v16887_v53 = vrot.slane %v14300_v40, 2  ;;  %v5533_v41 = vld [vmem:[#allocation4 + $0x2b0] sm:$0x1] }
 0x460   : > { %v4484_v19 = vsel %vm4384_vm2, %v16884_v62, %v4483_v24  ;;  %v6833_v2 = vadd.f32 %v6642_v5, %v6374_v12  ;;  %v3319_v10 = vadd.f32 %v12034_v28, %v3233_v52  ;;  %v7450_v33 = vadd.f32 %v7230_v8, %v6831_v17  ;;  %v6173_v4 = vld [vmem:[#allocation4 + $0x2e0] sm:$0x7f]  ;;  %v6911_v8 = vld [vmem:[#allocation4 + $0x2f0] sm:$0x1] }
 0x461   : > { %v4700_v38 = vadd.f32 %v4484_v19, %v4080_v7  ;;  %v5861_v31 = vsel %vm4384_vm2, %v16887_v53, %v5860_v32  ;;  %v3320_v14 = vadd.f32 %v12043_v43, %v3235_v25  ;;  %v3619_v26 = vmul.f32 %v16600_v20, %v3512_v57  ;;  %v3515_v57 = vld [vmem:[#allocation4 + $0x288] sm:$0x80]  ;;  %v16892_v25 = vld [vmem:[#allocation43_spill] sm:$0xff] }
 0x462   : > { %v14446_v24 = vadd.f32 %v7233_v37, %v6833_v2  ;;  %v16888_v5 = vrot.slane %v14332_v6, 2  ;;  %v3383_v52 = vmax.f32 %v3319_v10, 0.0  ;;  %v7679_v12 = vrot.slane %v7450_v33, 7  ;;  %v16891_v22 = vld [vmem:[#allocation40_spill] sm:$0xff]  ;;  %v4158_v33 = vld [vmem:[#allocation4 + $0x298] sm:$0xfe] }
 0x463   : > { %v4999_v59 = vadd.f32 %v4903_v58, %v4700_v38  ;;  %v3384_v40 = vmax.f32 %v3320_v14, 0.0  ;;  %v16889_v53 = vrot.slane %v14354_v49, 1  ;;  %v4250_v17 = vmul.f32 %v12115_v48, %v4155_v36 }
 0x464   : > { %v7239_v7 = vsel %vm4384_vm2, %v16888_v5, %v7238_v30  ;;  %v7680_v62 = vrot.slane %v14446_v24, 7  ;;  %v16890_v2 = vrot.slane %v14294_v0, 1  ;;  %3448 = vst [vmem:[#allocation4 + $0x3e0] sm:$0xff] %v3383_v52  ;;  %v4902_v6 = vmul.f32 %v12123_v15, %v4795_v54 }
 0x465   : > { %v4079_v44 = vadd.f32 %v16889_v53, %v3619_v26  ;;  %v5628_v37 = vmul.f32 %v16581_v63, %v5533_v41  ;;  %3449 = vst.msk [vmem:[#allocation4 + $0x3e8] sm:$0xff] %vm533_vm0, %v3384_v40  ;;  %v4481_v19 = vrot.slane %v4250_v17, 2  ;;  %v6280_v32 = vmul.f32 %v12129_v35, %v6173_v4 }
 0x466   : > { %v5458_v58 = vadd.f32 %v16890_v2, %v4999_v59  ;;  %v7006_v49 = vmul.f32 %v16589_v29, %v6911_v8  ;;  %v3239_v38 = vadd.f32 %v16892_v25, %v16891_v22  ;;  %v7681_v0 = vsel %vm7588_vm3, %v7679_v12, %v7680_v62  ;;  %v4798_v12 = vld [vmem:[#allocation4 + $0x2c8] sm:$0x80] }
 0x467   : > { %v5858_v10 = vrot.slane %v5628_v37, 2  ;;  %v3622_v36 = vmul.f32 %v12039_v18, %v3515_v57  ;;  %8070 = vmatmul.mubr.f32.gmra.mrb[68].mxu1 %v7681_v0  ;;  %v16893_v14 = vrot.slane %v14359_v34, 2  ;;  %v3624_v59 = vmul.f32 %v14082_v23, %v12039_v18 }
 0x468   : > { %v6077_v30 = vadd.f32 %v5861_v31, %v5458_v58  ;;  %v7236_v54 = vrot.slane %v7006_v49, 2  ;;  %v3321_v41 = vadd.f32 %v12034_v28, %v3239_v38  ;;  %v16894_v4 = vrot.slane %v14387_v61, 2  ;;  %v5536_v58 = vld [vmem:[#allocation4 + $0x2d8] sm:$0xfe] }
 0x469   : > { %v4482_v26 = vsel %vm4384_vm2, %v16893_v14, %v4481_v19  ;;  %v3741_v8 = vmul.f32 %v14082_v23, %v16576_v21  ;;  %v16895_v34 = vrot.slane %v14415_v46, 2  ;;  %v14484_v17 = vmul.f32 %v14091_v11, %v16576_v21  ;;  %v6176_v14 = vld [vmem:[#allocation4 + $0x308] sm:$0x80] }
 0x46a   : > { %v6377_v5 = vadd.f32 %v6281_v55, %v6077_v30  ;;  %v4699_v52 = vadd.f32 %v4482_v26, %v4079_v44  ;;  %v5859_v31 = vsel %vm4384_vm2, %v16894_v4, %v5858_v10  ;;  %v3385_v53 = vmax.f32 %v3321_v41, 0.0 }
 0x46b   : > { %v7237_v40 = vsel %vm4384_vm2, %v16895_v34, %v7236_v54  ;;  %v4253_v55 = vmul.f32 %v12052_v50, %v4158_v33  ;;  %v16896_v44 = vrot.slane %v14323_v39, 1  ;;  %v3890_v2 = vrot.slane %v3741_v8, 1  ;;  %v14523_v34 = vld [vmem:[#allocation4 + $0x328] sm:$0xff] }
 0x46c   : > { %v4998_v57 = vadd.f32 %v4902_v6, %v4699_v52  ;;  %v14491_v23 = vmul.f32 %v14091_v11, %v12052_v50  ;;  %3450 = vst [vmem:[#allocation4 + $0x410] sm:$0xff] %v3385_v53  ;;  %v16320_v46 = vrot.slane %v14484_v17, 1  ;;  %v4905_v19 = vmul.f32 %v12070_v47, %v4798_v12  ;;  %v14518_v52 = vld [vmem:[#allocation4 + $0x318] sm:$0xff] }
 0x46d   : > { %v6836_v61 = vadd.f32 %v16896_v44, %v6377_v5  ;;  %v4486_v37 = vrot.slane %v4253_v55, 2  ;;  %v4907_v49 = vmul.f32 %v14302_v60, %v12070_v47  ;;  %v16897_v39 = vrot.slane %v14380_v3, 1  ;;  %v6914_v53 = vld [vmem:[#allocation4 + $0x318] sm:$0xfe] }
 0x46e   : > { %v4082_v6 = vadd.f32 %v3890_v2, %v3622_v36  ;;  %v16319_v38 = vrot.slane %v14491_v23, 2  ;;  %v3894_v11 = vsel %vm3828_vm1, %v3890_v2, %v16320_v46  ;;  %v5120_v0 = vmul.f32 %v14302_v60, %v12076_v13 }
 0x46f   : > { %v7455_v22 = vadd.f32 %v7239_v7, %v6836_v61  ;;  %v5457_v25 = vadd.f32 %v16897_v39, %v4998_v57  ;;  %v14507_v30 = vmul.f32 %v14304_v45, %v12076_v13  ;;  %v5631_v10 = vmul.f32 %v12085_v9, %v5536_v58 }
 0x470   : > { %v4084_v3 = vadd.f32 %v3894_v11, %v3624_v59  ;;  %v4490_v36 = vsel %vm4384_vm2, %v4486_v37, %v16319_v38  ;;  %v4702_v26 = vadd.f32 %v4486_v37, %v4082_v6  ;;  %v5268_v54 = vrot.slane %v5120_v0, 1  ;;  %v6916_v38 = vld [vmem:[#allocation4 + $0x338] sm:$0x1] }
 0x471   : > { %v7687_v7 = vrot.slane %v7455_v22, 7  ;;  %v6076_v33 = vadd.f32 %v5859_v31, %v5457_v25  ;;  %v16313_v41 = vrot.slane %v14507_v30, 1  ;;  %v14516_v5 = vmul.f32 %v14304_v45, %v12085_v9 }
 0x472   : > { %v16898_v4 = vrot.slane %v14363_v42, 7  ;;  %v4704_v8 = vadd.f32 %v4490_v36, %v4084_v3  ;;  %v5863_v12 = vrot.slane %v5631_v10, 2  ;;  %v5001_v55 = vadd.f32 %v4905_v19, %v4702_v26  ;;  %v16900_v3 = vld [vmem:[#allocation35_spill] sm:$0xff]  ;;  %v16901_v36 = vld [vmem:[#allocation44_spill] sm:$0xff] }
 0x473   : > { %v6376_v59 = vadd.f32 %v6280_v32, %v6076_v33  ;;  %v5272_v44 = vsel %vm3828_vm1, %v5268_v54, %v16313_v41  ;;  %v16318_v61 = vrot.slane %v14516_v5, 2  ;;  %v6283_v57 = vmul.f32 %v12088_v1, %v6176_v14  ;;  %v16909_v41 = vld [vmem:[#allocation36_spill] sm:$0xff] }
 0x474   : > { %v7688_v31 = vsel %vm7588_vm3, %v16898_v4, %v7687_v7  ;;  %v16899_v42 = vrot.slane %v14407_v51, 1  ;;  %v5003_v32 = vadd.f32 %v4907_v49, %v4704_v8  ;;  %v6285_v58 = vmul.f32 %v12088_v1, %v14518_v52  ;;  %v3514_v51 = vld [vmem:[#allocation4 + $0x280] sm:$0x80] }
 0x475   : > { %8554 = vmatprep.mubr.msk.f32.mxu1 %vm533_vm0, %v7688_v31  ;;  %v6498_v37 = vmul.f32 %v16566_v27, %v14518_v52  ;;  %v5460_v22 = vadd.f32 %v5268_v54, %v5001_v55  ;;  %v5867_v19 = vsel %vm4384_vm2, %v5863_v12, %v16318_v61  ;;  %v14542_v39 = vmul.f32 %v16566_v27, %v14523_v34  ;;  %v4797_v55 = vld [vmem:[#allocation4 + $0x2c0] sm:$0x80] }
 0x476   : > { %v6835_v2 = vadd.f32 %v16899_v42, %v6376_v59  ;;  %v7009_v25 = vmul.f32 %v12107_v56, %v6914_v53  ;;  %v5462_v49 = vadd.f32 %v5272_v44, %v5003_v32  ;;  %v14547_v0 = vmul.f32 %v12107_v56, %v14523_v34 }
 0x477   : > { %v6646_v11 = vrot.slane %v6498_v37, 1  ;;  %v6079_v10 = vadd.f32 %v5863_v12, %v5460_v22  ;;  %v16311_v7 = vrot.slane %v14542_v39, 1  ;;  %v3241_v14 = vadd.f32 %v16901_v36, %v16900_v3  ;;  %v16904_v3 = vld [vmem:[#allocation47_spill] sm:$0xff] }
 0x478   : > { %v7454_v6 = vadd.f32 %v7237_v40, %v6835_v2  ;;  %v7241_v33 = vrot.slane %v7009_v25, 2  ;;  %v6081_v54 = vadd.f32 %v5867_v19, %v5462_v49  ;;  %v16317_v4 = vrot.slane %v14547_v0, 2  ;;  %v4157_v40 = vld [vmem:[#allocation4 + $0x290] sm:$0xfe]  ;;  %v16903_v19 = vld [vmem:[#allocation38_spill] sm:$0xff] }
 0x479   : > { %v3621_v31 = vmul.f32 %v16600_v20, %v3514_v51  ;;  %v6379_v59 = vadd.f32 %v6283_v57, %v6079_v10  ;;  %v6650_v8 = vsel %vm3828_vm1, %v6646_v11, %v16311_v7  ;;  %v3322_v12 = vadd.f32 %v12043_v43, %v3241_v14  ;;  %v16902_v57 = vld [vmem:[#allocation29_spill] sm:$0xff] }
 0x47a   : > { %v7685_v26 = vrot.slane %v7454_v6, 7  ;;  %v3623_v53 = vmul.f32 %v16875_v16, %v16600_v20  ;;  %v6381_v42 = vadd.f32 %v6285_v58, %v6081_v54  ;;  %v7245_v2 = vsel %vm4384_vm2, %v7241_v33, %v16317_v4  ;;  %v5535_v49 = vld [vmem:[#allocation4 + $0x2d0] sm:$0xfe] }
 0x47b   : > { %v3740_v32 = vmul.f32 %v16875_v16, %v16902_v57  ;;  %v6838_v37 = vadd.f32 %v6646_v11, %v6379_v59  ;;  %v3386_v22 = vmax.f32 %v3322_v12, 0.0  ;;  %v14570_v25 = vmul.f32 %v16903_v19, %v16902_v57  ;;  %v16906_v12 = vld [vmem:[#allocation46_spill] sm:$0xff] }
 0x47c   : > { %v7686_v44 = vsel %vm7588_vm3, %v7680_v62, %v7685_v26  ;;  %v4252_v51 = vmul.f32 %v12115_v48, %v4157_v40  ;;  %v6840_v24 = vadd.f32 %v6650_v8, %v6381_v42  ;;  %v14575_v62 = vmul.f32 %v16903_v19, %v12115_v48  ;;  %v16905_v40 = vld [vmem:[#allocation31_spill] sm:$0xff] }
 0x47d   : > { %8076 = vmatmul.mubr.f32.gmra.mrb[70].mxu1 %v7686_v44  ;;  %v3889_v6 = vrot.slane %v3740_v32, 1  ;;  %v4904_v58 = vmul.f32 %v12123_v15, %v4797_v55  ;;  %v7457_v10 = vadd.f32 %v7241_v33, %v6838_v37  ;;  %3451 = vst.msk [vmem:[#allocation4 + $0x418] sm:$0xff] %vm533_vm0, %v3386_v22  ;;  %v16314_v16 = vrot.slane %v14570_v25, 1  ;;  %v6175_v42 = vld [vmem:[#allocation4 + $0x300] sm:$0x80]  ;;  %v14599_v22 = vld [vmem:[#allocation4 + $0x310] sm:$0xff] }
 0x47e   : > { %v4485_v11 = vrot.slane %v4252_v51, 2  ;;  %v4906_v36 = vmul.f32 %v16904_v3, %v12123_v15  ;;  %v14582_v14 = vadd.f32 %v7245_v2, %v6840_v24  ;;  %v16312_v54 = vrot.slane %v14575_v62, 2  ;;  %16907 = vst [vmem:[#allocation48_spill] sm:$0xff] %v14599_v22 }
 0x47f   : > { %v4081_v26 = vadd.f32 %v3889_v6, %v3621_v31  ;;  %v5119_v59 = vmul.f32 %v16904_v3, %v16905_v40  ;;  %v7692_v8 = vrot.slane %v7457_v10, 7  ;;  %v3892_v33 = vsel %vm3828_vm1, %v3889_v6, %v16314_v16  ;;  %v6913_v10 = vld [vmem:[#allocation4 + $0x310] sm:$0xfe] }
 0x480   : > { %v14592_v55 = vmul.f32 %v16906_v12, %v16905_v40  ;;  %v5630_v44 = vmul.f32 %v16581_v63, %v5535_v49  ;;  %v16315_v2 = vrot.slane %v14582_v14, 7  ;;  %v4083_v31 = vadd.f32 %v3892_v33, %v3623_v53  ;;  %v14606_v49 = vld [vmem:[#allocation4 + $0x320] sm:$0xff] }
 0x481   : > { %v4488_v32 = vsel %vm4384_vm2, %v4485_v11, %v16312_v54  ;;  %v4701_v37 = vadd.f32 %v4485_v11, %v4081_v26  ;;  %v5267_v19 = vrot.slane %v5119_v59, 1  ;;  %v14604_v24 = vmul.f32 %v16906_v12, %v16581_v63  ;;  %16908 = vst [vmem:[#allocation50_spill] sm:$0xff] %v14606_v49  ;;  %v3519_v26 = vld [vmem:[#allocation4 + $0x2a8] sm:$0x7f]  ;;  %v16915_v12 = vld [vmem:[#allocation49_spill] sm:$0xff] }
 0x482   : > { %v16316_v51 = vrot.slane %v14592_v55, 1  ;;  %v5862_v6 = vrot.slane %v5630_v44, 2  ;;  %v7694_v53 = vsel %vm7588_vm3, %v7692_v8, %v16315_v2  ;;  %v4703_v33 = vadd.f32 %v4488_v32, %v4083_v31  ;;  %v4160_v32 = vld [vmem:[#allocation4 + $0x2b8] sm:$0x1] }
 0x483   : > { %v5000_v7 = vadd.f32 %v4904_v58, %v4701_v37  ;;  %v6282_v11 = vmul.f32 %v12129_v35, %v6175_v42  ;;  %8555 = vmatprep.mubr.msk.f32.mxu1 %vm533_vm0, %v7694_v53  ;;  %v16322_v44 = vrot.slane %v14604_v24, 2  ;;  %v6284_v54 = vmul.f32 %v12129_v35, %v14599_v22  ;;  %v4802_v37 = vld [vmem:[#allocation4 + $0x2e8] sm:$0x7f] }
 0x484   : > { %v5270_v59 = vsel %vm3828_vm1, %v5267_v19, %v16316_v51  ;;  %v6497_v16 = vmul.f32 %v16909_v41, %v14599_v22  ;;  %v5002_v8 = vadd.f32 %v4906_v36, %v4703_v33  ;;  %v14623_v58 = vmul.f32 %v16909_v41, %v14606_v49 }
 0x485   : > { %v5459_v31 = vadd.f32 %v5267_v19, %v5000_v7  ;;  %v7008_v42 = vmul.f32 %v16589_v29, %v6913_v10  ;;  %v5865_v53 = vsel %vm4384_vm2, %v5862_v6, %v16322_v44  ;;  %v14631_v51 = vmul.f32 %v16589_v29, %v14606_v49  ;;  %v5538_v7 = vld [vmem:[#allocation4 + $0x2f8] sm:$0x1]  ;;  %v6180_v10 = vld [vmem:[#allocation4 + $0x328] sm:$0x7f] }
 0x486   : > { %v6645_v2 = vrot.slane %v6497_v16, 1  ;;  %v3626_v36 = vmul.f32 %v12039_v18, %v3519_v26  ;;  %v5461_v19 = vadd.f32 %v5270_v59, %v5002_v8  ;;  %v16328_v4 = vrot.slane %v14623_v58, 1  ;;  %v3518_v59 = vld [vmem:[#allocation4 + $0x2a0] sm:$0x7f] }
 0x487   : > { %v6078_v33 = vadd.f32 %v5862_v6, %v5459_v31  ;;  %v7240_v61 = vrot.slane %v7008_v42, 2  ;;  %v16331_v46 = vrot.slane %v14631_v51, 2  ;;  %v16910_v41 = vrot.slane %v14484_v17, 1 }
 0x488   : > { %v4257_v16 = vmul.f32 %v12052_v50, %v4160_v32  ;;  %v4909_v49 = vmul.f32 %v12070_v47, %v4802_v37  ;;  %v6080_v40 = vadd.f32 %v5865_v53, %v5461_v19  ;;  %v6648_v6 = vsel %vm3828_vm1, %v6645_v2, %v16328_v4  ;;  %v16912_v53 = vld [vmem:[#allocation64_spill] sm:$0xff]  ;;  %v16914_v4 = vld [vmem:[#allocation55_spill] sm:$0xff] }
 0x489   : > { %v4086_v44 = vadd.f32 %v16910_v41, %v3626_v36  ;;  %v6378_v22 = vadd.f32 %v6282_v11, %v6078_v33  ;;  %v5635_v26 = vmul.f32 %v12085_v9, %v5538_v7  ;;  %v7243_v8 = vsel %vm4384_vm2, %v7240_v61, %v16331_v46  ;;  %v16911_v11 = vld [vmem:[#allocation61_spill] sm:$0xff]  ;;  %v4159_v46 = vld [vmem:[#allocation4 + $0x2b0] sm:$0x1] }
 0x48a   : > { %v4493_v31 = vrot.slane %v4257_v16, 2  ;;  %v6287_v17 = vmul.f32 %v12088_v1, %v6180_v10  ;;  %v7013_v41 = vmul.f32 %v12107_v56, %v6916_v38  ;;  %v6380_v42 = vadd.f32 %v6284_v54, %v6080_v40 }
 0x48b   : > { %v6837_v32 = vadd.f32 %v6645_v2, %v6378_v22  ;;  %v5870_v37 = vrot.slane %v5635_v26, 2  ;;  %v3245_v36 = vadd.f32 %v16912_v53, %v16911_v11  ;;  %v16913_v19 = vrot.slane %v14491_v23, 2  ;;  %v4801_v2 = vld [vmem:[#allocation4 + $0x2e0] sm:$0x7f]  ;;  %v5537_v22 = vld [vmem:[#allocation4 + $0x2f0] sm:$0x1] }
 0x48c   : > { %v7248_v33 = vrot.slane %v7013_v41, 2  ;;  %v3247_v57 = vadd.f32 %v16915_v12, %v16914_v4  ;;  %v3625_v16 = vmul.f32 %v16600_v20, %v3518_v59  ;;  %v6839_v10 = vadd.f32 %v6648_v6, %v6380_v42  ;;  %v6179_v6 = vld [vmem:[#allocation4 + $0x320] sm:$0x7f]  ;;  %v6915_v42 = vld [vmem:[#allocation4 + $0x330] sm:$0x1] }
 0x48d   : > { %v4494_v7 = vsel %vm4384_vm2, %v16913_v19, %v4493_v31  ;;  %v7456_v3 = vadd.f32 %v7240_v61, %v6837_v32  ;;  %v16916_v54 = vrot.slane %v14516_v5, 2  ;;  %v16917_v23 = vrot.slane %v14547_v0, 2  ;;  %v3521_v32 = vld [vmem:[#allocation4 + $0x2c8] sm:$0x80]  ;;  %v4162_v19 = vld [vmem:[#allocation4 + $0x2d8] sm:$0xfe] }
 0x48e   : > { %v4706_v38 = vadd.f32 %v4494_v7, %v4086_v44  ;;  %v3323_v31 = vadd.f32 %v12034_v28, %v3245_v36  ;;  %v3324_v4 = vadd.f32 %v12043_v43, %v3247_v57  ;;  %v16918_v12 = vrot.slane %v14570_v25, 1 }
 0x48f   : > { %v5871_v40 = vsel %vm4384_vm2, %v16916_v54, %v5870_v37  ;;  %v7249_v26 = vsel %vm4384_vm2, %v16917_v23, %v7248_v33  ;;  %v14667_v61 = vadd.f32 %v7243_v8, %v6839_v10  ;;  %v7689_v44 = vrot.slane %v7456_v3, 7 }
 0x490   : > { %v4085_v59 = vadd.f32 %v16918_v12, %v3625_v16  ;;  %v5005_v5 = vadd.f32 %v4909_v49, %v4706_v38  ;;  %v4256_v41 = vmul.f32 %v12115_v48, %v4159_v46  ;;  %v3387_v37 = vmax.f32 %v3323_v31, 0.0  ;;  %v4804_v38 = vld [vmem:[#allocation4 + $0x308] sm:$0x80] }
 0x491   : > { %v3388_v0 = vmax.f32 %v3324_v4, 0.0  ;;  %v4908_v11 = vmul.f32 %v12123_v15, %v4801_v2  ;;  %v5634_v28 = vmul.f32 %v16581_v63, %v5537_v22  ;;  %v7690_v43 = vrot.slane %v14667_v61, 7  ;;  %v5539_v61 = vld [vmem:[#allocation4 + $0x310] sm:$0xfe] }
 0x492   : > { %v16919_v57 = vrot.slane %v14507_v30, 1  ;;  %v4491_v53 = vrot.slane %v4256_v41, 2  ;;  %v6286_v8 = vmul.f32 %v12129_v35, %v6179_v6  ;;  %3452 = vst [vmem:[#allocation4 + $0x420] sm:$0xff] %v3387_v37  ;;  %v7012_v3 = vmul.f32 %v16589_v29, %v6915_v42  ;;  %v5540_v37 = vld [vmem:[#allocation4 + $0x318] sm:$0xfe] }
 0x493   : > { %3453 = vst.msk [vmem:[#allocation4 + $0x428] sm:$0xff] %vm533_vm0, %v3388_v0  ;;  %v5868_v46 = vrot.slane %v5634_v28, 2  ;;  %v3628_v49 = vmul.f32 %v12039_v18, %v3521_v32  ;;  %v3630_v36 = vmul.f32 %v14302_v60, %v12039_v18  ;;  %v7691_v30 = vsel %vm7588_vm3, %v7689_v44, %v7690_v43 }
 0x494   : > { %v5464_v25 = vadd.f32 %v16919_v57, %v5005_v5  ;;  %v16920_v33 = vrot.slane %v14575_v62, 2  ;;  %v3745_v10 = vmul.f32 %v14302_v60, %v16576_v21  ;;  %8082 = vmatmul.mubr.f32.gmra.mrb[72].mxu1 %v7691_v30  ;;  %v16921_v2 = vrot.slane %v14604_v24, 2 }
 0x495   : > { %v7246_v23 = vrot.slane %v7012_v3, 2  ;;  %v14694_v31 = vmul.f32 %v14304_v45, %v16576_v21  ;;  %v4259_v62 = vmul.f32 %v12052_v50, %v4162_v19  ;;  %v14699_v12 = vmul.f32 %v14304_v45, %v12052_v50 }
 0x496   : > { %v6083_v7 = vadd.f32 %v5871_v40, %v5464_v25  ;;  %v4492_v16 = vsel %vm4384_vm2, %v16920_v33, %v4491_v53  ;;  %v5869_v22 = vsel %vm4384_vm2, %v16921_v2, %v5868_v46  ;;  %v3896_v4 = vrot.slane %v3745_v10, 1  ;;  %v6182_v46 = vld [vmem:[#allocation4 + $0x348] sm:$0x80] }
 0x497   : > { %v4705_v54 = vadd.f32 %v4492_v16, %v4085_v59  ;;  %v16922_v59 = vrot.slane %v14631_v51, 2  ;;  %v3899_v6 = vrot.slane %v14694_v31, 1  ;;  %v4911_v44 = vmul.f32 %v12070_v47, %v4804_v38  ;;  %v14734_v2 = vld [vmem:[#allocation4 + $0x368] sm:$0xff] }
 0x498   : > { %v6383_v40 = vadd.f32 %v6287_v17, %v6083_v7  ;;  %v16923_v5 = vrot.slane %v14542_v39, 1  ;;  %v4088_v17 = vadd.f32 %v3896_v4, %v3628_v49  ;;  %v4496_v42 = vrot.slane %v4259_v62, 2 }
 0x499   : > { %v5004_v60 = vadd.f32 %v4908_v11, %v4705_v54  ;;  %v7247_v24 = vsel %vm4384_vm2, %v16922_v59, %v7246_v23  ;;  %v16342_v32 = vrot.slane %v14699_v12, 2  ;;  %v16924_v45 = vrot.slane %v14592_v55, 1 }
 0x49a   : > { %v6842_v41 = vadd.f32 %v16923_v5, %v6383_v40  ;;  %v3900_v51 = vsel %vm3828_vm1, %v3896_v4, %v3899_v6  ;;  %v4913_v11 = vmul.f32 %v14518_v52, %v12070_v47  ;;  %v5124_v28 = vmul.f32 %v14518_v52, %v12076_v13 }
 0x49b   : > { %v5463_v0 = vadd.f32 %v16924_v45, %v5004_v60  ;;  %v4090_v57 = vadd.f32 %v3900_v51, %v3630_v36  ;;  %v4500_v25 = vsel %vm4384_vm2, %v4496_v42, %v16342_v32  ;;  %v4708_v53 = vadd.f32 %v4496_v42, %v4088_v17  ;;  %v14730_v36 = vld [vmem:[#allocation4 + $0x358] sm:$0xff] }
 0x49c   : > { %v7461_v39 = vadd.f32 %v7249_v26, %v6842_v41  ;;  %v14723_v3 = vmul.f32 %v14523_v34, %v12076_v13  ;;  %v5274_v49 = vrot.slane %v5124_v28, 1  ;;  %v5637_v19 = vmul.f32 %v12085_v9, %v5540_v37  ;;  %v6918_v60 = vld [vmem:[#allocation4 + $0x358] sm:$0xfe]  ;;  %v3520_v41 = vld [vmem:[#allocation4 + $0x2c0] sm:$0x80] }
 0x49d   : > { %v6082_v55 = vadd.f32 %v5869_v22, %v5463_v0  ;;  %v4710_v7 = vadd.f32 %v4500_v25, %v4090_v57  ;;  %v5007_v33 = vadd.f32 %v4911_v44, %v4708_v53  ;;  %v14728_v26 = vmul.f32 %v14523_v34, %v12085_v9  ;;  %v4161_v53 = vld [vmem:[#allocation4 + $0x2d0] sm:$0xfe] }
 0x49e   : > { %v7697_v30 = vrot.slane %v7461_v39, 7  ;;  %v16334_v10 = vrot.slane %v14723_v3, 1  ;;  %v5873_v38 = vrot.slane %v5637_v19, 2  ;;  %v6289_v54 = vmul.f32 %v12088_v1, %v6182_v46 }
 0x49f   : > { %v6382_v16 = vadd.f32 %v6286_v8, %v6082_v55  ;;  %v16925_v22 = vrot.slane %v14582_v14, 7  ;;  %v5009_v40 = vadd.f32 %v4913_v11, %v4710_v7  ;;  %v5466_v4 = vadd.f32 %v5274_v49, %v5007_v33 }
 0x4a0   : > { %v16340_v62 = vrot.slane %v14728_v26, 2  ;;  %v16926_v8 = vrot.slane %v14623_v58, 1  ;;  %v5278_v44 = vsel %vm3828_vm1, %v5274_v49, %v16334_v10  ;;  %v6291_v5 = vmul.f32 %v12088_v1, %v14730_v36 }
 0x4a1   : > { %v7698_v23 = vsel %vm7588_vm3, %v16925_v22, %v7697_v30  ;;  %v6502_v14 = vmul.f32 %v16566_v27, %v14730_v36  ;;  %v5468_v17 = vadd.f32 %v5278_v44, %v5009_v40  ;;  %v6085_v37 = vadd.f32 %v5873_v38, %v5466_v4  ;;  %v16929_v40 = vld [vmem:[#allocation46_spill] sm:$0xff] }
 0x4a2   : > { %8556 = vmatprep.mubr.msk.f32.mxu1 %vm533_vm0, %v7698_v23  ;;  %v6841_v59 = vadd.f32 %v16926_v8, %v6382_v16  ;;  %v5877_v42 = vsel %vm4384_vm2, %v5873_v38, %v16340_v62  ;;  %v14755_v58 = vmul.f32 %v16566_v27, %v14734_v2  ;;  %v7015_v51 = vmul.f32 %v12107_v56, %v6918_v60  ;;  %v16928_v16 = vld [vmem:[#allocation29_spill] sm:$0xff] }
 0x4a3   : > { %v6652_v0 = vrot.slane %v6502_v14, 1  ;;  %v14760_v11 = vmul.f32 %v12107_v56, %v14734_v2  ;;  %v6087_v28 = vadd.f32 %v5877_v42, %v5468_v17  ;;  %v6385_v39 = vadd.f32 %v6289_v54, %v6085_v37  ;;  %v4803_v54 = vld [vmem:[#allocation4 + $0x300] sm:$0x80]  ;;  %v16930_v17 = vld [vmem:[#allocation48_spill] sm:$0xff] }
 0x4a4   : > { %v7460_v45 = vadd.f32 %v7247_v24, %v6841_v59  ;;  %v16333_v57 = vrot.slane %v14755_v58, 1  ;;  %v3627_v25 = vmul.f32 %v16600_v20, %v3520_v41  ;;  %v7251_v55 = vrot.slane %v7015_v51, 2  ;;  %v16927_v24 = vld [vmem:[#allocation47_spill] sm:$0xff] }
 0x4a5   : > { %v16339_v49 = vrot.slane %v14760_v11, 2  ;;  %v3629_v19 = vmul.f32 %v16927_v24, %v16600_v20  ;;  %v6387_v30 = vadd.f32 %v6291_v5, %v6087_v28  ;;  %v6844_v33 = vadd.f32 %v6652_v0, %v6385_v39  ;;  %v16931_v39 = vld [vmem:[#allocation31_spill] sm:$0xff] }
 0x4a6   : > { %v7695_v46 = vrot.slane %v7460_v45, 7  ;;  %v6656_v7 = vsel %vm3828_vm1, %v6652_v0, %v16333_v57  ;;  %v3744_v38 = vmul.f32 %v16927_v24, %v16928_v16  ;;  %v14780_v4 = vmul.f32 %v16929_v40, %v16928_v16  ;;  %v16935_v57 = vld [vmem:[#allocation36_spill] sm:$0xff] }
 0x4a7   : > { %v7255_v23 = vsel %vm4384_vm2, %v7251_v55, %v16339_v49  ;;  %v4258_v60 = vmul.f32 %v12115_v48, %v4161_v53  ;;  %v6846_v8 = vadd.f32 %v6656_v7, %v6387_v30  ;;  %v7463_v59 = vadd.f32 %v7251_v55, %v6844_v33  ;;  %v6181_v30 = vld [vmem:[#allocation4 + $0x340] sm:$0x80]  ;;  %v6920_v49 = vld [vmem:[#allocation4 + $0x378] sm:$0x1] }
 0x4a8   : > { %v7696_v22 = vsel %vm7588_vm3, %v7690_v43, %v7695_v46  ;;  %v3895_v44 = vrot.slane %v3744_v38, 1  ;;  %v14785_v5 = vmul.f32 %v16929_v40, %v12115_v48  ;;  %v16338_v43 = vrot.slane %v14780_v4, 1  ;;  %v16932_v46 = vld [vmem:[#allocation50_spill] sm:$0xff] }
 0x4a9   : > { %8088 = vmatmul.mubr.f32.gmra.mrb[74].mxu1 %v7696_v22  ;;  %v4495_v14 = vrot.slane %v4258_v60, 2  ;;  %v4910_v41 = vmul.f32 %v12123_v15, %v4803_v54  ;;  %v4912_v42 = vmul.f32 %v16930_v17, %v12123_v15  ;;  %v14791_v37 = vadd.f32 %v7255_v23, %v6846_v8  ;;  %v14808_v54 = vld [vmem:[#allocation4 + $0x350] sm:$0xff]  ;;  %v14815_v8 = vld [vmem:[#allocation4 + $0x360] sm:$0xff] }
 0x4aa   : > { %v7702_v45 = vrot.slane %v7463_v59, 7  ;;  %v4087_v0 = vadd.f32 %v3895_v44, %v3627_v25  ;;  %v16337_v51 = vrot.slane %v14785_v5, 2  ;;  %v3898_v28 = vsel %vm3828_vm1, %v3895_v44, %v16338_v43  ;;  %16933 = vst [vmem:[#allocation54_spill] sm:$0xff] %v14808_v54  ;;  %16934 = vst [vmem:[#allocation51_spill] sm:$0xff] %v14815_v8  ;;  %v6917_v59 = vld [vmem:[#allocation4 + $0x350] sm:$0xfe] }
 0x4ab   : > { %v5123_v53 = vmul.f32 %v16930_v17, %v16931_v39  ;;  %v14801_v55 = vmul.f32 %v16932_v46, %v16931_v39  ;;  %v5636_v24 = vmul.f32 %v16581_v63, %v5539_v61  ;;  %v16335_v7 = vrot.slane %v14791_v37, 7 }
 0x4ac   : > { %v4089_v33 = vadd.f32 %v3898_v28, %v3629_v19  ;;  %v4498_v25 = vsel %vm4384_vm2, %v4495_v14, %v16337_v51  ;;  %v4707_v38 = vadd.f32 %v4495_v14, %v4087_v0  ;;  %v14813_v40 = vmul.f32 %v16932_v46, %v16581_v63  ;;  %v3525_v0 = vld [vmem:[#allocation4 + $0x2e8] sm:$0x7f] }
 0x4ad   : > { %v5273_v22 = vrot.slane %v5123_v53, 1  ;;  %v16336_v23 = vrot.slane %v14801_v55, 1  ;;  %v5872_v60 = vrot.slane %v5636_v24, 2  ;;  %v7704_v19 = vsel %vm7588_vm3, %v7702_v45, %v16335_v7 }
 0x4ae   : > { %v4709_v44 = vadd.f32 %v4498_v25, %v4089_v33  ;;  %v5006_v61 = vadd.f32 %v4910_v41, %v4707_v38  ;;  %v6288_v14 = vmul.f32 %v12129_v35, %v6181_v30  ;;  %8557 = vmatprep.mubr.msk.f32.mxu1 %vm533_vm0, %v7704_v19  ;;  %v16341_v53 = vrot.slane %v14813_v40, 2  ;;  %v4164_v25 = vld [vmem:[#allocation4 + $0x2f8] sm:$0x1]  ;;  %v4808_v38 = vld [vmem:[#allocation4 + $0x328] sm:$0x7f] }
 0x4af   : > { %v5276_v28 = vsel %vm3828_vm1, %v5273_v22, %v16336_v23  ;;  %v6290_v24 = vmul.f32 %v12129_v35, %v14808_v54  ;;  %v6501_v10 = vmul.f32 %v16935_v57, %v14808_v54  ;;  %v14832_v41 = vmul.f32 %v16935_v57, %v14815_v8  ;;  %v3524_v57 = vld [vmem:[#allocation4 + $0x2e0] sm:$0x7f] }
 0x4b0   : > { %v5008_v45 = vadd.f32 %v4912_v42, %v4709_v44  ;;  %v5465_v33 = vadd.f32 %v5273_v22, %v5006_v61  ;;  %v7014_v30 = vmul.f32 %v16589_v29, %v6917_v59  ;;  %v5875_v19 = vsel %vm4384_vm2, %v5872_v60, %v16341_v53  ;;  %v5542_v22 = vld [vmem:[#allocation4 + $0x338] sm:$0x1]  ;;  %v6186_v59 = vld [vmem:[#allocation4 + $0x368] sm:$0x7f] }
 0x4b1   : > { %v6651_v7 = vrot.slane %v6501_v10, 1  ;;  %v14840_v23 = vmul.f32 %v16589_v29, %v14815_v8  ;;  %v3632_v42 = vmul.f32 %v12039_v18, %v3525_v0  ;;  %v16346_v51 = vrot.slane %v14832_v41, 1 }
 0x4b2   : > { %v5467_v44 = vadd.f32 %v5276_v28, %v5008_v45  ;;  %v6084_v61 = vadd.f32 %v5872_v60, %v5465_v33  ;;  %v7250_v43 = vrot.slane %v7014_v30, 2  ;;  %v4263_v10 = vmul.f32 %v12052_v50, %v4164_v25  ;;  %v4163_v45 = vld [vmem:[#allocation4 + $0x2f0] sm:$0x1]  ;;  %v4807_v33 = vld [vmem:[#allocation4 + $0x320] sm:$0x7f] }
 0x4b3   : > { %v7252_v62 = vrot.slane %v14840_v23, 2  ;;  %v4092_v53 = vadd.f32 %v3899_v6, %v3632_v42  ;;  %v4915_v32 = vmul.f32 %v12070_v47, %v4808_v38  ;;  %v6654_v60 = vsel %vm3828_vm1, %v6651_v7, %v16346_v51 }
 0x4b4   : > { %v6086_v8 = vadd.f32 %v5875_v19, %v5467_v44  ;;  %v6384_v0 = vadd.f32 %v6288_v14, %v6084_v61  ;;  %v5641_v28 = vmul.f32 %v12085_v9, %v5542_v22  ;;  %v4503_v30 = vrot.slane %v4263_v10, 2  ;;  %v5541_v19 = vld [vmem:[#allocation4 + $0x330] sm:$0x1]  ;;  %v6185_v10 = vld [vmem:[#allocation4 + $0x360] sm:$0x7f] }
 0x4b5   : > { %v7253_v23 = vsel %vm4384_vm2, %v7250_v43, %v7252_v62  ;;  %v6293_v31 = vmul.f32 %v12088_v1, %v6186_v59  ;;  %v7019_v6 = vmul.f32 %v12107_v56, %v6920_v49  ;;  %v3631_v14 = vmul.f32 %v16600_v20, %v3524_v57  ;;  %v3527_v57 = vld [vmem:[#allocation4 + $0x308] sm:$0x80] }
 0x4b6   : > { %v6386_v25 = vadd.f32 %v6290_v24, %v6086_v8  ;;  %v6843_v38 = vadd.f32 %v6651_v7, %v6384_v0  ;;  %v5880_v42 = vrot.slane %v5641_v28, 2  ;;  %v16936_v44 = vrot.slane %v14699_v12, 2  ;;  %v6919_v8 = vld [vmem:[#allocation4 + $0x370] sm:$0x1] }
 0x4b7   : > { %v7258_v22 = vrot.slane %v7019_v6, 2  ;;  %v4262_v51 = vmul.f32 %v12115_v48, %v4163_v45  ;;  %v4914_v39 = vmul.f32 %v12123_v15, %v4807_v33  ;;  %v16937_v49 = vrot.slane %v14728_v26, 2 }
 0x4b8   : > { %v4504_v61 = vsel %vm4384_vm2, %v16936_v44, %v4503_v30  ;;  %v6845_v54 = vadd.f32 %v6654_v60, %v6386_v25  ;;  %v7462_v59 = vadd.f32 %v7250_v43, %v6843_v38  ;;  %v16938_v24 = vrot.slane %v14760_v11, 2 }
 0x4b9   : > { %v4712_v46 = vadd.f32 %v4504_v61, %v4092_v53  ;;  %v5881_v7 = vsel %vm4384_vm2, %v16937_v49, %v5880_v42  ;;  %v16939_v0 = vrot.slane %v14780_v4, 1  ;;  %v4501_v45 = vrot.slane %v4262_v51, 2  ;;  %v4166_v4 = vld [vmem:[#allocation4 + $0x318] sm:$0xfe]  ;;  %v4810_v61 = vld [vmem:[#allocation4 + $0x348] sm:$0x80] }
 0x4ba   : > { %v7259_v12 = vsel %vm4384_vm2, %v16938_v24, %v7258_v22  ;;  %v5640_v33 = vmul.f32 %v16581_v63, %v5541_v19  ;;  %v14871_v30 = vadd.f32 %v7253_v23, %v6845_v54  ;;  %v7699_v43 = vrot.slane %v7462_v59, 7 }
 0x4bb   : > { %v4091_v28 = vadd.f32 %v16939_v0, %v3631_v14  ;;  %v5011_v53 = vadd.f32 %v4915_v32, %v4712_v46  ;;  %v6292_v26 = vmul.f32 %v12129_v35, %v6185_v10  ;;  %v16940_v60 = vrot.slane %v14785_v5, 2 }
 0x4bc   : > { %v5878_v25 = vrot.slane %v5640_v33, 2  ;;  %v7018_v11 = vmul.f32 %v16589_v29, %v6919_v8  ;;  %v3634_v38 = vmul.f32 %v12039_v18, %v3527_v57  ;;  %v7700_v51 = vrot.slane %v14871_v30, 7  ;;  %v16947_v30 = vld [vmem:[#allocation50_spill] sm:$0xff] }
 0x4bd   : > { %v4502_v6 = vsel %vm4384_vm2, %v16940_v60, %v4501_v45  ;;  %v16941_v42 = vrot.slane %v14723_v3, 1  ;;  %v3636_v32 = vmul.f32 %v14518_v52, %v12039_v18  ;;  %v16942_v46 = vrot.slane %v14813_v40, 2 }
 0x4be   : > { %v4711_v23 = vadd.f32 %v4502_v6, %v4091_v28  ;;  %v7256_v14 = vrot.slane %v7018_v11, 2  ;;  %v3749_v19 = vmul.f32 %v14518_v52, %v16576_v21  ;;  %v14891_v44 = vmul.f32 %v14523_v34, %v16576_v21 }
 0x4bf   : > { %v5470_v54 = vadd.f32 %v16941_v42, %v5011_v53  ;;  %v5879_v5 = vsel %vm4384_vm2, %v16942_v46, %v5878_v25  ;;  %v7701_v3 = vsel %vm7588_vm3, %v7699_v43, %v7700_v51  ;;  %v4265_v59 = vmul.f32 %v12052_v50, %v4166_v4  ;;  %v6188_v4 = vld [vmem:[#allocation4 + $0x388] sm:$0x80] }
 0x4c0   : > { %v5010_v10 = vadd.f32 %v4914_v39, %v4711_v23  ;;  %8094 = vmatmul.mubr.f32.gmra.mrb[76].mxu1 %v7701_v3  ;;  %v7257_v40 = vsel %vm4384_vm2, %v7252_v62, %v7256_v14  ;;  %v3902_v49 = vrot.slane %v3749_v19, 1  ;;  %v16361_v8 = vrot.slane %v14891_v44, 1  ;;  %v5544_v39 = vld [vmem:[#allocation4 + $0x358] sm:$0xfe] }
 0x4c1   : > { %v6089_v22 = vadd.f32 %v5881_v7, %v5470_v54  ;;  %v14901_v52 = vmul.f32 %v14523_v34, %v12052_v50  ;;  %v16943_v24 = vrot.slane %v14801_v55, 1  ;;  %v4506_v28 = vrot.slane %v4265_v59, 2  ;;  %v6922_v59 = vld [vmem:[#allocation4 + $0x398] sm:$0xfe] }
 0x4c2   : > { %v4917_v7 = vmul.f32 %v12070_v47, %v4810_v61  ;;  %v3906_v45 = vsel %vm3828_vm1, %v3902_v49, %v16361_v8  ;;  %v4094_v62 = vadd.f32 %v3902_v49, %v3634_v38  ;;  %v4919_v43 = vmul.f32 %v14730_v36, %v12070_v47 }
 0x4c3   : > { %v6389_v57 = vadd.f32 %v6293_v31, %v6089_v22  ;;  %v5469_v0 = vadd.f32 %v16943_v24, %v5010_v10  ;;  %v16360_v33 = vrot.slane %v14901_v52, 2  ;;  %v16944_v34 = vrot.slane %v14755_v58, 1 }
 0x4c4   : > { %v4096_v55 = vadd.f32 %v3906_v45, %v3636_v32  ;;  %v5128_v60 = vmul.f32 %v14730_v36, %v12076_v13  ;;  %v4714_v25 = vadd.f32 %v4506_v28, %v4094_v62  ;;  %v14921_v11 = vmul.f32 %v14734_v2, %v12076_v13  ;;  %v14924_v32 = vld [vmem:[#allocation4 + $0x398] sm:$0xff]  ;;  %v3526_v62 = vld [vmem:[#allocation4 + $0x300] sm:$0x80] }
 0x4c5   : > { %v6848_v31 = vadd.f32 %v16944_v34, %v6389_v57  ;;  %v6088_v53 = vadd.f32 %v5879_v5, %v5469_v0  ;;  %v4510_v6 = vsel %vm4384_vm2, %v4506_v28, %v16360_v33  ;;  %v5643_v38 = vmul.f32 %v12085_v9, %v5544_v39  ;;  %v6924_v33 = vld [vmem:[#allocation4 + $0x3b8] sm:$0x1] }
 0x4c6   : > { %v4716_v54 = vadd.f32 %v4510_v6, %v4096_v55  ;;  %v5280_v23 = vrot.slane %v5128_v60, 1  ;;  %v5013_v46 = vadd.f32 %v4917_v7, %v4714_v25  ;;  %v16354_v5 = vrot.slane %v14921_v11, 1 }
 0x4c7   : > { %v7467_v42 = vadd.f32 %v7259_v12, %v6848_v31  ;;  %v6388_v58 = vadd.f32 %v6292_v26, %v6088_v53  ;;  %v14929_v14 = vmul.f32 %v14734_v2, %v12085_v9  ;;  %v5883_v19 = vrot.slane %v5643_v38, 2  ;;  %v14934_v26 = vld [vmem:[#allocation4 + $0x3a8] sm:$0xff] }
 0x4c8   : > { %v16945_v3 = vrot.slane %v14832_v41, 1  ;;  %v5015_v10 = vadd.f32 %v4919_v43, %v4716_v54  ;;  %v6295_v12 = vmul.f32 %v12088_v1, %v6188_v4  ;;  %v5284_v49 = vsel %vm3828_vm1, %v5280_v23, %v16354_v5 }
 0x4c9   : > { %v7707_v61 = vrot.slane %v7467_v42, 7  ;;  %v5472_v57 = vadd.f32 %v5280_v23, %v5013_v46  ;;  %v16357_v24 = vrot.slane %v14929_v14, 2  ;;  %v6297_v0 = vmul.f32 %v12088_v1, %v14924_v32  ;;  %v4165_v42 = vld [vmem:[#allocation4 + $0x310] sm:$0xfe] }
 0x4ca   : > { %v6847_v22 = vadd.f32 %v16945_v3, %v6388_v58  ;;  %v16946_v28 = vrot.slane %v14791_v37, 7  ;;  %v5474_v39 = vadd.f32 %v5284_v49, %v5015_v10  ;;  %v6506_v45 = vmul.f32 %v16566_v27, %v14924_v32 }
 0x4cb   : > { %v5887_v43 = vsel %vm4384_vm2, %v5883_v19, %v16357_v24  ;;  %v6091_v34 = vadd.f32 %v5883_v19, %v5472_v57  ;;  %v14953_v31 = vmul.f32 %v16566_v27, %v14934_v26  ;;  %v7021_v37 = vmul.f32 %v12107_v56, %v6922_v59  ;;  %v4809_v19 = vld [vmem:[#allocation4 + $0x340] sm:$0x80]  ;;  %v3530_v24 = vld [vmem:[#allocation4 + $0x320] sm:$0x7f] }
 0x4cc   : > { %v7708_v41 = vsel %vm7588_vm3, %v16946_v28, %v7707_v61  ;;  %v7466_v7 = vadd.f32 %v7257_v40, %v6847_v22  ;;  %v6093_v40 = vadd.f32 %v5887_v43, %v5474_v39  ;;  %v6658_v55 = vrot.slane %v6506_v45, 1  ;;  %v16948_v45 = vld [vmem:[#allocation54_spill] sm:$0xff]  ;;  %v5543_v43 = vld [vmem:[#allocation4 + $0x350] sm:$0xfe] }
 0x4cd   : > { %8558 = vmatprep.mubr.msk.f32.mxu1 %vm533_vm0, %v7708_v41  ;;  %v14958_v60 = vmul.f32 %v12107_v56, %v14934_v26  ;;  %v6391_v6 = vadd.f32 %v6295_v12, %v6091_v34  ;;  %v16351_v25 = vrot.slane %v14953_v31, 1  ;;  %v7261_v38 = vrot.slane %v7021_v37, 2 }
 0x4ce   : > { %v7705_v53 = vrot.slane %v7466_v7, 7  ;;  %v3633_v4 = vmul.f32 %v16600_v20, %v3526_v62  ;;  %v6393_v54 = vadd.f32 %v6297_v0, %v6093_v40  ;;  %v3635_v46 = vmul.f32 %v16930_v17, %v16600_v20  ;;  %v16949_v40 = vld [vmem:[#allocation31_spill] sm:$0xff] }
 0x4cf   : > { %v16356_v23 = vrot.slane %v14958_v60, 2  ;;  %v6662_v61 = vsel %vm3828_vm1, %v6658_v55, %v16351_v25  ;;  %v6850_v3 = vadd.f32 %v6658_v55, %v6391_v6  ;;  %v3748_v22 = vmul.f32 %v16930_v17, %v16928_v16  ;;  %v6187_v6 = vld [vmem:[#allocation4 + $0x380] sm:$0x80] }
 0x4d0   : > { %v7706_v58 = vsel %vm7588_vm3, %v7700_v51, %v7705_v53  ;;  %v14975_v10 = vmul.f32 %v16947_v30, %v16928_v16  ;;  %v6852_v51 = vadd.f32 %v6662_v61, %v6393_v54  ;;  %v4264_v59 = vmul.f32 %v12115_v48, %v4165_v42  ;;  %v16950_v54 = vld [vmem:[#allocation51_spill] sm:$0xff]  ;;  %v15005_v61 = vld [vmem:[#allocation4 + $0x390] sm:$0xff] }
 0x4d1   : > { %8100 = vmatmul.mubr.f32.gmra.mrb[78].mxu1 %v7706_v58  ;;  %v7265_v12 = vsel %vm4384_vm2, %v7261_v38, %v16356_v23  ;;  %v14983_v49 = vmul.f32 %v16947_v30, %v12115_v48  ;;  %v7469_v57 = vadd.f32 %v7261_v38, %v6850_v3  ;;  %v3901_v0 = vrot.slane %v3748_v22, 1  ;;  %16951 = vst [vmem:[#allocation60_spill] sm:$0xff] %v15005_v61  ;;  %v5546_v23 = vld [vmem:[#allocation4 + $0x378] sm:$0x1] }
 0x4d2   : > { %v16358_v28 = vrot.slane %v14975_v10, 1  ;;  %v4916_v17 = vmul.f32 %v12123_v15, %v4809_v19  ;;  %v14987_v41 = vadd.f32 %v7265_v12, %v6852_v51  ;;  %v4505_v7 = vrot.slane %v4264_v59, 2  ;;  %v15012_v51 = vld [vmem:[#allocation4 + $0x3a0] sm:$0xff] }
 0x4d3   : > { %v16355_v39 = vrot.slane %v14983_v49, 2  ;;  %v4918_v62 = vmul.f32 %v16948_v45, %v12123_v15  ;;  %v7712_v34 = vrot.slane %v7469_v57, 7  ;;  %v4093_v53 = vadd.f32 %v3901_v0, %v3633_v4  ;;  %16952 = vst [vmem:[#allocation63_spill] sm:$0xff] %v15012_v51 }
 0x4d4   : > { %v3904_v37 = vsel %vm3828_vm1, %v3901_v0, %v16358_v28  ;;  %v5127_v55 = vmul.f32 %v16948_v45, %v16949_v40  ;;  %v16352_v38 = vrot.slane %v14987_v41, 7  ;;  %v15003_v19 = vmul.f32 %v16950_v54, %v16949_v40  ;;  %v6921_v0 = vld [vmem:[#allocation4 + $0x390] sm:$0xfe] }
 0x4d5   : > { %v4095_v42 = vadd.f32 %v3904_v37, %v3635_v46  ;;  %v4508_v58 = vsel %vm4384_vm2, %v4505_v7, %v16355_v39  ;;  %v4713_v3 = vadd.f32 %v4505_v7, %v4093_v53  ;;  %v5642_v4 = vmul.f32 %v16581_v63, %v5543_v43 }
 0x4d6   : > { %v5279_v22 = vrot.slane %v5127_v55, 1  ;;  %v15010_v30 = vmul.f32 %v16950_v54, %v16581_v63  ;;  %v7714_v46 = vsel %vm7588_vm3, %v7712_v34, %v16352_v38  ;;  %v16353_v59 = vrot.slane %v15003_v19, 1  ;;  %v3531_v55 = vld [vmem:[#allocation4 + $0x328] sm:$0x7f] }
 0x4d7   : > { %v4715_v12 = vadd.f32 %v4508_v58, %v4095_v42  ;;  %v6294_v57 = vmul.f32 %v12129_v35, %v6187_v6  ;;  %8559 = vmatprep.mubr.msk.f32.mxu1 %vm533_vm0, %v7714_v46  ;;  %v5012_v7 = vadd.f32 %v4916_v17, %v4713_v3  ;;  %v5882_v43 = vrot.slane %v5642_v4, 2  ;;  %v16953_v42 = vld [vmem:[#allocation36_spill] sm:$0xff]  ;;  %v4168_v17 = vld [vmem:[#allocation4 + $0x338] sm:$0x1] }
 0x4d8   : > { %v16359_v37 = vrot.slane %v15010_v30, 2  ;;  %v6296_v53 = vmul.f32 %v12129_v35, %v15005_v61  ;;  %v5282_v34 = vsel %vm3828_vm1, %v5279_v22, %v16353_v59  ;;  %v6505_v58 = vmul.f32 %v16953_v42, %v15005_v61 }
 0x4d9   : > { %v5014_v25 = vadd.f32 %v4918_v62, %v4715_v12  ;;  %v15030_v6 = vmul.f32 %v16953_v42, %v15012_v51  ;;  %v5471_v3 = vadd.f32 %v5279_v22, %v5012_v7  ;;  %v7020_v46 = vmul.f32 %v16589_v29, %v6921_v0  ;;  %v4814_v12 = vld [vmem:[#allocation4 + $0x368] sm:$0x7f]  ;;  %v4167_v42 = vld [vmem:[#allocation4 + $0x330] sm:$0x1] }
 0x4da   : > { %v5885_v4 = vsel %vm4384_vm2, %v5882_v43, %v16359_v37  ;;  %v15038_v62 = vmul.f32 %v16589_v29, %v15012_v51  ;;  %v6657_v59 = vrot.slane %v6505_v58, 1  ;;  %v3638_v39 = vmul.f32 %v12039_v18, %v3531_v55  ;;  %v6192_v0 = vld [vmem:[#allocation4 + $0x3a8] sm:$0x7f] }
 0x4db   : > { %v5473_v38 = vadd.f32 %v5282_v34, %v5014_v25  ;;  %v16365_v5 = vrot.slane %v15030_v6, 1  ;;  %v6090_v22 = vadd.f32 %v5882_v43, %v5471_v3  ;;  %v7260_v7 = vrot.slane %v7020_v46, 2 }
 0x4dc   : > { %v7262_v28 = vrot.slane %v15038_v62, 2  ;;  %v4269_v37 = vmul.f32 %v12052_v50, %v4168_v17  ;;  %v16954_v34 = vrot.slane %v14891_v44, 1  ;;  %v4921_v55 = vmul.f32 %v12070_v47, %v4814_v12 }
 0x4dd   : > { %v6092_v8 = vadd.f32 %v5885_v4, %v5473_v38  ;;  %v6660_v25 = vsel %vm3828_vm1, %v6657_v59, %v16365_v5  ;;  %v6390_v51 = vadd.f32 %v6294_v57, %v6090_v22  ;;  %v5647_v46 = vmul.f32 %v12085_v9, %v5546_v23  ;;  %v4813_v5 = vld [vmem:[#allocation4 + $0x360] sm:$0x7f]  ;;  %v5545_v22 = vld [vmem:[#allocation4 + $0x370] sm:$0x1] }
 0x4de   : > { %v4098_v58 = vadd.f32 %v16954_v34, %v3638_v39  ;;  %v7263_v43 = vsel %vm4384_vm2, %v7260_v7, %v7262_v28  ;;  %v4513_v3 = vrot.slane %v4269_v37, 2  ;;  %v6299_v62 = vmul.f32 %v12088_v1, %v6192_v0  ;;  %v6191_v0 = vld [vmem:[#allocation4 + $0x3a0] sm:$0x7f] }
 0x4df   : > { %v6392_v17 = vadd.f32 %v6296_v53, %v6092_v8  ;;  %v7025_v38 = vmul.f32 %v12107_v56, %v6924_v33  ;;  %v3637_v4 = vmul.f32 %v16600_v20, %v3530_v24  ;;  %v6849_v40 = vadd.f32 %v6657_v59, %v6390_v51  ;;  %v6923_v33 = vld [vmem:[#allocation4 + $0x3b0] sm:$0x1] }
 0x4e0   : > { %v16955_v44 = vrot.slane %v14901_v52, 2  ;;  %v5890_v12 = vrot.slane %v5647_v46, 2  ;;  %v4268_v57 = vmul.f32 %v12115_v48, %v4167_v42  ;;  %v16956_v8 = vrot.slane %v14975_v10, 1  ;;  %v3533_v46 = vld [vmem:[#allocation4 + $0x348] sm:$0x80] }
 0x4e1   : > { %v6851_v37 = vadd.f32 %v6660_v25, %v6392_v17  ;;  %v7268_v23 = vrot.slane %v7025_v38, 2  ;;  %v7468_v61 = vadd.f32 %v7260_v7, %v6849_v40  ;;  %v16957_v24 = vrot.slane %v14929_v14, 2 }
 0x4e2   : > { %v4514_v39 = vsel %vm4384_vm2, %v16955_v44, %v4513_v3  ;;  %v4097_v53 = vadd.f32 %v16956_v8, %v3637_v4  ;;  %v4511_v52 = vrot.slane %v4268_v57, 2  ;;  %v4920_v59 = vmul.f32 %v12123_v15, %v4813_v5  ;;  %v4170_v44 = vld [vmem:[#allocation4 + $0x358] sm:$0xfe]  ;;  %v4816_v57 = vld [vmem:[#allocation4 + $0x388] sm:$0x80] }
 0x4e3   : > { %v4718_v34 = vadd.f32 %v4514_v39, %v4098_v58  ;;  %v5891_v51 = vsel %vm4384_vm2, %v16957_v24, %v5890_v12  ;;  %v15065_v3 = vadd.f32 %v7263_v43, %v6851_v37  ;;  %v16958_v25 = vrot.slane %v14958_v60, 2 }
 0x4e4   : > { %v5646_v10 = vmul.f32 %v16581_v63, %v5545_v22  ;;  %v7709_v17 = vrot.slane %v7468_v61, 7  ;;  %v16959_v40 = vrot.slane %v14983_v49, 2  ;;  %v6298_v7 = vmul.f32 %v12129_v35, %v6191_v0 }
 0x4e5   : > { %v5017_v42 = vadd.f32 %v4921_v55, %v4718_v34  ;;  %v7269_v58 = vsel %vm4384_vm2, %v16958_v25, %v7268_v23  ;;  %v7024_v38 = vmul.f32 %v16589_v29, %v6923_v33  ;;  %v7710_v5 = vrot.slane %v15065_v3, 7 }
 0x4e6   : > { %v4512_v14 = vsel %vm4384_vm2, %v16959_v40, %v4511_v52  ;;  %v16960_v55 = vrot.slane %v14921_v11, 1  ;;  %v5888_v4 = vrot.slane %v5646_v10, 2  ;;  %v3640_v12 = vmul.f32 %v12039_v18, %v3533_v46  ;;  %v15106_v46 = vpop.f32.mrb[32].mxu1 }
 0x4e7   : > { %v4717_v60 = vadd.f32 %v4512_v14, %v4097_v53  ;;  %v7266_v39 = vrot.slane %v7024_v38, 2  ;;  %v3642_v49 = vmul.f32 %v14730_v36, %v12039_v18  ;;  %v3753_v61 = vmul.f32 %v14730_v36, %v16576_v21  ;;  %16963 = vst [vmem:[#allocation53_spill] sm:$0xff] %v15106_v46  ;;  %v15113_v14 = vpop.f32.mrb[33].mxu1 }
 0x4e8   : > { %v5476_v43 = vadd.f32 %v16960_v55, %v5017_v42  ;;  %v7711_v22 = vsel %vm7588_vm3, %v7709_v17, %v7710_v5  ;;  %v16961_v34 = vrot.slane %v15010_v30, 2  ;;  %v15093_v53 = vmul.f32 %v14734_v2, %v16576_v21  ;;  %16965 = vst [vmem:[#allocation56_spill] sm:$0xff] %v15113_v14 }
 0x4e9   : > { %v5016_v11 = vadd.f32 %v4920_v59, %v4717_v60  ;;  %8106 = vmatmul.mubr.f32.gmra.mrb[80].mxu1 %v7711_v22  ;;  %v7267_v8 = vsel %vm4384_vm2, %v7262_v28, %v7266_v39  ;;  %v3908_v0 = vrot.slane %v3753_v61, 1  ;;  %v4271_v36 = vmul.f32 %v12052_v50, %v4170_v44  ;;  %v5548_v59 = vld [vmem:[#allocation4 + $0x398] sm:$0xfe]  ;;  %v15123_v60 = vpop.f32.mrb[34].mxu1  ;;  %v6194_v61 = vld [vmem:[#allocation4 + $0x3c8] sm:$0x80] }
 0x4ea   : > { %v6095_v37 = vadd.f32 %v5891_v51, %v5476_v43  ;;  %v5889_v23 = vsel %vm4384_vm2, %v16961_v34, %v5888_v4  ;;  %v16962_v24 = vrot.slane %v15003_v19, 1  ;;  %v15100_v51 = vmul.f32 %v14734_v2, %v12052_v50  ;;  %16966 = vst [vmem:[#allocation39_spill] sm:$0xff] %v15123_v60  ;;  %v6928_v60 = vld [vmem:[#allocation4 + $0x3f8] sm:$0x1] }
 0x4eb   : > { %v4923_v30 = vmul.f32 %v12070_v47, %v4816_v57  ;;  %v16374_v28 = vrot.slane %v15093_v53, 1  ;;  %v4100_v42 = vadd.f32 %v3908_v0, %v3640_v12  ;;  %v4516_v25 = vrot.slane %v4271_v36, 2  ;;  %v15128_v57 = vpop.f32.mrb[35].mxu1 }
 0x4ec   : > { %v6395_v33 = vadd.f32 %v6299_v62, %v6095_v37  ;;  %v5475_v52 = vadd.f32 %v16962_v24, %v5016_v11  ;;  %v4925_v10 = vmul.f32 %v14924_v32, %v12070_v47  ;;  %v16964_v62 = vrot.slane %v14953_v31, 1  ;;  %16967 = vst [vmem:[#allocation37_spill] sm:$0xff] %v15128_v57  ;;  %v15141_v24 = vld [vmem:[#allocation4 + $0x3e8] sm:$0xff] }
 0x4ed   : > { %v16373_v40 = vrot.slane %v15100_v51, 2  ;;  %v5132_v2 = vmul.f32 %v14924_v32, %v12076_v13  ;;  %v3912_v38 = vsel %vm3828_vm1, %v3908_v0, %v16374_v28  ;;  %v4720_v55 = vadd.f32 %v4516_v25, %v4100_v42 }
 0x4ee   : > { %v6854_v19 = vadd.f32 %v16964_v62, %v6395_v33  ;;  %v6094_v17 = vadd.f32 %v5889_v23, %v5475_v52  ;;  %v15120_v43 = vmul.f32 %v14934_v26, %v12076_v13  ;;  %v5649_v31 = vmul.f32 %v12085_v9, %v5548_v59  ;;  %v15135_v23 = vld [vmem:[#allocation4 + $0x3d8] sm:$0xff] }
 0x4ef   : > { %v4102_v39 = vadd.f32 %v3912_v38, %v3642_v49  ;;  %v4520_v12 = vsel %vm4384_vm2, %v4516_v25, %v16373_v40  ;;  %v5019_v22 = vadd.f32 %v4923_v30, %v4720_v55  ;;  %v5286_v37 = vrot.slane %v5132_v2, 1  ;;  %v6926_v62 = vld [vmem:[#allocation4 + $0x3d8] sm:$0xfe]  ;;  %v16981_v40 = vld [vmem:[#allocation60_spill] sm:$0xff] }
 0x4f0   : > { %v7473_v4 = vadd.f32 %v7269_v58, %v6854_v19  ;;  %v6394_v44 = vadd.f32 %v6298_v7, %v6094_v17  ;;  %v16369_v11 = vrot.slane %v15120_v43, 1  ;;  %v15133_v34 = vmul.f32 %v14934_v26, %v12085_v9  ;;  %v15137_v58 = vpop.f32.mrb[36].mxu1 }
 0x4f1   : > { %16968 = vst [vmem:[#allocation30_spill] sm:$0xff] %v15137_v58  ;;  %v16969_v49 = vrot.slane %v15030_v6, 1  ;;  %v4722_v36 = vadd.f32 %v4520_v12, %v4102_v39  ;;  %v5893_v33 = vrot.slane %v5649_v31, 2  ;;  %v15143_v52 = vpop.f32.mrb[37].mxu1  ;;  %v5478_v59 = vadd.f32 %v5286_v37, %v5019_v22  ;;  %v3532_v31 = vld [vmem:[#allocation4 + $0x340] sm:$0x80] }
 0x4f2   : > { %v7717_v7 = vrot.slane %v7473_v4, 7  ;;  %16970 = vst [vmem:[#allocation42_spill] sm:$0xff] %v15143_v52  ;;  %v5290_v30 = vsel %vm3828_vm1, %v5286_v37, %v16369_v11  ;;  %v16372_v42 = vrot.slane %v15133_v34, 2  ;;  %v6301_v25 = vmul.f32 %v12088_v1, %v6194_v61  ;;  %v15150_v19 = vpop.f32.mrb[38].mxu1 }
 0x4f3   : > { %v6853_v0 = vadd.f32 %v16969_v49, %v6394_v44  ;;  %16971 = vst [vmem:[#allocation58_spill] sm:$0xff] %v15150_v19  ;;  %v16972_v6 = vrot.slane %v14987_v41, 7  ;;  %v5021_v38 = vadd.f32 %v4925_v10, %v4722_v36  ;;  %v6303_v55 = vmul.f32 %v12088_v1, %v15135_v23  ;;  %v15157_v4 = vpop.f32.mrb[39].mxu1  ;;  %v4820_v19 = vld [vmem:[#allocation4 + $0x3a8] sm:$0x7f] }
 0x4f4   : > { %16973 = vst [vmem:[#allocation59_spill] sm:$0xff] %v15157_v4  ;;  %v5897_v44 = vsel %vm4384_vm2, %v5893_v33, %v16372_v42  ;;  %v6097_v39 = vadd.f32 %v5893_v33, %v5478_v59  ;;  %v6510_v41 = vmul.f32 %v16566_v27, %v15135_v23  ;;  %v15169_v10 = vpop.f32.mrb[40].mxu1  ;;  %v7027_v22 = vmul.f32 %v12107_v56, %v6926_v62  ;;  %v4169_v59 = vld [vmem:[#allocation4 + $0x350] sm:$0xfe] }
 0x4f5   : > { %v7718_v17 = vsel %vm7588_vm3, %v16972_v6, %v7717_v7  ;;  %v7472_v2 = vadd.f32 %v7267_v8, %v6853_v0  ;;  %v15167_v8 = vmul.f32 %v16566_v27, %v15141_v24  ;;  %16974 = vst [vmem:[#allocation41_spill] sm:$0xff] %v15169_v10  ;;  %v5480_v61 = vadd.f32 %v5290_v30, %v5021_v38  ;;  %v15176_v7 = vpop.f32.mrb[41].mxu1  ;;  %v4815_v38 = vld [vmem:[#allocation4 + $0x380] sm:$0x80] }
 0x4f6   : > { %8560 = vmatprep.mubr.msk.f32.mxu1 %vm533_vm0, %v7718_v17  ;;  %v15174_v37 = vmul.f32 %v12107_v56, %v15141_v24  ;;  %16975 = vst [vmem:[#allocation62_spill] sm:$0xff] %v15176_v7  ;;  %v6397_v49 = vadd.f32 %v6301_v25, %v6097_v39  ;;  %v6664_v0 = vrot.slane %v6510_v41, 1  ;;  %v3639_v33 = vmul.f32 %v16600_v20, %v3532_v31  ;;  %v15180_v6 = vpop.f32.mrb[42].mxu1 }
 0x4f7   : > { %v7715_v12 = vrot.slane %v7472_v2, 7  ;;  %v16370_v36 = vrot.slane %v15167_v8, 1  ;;  %16976 = vst [vmem:[#allocation57_spill] sm:$0xff] %v15180_v6  ;;  %v6099_v62 = vadd.f32 %v5897_v44, %v5480_v61  ;;  %v7271_v17 = vrot.slane %v7027_v22, 2  ;;  %v15186_v11 = vpop.f32.mrb[43].mxu1  ;;  %v15241_v6 = vld [vmem:[#allocation4 + $0x3e0] sm:$0xff] }
 0x4f8   : > { %v16371_v2 = vrot.slane %v15174_v37, 2  ;;  %16977 = vst [vmem:[#allocation52_spill] sm:$0xff] %v15186_v11  ;;  %v6856_v31 = vadd.f32 %v6664_v0, %v6397_v49  ;;  %v3641_v39 = vmul.f32 %v16948_v45, %v16600_v20  ;;  %v3752_v3 = vmul.f32 %v16948_v45, %v16928_v16  ;;  %16989 = vst [vmem:[#allocation38_spill] sm:$0xff] %v15241_v6 }
 0x4f9   : > { %v7716_v30 = vsel %vm7588_vm3, %v7710_v5, %v7715_v12  ;;  %v6668_v25 = vsel %vm3828_vm1, %v6664_v0, %v16370_v36  ;;  %v15195_v5 = vpop.f32.mrb[44].mxu1  ;;  %v6399_v44 = vadd.f32 %v6303_v55, %v6099_v62  ;;  %v15202_v12 = vmul.f32 %v16950_v54, %v16928_v16 }
 0x4fa   : > { %8112 = vmatmul.mubr.f32.gmra.mrb[82].mxu1 %v7716_v30  ;;  %16978 = vst [vmem:[#allocation34_spill] sm:$0xff] %v15195_v5  ;;  %v7275_v41 = vsel %vm4384_vm2, %v7271_v17, %v16371_v2  ;;  %v4270_v61 = vmul.f32 %v12115_v48, %v4169_v59  ;;  %v15205_v22 = vpop.f32.mrb[45].mxu1  ;;  %v7475_v49 = vadd.f32 %v7271_v17, %v6856_v31  ;;  %v3907_v0 = vrot.slane %v3752_v3, 1  ;;  %v5547_v30 = vld [vmem:[#allocation4 + $0x390] sm:$0xfe] }
 0x4fb   : > { %16979 = vst [vmem:[#allocation28_spill] sm:$0xff] %v15205_v22  ;;  %v15209_v45 = vmul.f32 %v16950_v54, %v12115_v48  ;;  %v4922_v55 = vmul.f32 %v12123_v15, %v4815_v38  ;;  %v15212_v62 = vpop.f32.mrb[46].mxu1  ;;  %v6858_v36 = vadd.f32 %v6668_v25, %v6399_v44  ;;  %v16375_v2 = vrot.slane %v15202_v12, 1  ;;  %v16983_v54 = vld [vmem:[#allocation31_spill] sm:$0xff] }
 0x4fc   : > { %16980 = vst [vmem:[#allocation45_spill] sm:$0xff] %v15212_v62  ;;  %v4515_v42 = vrot.slane %v4270_v61, 2  ;;  %v4924_v59 = vmul.f32 %v16981_v40, %v12123_v15  ;;  %v15217_v28 = vpop.f32.mrb[47].mxu1  ;;  %v7722_v17 = vrot.slane %v7475_v49, 7  ;;  %v4099_v31 = vadd.f32 %v3907_v0, %v3639_v33  ;;  %v16985_v44 = vld [vmem:[#allocation63_spill] sm:$0xff] }
 0x4fd   : > { %16982 = vst [vmem:[#allocation40_spill] sm:$0xff] %v15217_v28  ;;  %v5131_v22 = vmul.f32 %v16981_v40, %v16983_v54  ;;  %v15222_v38 = vpop.f32.mrb[48].mxu1  ;;  %v15224_v5 = vadd.f32 %v7275_v41, %v6858_v36  ;;  %v3910_v25 = vsel %vm3828_vm1, %v3907_v0, %v16375_v2  ;;  %v15231_v61 = vmul.f32 %v16985_v44, %v16983_v54  ;;  %v6193_v33 = vld [vmem:[#allocation4 + $0x3c0] sm:$0x80]  ;;  %v15234_v28 = vld [vmem:[#allocation4 + $0x3d0] sm:$0xff] }
 0x4fe   : > { %16984 = vst [vmem:[#allocation43_spill] sm:$0xff] %v15222_v38  ;;  %v5648_v49 = vmul.f32 %v16581_v63, %v5547_v30  ;;  %16986 = vst [vmem:[#allocation35_spill] sm:$0xff] %v15234_v28  ;;  %v15236_v3 = vpop.f32.mrb[49].mxu1  ;;  %v4101_v62 = vadd.f32 %v3910_v25, %v3641_v39  ;;  %v16988_v38 = vrot.slane %v15209_v45, 2  ;;  %v4719_v41 = vadd.f32 %v4515_v42, %v4099_v31  ;;  %v6925_v39 = vld [vmem:[#allocation4 + $0x3d0] sm:$0xfe] }
 0x4ff   : > { %16987 = vst [vmem:[#allocation44_spill] sm:$0xff] %v15236_v3  ;;  %v5285_v11 = vrot.slane %v5131_v22, 1  ;;  %v15243_v0 = vpop.f32.mrb[50].mxu1  ;;  %v16376_v2 = vrot.slane %v15224_v5, 7  ;;  %v15249_v7 = vmul.f32 %v16985_v44, %v16581_v63  ;;  %v6302_v22 = vmul.f32 %v12129_v35, %v15234_v28  ;;  %v3537_v31 = vld [vmem:[#allocation4 + $0x368] sm:$0x7f] }
 0x500   : > { %v4518_v36 = vsel %vm4384_vm2, %v4515_v42, %v16988_v38  ;;  %16990 = vst [vmem:[#allocation61_spill] sm:$0xff] %v15243_v0  ;;  %v5892_v3 = vrot.slane %v5648_v49, 2  ;;  %v15251_v25 = vpop.f32.mrb[51].mxu1  ;;  %v5018_v38 = vadd.f32 %v4922_v55, %v4719_v41  ;;  %v6300_v42 = vmul.f32 %v12129_v35, %v6193_v33  ;;  %v16994_v55 = vld [vmem:[#allocation36_spill] sm:$0xff] }
 0x501   : > { %16991 = vst [vmem:[#allocation64_spill] sm:$0xff] %v15251_v25  ;;  %v4721_v10 = vadd.f32 %v4518_v36, %v4101_v62  ;;  %v15256_v0 = vpop.f32.mrb[52].mxu1  ;;  %v7724_v30 = vsel %vm7588_vm3, %v7722_v17, %v16376_v2  ;;  %v16993_v4 = vrot.slane %v15231_v61, 1  ;;  %v16377_v25 = vrot.slane %v15249_v7, 2  ;;  %v4172_v2 = vld [vmem:[#allocation4 + $0x378] sm:$0x1] }
 0x502   : > { %16992 = vst [vmem:[#allocation55_spill] sm:$0xff] %v15256_v0  ;;  %v6509_v62 = vmul.f32 %v16994_v55, %v15234_v28  ;;  %v15267_v33 = vpop.f32.mrb[53].mxu1  ;;  %8561 = vmatprep.mubr.msk.f32.mxu1 %vm533_vm0, %v7724_v30  ;;  %v5477_v41 = vadd.f32 %v5285_v11, %v5018_v38  ;;  %v15272_v0 = vmul.f32 %v16994_v55, %v15241_v6 }
 0x503   : > { %v5288_v49 = vsel %vm3828_vm1, %v5285_v11, %v16993_v4  ;;  %16995 = vst [vmem:[#allocation49_spill] sm:$0xff] %v15267_v33  ;;  %v5020_v36 = vadd.f32 %v4924_v59, %v4721_v10  ;;  %v7026_v17 = vmul.f32 %v16589_v29, %v6925_v39  ;;  %v15275_v4 = vpop.f32.mrb[54].mxu1  ;;  %v5895_v52 = vsel %vm4384_vm2, %v5892_v3, %v16377_v25  ;;  %v5550_v10 = vld [vmem:[#allocation4 + $0x3b8] sm:$0x1]  ;;  %v6198_v59 = vld [vmem:[#allocation4 + $0x3e8] sm:$0x7f] }
 0x504   : > { %16996 = vst [vmem:[#allocation47_spill] sm:$0xff] %v15275_v4  ;;  %v6663_v58 = vrot.slane %v6509_v62, 1  ;;  %v15282_v30 = vmul.f32 %v16589_v29, %v15241_v6  ;;  %v3644_v11 = vmul.f32 %v12039_v18, %v3537_v31  ;;  %v15285_v38 = vpop.f32.mrb[55].mxu1  ;;  %v6096_v33 = vadd.f32 %v5892_v3, %v5477_v41  ;;  %v3536_v6 = vld [vmem:[#allocation4 + $0x360] sm:$0x7f] }
 0x505   : > { %16997 = vst [vmem:[#allocation29_spill] sm:$0xff] %v15285_v38  ;;  %v5479_v39 = vadd.f32 %v5288_v49, %v5020_v36  ;;  %v16382_v57 = vrot.slane %v15272_v0, 1  ;;  %v7270_v4 = vrot.slane %v7026_v17, 2  ;;  %v15288_v14 = vpop.f32.mrb[56].mxu1  ;;  %v16999_v25 = vrot.slane %v15093_v53, 1 }
 0x506   : > { %16998 = vst [vmem:[#allocation46_spill] sm:$0xff] %v15288_v14  ;;  %v4275_v55 = vmul.f32 %v12052_v50, %v4172_v2  ;;  %v4927_v31 = vmul.f32 %v12070_v47, %v4820_v19  ;;  %v15295_v54 = vpop.f32.mrb[57].mxu1  ;;  %v6396_v3 = vadd.f32 %v6300_v42, %v6096_v33  ;;  %v5653_v41 = vmul.f32 %v12085_v9, %v5550_v10  ;;  %v4171_v17 = vld [vmem:[#allocation4 + $0x370] sm:$0x1]  ;;  %v4819_v62 = vld [vmem:[#allocation4 + $0x3a0] sm:$0x7f] }
 0x507   : > { %v4104_v46 = vadd.f32 %v16999_v25, %v3644_v11  ;;  %17000 = vst [vmem:[#allocation48_spill] sm:$0xff] %v15295_v54  ;;  %v6098_v49 = vadd.f32 %v5895_v52, %v5479_v39  ;;  %v6666_v36 = vsel %vm3828_vm1, %v6663_v58, %v16382_v57  ;;  %v15301_v14 = vpop.f32.mrb[58].mxu1  ;;  %v17002_v53 = vrot.slane %v15282_v30, 2  ;;  %v5549_v57 = vld [vmem:[#allocation4 + $0x3b0] sm:$0x1] }
 0x508   : > { %17001 = vst [vmem:[#allocation50_spill] sm:$0xff] %v15301_v14  ;;  %v4523_v19 = vrot.slane %v4275_v55, 2  ;;  %v6305_v25 = vmul.f32 %v12088_v1, %v6198_v59  ;;  %v7031_v52 = vmul.f32 %v12107_v56, %v6928_v60  ;;  %v15308_v42 = vpop.f32.mrb[59].mxu1  ;;  %v6855_v11 = vadd.f32 %v6663_v58, %v6396_v3  ;;  %v6197_v60 = vld [vmem:[#allocation4 + $0x3e0] sm:$0x7f] }
 0x509   : > { %v7273_v2 = vsel %vm4384_vm2, %v7270_v4, %v17002_v53  ;;  %17003 = vst [vmem:[#allocation54_spill] sm:$0xff] %v15308_v42  ;;  %v6398_v33 = vadd.f32 %v6302_v22, %v6098_v49  ;;  %v5900_v39 = vrot.slane %v5653_v41, 2  ;;  %v3643_v10 = vmul.f32 %v16600_v20, %v3536_v6  ;;  %v15311_v54 = vpop.f32.mrb[60].mxu1  ;;  %v6927_v41 = vld [vmem:[#allocation4 + $0x3f0] sm:$0x1] }
 0x50a   : > { %17004 = vst [vmem:[#allocation51_spill] sm:$0xff] %v15311_v54  ;;  %v17005_v14 = vrot.slane %v15100_v51, 2  ;;  %v7278_v53 = vrot.slane %v7031_v52, 2  ;;  %v4274_v55 = vmul.f32 %v12115_v48, %v4171_v17  ;;  %v4926_v59 = vmul.f32 %v12123_v15, %v4819_v62  ;;  %v15318_v28 = vpop.f32.mrb[61].mxu1  ;;  %v3539_v54 = vld [vmem:[#allocation4 + $0x388] sm:$0x80] }
 0x50b   : > { %17006 = vst [vmem:[#allocation60_spill] sm:$0xff] %v15318_v28  ;;  %v6857_v22 = vadd.f32 %v6666_v36, %v6398_v33  ;;  %v7474_v58 = vadd.f32 %v7270_v4, %v6855_v11  ;;  %v17007_v6 = vrot.slane %v15133_v34, 2  ;;  %v15323_v51 = vpop.f32.mrb[62].mxu1  ;;  %v17010_v62 = vrot.slane %v15202_v12, 1  ;;  %v6932_v28 = vld [vmem:[#allocation4 + $0x438] sm:$0x1] }
 0x50c   : > { %v4524_v38 = vsel %vm4384_vm2, %v17005_v14, %v4523_v19  ;;  %17008 = vst [vmem:[#allocation63_spill] sm:$0xff] %v15323_v51  ;;  %v17009_v14 = vrot.slane %v15174_v37, 2  ;;  %v4521_v52 = vrot.slane %v4274_v55, 2  ;;  %v5652_v36 = vmul.f32 %v16581_v63, %v5549_v57  ;;  %v15331_v4 = vpop.f32.mrb[63].mxu1 }
 0x50d   : > { %v4724_v49 = vadd.f32 %v4524_v38, %v4104_v46  ;;  %v5901_v3 = vsel %vm4384_vm2, %v17007_v6, %v5900_v39  ;;  %v4103_v19 = vadd.f32 %v17010_v62, %v3643_v10  ;;  %17011 = vst [vmem:[#allocation65_spill] sm:$0xff] %v15331_v4  ;;  %v15333_v46 = vadd.f32 %v7273_v2, %v6857_v22  ;;  %v4174_v10 = vld [vmem:[#allocation4 + $0x398] sm:$0xfe]  ;;  %v4822_v6 = vld [vmem:[#allocation4 + $0x3c8] sm:$0x80] }
 0x50e   : > { %v7279_v17 = vsel %vm4384_vm2, %v17009_v14, %v7278_v53  ;;  %v7719_v34 = vrot.slane %v7474_v58, 7  ;;  %v6304_v33 = vmul.f32 %v12129_v35, %v6197_v60  ;;  %v17012_v11 = vrot.slane %v15209_v45, 2  ;;  %v3542_v4 = vld [vmem:[#allocation4 + $0x3a0] sm:$0x7f] }
 0x50f   : > { %v5023_v38 = vadd.f32 %v4927_v31, %v4724_v49  ;;  %v5898_v39 = vrot.slane %v5652_v36, 2  ;;  %v7030_v53 = vmul.f32 %v16589_v29, %v6927_v41  ;;  %v3646_v12 = vmul.f32 %v12039_v18, %v3539_v54 }
 0x510   : > { %v4522_v37 = vsel %vm4384_vm2, %v17012_v11, %v4521_v52  ;;  %v7720_v57 = vrot.slane %v15333_v46, 7  ;;  %v17013_v55 = vrot.slane %v15120_v43, 1  ;;  %v3648_v31 = vmul.f32 %v14924_v32, %v12039_v18 }
 0x511   : > { %v4723_v22 = vadd.f32 %v4522_v37, %v4103_v19  ;;  %v17014_v60 = vrot.slane %v15249_v7, 2  ;;  %v7276_v58 = vrot.slane %v7030_v53, 2  ;;  %v3757_v49 = vmul.f32 %v14924_v32, %v16576_v21  ;;  %v5552_v37 = vld [vmem:[#allocation4 + $0x3d8] sm:$0xfe] }
 0x512   : > { %v5482_v2 = vadd.f32 %v17013_v55, %v5023_v38  ;;  %v15353_v54 = vmul.f32 %v14934_v26, %v16576_v21  ;;  %v7721_v43 = vsel %vm7588_vm3, %v7719_v34, %v7720_v57  ;;  %v4277_v62 = vmul.f32 %v12052_v50, %v4174_v10 }
 0x513   : > { %v5899_v45 = vsel %vm4384_vm2, %v17014_v60, %v5898_v39  ;;  %v5022_v14 = vadd.f32 %v4926_v59, %v4723_v22  ;;  %8118 = vmatmul.mubr.f32.gmra.mrb[84].mxu1 %v7721_v43  ;;  %v17015_v7 = vrot.slane %v15282_v30, 2  ;;  %v3914_v52 = vrot.slane %v3757_v49, 1  ;;  %v6200_v49 = vld [vmem:[#allocation4 + $0x408] sm:$0x80] }
 0x514   : > { %v6101_v41 = vadd.f32 %v5901_v3, %v5482_v2  ;;  %v16394_v32 = vrot.slane %v15353_v54, 1  ;;  %v15365_v36 = vmul.f32 %v14934_v26, %v12052_v50  ;;  %v17016_v11 = vrot.slane %v15231_v61, 1 }
 0x515   : > { %v7277_v19 = vsel %vm4384_vm2, %v17015_v7, %v7276_v58  ;;  %v4526_v3 = vrot.slane %v4277_v62, 2  ;;  %v4929_v59 = vmul.f32 %v12070_v47, %v4822_v6  ;;  %v4106_v39 = vadd.f32 %v3914_v52, %v3646_v12 }
 0x516   : > { %v6401_v38 = vadd.f32 %v6305_v25, %v6101_v41  ;;  %v5481_v34 = vadd.f32 %v17016_v11, %v5022_v14  ;;  %v3918_v30 = vsel %vm3828_vm1, %v3914_v52, %v16394_v32  ;;  %v16391_v53 = vrot.slane %v15365_v36, 2 }
 0x517   : > { %v4931_v10 = vmul.f32 %v15135_v23, %v12070_v47  ;;  %v17017_v26 = vrot.slane %v15167_v8, 1  ;;  %v4108_v61 = vadd.f32 %v3918_v30, %v3648_v31  ;;  %v5136_v2 = vmul.f32 %v15135_v23, %v12076_v13  ;;  %v15388_v31 = vld [vmem:[#allocation4 + $0x418] sm:$0xff] }
 0x518   : > { %v6100_v55 = vadd.f32 %v5899_v45, %v5481_v34  ;;  %v4530_v22 = vsel %vm4384_vm2, %v4526_v3, %v16391_v53  ;;  %v4726_v60 = vadd.f32 %v4526_v3, %v4106_v39  ;;  %v15385_v12 = vmul.f32 %v15141_v24, %v12076_v13  ;;  %v6930_v3 = vld [vmem:[#allocation4 + $0x418] sm:$0xfe] }
 0x519   : > { %v6860_v25 = vadd.f32 %v17017_v26, %v6401_v38  ;;  %v5655_v58 = vmul.f32 %v12085_v9, %v5552_v37  ;;  %v4728_v43 = vadd.f32 %v4530_v22, %v4108_v61  ;;  %v5292_v45 = vrot.slane %v5136_v2, 1  ;;  %v3538_v61 = vld [vmem:[#allocation4 + $0x380] sm:$0x80] }
 0x51a   : > { %v6400_v8 = vadd.f32 %v6304_v33, %v6100_v55  ;;  %v5025_v41 = vadd.f32 %v4929_v59, %v4726_v60  ;;  %v16386_v14 = vrot.slane %v15385_v12, 1  ;;  %v15393_v62 = vmul.f32 %v15141_v24, %v12085_v9  ;;  %v15398_v33 = vld [vmem:[#allocation4 + $0x428] sm:$0xff] }
 0x51b   : > { %v7479_v6 = vadd.f32 %v7279_v17, %v6860_v25  ;;  %v5903_v7 = vrot.slane %v5655_v58, 2  ;;  %v17018_v38 = vrot.slane %v15272_v0, 1  ;;  %v5027_v34 = vadd.f32 %v4931_v10, %v4728_v43 }
 0x51c   : > { %v6307_v17 = vmul.f32 %v12088_v1, %v6200_v49  ;;  %v5296_v59 = vsel %vm3828_vm1, %v5292_v45, %v16386_v14  ;;  %v5484_v37 = vadd.f32 %v5292_v45, %v5025_v41  ;;  %v16389_v30 = vrot.slane %v15393_v62, 2  ;;  %v15480_v14 = vld [vmem:[#allocation4 + $0x420] sm:$0xff] }
 0x51d   : > { %v7727_v52 = vrot.slane %v7479_v6, 7  ;;  %v6859_v11 = vadd.f32 %v17018_v38, %v6400_v8  ;;  %v6309_v39 = vmul.f32 %v12088_v1, %v15388_v31  ;;  %v17019_v26 = vrot.slane %v15224_v5, 7  ;;  %v15424_v8 = vpop.f32.mrb[64].mxu1 }
 0x51e   : > { %v5486_v25 = vadd.f32 %v5296_v59, %v5027_v34  ;;  %v6514_v55 = vmul.f32 %v16566_v27, %v15388_v31  ;;  %v5907_v2 = vsel %vm4384_vm2, %v5903_v7, %v16389_v30  ;;  %v6103_v22 = vadd.f32 %v5903_v7, %v5484_v37  ;;  %17020 = vst [vmem:[#allocation66_spill] sm:$0xff] %v15424_v8  ;;  %v15428_v38 = vpop.f32.mrb[65].mxu1  ;;  %v4821_v37 = vld [vmem:[#allocation4 + $0x3c0] sm:$0x80]  ;;  %v6929_v30 = vld [vmem:[#allocation4 + $0x410] sm:$0xfe] }
 0x51f   : > { %v7728_v0 = vsel %vm7588_vm3, %v17019_v26, %v7727_v52  ;;  %v7478_v10 = vadd.f32 %v7277_v19, %v6859_v11  ;;  %v15417_v60 = vmul.f32 %v16566_v27, %v15398_v33  ;;  %v7033_v5 = vmul.f32 %v12107_v56, %v6930_v3  ;;  %v4173_v52 = vld [vmem:[#allocation4 + $0x390] sm:$0xfe]  ;;  %17021 = vst [vmem:[#allocation67_spill] sm:$0xff] %v15428_v38  ;;  %v5554_v8 = vld [vmem:[#allocation4 + $0x3f8] sm:$0x1] }
 0x520   : > { %8562 = vmatprep.mubr.msk.f32.mxu1 %vm533_vm0, %v7728_v0  ;;  %v6105_v19 = vadd.f32 %v5907_v2, %v5486_v25  ;;  %v6670_v49 = vrot.slane %v6514_v55, 1  ;;  %v15422_v6 = vmul.f32 %v12107_v56, %v15398_v33  ;;  %v6403_v43 = vadd.f32 %v6307_v17, %v6103_v22 }
 0x521   : > { %v7725_v58 = vrot.slane %v7478_v10, 7  ;;  %v16385_v45 = vrot.slane %v15417_v60, 1  ;;  %v7281_v41 = vrot.slane %v7033_v5, 2  ;;  %v3645_v7 = vmul.f32 %v16600_v20, %v3538_v61 }
 0x522   : > { %v6405_v34 = vadd.f32 %v6309_v39, %v6105_v19  ;;  %v16388_v3 = vrot.slane %v15422_v6, 2  ;;  %v3647_v59 = vmul.f32 %v16981_v40, %v16600_v20  ;;  %v6862_v26 = vadd.f32 %v6670_v49, %v6403_v43  ;;  %v17022_v19 = vld [vmem:[#allocation35_spill] sm:$0xff]  ;;  %v5551_v43 = vld [vmem:[#allocation4 + $0x3d0] sm:$0xfe] }
 0x523   : > { %v7726_v11 = vsel %vm7588_vm3, %v7720_v57, %v7725_v58  ;;  %v6674_v17 = vsel %vm3828_vm1, %v6670_v49, %v16385_v45  ;;  %v3756_v0 = vmul.f32 %v16981_v40, %v16928_v16  ;;  %v15443_v46 = vmul.f32 %v16985_v44, %v16928_v16 }
 0x524   : > { %8124 = vmatmul.mubr.f32.gmra.mrb[86].mxu1 %v7726_v11  ;;  %v6864_v57 = vadd.f32 %v6674_v17, %v6405_v34  ;;  %v7285_v39 = vsel %vm4384_vm2, %v7281_v41, %v16388_v3  ;;  %v4276_v10 = vmul.f32 %v12115_v48, %v4173_v52  ;;  %v15451_v25 = vmul.f32 %v16985_v44, %v12115_v48  ;;  %v17023_v11 = vld [vmem:[#allocation31_spill] sm:$0xff] }
 0x525   : > { %v7481_v55 = vadd.f32 %v7281_v41, %v6862_v26  ;;  %v3913_v61 = vrot.slane %v3756_v0, 1  ;;  %v16390_v2 = vrot.slane %v15443_v46, 1  ;;  %v4928_v40 = vmul.f32 %v12123_v15, %v4821_v37  ;;  %v6199_v17 = vld [vmem:[#allocation4 + $0x400] sm:$0x80] }
 0x526   : > { %v15455_v22 = vadd.f32 %v7285_v39, %v6864_v57  ;;  %v4525_v5 = vrot.slane %v4276_v10, 2  ;;  %v16387_v58 = vrot.slane %v15451_v25, 2  ;;  %v4930_v49 = vmul.f32 %v17022_v19, %v12123_v15  ;;  %v17024_v57 = vld [vmem:[#allocation38_spill] sm:$0xff]  ;;  %v15473_v10 = vld [vmem:[#allocation4 + $0x410] sm:$0xff] }
 0x527   : > { %v7732_v52 = vrot.slane %v7481_v55, 7  ;;  %v3916_v44 = vsel %vm3828_vm1, %v3913_v61, %v16390_v2  ;;  %v4105_v41 = vadd.f32 %v3913_v61, %v3645_v7  ;;  %v5135_v34 = vmul.f32 %v17022_v19, %v17023_v11  ;;  %17025 = vst [vmem:[#allocation35_spill] sm:$0xff] %v15473_v10  ;;  %17026 = vst [vmem:[#allocation38_spill] sm:$0xff] %v15480_v14  ;;  %v3543_v2 = vld [vmem:[#allocation4 + $0x3a8] sm:$0x7f] }
 0x528   : > { %v16392_v37 = vrot.slane %v15455_v22, 7  ;;  %v4107_v26 = vadd.f32 %v3916_v44, %v3647_v59  ;;  %v4528_v0 = vsel %vm4384_vm2, %v4525_v5, %v16387_v58  ;;  %v15471_v39 = vmul.f32 %v17024_v57, %v17023_v11  ;;  %v6203_v11 = vld [vmem:[#allocation4 + $0x420] sm:$0x7f] }
 0x529   : > { %v4725_v55 = vadd.f32 %v4525_v5, %v4105_v41  ;;  %v5291_v45 = vrot.slane %v5135_v34, 1  ;;  %v5654_v7 = vmul.f32 %v16581_v63, %v5551_v43  ;;  %v15478_v61 = vmul.f32 %v17024_v57, %v16581_v63 }
 0x52a   : > { %v7734_v59 = vsel %vm7588_vm3, %v7732_v52, %v16392_v37  ;;  %v4727_v44 = vadd.f32 %v4528_v0, %v4107_v26  ;;  %v16393_v58 = vrot.slane %v15471_v39, 1  ;;  %v6306_v3 = vmul.f32 %v12129_v35, %v6199_v17  ;;  %v17027_v26 = vld [vmem:[#allocation36_spill] sm:$0xff] }
 0x52b   : > { %8563 = vmatprep.mubr.msk.f32.mxu1 %vm533_vm0, %v7734_v59  ;;  %v5024_v5 = vadd.f32 %v4928_v40, %v4725_v55  ;;  %v5902_v43 = vrot.slane %v5654_v7, 2  ;;  %v16395_v41 = vrot.slane %v15478_v61, 2  ;;  %v6308_v34 = vmul.f32 %v12129_v35, %v15473_v10  ;;  %v4176_v40 = vld [vmem:[#allocation4 + $0x3b8] sm:$0x1] }
 0x52c   : > { %v5026_v53 = vadd.f32 %v4930_v49, %v4727_v44  ;;  %v5294_v52 = vsel %vm3828_vm1, %v5291_v45, %v16393_v58  ;;  %v6513_v0 = vmul.f32 %v17027_v26, %v15473_v10  ;;  %v15498_v17 = vmul.f32 %v17027_v26, %v15480_v14  ;;  %v4826_v44 = vld [vmem:[#allocation4 + $0x3e8] sm:$0x7f]  ;;  %v4175_v26 = vld [vmem:[#allocation4 + $0x3b0] sm:$0x1] }
 0x52d   : > { %v5483_v55 = vadd.f32 %v5291_v45, %v5024_v5  ;;  %v5905_v7 = vsel %vm4384_vm2, %v5902_v43, %v16395_v41  ;;  %v7032_v59 = vmul.f32 %v16589_v29, %v6929_v30  ;;  %v15506_v49 = vmul.f32 %v16589_v29, %v15480_v14  ;;  %v6204_v30 = vld [vmem:[#allocation4 + $0x428] sm:$0x7f] }
 0x52e   : > { %v5485_v37 = vadd.f32 %v5294_v52, %v5026_v53  ;;  %v6669_v58 = vrot.slane %v6513_v0, 1  ;;  %v16399_v32 = vrot.slane %v15498_v17, 1  ;;  %v3650_v38 = vmul.f32 %v12039_v18, %v3543_v2 }
 0x52f   : > { %v6102_v45 = vadd.f32 %v5902_v43, %v5483_v55  ;;  %v7280_v5 = vrot.slane %v7032_v59, 2  ;;  %v7282_v51 = vrot.slane %v15506_v49, 2  ;;  %v4281_v41 = vmul.f32 %v12052_v50, %v4176_v40  ;;  %v15520_v40 = vpop.f32.mrb[66].mxu1 }
 0x530   : > { %v6104_v42 = vadd.f32 %v5905_v7, %v5485_v37  ;;  %v6672_v53 = vsel %vm3828_vm1, %v6669_v58, %v16399_v32  ;;  %v17028_v52 = vrot.slane %v15353_v54, 1  ;;  %v4933_v2 = vmul.f32 %v12070_v47, %v4826_v44  ;;  %17029 = vst [vmem:[#allocation68_spill] sm:$0xff] %v15520_v40  ;;  %v4825_v54 = vld [vmem:[#allocation4 + $0x3e0] sm:$0x7f] }
 0x531   : > { %v6402_v14 = vadd.f32 %v6306_v3, %v6102_v45  ;;  %v7283_v43 = vsel %vm4384_vm2, %v7280_v5, %v7282_v51  ;;  %v4533_v55 = vrot.slane %v4281_v41, 2  ;;  %v5659_v59 = vmul.f32 %v12085_v9, %v5554_v8 }
 0x532   : > { %v4110_v0 = vadd.f32 %v17028_v52, %v3650_v38  ;;  %v6404_v49 = vadd.f32 %v6308_v34, %v6104_v42  ;;  %v6311_v37 = vmul.f32 %v12088_v1, %v6204_v30  ;;  %v7037_v7 = vmul.f32 %v12107_v56, %v6932_v28  ;;  %v15525_v38 = vpop.f32.mrb[67].mxu1  ;;  %v5553_v52 = vld [vmem:[#allocation4 + $0x3f0] sm:$0x1] }
 0x533   : > { %v3649_v32 = vmul.f32 %v16600_v20, %v3542_v4  ;;  %17030 = vst [vmem:[#allocation69_spill] sm:$0xff] %v15525_v38  ;;  %v6861_v44 = vadd.f32 %v6669_v58, %v6402_v14  ;;  %v17031_v3 = vrot.slane %v15365_v36, 2  ;;  %v5910_v41 = vrot.slane %v5659_v59, 2  ;;  %v6931_v4 = vld [vmem:[#allocation4 + $0x430] sm:$0x1] }
 0x534   : > { %v4280_v8 = vmul.f32 %v12115_v48, %v4175_v26  ;;  %v6863_v40 = vadd.f32 %v6672_v53, %v6404_v49  ;;  %v7288_v34 = vrot.slane %v7037_v7, 2  ;;  %v17032_v30 = vrot.slane %v15443_v46, 1 }
 0x535   : > { %v4534_v45 = vsel %vm4384_vm2, %v17031_v3, %v4533_v55  ;;  %v7480_v10 = vadd.f32 %v7280_v5, %v6861_v44  ;;  %v17033_v38 = vrot.slane %v15393_v62, 2  ;;  %v4932_v58 = vmul.f32 %v12123_v15, %v4825_v54 }
 0x536   : > { %v4730_v42 = vadd.f32 %v4534_v45, %v4110_v0  ;;  %v4109_v28 = vadd.f32 %v17032_v30, %v3649_v32  ;;  %v4531_v36 = vrot.slane %v4280_v8, 2  ;;  %v15537_v55 = vadd.f32 %v7283_v43, %v6863_v40  ;;  %v3545_v32 = vld [vmem:[#allocation4 + $0x3c8] sm:$0x80] }
 0x537   : > { %v5911_v14 = vsel %vm4384_vm2, %v17033_v38, %v5910_v41  ;;  %v17034_v53 = vrot.slane %v15422_v6, 2  ;;  %v5658_v46 = vmul.f32 %v16581_v63, %v5553_v52  ;;  %v7729_v59 = vrot.slane %v7480_v10, 7  ;;  %v4178_v38 = vld [vmem:[#allocation4 + $0x3d8] sm:$0xfe] }
 0x538   : > { %v5029_v26 = vadd.f32 %v4933_v2, %v4730_v42  ;;  %v17035_v5 = vrot.slane %v15451_v25, 2  ;;  %v6310_v49 = vmul.f32 %v12129_v35, %v6203_v11  ;;  %v7036_v7 = vmul.f32 %v16589_v29, %v6931_v4  ;;  %v4828_v11 = vld [vmem:[#allocation4 + $0x408] sm:$0x80] }
 0x539   : > { %v7289_v0 = vsel %vm4384_vm2, %v17034_v53, %v7288_v34  ;;  %v7730_v43 = vrot.slane %v15537_v55, 7  ;;  %v17036_v2 = vrot.slane %v15385_v12, 1  ;;  %v5908_v54 = vrot.slane %v5658_v46, 2 }
 0x53a   : > { %v4532_v62 = vsel %vm4384_vm2, %v17035_v5, %v4531_v36  ;;  %v7286_v44 = vrot.slane %v7036_v7, 2  ;;  %v3652_v3 = vmul.f32 %v12039_v18, %v3545_v32  ;;  %v3654_v25 = vmul.f32 %v15135_v23, %v12039_v18  ;;  %v15635_v55 = vpop.f32.mrb[68].mxu1 }
 0x53b   : > { %v5488_v40 = vadd.f32 %v17036_v2, %v5029_v26  ;;  %v4729_v6 = vadd.f32 %v4532_v62, %v4109_v28  ;;  %v3761_v10 = vmul.f32 %v15135_v23, %v16576_v21  ;;  %v7731_v45 = vsel %vm7588_vm3, %v7729_v59, %v7730_v43 }
 0x53c   : > { %v17037_v8 = vrot.slane %v15478_v61, 2  ;;  %8130 = vmatmul.mubr.f32.gmra.mrb[88].mxu1 %v7731_v45  ;;  %v7287_v42 = vsel %vm4384_vm2, %v7282_v51, %v7286_v44  ;;  %v15565_v34 = vmul.f32 %v15141_v24, %v16576_v21  ;;  %v4283_v23 = vmul.f32 %v12052_v50, %v4178_v38  ;;  %v6445_v45 = vld [vmem:[#allocation4 + $0x468] sm:$0xff] }
 0x53d   : > { %v6107_v41 = vadd.f32 %v5911_v14, %v5488_v40  ;;  %v5028_v12 = vadd.f32 %v4932_v58, %v4729_v6  ;;  %v3920_v30 = vrot.slane %v3761_v10, 1  ;;  %v17038_v4 = vrot.slane %v15471_v39, 1  ;;  %v5556_v58 = vld [vmem:[#allocation4 + $0x418] sm:$0xfe] }
 0x53e   : > { %v5909_v52 = vsel %vm4384_vm2, %v17037_v8, %v5908_v54  ;;  %v15572_v14 = vmul.f32 %v15141_v24, %v12052_v50  ;;  %v4935_v61 = vmul.f32 %v12070_v47, %v4828_v11  ;;  %v3923_v51 = vrot.slane %v15565_v34, 1  ;;  %v6206_v54 = vld [vmem:[#allocation4 + $0x448] sm:$0x80] }
 0x53f   : > { %v6407_v28 = vadd.f32 %v6311_v37, %v6107_v41  ;;  %v5487_v36 = vadd.f32 %v17038_v4, %v5028_v12  ;;  %v4112_v26 = vadd.f32 %v3920_v30, %v3652_v3  ;;  %v4536_v53 = vrot.slane %v4283_v23, 2 }
 0x540   : > { %v4937_v21 = vmul.f32 %v15388_v31, %v12070_v47  ;;  %v17039_v46 = vrot.slane %v15417_v60, 1  ;;  %v4539_v39 = vrot.slane %v15572_v14, 2  ;;  %v5140_v24 = vmul.f32 %v15388_v31, %v12076_v13 }
 0x541   : > { %v6106_v32 = vadd.f32 %v5909_v52, %v5487_v36  ;;  %v3924_v59 = vsel %vm3828_vm1, %v3920_v30, %v3923_v51  ;;  %v4732_v5 = vadd.f32 %v4536_v53, %v4112_v26  ;;  %v15588_v62 = vmul.f32 %v15398_v33, %v12076_v13  ;;  %v6934_v30 = vld [vmem:[#allocation4 + $0x458] sm:$0xfe]  ;;  %v3544_v36 = vld [vmem:[#allocation4 + $0x3c0] sm:$0x80] }
 0x542   : > { %v6866_v37 = vadd.f32 %v17039_v46, %v6407_v28  ;;  %v5661_v7 = vmul.f32 %v12085_v9, %v5556_v58  ;;  %v4114_v40 = vadd.f32 %v3924_v59, %v3654_v25  ;;  %v4540_v6 = vsel %vm4384_vm2, %v4536_v53, %v4539_v39  ;;  %v6208_v25 = vld [vmem:[#allocation4 + $0x458] sm:$0xff] }
 0x543   : > { %v6406_v60 = vadd.f32 %v6310_v49, %v6106_v32  ;;  %v5031_v31 = vadd.f32 %v4935_v61, %v4732_v5  ;;  %v5298_v38 = vrot.slane %v5140_v24, 1  ;;  %v5301_v44 = vrot.slane %v15588_v62, 1  ;;  %v4177_v5 = vld [vmem:[#allocation4 + $0x3d0] sm:$0xfe] }
 0x544   : > { %v7485_v2 = vadd.f32 %v7289_v0, %v6866_v37  ;;  %v15597_v3 = vmul.f32 %v15398_v33, %v12085_v9  ;;  %v17040_v10 = vrot.slane %v15498_v17, 1  ;;  %v4734_v0 = vadd.f32 %v4540_v6, %v4114_v40  ;;  %v4827_v40 = vld [vmem:[#allocation4 + $0x400] sm:$0x80] }
 0x545   : > { %v5913_v49 = vrot.slane %v5661_v7, 2  ;;  %v5302_v41 = vsel %vm3828_vm1, %v5298_v38, %v5301_v44  ;;  %v5490_v12 = vadd.f32 %v5298_v38, %v5031_v31  ;;  %v6313_v52 = vmul.f32 %v12088_v1, %v6206_v54 }
 0x546   : > { %v7737_v13 = vrot.slane %v7485_v2, 7  ;;  %v6865_v11 = vadd.f32 %v17040_v10, %v6406_v60  ;;  %v5916_v8 = vrot.slane %v15597_v3, 2  ;;  %v17041_v33 = vrot.slane %v15455_v22, 7 }
 0x547   : > { %v5033_v28 = vadd.f32 %v4937_v21, %v4734_v0  ;;  %v6315_v4 = vmul.f32 %v12088_v1, %v6208_v25  ;;  %v6109_v58 = vadd.f32 %v5913_v49, %v5490_v12  ;;  %v6518_v26 = vmul.f32 %v16566_v27, %v6208_v25  ;;  %v15645_v0 = vpop.f32.mrb[69].mxu1 }
 0x548   : > { %v7738_v23 = vsel %vm7588_vm3, %v17041_v33, %v7737_v13  ;;  %v7484_v17 = vadd.f32 %v7287_v42, %v6865_v11  ;;  %v5917_v61 = vsel %vm4384_vm2, %v5913_v49, %v5916_v8  ;;  %v15616_v53 = vmul.f32 %v16566_v27, %v6445_v45 }
 0x549   : > { %8564 = vmatprep.mubr.msk.f32.mxu1 %vm533_vm0, %v7738_v23  ;;  %v5492_v46 = vadd.f32 %v5302_v41, %v5033_v28  ;;  %v7039_v42 = vmul.f32 %v12107_v56, %v6934_v30  ;;  %v15620_v21 = vmul.f32 %v12107_v56, %v6445_v45  ;;  %v6409_v37 = vadd.f32 %v6313_v52, %v6109_v58  ;;  %v5555_v41 = vld [vmem:[#allocation4 + $0x410] sm:$0xfe]  ;;  %v17044_v58 = vld [vmem:[#allocation38_spill] sm:$0xff] }
 0x54a   : > { %v7735_v22 = vrot.slane %v7484_v17, 7  ;;  %v6676_v32 = vrot.slane %v6518_v26, 1  ;;  %v6679_v24 = vrot.slane %v15616_v53, 1  ;;  %v3651_v59 = vmul.f32 %v16600_v20, %v3544_v36 }
 0x54b   : > { %v6111_v27 = vadd.f32 %v5917_v61, %v5492_v46  ;;  %v7291_v2 = vrot.slane %v7039_v42, 2  ;;  %v7294_v60 = vrot.slane %v15620_v21, 2  ;;  %v3653_v31 = vmul.f32 %v17022_v19, %v16600_v20  ;;  %v6205_v46 = vld [vmem:[#allocation4 + $0x440] sm:$0x80] }
 0x54c   : > { %v7736_v7 = vsel %vm7588_vm3, %v7730_v43, %v7735_v22  ;;  %v6680_v6 = vsel %vm3828_vm1, %v6676_v32, %v6679_v24  ;;  %v6868_v54 = vadd.f32 %v6676_v32, %v6409_v37  ;;  %v3760_v38 = vmul.f32 %v17022_v19, %v16928_v16 }
 0x54d   : > { %8136 = vmatmul.mubr.f32.gmra.mrb[90].mxu1 %v7736_v7  ;;  %v6411_v43 = vadd.f32 %v6315_v4, %v6111_v27  ;;  %v7295_v13 = vsel %vm4384_vm2, %v7291_v2, %v7294_v60  ;;  %v15642_v10 = vmul.f32 %v17024_v57, %v16928_v16  ;;  %v4282_v11 = vmul.f32 %v12115_v48, %v4177_v5  ;;  %v17042_v16 = vld [vmem:[#allocation35_spill] sm:$0xff] }
 0x54e   : > { %v7487_v49 = vadd.f32 %v7291_v2, %v6868_v54  ;;  %v3919_v25 = vrot.slane %v3760_v38, 1  ;;  %v15649_v19 = vmul.f32 %v17024_v57, %v12115_v48  ;;  %v4934_v45 = vmul.f32 %v12123_v15, %v4827_v40  ;;  %v17043_v4 = vld [vmem:[#allocation31_spill] sm:$0xff]  ;;  %v6933_v40 = vld [vmem:[#allocation4 + $0x450] sm:$0xfe] }
 0x54f   : > { %v6870_v12 = vadd.f32 %v6680_v6, %v6411_v43  ;;  %v3921_v52 = vrot.slane %v15642_v10, 1  ;;  %v4535_v30 = vrot.slane %v4282_v11, 2  ;;  %v4936_v33 = vmul.f32 %v17042_v16, %v12123_v15  ;;  %v8914_v38 = vld [vmem:[#allocation2 + $0x8] sm:$0xff]  ;;  %v4180_v11 = vld [vmem:[#allocation4 + $0x3f8] sm:$0x1] }
 0x550   : > { %v7742_v23 = vrot.slane %v7487_v49, 7  ;;  %v4111_v17 = vadd.f32 %v3919_v25, %v3651_v59  ;;  %v4537_v28 = vrot.slane %v15649_v19, 2  ;;  %v5139_v36 = vmul.f32 %v17042_v16, %v17043_v4 }
 0x551   : > { %v15658_v61 = vadd.f32 %v7295_v13, %v6870_v12  ;;  %v3922_v57 = vsel %vm3828_vm1, %v3919_v25, %v3921_v52  ;;  %v15665_v26 = vmul.f32 %v17044_v58, %v17043_v4  ;;  %v5660_v22 = vmul.f32 %v16581_v63, %v5555_v41  ;;  %v3549_v13 = vld [vmem:[#allocation4 + $0x3e8] sm:$0x7f] }
 0x552   : > { %v4113_v42 = vadd.f32 %v3922_v57, %v3653_v31  ;;  %v4538_v37 = vsel %vm4384_vm2, %v4535_v30, %v4537_v28  ;;  %v4731_v32 = vadd.f32 %v4535_v30, %v4111_v17  ;;  %v5297_v59 = vrot.slane %v5139_v36, 1  ;;  %v17045_v12 = vld [vmem:[#allocation36_spill] sm:$0xff] }
 0x553   : > { %v7743_v5 = vrot.slane %v15658_v61, 7  ;;  %v5299_v7 = vrot.slane %v15665_v26, 1  ;;  %v15675_v27 = vmul.f32 %v17044_v58, %v16581_v63  ;;  %v5912_v2 = vrot.slane %v5660_v22, 2  ;;  %v4832_v36 = vld [vmem:[#allocation4 + $0x428] sm:$0x7f] }
 0x554   : > { %v4733_v6 = vadd.f32 %v4538_v37, %v4113_v42  ;;  %v5030_v54 = vadd.f32 %v4934_v45, %v4731_v32  ;;  %v6312_v31 = vmul.f32 %v12129_v35, %v6205_v46  ;;  %v6314_v43 = vmul.f32 %v8914_v38, %v12129_v35  ;;  %v5558_v46 = vld [vmem:[#allocation4 + $0x438] sm:$0x1]  ;;  %v3548_v42 = vld [vmem:[#allocation4 + $0x3e0] sm:$0x7f] }
 0x555   : > { %v7744_v49 = vsel %vm7588_vm3, %v7742_v23, %v7743_v5  ;;  %v5300_v25 = vsel %vm3828_vm1, %v5297_v59, %v5299_v7  ;;  %v5914_v41 = vrot.slane %v15675_v27, 2  ;;  %v6517_v30 = vmul.f32 %v8914_v38, %v17045_v12 }
 0x556   : > { %8565 = vmatprep.mubr.msk.f32.mxu1 %vm533_vm0, %v7744_v49  ;;  %v5032_v45 = vadd.f32 %v4936_v33, %v4733_v6  ;;  %v5489_v16 = vadd.f32 %v5297_v59, %v5030_v54  ;;  %v7038_v17 = vmul.f32 %v16589_v29, %v6933_v40  ;;  %v15690_v4 = vmul.f32 %v8914_v38, %v16589_v29  ;;  %v6210_v40 = vld [vmem:[#allocation4 + $0x468] sm:$0x7f]  ;;  %v6936_v6 = vld [vmem:[#allocation4 + $0x478] sm:$0x1] }
 0x557   : > { %v5915_v23 = vsel %vm4384_vm2, %v5912_v2, %v5914_v41  ;;  %v15695_v57 = vrot.slane %v6517_v30, 1  ;;  %v3656_v58 = vmul.f32 %v12039_v18, %v3549_v13  ;;  %v4287_v22 = vmul.f32 %v12052_v50, %v4180_v11  ;;  %v4179_v13 = vld [vmem:[#allocation4 + $0x3f0] sm:$0x1]  ;;  %v4831_v11 = vld [vmem:[#allocation4 + $0x420] sm:$0x7f] }
 0x558   : > { %v5491_v33 = vadd.f32 %v5300_v25, %v5032_v45  ;;  %v6108_v37 = vadd.f32 %v5912_v2, %v5489_v16  ;;  %v7290_v32 = vrot.slane %v7038_v17, 2  ;;  %v7292_v59 = vrot.slane %v15690_v4, 2  ;;  %v5557_v17 = vld [vmem:[#allocation4 + $0x430] sm:$0x1]  ;;  %v6209_v4 = vld [vmem:[#allocation4 + $0x460] sm:$0x7f] }
 0x559   : > { %v4116_v54 = vadd.f32 %v3923_v51, %v3656_v58  ;;  %v4543_v38 = vrot.slane %v4287_v22, 2  ;;  %v4939_v49 = vmul.f32 %v12070_v47, %v4832_v36  ;;  %v5665_v50 = vmul.f32 %v12085_v9, %v5558_v46  ;;  %v7821_v58 = vld [vmem:[#allocation19] sm:$0x3]  ;;  %v15720_v22 = vpop.f32.mrb[70].mxu1 }
 0x55a   : > { %v6110_v12 = vadd.f32 %v5915_v23, %v5491_v33  ;;  %v6408_v30 = vadd.f32 %v6312_v31, %v6108_v37  ;;  %v7293_v18 = vsel %vm4384_vm2, %v7290_v32, %v7292_v59  ;;  %v6317_v25 = vmul.f32 %v12088_v1, %v6210_v40  ;;  %v6935_v1 = vld [vmem:[#allocation4 + $0x470] sm:$0x1]  ;;  %v15727_v46 = vpop.f32.mrb[71].mxu1  ;;  %v17046_v37 = vld [vmem:[#allocation33_spill] sm:$0xff] }
 0x55b   : > { %v4544_v2 = vsel %vm4384_vm2, %v4539_v39, %v4543_v38  ;;  %v7043_v34 = vmul.f32 %v12107_v56, %v6936_v6  ;;  %v3655_v51 = vmul.f32 %v16600_v20, %v3548_v42  ;;  %v5920_v16 = vrot.slane %v5665_v50, 2 }
 0x55c   : > { %v6410_v45 = vadd.f32 %v6314_v43, %v6110_v12  ;;  %v6867_v47 = vadd.f32 %v15695_v57, %v6408_v30  ;;  %v4736_v31 = vadd.f32 %v4544_v2, %v4116_v54  ;;  %v4286_v14 = vmul.f32 %v12115_v48, %v4179_v13  ;;  %v17051_v2 = vld [vmem:[#allocation37_spill] sm:$0xff] }
 0x55d   : > { %v7298_v9 = vrot.slane %v7043_v34, 2  ;;  %v4115_v36 = vadd.f32 %v3921_v52, %v3655_v51  ;;  %v4938_v39 = vmul.f32 %v12123_v15, %v4831_v11  ;;  %v5921_v43 = vsel %vm4384_vm2, %v5916_v8, %v5920_v16 }
 0x55e   : > { %v6869_v56 = vadd.f32 %v15695_v57, %v6410_v45  ;;  %v7486_v23 = vadd.f32 %v7290_v32, %v6867_v47  ;;  %v5035_v20 = vadd.f32 %v4939_v49, %v4736_v31  ;;  %v4541_v48 = vrot.slane %v4286_v14, 2  ;;  %v17050_v49 = vld [vmem:[#allocation39_spill] sm:$0xff]  ;;  %v17052_v47 = vld [vmem:[#allocation30_spill] sm:$0xff] }
 0x55f   : > { %v7299_v10 = vsel %vm4384_vm2, %v7294_v60, %v7298_v9  ;;  %v5664_v15 = vmul.f32 %v16581_v63, %v5557_v17  ;;  %v6316_v52 = vmul.f32 %v12129_v35, %v6209_v4  ;;  %v7042_v8 = vmul.f32 %v16589_v29, %v6935_v1  ;;  %v17047_v35 = vld [vmem:[#allocation32_spill] sm:$0xff]  ;;  %v17056_v17 = vld [vmem:[#allocation41_spill] sm:$0xff] }
 0x560   : > { %v15729_v42 = vadd.f32 %v7293_v18, %v6869_v56  ;;  %v7739_v33 = vrot.slane %v7486_v23, 7  ;;  %v5494_v3 = vadd.f32 %v5301_v44, %v5035_v20  ;;  %v4542_v21 = vsel %vm4384_vm2, %v4537_v28, %v4541_v48  ;;  %v17048_v44 = vld [vmem:[#allocation53_spill] sm:$0xff]  ;;  %v17049_v28 = vld [vmem:[#allocation56_spill] sm:$0xff]  ;;  %v17057_v20 = vld [vmem:[#allocation62_spill] sm:$0xff] }
 0x561   : > { %v5918_v60 = vrot.slane %v5664_v15, 2  ;;  %v15739_v63 = vrot.slane %v7821_v58, %v17046_v37  ;;  %v15742_v32 = vrot.slane %v7821_v58, %v17047_v35  ;;  %v4735_v54 = vadd.f32 %v4542_v21, %v4115_v36  ;;  %v17060_v21 = vld [vmem:[#allocation34_spill] sm:$0xff]  ;;  %v17062_v35 = vld [vmem:[#allocation45_spill] sm:$0xff] }
 0x562   : > { %v7740_v40 = vrot.slane %v15729_v42, 7  ;;  %v6113_v6 = vadd.f32 %v5921_v43, %v5494_v3  ;;  %v7296_v62 = vrot.slane %v7042_v8, 2 }
 0x563   : > { %v5919_v29 = vsel %vm4384_vm2, %v5914_v41, %v5918_v60  ;;  %v7964_v19 = vadd.f32 %v17048_v44, %v15739_v63  ;;  %v7966_v38 = vadd.f32 %v17049_v28, %v15742_v32  ;;  %v7970_v12 = vadd.f32 %v17050_v49, %v15739_v63  ;;  %v17061_v60 = vld [vmem:[#allocation28_spill] sm:$0xff] }
 0x564   : > { %v7741_v30 = vsel %vm7588_vm3, %v7739_v33, %v7740_v40  ;;  %v6413_v18 = vadd.f32 %v6317_v25, %v6113_v6  ;;  %v5034_v50 = vadd.f32 %v4938_v39, %v4735_v54  ;;  %v7297_v13 = vsel %vm4384_vm2, %v7292_v59, %v7296_v62  ;;  %v17053_v25 = vld [vmem:[#allocation42_spill] sm:$0xff]  ;;  %v17059_v33 = vld [vmem:[#allocation52_spill] sm:$0xff] }
 0x565   : > { %8142 = vmatmul.mubr.f32.gmra.mrb[92].mxu1 %v7741_v30  ;;  %v8154_v27 = vmax.f32 %v7964_v19, 0.0  ;;  %v8155_v41 = vmax.f32 %v7966_v38, 0.0  ;;  %v8156_v11 = vmax.f32 %v7970_v12, 0.0  ;;  %v7972_v34 = vadd.f32 %v17051_v2, %v15742_v32  ;;  %v17063_v49 = vld [vmem:[#allocation40_spill] sm:$0xff]  ;;  %v17068_v2 = vld [vmem:[#allocation55_spill] sm:$0xff] }
 0x566   : > { %v6872_v51 = vadd.f32 %v6679_v24, %v6413_v18  ;;  %v5493_v45 = vadd.f32 %v5299_v7, %v5034_v50  ;;  %v7976_v31 = vadd.f32 %v17052_v47, %v15739_v63  ;;  %v7978_v16 = vadd.f32 %v17053_v25, %v15742_v32  ;;  %v17054_v24 = vld [vmem:[#allocation58_spill] sm:$0xff]  ;;  %v17055_v7 = vld [vmem:[#allocation59_spill] sm:$0xff]  ;;  %v17065_v30 = vld [vmem:[#allocation44_spill] sm:$0xff] }
 0x567   : > { %8218 = vst [vmem:[%s15768_s22] sm:$0xff] %v8154_v27  ;;  %8219 = vst.msk [vmem:[%s15768_s22 + $0x8] sm:$0xff] %vm533_vm0, %v8155_v41  ;;  %v8157_v53 = vmax.f32 %v7972_v34, 0.0  ;;  %v7982_v26 = vadd.f32 %v17054_v24, %v15739_v63  ;;  %v7984_v59 = vadd.f32 %v17055_v7, %v15742_v32  ;;  %v7988_v4 = vadd.f32 %v17056_v17, %v15739_v63  ;;  %v17066_v50 = vld [vmem:[#allocation61_spill] sm:$0xff]  ;;  %v17067_v41 = vld [vmem:[#allocation64_spill] sm:$0xff] }
 0x568   : > { %8220 = vst [vmem:[%s15768_s22 + $0x10] sm:$0xff] %v8156_v11  ;;  %v7491_v9 = vadd.f32 %v7299_v10, %v6872_v51  ;;  %v6112_v36 = vadd.f32 %v5919_v29, %v5493_v45  ;;  %v8158_v14 = vmax.f32 %v7976_v31, 0.0  ;;  %v8159_v39 = vmax.f32 %v7978_v16, 0.0  ;;  %v17058_v10 = vld [vmem:[#allocation57_spill] sm:$0xff]  ;;  %v17070_v7 = vld [vmem:[#allocation47_spill] sm:$0xff] }
 0x569   : > { %8221 = vst.msk [vmem:[%s15768_s22 + $0x18] sm:$0xff] %vm533_vm0, %v8157_v53  ;;  %v8160_v1 = vmax.f32 %v7982_v26, 0.0  ;;  %v8161_v56 = vmax.f32 %v7984_v59, 0.0  ;;  %v8162_v23 = vmax.f32 %v7988_v4, 0.0  ;;  %v7990_v43 = vadd.f32 %v17057_v20, %v15742_v32  ;;  %v17069_v51 = vld [vmem:[#allocation49_spill] sm:$0xff] }
 0x56a   : > { %v7747_v58 = vrot.slane %v7491_v9, 7  ;;  %v6412_v48 = vadd.f32 %v6316_v52, %v6112_v36  ;;  %8222 = vst [vmem:[%s15768_s22 + $0x20] sm:$0xff] %v8158_v14  ;;  %8223 = vst.msk [vmem:[%s15768_s22 + $0x28] sm:$0xff] %vm533_vm0, %v8159_v39  ;;  %v7994_v15 = vadd.f32 %v17058_v10, %v15739_v63  ;;  %v7996_v3 = vadd.f32 %v17059_v33, %v15742_v32  ;;  %v17071_v4 = vld [vmem:[#allocation29_spill] sm:$0xff]  ;;  %v17072_v36 = vld [vmem:[#allocation46_spill] sm:$0xff] }
 0x56b   : > { %8224 = vst [vmem:[%s15768_s22 + $0x30] sm:$0xff] %v8160_v1  ;;  %8225 = vst.msk [vmem:[%s15768_s22 + $0x38] sm:$0xff] %vm533_vm0, %v8161_v56  ;;  %v8163_v8 = vmax.f32 %v7990_v43, 0.0  ;;  %v8000_v52 = vadd.f32 %v17060_v21, %v15739_v63  ;;  %v8002_v37 = vadd.f32 %v17061_v60, %v15742_v32  ;;  %v8006_v6 = vadd.f32 %v17062_v35, %v15739_v63  ;;  %v17073_v39 = vld [vmem:[#allocation48_spill] sm:$0xff]  ;;  %v17076_v43 = vld [vmem:[#allocation51_spill] sm:$0xff] }
 0x56c   : > { %8226 = vst [vmem:[%s15768_s22 + $0x40] sm:$0xff] %v8162_v23  ;;  %v7748_v54 = vsel %vm7588_vm3, %v7743_v5, %v7747_v58  ;;  %v6871_v62 = vadd.f32 %v15695_v57, %v6412_v48  ;;  %v8164_v29 = vmax.f32 %v7994_v15, 0.0  ;;  %v8165_v44 = vmax.f32 %v7996_v3, 0.0  ;;  %v17064_v5 = vld [vmem:[#allocation43_spill] sm:$0xff]  ;;  %v17075_v23 = vld [vmem:[#allocation54_spill] sm:$0xff]  ;;  %v17077_v33 = vld [vmem:[#allocation60_spill] sm:$0xff] }
 0x56d   : > { %8566 = vmatprep.mubr.msk.f32.mxu1 %vm533_vm0, %v7748_v54  ;;  %8227 = vst.msk [vmem:[%s15768_s22 + $0x48] sm:$0xff] %vm533_vm0, %v8163_v8  ;;  %v8166_v19 = vmax.f32 %v8000_v52, 0.0  ;;  %v8167_v28 = vmax.f32 %v8002_v37, 0.0  ;;  %v8168_v38 = vmax.f32 %v8006_v6, 0.0  ;;  %v8008_v12 = vadd.f32 %v17063_v49, %v15742_v32  ;;  %v17078_v60 = vld [vmem:[#allocation63_spill] sm:$0xff]  ;;  %v17079_v6 = vld [vmem:[#allocation65_spill] sm:$0xff] }
 0x56e   : > { %v7490_v61 = vadd.f32 %v7297_v13, %v6871_v62  ;;  %8228 = vst [vmem:[%s15768_s22 + $0x50] sm:$0xff] %v8164_v29  ;;  %8229 = vst.msk [vmem:[%s15768_s22 + $0x58] sm:$0xff] %vm533_vm0, %v8165_v44  ;;  %v8012_v57 = vadd.f32 %v17064_v5, %v15739_v63  ;;  %v8014_v18 = vadd.f32 %v17065_v30, %v15742_v32  ;;  %v17080_v62 = vld [vmem:[#allocation66_spill] sm:$0xff]  ;;  %v17081_v44 = vld [vmem:[#allocation67_spill] sm:$0xff] }
 0x56f   : > { %v8018_v27 = vadd.f32 %v17066_v50, %v15739_v63  ;;  %8230 = vst [vmem:[%s15768_s22 + $0x60] sm:$0xff] %v8166_v19  ;;  %8231 = vst.msk [vmem:[%s15768_s22 + $0x68] sm:$0xff] %vm533_vm0, %v8167_v28  ;;  %v8169_v13 = vmax.f32 %v8008_v12, 0.0  ;;  %v8020_v11 = vadd.f32 %v17067_v41, %v15742_v32  ;;  %v8024_v34 = vadd.f32 %v17068_v2, %v15739_v63  ;;  %v8083_v28 = vpop.f32.mrb[72].mxu1  ;;  %v17082_v49 = vld [vmem:[#allocation68_spill] sm:$0xff] }
 0x570   : > { %8232 = vst [vmem:[%s15768_s22 + $0x70] sm:$0xff] %v8168_v38  ;;  %v8026_v45 = vadd.f32 %v17069_v51, %v15742_v32  ;;  %v7745_v47 = vrot.slane %v7490_v61, 7  ;;  %v8170_v31 = vmax.f32 %v8012_v57, 0.0  ;;  %v8171_v25 = vmax.f32 %v8014_v18, 0.0  ;;  %v17083_v61 = vld [vmem:[#allocation69_spill] sm:$0xff]  ;;  %v8085_v30 = vpop.f32.mrb[73].mxu1 }
 0x571   : > { %v8172_v16 = vmax.f32 %v8018_v27, 0.0  ;;  %8233 = vst.msk [vmem:[%s15768_s22 + $0x78] sm:$0xff] %vm533_vm0, %v8169_v13  ;;  %v8173_v53 = vmax.f32 %v8020_v11, 0.0  ;;  %v8174_v24 = vmax.f32 %v8024_v34, 0.0  ;;  %v8030_v59 = vadd.f32 %v17070_v7, %v15739_v63 }
 0x572   : > { %v8175_v26 = vmax.f32 %v8026_v45, 0.0  ;;  %v7746_v17 = vsel %vm7588_vm3, %v7740_v40, %v7745_v47  ;;  %8234 = vst [vmem:[%s15768_s22 + $0x80] sm:$0xff] %v8170_v31  ;;  %8235 = vst.msk [vmem:[%s15768_s22 + $0x88] sm:$0xff] %vm533_vm0, %v8171_v25  ;;  %v8032_v9 = vadd.f32 %v17071_v4, %v15742_v32  ;;  %v8036_v14 = vadd.f32 %v17072_v36, %v15739_v63  ;;  %v17074_v40 = vld [vmem:[#allocation50_spill] sm:$0xff] }
 0x573   : > { %8236 = vst [vmem:[%s15768_s22 + $0x90] sm:$0xff] %v8172_v16  ;;  %v8038_v1 = vadd.f32 %v17073_v39, %v15742_v32  ;;  %8148 = vmatmul.mubr.f32.gmra.mrb[94].mxu1 %v7746_v17  ;;  %8237 = vst.msk [vmem:[%s15768_s22 + $0x98] sm:$0xff] %vm533_vm0, %v8173_v53  ;;  %v8176_v42 = vmax.f32 %v8030_v59, 0.0  ;;  %v8042_v56 = vadd.f32 %v17074_v40, %v15739_v63 }
 0x574   : > { %8238 = vst [vmem:[%s15768_s22 + $0xa0] sm:$0xff] %v8174_v24  ;;  %8239 = vst.msk [vmem:[%s15768_s22 + $0xa8] sm:$0xff] %vm533_vm0, %v8175_v26  ;;  %v8044_v20 = vadd.f32 %v17075_v23, %v15742_v32  ;;  %v8048_v58 = vadd.f32 %v17076_v43, %v15739_v63  ;;  %v8177_v48 = vmax.f32 %v8032_v9, 0.0  ;;  %v8178_v10 = vmax.f32 %v8036_v14, 0.0 }
 0x575   : > { %v8179_v15 = vmax.f32 %v8038_v1, 0.0  ;;  %v8050_v3 = vadd.f32 %v17077_v33, %v15742_v32  ;;  %8240 = vst [vmem:[%s15768_s22 + $0xb0] sm:$0xff] %v8176_v42  ;;  %v8180_v8 = vmax.f32 %v8042_v56, 0.0  ;;  %v8054_v37 = vadd.f32 %v17078_v60, %v15739_v63 }
 0x576   : > { %v8181_v21 = vmax.f32 %v8044_v20, 0.0  ;;  %v8182_v52 = vmax.f32 %v8048_v58, 0.0  ;;  %8241 = vst.msk [vmem:[%s15768_s22 + $0xb8] sm:$0xff] %vm533_vm0, %v8177_v48  ;;  %8242 = vst [vmem:[%s15768_s22 + $0xc0] sm:$0xff] %v8178_v10  ;;  %v8056_v54 = vadd.f32 %v17079_v6, %v15742_v32  ;;  %v8060_v29 = vadd.f32 %v17080_v62, %v15739_v63 }
 0x577   : > { %8243 = vst.msk [vmem:[%s15768_s22 + $0xc8] sm:$0xff] %vm533_vm0, %v8179_v15  ;;  %v8183_v35 = vmax.f32 %v8050_v3, 0.0  ;;  %v8062_v19 = vadd.f32 %v17081_v44, %v15742_v32  ;;  %8244 = vst [vmem:[%s15768_s22 + $0xd0] sm:$0xff] %v8180_v8  ;;  %v8184_v38 = vmax.f32 %v8054_v37, 0.0  ;;  %v8066_v12 = vadd.f32 %v17082_v49, %v15739_v63 }
 0x578   : > { %8245 = vst.msk [vmem:[%s15768_s22 + $0xd8] sm:$0xff] %vm533_vm0, %v8181_v21  ;;  %8246 = vst [vmem:[%s15768_s22 + $0xe0] sm:$0xff] %v8182_v52  ;;  %v8068_v5 = vadd.f32 %v17083_v61, %v15742_v32  ;;  %v8072_v57 = vadd.f32 %v15635_v55, %v15739_v63  ;;  %v8185_v18 = vmax.f32 %v8056_v54, 0.0  ;;  %v8186_v50 = vmax.f32 %v8060_v29, 0.0 }
 0x579   : > { %8247 = vst.msk [vmem:[%s15768_s22 + $0xe8] sm:$0xff] %vm533_vm0, %v8183_v35  ;;  %v8187_v27 = vmax.f32 %v8062_v19, 0.0  ;;  %v8074_v13 = vadd.f32 %v15645_v0, %v15742_v32  ;;  %8248 = vst [vmem:[%s15768_s22 + $0xf0] sm:$0xff] %v8184_v38  ;;  %v8188_v41 = vmax.f32 %v8066_v12, 0.0  ;;  %v8078_v55 = vadd.f32 %v15720_v22, %v15739_v63 }
 0x57a   : > { %v8189_v11 = vmax.f32 %v8068_v5, 0.0  ;;  %v8190_v2 = vmax.f32 %v8072_v57, 0.0  ;;  %8249 = vst.msk [vmem:[%s15768_s22 + $0xf8] sm:$0xff] %vm533_vm0, %v8185_v18  ;;  %8250 = vst [vmem:[%s15768_s22 + $0x100] sm:$0xff] %v8186_v50  ;;  %v8080_v0 = vadd.f32 %v15727_v46, %v15742_v32  ;;  %v8084_v51 = vadd.f32 %v8083_v28, %v15739_v63 }
 0x57b   : > { %8251 = vst.msk [vmem:[%s15768_s22 + $0x108] sm:$0xff] %vm533_vm0, %v8187_v27  ;;  %v8191_v34 = vmax.f32 %v8074_v13, 0.0  ;;  %v8086_v45 = vadd.f32 %v8085_v30, %v15742_v32  ;;  %8252 = vst [vmem:[%s15768_s22 + $0x110] sm:$0xff] %v8188_v41  ;;  %v8192_v22 = vmax.f32 %v8078_v55, 0.0 }
 0x57c   : > { %8253 = vst.msk [vmem:[%s15768_s22 + $0x118] sm:$0xff] %vm533_vm0, %v8189_v11  ;;  %8254 = vst [vmem:[%s15768_s22 + $0x120] sm:$0xff] %v8190_v2  ;;  %v8193_v47 = vmax.f32 %v8080_v0, 0.0  ;;  %v8194_v31 = vmax.f32 %v8084_v51, 0.0  ;;  %v8089_v46 = vpop.f32.mrb[74].mxu1 }
 0x57d   : > { %8255 = vst.msk [vmem:[%s15768_s22 + $0x128] sm:$0xff] %vm533_vm0, %v8191_v34  ;;  %v8195_v25 = vmax.f32 %v8086_v45, 0.0  ;;  %8256 = vst [vmem:[%s15768_s22 + $0x130] sm:$0xff] %v8192_v22  ;;  %v8090_v16 = vadd.f32 %v8089_v46, %v15739_v63  ;;  %v8091_v53 = vpop.f32.mrb[75].mxu1 }
 0x57e   : > { %8257 = vst.msk [vmem:[%s15768_s22 + $0x138] sm:$0xff] %vm533_vm0, %v8193_v47  ;;  %8258 = vst [vmem:[%s15768_s22 + $0x140] sm:$0xff] %v8194_v31  ;;  %v8092_v24 = vadd.f32 %v8091_v53, %v15742_v32 }
 0x57f   : > { %8259 = vst.msk [vmem:[%s15768_s22 + $0x148] sm:$0xff] %vm533_vm0, %v8195_v25  ;;  %v8196_v26 = vmax.f32 %v8090_v16, 0.0 }
 0x580   : > { %v8197_v7 = vmax.f32 %v8092_v24, 0.0 }
 0x581   : > { %8260 = vst [vmem:[%s15768_s22 + $0x150] sm:$0xff] %v8196_v26 }
 0x582   : > { %8261 = vst.msk [vmem:[%s15768_s22 + $0x158] sm:$0xff] %vm533_vm0, %v8197_v7 }
 0x593   : > { %v8095_v59 = vpop.f32.mrb[76].mxu1 }
 0x594   : > { %v8096_v17 = vadd.f32 %v8095_v59, %v15739_v63  ;;  %v8097_v4 = vpop.f32.mrb[77].mxu1 }
 0x595   : > { %v8098_v9 = vadd.f32 %v8097_v4, %v15742_v32 }
 0x596   : > { %v8198_v36 = vmax.f32 %v8096_v17, 0.0 }
 0x597   : > { %v8199_v14 = vmax.f32 %v8098_v9, 0.0 }
 0x598   : > { %8262 = vst [vmem:[%s15768_s22 + $0x160] sm:$0xff] %v8198_v36 }
 0x599   : > { %8263 = vst.msk [vmem:[%s15768_s22 + $0x168] sm:$0xff] %vm533_vm0, %v8199_v14 }
 0x5a4   : > { %v8101_v39 = vpop.f32.mrb[78].mxu1 }
 0x5a5   : > { %v8102_v1 = vadd.f32 %v8101_v39, %v15739_v63  ;;  %v8103_v42 = vpop.f32.mrb[79].mxu1 }
 0x5a6   : > { %v8104_v40 = vadd.f32 %v8103_v42, %v15742_v32 }
 0x5a7   : > { %v8200_v56 = vmax.f32 %v8102_v1, 0.0 }
 0x5a8   : > { %v8201_v23 = vmax.f32 %v8104_v40, 0.0 }
 0x5a9   : > { %8264 = vst [vmem:[%s15768_s22 + $0x170] sm:$0xff] %v8200_v56 }
 0x5aa   : > { %8265 = vst.msk [vmem:[%s15768_s22 + $0x178] sm:$0xff] %vm533_vm0, %v8201_v23 }
 0x5bc   : > { %v8107_v20 = vpop.f32.mrb[80].mxu1 }
 0x5bd   : > { %v8108_v43 = vadd.f32 %v8107_v20, %v15739_v63  ;;  %v8109_v58 = vpop.f32.mrb[81].mxu1 }
 0x5be   : > { %v8110_v48 = vadd.f32 %v8109_v58, %v15742_v32 }
 0x5bf   : > { %v8202_v10 = vmax.f32 %v8108_v43, 0.0 }
 0x5c0   : > { %v8203_v15 = vmax.f32 %v8110_v48, 0.0 }
 0x5c1   : > { %8266 = vst [vmem:[%s15768_s22 + $0x180] sm:$0xff] %v8202_v10 }
 0x5c2   : > { %8267 = vst.msk [vmem:[%s15768_s22 + $0x188] sm:$0xff] %vm533_vm0, %v8203_v15 }
 0x5cd   : > { %v8113_v33 = vpop.f32.mrb[82].mxu1 }
 0x5ce   : > { %v8114_v3 = vadd.f32 %v8113_v33, %v15739_v63  ;;  %v8115_v8 = vpop.f32.mrb[83].mxu1 }
 0x5cf   : > { %v8116_v21 = vadd.f32 %v8115_v8, %v15742_v32 }
 0x5d0   : > { %v8204_v52 = vmax.f32 %v8114_v3, 0.0 }
 0x5d1   : > { %v8205_v60 = vmax.f32 %v8116_v21, 0.0 }
 0x5d2   : > { %8268 = vst [vmem:[%s15768_s22 + $0x190] sm:$0xff] %v8204_v52 }
 0x5d3   : > { %8269 = vst.msk [vmem:[%s15768_s22 + $0x198] sm:$0xff] %vm533_vm0, %v8205_v60 }
 0x5e6   : > { %v8119_v37 = vpop.f32.mrb[84].mxu1 }
 0x5e7   : > { %v8120_v35 = vadd.f32 %v8119_v37, %v15739_v63  ;;  %v8121_v6 = vpop.f32.mrb[85].mxu1 }
 0x5e8   : > { %v8122_v54 = vadd.f32 %v8121_v6, %v15742_v32 }
 0x5e9   : > { %v8206_v62 = vmax.f32 %v8120_v35, 0.0 }
 0x5ea   : > { %v8207_v29 = vmax.f32 %v8122_v54, 0.0 }
 0x5eb   : > { %8270 = vst [vmem:[%s15768_s22 + $0x1a0] sm:$0xff] %v8206_v62 }
 0x5ec   : > { %8271 = vst.msk [vmem:[%s15768_s22 + $0x1a8] sm:$0xff] %vm533_vm0, %v8207_v29 }
 0x5f7   : > { %v8125_v44 = vpop.f32.mrb[86].mxu1 }
 0x5f8   : > { %v8126_v19 = vadd.f32 %v8125_v44, %v15739_v63  ;;  %v8127_v28 = vpop.f32.mrb[87].mxu1 }
 0x5f9   : > { %v8128_v38 = vadd.f32 %v8127_v28, %v15742_v32 }
 0x5fa   : > { %v8208_v49 = vmax.f32 %v8126_v19, 0.0 }
 0x5fb   : > { %v8209_v12 = vmax.f32 %v8128_v38, 0.0 }
 0x5fc   : > { %8272 = vst [vmem:[%s15768_s22 + $0x1b0] sm:$0xff] %v8208_v49 }
 0x5fd   : > { %8273 = vst.msk [vmem:[%s15768_s22 + $0x1b8] sm:$0xff] %vm533_vm0, %v8209_v12 }
 0x60f   : > { %v8131_v61 = vpop.f32.mrb[88].mxu1 }
 0x610   : > { %v8132_v5 = vadd.f32 %v8131_v61, %v15739_v63  ;;  %v8133_v57 = vpop.f32.mrb[89].mxu1 }
 0x611   : > { %v8134_v30 = vadd.f32 %v8133_v57, %v15742_v32 }
 0x612   : > { %v8210_v18 = vmax.f32 %v8132_v5, 0.0 }
 0x613   : > { %v8211_v50 = vmax.f32 %v8134_v30, 0.0 }
 0x614   : > { %8274 = vst [vmem:[%s15768_s22 + $0x1c0] sm:$0xff] %v8210_v18 }
 0x615   : > { %8275 = vst.msk [vmem:[%s15768_s22 + $0x1c8] sm:$0xff] %vm533_vm0, %v8211_v50 }
 0x620   : > { %v8137_v27 = vpop.f32.mrb[90].mxu1 }
 0x621   : > { %v8138_v13 = vadd.f32 %v8137_v27, %v15739_v63  ;;  %v8139_v41 = vpop.f32.mrb[91].mxu1 }
 0x622   : > { %v8140_v11 = vadd.f32 %v8139_v41, %v15742_v32 }
 0x623   : > { %v8212_v2 = vmax.f32 %v8138_v13, 0.0 }
 0x624   : > { %v8213_v55 = vmax.f32 %v8140_v11, 0.0 }
 0x625   : > { %8276 = vst [vmem:[%s15768_s22 + $0x1d0] sm:$0xff] %v8212_v2 }
 0x626   : > { %8277 = vst.msk [vmem:[%s15768_s22 + $0x1d8] sm:$0xff] %vm533_vm0, %v8213_v55 }
 0x638   : > { %v8143_v34 = vpop.f32.mrb[92].mxu1 }
 0x639   : > { %v8144_v0 = vadd.f32 %v8143_v34, %v15739_v63  ;;  %v8145_v51 = vpop.f32.mrb[93].mxu1 }
 0x63a   : > { %v8146_v45 = vadd.f32 %v8145_v51, %v15742_v32 }
 0x63b   : > { %v8214_v22 = vmax.f32 %v8144_v0, 0.0 }
 0x63c   : > { %v8215_v47 = vmax.f32 %v8146_v45, 0.0 }
 0x63d   : > { %8278 = vst [vmem:[%s15768_s22 + $0x1e0] sm:$0xff] %v8214_v22 }
 0x63e   : > { %8279 = vst.msk [vmem:[%s15768_s22 + $0x1e8] sm:$0xff] %vm533_vm0, %v8215_v47 }
 0x646   : > { %v8149_v31 = vpop.f32.mrb[94].mxu1 }
 0x647   : > { %v8150_v25 = vadd.f32 %v8149_v31, %v15739_v63  ;;  %v8151_v46 = vpop.f32.mrb[95].mxu1 }
 0x648   : > { %v8152_v16 = vadd.f32 %v8151_v46, %v15742_v32 }
 0x649   : > { %v8216_v53 = vmax.f32 %v8150_v25, 0.0 }
 0x64a   : > { %v8217_v24 = vmax.f32 %v8152_v16, 0.0 }
 0x64b   : > { %8280 = vst [vmem:[%s15768_s22 + $0x1f0] sm:$0xff] %v8216_v53 }
 0x64c   : > { %8281 = vst.msk [vmem:[%s15768_s22 + $0x1f8] sm:$0xff] %vm533_vm0, %v8217_v24 }
 0x64d   : > { %9184 = shalt.err (!%p9181_p1)
}
 0x64e   : > { %s9185_s27 = scalar_lea.hbm %s15968_s3, 8192  ;;  %s9189_s4 = scalar_lea.hbm %s17084_s17, 16384 }
 0x64f   : > { %p9186_p12 = scmp.ne.s32.totalorder %s15968_s3, %s9185_s27  ;;  %p9190_p0 = scmp.lt.u32.totalorder %s15968_s3, %s17084_s17 }
 0x650   : > { %p9191_p6 = scmp.lt.u32.totalorder %s9189_s4, %s9185_s27  ;;  %p9193_p4 = scmp.lt.u32.totalorder %s9185_s27, %s15968_s3 }
 0x651   : > { %p9187_p13 = pnand %p9186_p12, %p17085_p10 }
 0x652   : > { %p9192_p2 = por %p9191_p6, %p9190_p0 }
 0x653   : > { %p9188_p3 = pneg %p9187_p13 }
 0x654   : > { %p9194_p5 = por %p9193_p4, %p9192_p2 }
 0x656   : > { %p9195_p7 = pnand %p9194_p5, %p9188_p3 }
 0x658   : > { %9198 = shalt.err (!%p9195_p7)
}
 0x659   : > { %s9277_s22 = smov 256   ;;  %s9278_s24 = smov 16  }
 0x65a   : > { %8755 = dma.vmem_to_hbm [thread:$0]  (%p17085_p10), %s15970_s20, 8192, %s15968_s3, %s8283_s15, %s9277_s22, %s9277_s22, %s9278_s24  }
 0x65b PF: > { %s8311_s23 = sand.u32 1, %s9245_s30   ;;  %p17086_p9 = scmp.ne.s32.totalorder %s16420_s18, 0 }
 0x65c   : > { %p17087_p8 = scmp.ge.s32.totalorder %s9257_s12, 2  ;;  %s8312_s13 = scalar_lea.sflag [#allocation7], %s8311_s23 }
 0x65e   : > { %p8787_p11 = pnand %p17087_p8, %p17086_p9 }
 0x660   : > { %9240 = dma.done.wait (!%p8787_p11), %s8312_s13, 8192  }
 0x661   : > { %9242 = vsyncadd (!%p8787_p11), %s8312_s13, 4294959104  ;;  %p28_p1 = scmp.ge.s32.totalorder %s9538_s19, 4   ;;  %s17088_s30 = smov %s9249_s10 }
 0x662   : > { %s17089_s10 = smov %s9253_s11  ;;  %s17090_s11 = smov %s9549_s25 }
 0x663   : > { %s17091_s12 = smov %s9538_s19  ;;  %30 = sbr.rel (!%p28_p1) target bundleno = 17 (0x11), region = 151 }
 0x66a   :  { %8317 = vsyncpa [#allocation6], 1 }
 0x66b   :  { %8319 = vsyncpa [#allocation6 + $0x1], 1 }
 0x66c   :  { %8320 = vsyncpa [#allocation9], 1 }
 0x66d   :  { %8322 = vsyncpa [#allocation9 + $0x1], 1 }
 0x66e   :  { %8323 = vsyncpa [#allocation12], 1 }
 0x66f   :  { %8324 = vsyncpa [#allocation15], 1 }
 0x670   :  { %8325 = vsyncpa [#allocation18], 1 }
 0x671   :  { %8326 = vsyncpa [#allocation7], 1 }
 0x672   :  { %8328 = vsyncpa [#allocation7 + $0x1], 1 }

</bundles_post_ra>
